<compile_context>
chip_gen: v7x
topology: tpu7x:2x2x1
jax: 0.10.0
libtpu: 0.0.40
codegen_flags: <defaults>
</compile_context>

<pallas_src>
import functools
import math

import jax
import jax.numpy as jnp
from jax.experimental import pallas as pl
from jax.experimental.pallas import tpu as pltpu


# ----------------------------- fused per-layer Pallas kernel -----------------------------

def _perceiver_layer_kernel(*refs, B, N, H, eps, n_tlayers, reduce_mean):
    """One full PerceiverLayer: cross-attn block + MLP block + n_tlayers GPT-2 blocks.

    refs = (latent_ref [B*N, D], kv_ref [B*S, Dk], <flattened weights...>, out_ref)
    """
    out_ref = refs[-1]
    it = iter(refs[:-1])

    latent = next(it)[...].astype(jnp.float32)      # [B*N, D]
    kv = next(it)[...].astype(jnp.float32)          # [B*S, Dk]
    D = latent.shape[-1]
    hd = D // H
    scale = 1.0 / math.sqrt(hd)

    def rd(n):
        return tuple(next(it)[...] for _ in range(n))

    def ln(x, g, b):
        # f32 statistics, matches nn.LayerNorm(eps)
        mu = jnp.mean(x, axis=-1, keepdims=True)
        xc = x - mu
        var = jnp.mean(xc * xc, axis=-1, keepdims=True)
        return xc * jax.lax.rsqrt(var + eps) * g + b

    def linear(x, w, b):
        # bf16 MXU operands, f32 accumulation, f32 bias add
        return jnp.dot(x.astype(jnp.bfloat16), w,
                       preferred_element_type=jnp.float32) + b

    def mlp(x, w1, b1, w2, b2):
        h = linear(x, w1, b1)
        h = jnp.maximum(h, 0.0)                     # activation_fn = nn.ReLU
        return linear(h, w2, b2)

    def mha(q_in, k_in, v_in, wq, bq, wk, bk, wv, bv, wo, bo):
        # q_in: [B*Nq, Dq]; k_in/v_in: [B*Nk, Dkv].  All heads handled in this
        # single grid step; head split done in-kernel via static lane slices.
        Mq, Mk = q_in.shape[0], k_in.shape[0]
        nq, nk = Mq // B, Mk // B
        q = linear(q_in, wq, bq)                    # [B*Nq, D] f32
        k = linear(k_in, wk, bk)                    # [B*Nk, D]
        v = linear(v_in, wv, bv)                    # [B*Nk, D]
        acc = None
        for h in range(H):                          # unrolled, H small
            sl = slice(h * hd, (h + 1) * hd)
            qh = q[:, sl].reshape(B, nq, hd).astype(jnp.bfloat16)
            kh = k[:, sl].reshape(B, nk, hd).astype(jnp.bfloat16)
            vh = v[:, sl].reshape(B, nk, hd).astype(jnp.bfloat16)
            s = jnp.einsum('bqd,bkd->bqk', qh, kh,
                           preferred_element_type=jnp.float32) * scale
            s = s - jnp.max(s, axis=-1, keepdims=True)
            p = jnp.exp(s)
            p = p * pl.reciprocal(jnp.sum(p, axis=-1, keepdims=True), approx=True)
            oh = jnp.einsum('bqk,bkd->bqd', p.astype(jnp.bfloat16), vh,
                            preferred_element_type=jnp.float32)        # [B, nq, hd]
            # fold output projection per head: concat(heads) @ wo == sum_h oh @ wo[rows_h]
            contrib = jnp.dot(oh.reshape(Mq, hd).astype(jnp.bfloat16), wo[sl, :],
                              preferred_element_type=jnp.float32)
            acc = contrib if acc is None else acc + contrib
        return acc + bo

    # --- cross-attention block (latent queries, kv keys/values) ---
    lg, lb, kg, kb = rd(4)
    wq, bq, wk, bk, wv, bv, wo, bo = rd(8)
    mg, mb, w1, b1, w2, b2 = rd(6)

    lat_n = ln(latent, lg, lb)
    kv_n = ln(kv, kg, kb)
    latent = latent + mha(lat_n, kv_n, kv_n, wq, bq, wk, bk, wv, bv, wo, bo)
    latent = latent + mlp(ln(latent, mg, mb), w1, b1, w2, b2)

    # --- latent self-attention transformer layers (pre-LN GPT-2 blocks) ---
    # TODO(synk): GPT2DecoderLayer source unavailable; standard pre-LN block assumed.
    for _ in range(n_tlayers):
        g1, bb1 = rd(2)
        wq, bq, wk, bk, wv, bv, wo, bo = rd(8)
        g2, bb2, tw1, tb1, tw2, tb2 = rd(6)
        xn = ln(latent, g1, bb1)
        latent = latent + mha(xn, xn, xn, wq, bq, wk, bk, wv, bv, wo, bo)
        latent = latent + mlp(ln(latent, g2, bb2), tw1, tb1, tw2, tb2)

    # --- epilogue: either write the latent back or fold in the final mean ---
    if reduce_mean:
        out_ref[...] = jnp.mean(latent.reshape(B, N, D), axis=1).astype(out_ref.dtype)
    else:
        out_ref[...] = latent.astype(out_ref.dtype)


# ----------------------------- wrapper / param flattening -----------------------------

def _full_block_spec(shape):
    zeros = (0,) * len(shape)
    return pl.BlockSpec(shape, lambda *args, _z=zeros: _z)


def _flatten_mha(p):
    return [p["wq"], p["bq"], p["wk"], p["bk"], p["wv"], p["bv"], p["wo"], p["bo"]]


def _flatten_layer_params(lp):
    flat = [lp["latent_norm_g"], lp["latent_norm_b"],
            lp["kv_norm_g"], lp["kv_norm_b"]]
    flat += _flatten_mha(lp["cross_attn"])
    flat += [lp["mlp_norm_g"], lp["mlp_norm_b"],
             lp["mlp_w1"], lp["mlp_b1"], lp["mlp_w2"], lp["mlp_b2"]]
    for tp in lp["transformer_layers"]:
        flat += [tp["ln1_g"], tp["ln1_b"]]
        flat += _flatten_mha(tp["attn"])
        flat += [tp["ln2_g"], tp["ln2_b"],
                 tp["mlp_w1"], tp["mlp_b1"], tp["mlp_w2"], tp["mlp_b2"]]
    return flat


def perceiver_layer_call(latent2d, kv2d, lp, *, B, N, n_heads, reduce_mean, eps=1e-5):
    D = latent2d.shape[-1]
    weights = _flatten_layer_params(lp)
    inputs = [latent2d, kv2d] + weights
    out_shape = jax.ShapeDtypeStruct((B, D) if reduce_mean else (B * N, D), jnp.float32)
    kernel = functools.partial(
        _perceiver_layer_kernel, B=B, N=N, H=n_heads, eps=eps,
        n_tlayers=len(lp["transformer_layers"]), reduce_mean=reduce_mean)
    return pl.pallas_call(
        kernel,
        out_shape=out_shape,
        grid=(1,),
        in_specs=[_full_block_spec(a.shape) for a in inputs],
        out_specs=_full_block_spec(out_shape.shape),
        compiler_params=pltpu.CompilerParams(dimension_semantics=("arbitrary",)),
    )(*inputs)


# ----------------------------- model glue (JAX side) -----------------------------

def fourier_encode(pos, freqs):
    # Gaussian Fourier features with concat_original=True: [x, sin(2*pi*x*B), cos(2*pi*x*B)]
    # TODO(synk): exact GaussianFourierEncoder source unavailable; standard Gaussian
    # Fourier-feature convention assumed (output dim = 2*num_bands + input_dim).
    proj = 2.0 * math.pi * (pos @ freqs)                      # [S, num_bands]
    return jnp.concatenate([pos, jnp.sin(proj), jnp.cos(proj)], axis=-1)


def perceiver_forward(tokens, params, cfg):
    B, S = tokens.shape
    pos = jnp.linspace(cfg["low"], cfg["high"], S, dtype=jnp.float32).reshape(S, 1)
    enc = fourier_encode(pos, params["fourier_freqs"])        # [S, 2*nb + 1]
    enc = jnp.broadcast_to(enc[None], (B, S, enc.shape[-1]))
    emb = params["embedding"][tokens]                         # gather stays in JAX
    kv = jnp.concatenate([emb, enc], axis=-1)                 # [B, S, kv_dim]
    Dk = kv.shape[-1]
    N, D = params["latent_vec"].shape
    latent = jnp.broadcast_to(params["latent_vec"][None], (B, N, D)).reshape(B * N, D)
    kv2 = kv.reshape(B * S, Dk)
    n_layers = len(params["layers"])
    for i, lp in enumerate(params["layers"]):
        latent = perceiver_layer_call(
            latent, kv2, lp, B=B, N=N, n_heads=cfg["n_heads"],
            reduce_mean=(i == n_layers - 1))
    return latent                                             # [B, latent_dim]


# ----------------------------- deterministic parameter init -----------------------------

def _init_linear(key, din, dout, scale=0.02):
    kw, kb = jax.random.split(key)
    w = (jax.random.normal(kw, (din, dout), jnp.float32) * scale).astype(jnp.bfloat16)
    b = jax.random.normal(kb, (1, dout), jnp.float32) * scale
    return w, b


def _init_mha(key, q_dim, kv_dim, model_dim):
    ks = jax.random.split(key, 4)
    wq, bq = _init_linear(ks[0], q_dim, model_dim)
    wk, bk = _init_linear(ks[1], kv_dim, model_dim)
    wv, bv = _init_linear(ks[2], kv_dim, model_dim)
    wo, bo = _init_linear(ks[3], model_dim, model_dim)
    return dict(wq=wq, bq=bq, wk=wk, bk=bk, wv=wv, bv=bv, wo=wo, bo=bo)


def _init_gpt2_layer(key, d, ff):
    ks = jax.random.split(key, 3)
    w1, b1 = _init_linear(ks[0], d, ff)
    w2, b2 = _init_linear(ks[1], ff, d)
    return dict(
        ln1_g=jnp.ones((1, d), jnp.float32), ln1_b=jnp.zeros((1, d), jnp.float32),
        attn=_init_mha(ks[2], d, d, d),
        ln2_g=jnp.ones((1, d), jnp.float32), ln2_b=jnp.zeros((1, d), jnp.float32),
        mlp_w1=w1, mlp_b1=b1, mlp_w2=w2, mlp_b2=b2,
    )


def _init_perceiver_layer(key, d, kv_dim, ff, num_transformer_layers):
    ks = jax.random.split(key, 3 + num_transformer_layers)
    w1, b1 = _init_linear(ks[0], d, ff)
    w2, b2 = _init_linear(ks[1], ff, d)
    return dict(
        latent_norm_g=jnp.ones((1, d), jnp.float32), latent_norm_b=jnp.zeros((1, d), jnp.float32),
        kv_norm_g=jnp.ones((1, kv_dim), jnp.float32), kv_norm_b=jnp.zeros((1, kv_dim), jnp.float32),
        cross_attn=_init_mha(ks[2], d, kv_dim, d),
        mlp_norm_g=jnp.ones((1, d), jnp.float32), mlp_norm_b=jnp.zeros((1, d), jnp.float32),
        mlp_w1=w1, mlp_b1=b1, mlp_w2=w2, mlp_b2=b2,
        transformer_layers=[_init_gpt2_layer(ks[3 + i], d, ff)
                            for i in range(num_transformer_layers)],
    )


def init_perceiver(key, cfg):
    nb = cfg["num_bands"]
    kv_dim = 2 * nb + 1 + cfg["emb_dim"]
    ks = jax.random.split(key, 3 + cfg["num_perceiver_layers"])
    emb = jax.random.normal(ks[0], (cfg["vocab_size"], cfg["emb_dim"]), jnp.float32)
    emb = emb.at[cfg["padding_idx"]].set(0.0)                 # padding_idx behavior
    # TODO(synk): PyTorch uses trunc_normal(std=0.02, a=-2, b=2); plain normal*0.02 used here.
    latent_vec = jax.random.normal(ks[1], (cfg["num_latent_vecs"], cfg["latent_dim"]),
                                   jnp.float32) * 0.02
    freqs = jax.random.normal(ks[2], (1, nb), jnp.float32) * cfg["sigma"]
    layers = [_init_perceiver_layer(ks[3 + i], cfg["latent_dim"], kv_dim,
                                    cfg["dim_feedforward"], cfg["num_transformer_layers"])
              for i in range(cfg["num_perceiver_layers"])]
    return dict(embedding=emb, latent_vec=latent_vec, fourier_freqs=freqs, layers=layers)


# ----------------------------- main -----------------------------

if __name__ == "__main__":
    cfg = dict(
        vocab_size=50, emb_dim=16, latent_dim=32, n_heads=4, dim_feedforward=64,
        dropout=0.0, num_transformer_layers=1, num_perceiver_layers=2,
        num_latent_vecs=8, num_bands=4, sigma=1.0, low=-1.0, high=1.0, padding_idx=0,
    )
    key = jax.random.PRNGKey(0)
    k_tok, k_par = jax.random.split(key)
    tokens = jax.random.randint(k_tok, (2, 8), 0, cfg["vocab_size"], dtype=jnp.int32)
    params = init_perceiver(k_par, cfg)

    fwd = jax.jit(functools.partial(perceiver_forward, cfg=cfg))
    out = fwd(tokens, params)
    out = jax.block_until_ready(out)
    assert out.shape == (2, cfg["latent_dim"]), out.shape
    assert bool(jnp.all(jnp.isfinite(out)))
    print("KERNEL_OK")
</pallas_src>

<mosaic_0001>
module attributes {stable_mosaic.version = 11 : i64} {
  func.func @_perceiver_layer_kernel(%arg0: i32, %arg1: memref<16x32xf32, #tpu.memory_space<vmem>>, %arg2: memref<16x25xf32, #tpu.memory_space<vmem>>, %arg3: memref<1x32xf32, #tpu.memory_space<vmem>>, %arg4: memref<1x32xf32, #tpu.memory_space<vmem>>, %arg5: memref<1x25xf32, #tpu.memory_space<vmem>>, %arg6: memref<1x25xf32, #tpu.memory_space<vmem>>, %arg7: memref<32x32xbf16, #tpu.memory_space<vmem>>, %arg8: memref<1x32xf32, #tpu.memory_space<vmem>>, %arg9: memref<25x32xbf16, #tpu.memory_space<vmem>>, %arg10: memref<1x32xf32, #tpu.memory_space<vmem>>, %arg11: memref<25x32xbf16, #tpu.memory_space<vmem>>, %arg12: memref<1x32xf32, #tpu.memory_space<vmem>>, %arg13: memref<32x32xbf16, #tpu.memory_space<vmem>>, %arg14: memref<1x32xf32, #tpu.memory_space<vmem>>, %arg15: memref<1x32xf32, #tpu.memory_space<vmem>>, %arg16: memref<1x32xf32, #tpu.memory_space<vmem>>, %arg17: memref<32x64xbf16, #tpu.memory_space<vmem>>, %arg18: memref<1x64xf32, #tpu.memory_space<vmem>>, %arg19: memref<64x32xbf16, #tpu.memory_space<vmem>>, %arg20: memref<1x32xf32, #tpu.memory_space<vmem>>, %arg21: memref<1x32xf32, #tpu.memory_space<vmem>>, %arg22: memref<1x32xf32, #tpu.memory_space<vmem>>, %arg23: memref<32x32xbf16, #tpu.memory_space<vmem>>, %arg24: memref<1x32xf32, #tpu.memory_space<vmem>>, %arg25: memref<32x32xbf16, #tpu.memory_space<vmem>>, %arg26: memref<1x32xf32, #tpu.memory_space<vmem>>, %arg27: memref<32x32xbf16, #tpu.memory_space<vmem>>, %arg28: memref<1x32xf32, #tpu.memory_space<vmem>>, %arg29: memref<32x32xbf16, #tpu.memory_space<vmem>>, %arg30: memref<1x32xf32, #tpu.memory_space<vmem>>, %arg31: memref<1x32xf32, #tpu.memory_space<vmem>>, %arg32: memref<1x32xf32, #tpu.memory_space<vmem>>, %arg33: memref<32x64xbf16, #tpu.memory_space<vmem>>, %arg34: memref<1x64xf32, #tpu.memory_space<vmem>>, %arg35: memref<64x32xbf16, #tpu.memory_space<vmem>>, %arg36: memref<1x32xf32, #tpu.memory_space<vmem>>, %arg37: memref<2x32xf32, #tpu.memory_space<vmem>>) attributes {dimension_semantics = [#tpu.dimension_semantics<arbitrary>], iteration_bounds = array<i64: 1>, scalar_prefetch = 0 : i64, scratch_operands = 0 : i64, tpu.core_type = #tpu.core_type<tc>, window_params = [{pipeline_mode = #tpu.pipeline_mode<synchronous>, transform_indices = @transform_0, window_bounds = array<i64: 16, 32>}, {pipeline_mode = #tpu.pipeline_mode<synchronous>, transform_indices = @transform_1, window_bounds = array<i64: 16, 25>}, {pipeline_mode = #tpu.pipeline_mode<synchronous>, transform_indices = @transform_2, window_bounds = array<i64: 1, 32>}, {pipeline_mode = #tpu.pipeline_mode<synchronous>, transform_indices = @transform_3, window_bounds = array<i64: 1, 32>}, {pipeline_mode = #tpu.pipeline_mode<synchronous>, transform_indices = @transform_4, window_bounds = array<i64: 1, 25>}, {pipeline_mode = #tpu.pipeline_mode<synchronous>, transform_indices = @transform_5, window_bounds = array<i64: 1, 25>}, {pipeline_mode = #tpu.pipeline_mode<synchronous>, transform_indices = @transform_6, window_bounds = array<i64: 32, 32>}, {pipeline_mode = #tpu.pipeline_mode<synchronous>, transform_indices = @transform_7, window_bounds = array<i64: 1, 32>}, {pipeline_mode = #tpu.pipeline_mode<synchronous>, transform_indices = @transform_8, window_bounds = array<i64: 25, 32>}, {pipeline_mode = #tpu.pipeline_mode<synchronous>, transform_indices = @transform_9, window_bounds = array<i64: 1, 32>}, {pipeline_mode = #tpu.pipeline_mode<synchronous>, transform_indices = @transform_10, window_bounds = array<i64: 25, 32>}, {pipeline_mode = #tpu.pipeline_mode<synchronous>, transform_indices = @transform_11, window_bounds = array<i64: 1, 32>}, {pipeline_mode = #tpu.pipeline_mode<synchronous>, transform_indices = @transform_12, window_bounds = array<i64: 32, 32>}, {pipeline_mode = #tpu.pipeline_mode<synchronous>, transform_indices = @transform_13, window_bounds = array<i64: 1, 32>}, {pipeline_mode = #tpu.pipeline_mode<synchronous>, transform_indices = @transform_14, window_bounds = array<i64: 1, 32>}, {pipeline_mode = #tpu.pipeline_mode<synchronous>, transform_indices = @transform_15, window_bounds = array<i64: 1, 32>}, {pipeline_mode = #tpu.pipeline_mode<synchronous>, transform_indices = @transform_16, window_bounds = array<i64: 32, 64>}, {pipeline_mode = #tpu.pipeline_mode<synchronous>, transform_indices = @transform_17, window_bounds = array<i64: 1, 64>}, {pipeline_mode = #tpu.pipeline_mode<synchronous>, transform_indices = @transform_18, window_bounds = array<i64: 64, 32>}, {pipeline_mode = #tpu.pipeline_mode<synchronous>, transform_indices = @transform_19, window_bounds = array<i64: 1, 32>}, {pipeline_mode = #tpu.pipeline_mode<synchronous>, transform_indices = @transform_20, window_bounds = array<i64: 1, 32>}, {pipeline_mode = #tpu.pipeline_mode<synchronous>, transform_indices = @transform_21, window_bounds = array<i64: 1, 32>}, {pipeline_mode = #tpu.pipeline_mode<synchronous>, transform_indices = @transform_22, window_bounds = array<i64: 32, 32>}, {pipeline_mode = #tpu.pipeline_mode<synchronous>, transform_indices = @transform_23, window_bounds = array<i64: 1, 32>}, {pipeline_mode = #tpu.pipeline_mode<synchronous>, transform_indices = @transform_24, window_bounds = array<i64: 32, 32>}, {pipeline_mode = #tpu.pipeline_mode<synchronous>, transform_indices = @transform_25, window_bounds = array<i64: 1, 32>}, {pipeline_mode = #tpu.pipeline_mode<synchronous>, transform_indices = @transform_26, window_bounds = array<i64: 32, 32>}, {pipeline_mode = #tpu.pipeline_mode<synchronous>, transform_indices = @transform_27, window_bounds = array<i64: 1, 32>}, {pipeline_mode = #tpu.pipeline_mode<synchronous>, transform_indices = @transform_28, window_bounds = array<i64: 32, 32>}, {pipeline_mode = #tpu.pipeline_mode<synchronous>, transform_indices = @transform_29, window_bounds = array<i64: 1, 32>}, {pipeline_mode = #tpu.pipeline_mode<synchronous>, transform_indices = @transform_30, window_bounds = array<i64: 1, 32>}, {pipeline_mode = #tpu.pipeline_mode<synchronous>, transform_indices = @transform_31, window_bounds = array<i64: 1, 32>}, {pipeline_mode = #tpu.pipeline_mode<synchronous>, transform_indices = @transform_32, window_bounds = array<i64: 32, 64>}, {pipeline_mode = #tpu.pipeline_mode<synchronous>, transform_indices = @transform_33, window_bounds = array<i64: 1, 64>}, {pipeline_mode = #tpu.pipeline_mode<synchronous>, transform_indices = @transform_34, window_bounds = array<i64: 64, 32>}, {pipeline_mode = #tpu.pipeline_mode<synchronous>, transform_indices = @transform_35, window_bounds = array<i64: 1, 32>}, {pipeline_mode = #tpu.pipeline_mode<synchronous>, transform_indices = @transform_36, window_bounds = array<i64: 2, 32>}]} {
    %c0 = arith.constant 0 : index
    %c0_0 = arith.constant 0 : index
    %0 = vector.load %arg1[%c0, %c0_0] : memref<16x32xf32, #tpu.memory_space<vmem>>, vector<16x32xf32>
    %c0_1 = arith.constant 0 : index
    %c0_2 = arith.constant 0 : index
    %1 = vector.load %arg2[%c0_1, %c0_2] : memref<16x25xf32, #tpu.memory_space<vmem>>, vector<16x25xf32>
    %c0_3 = arith.constant 0 : index
    %c0_4 = arith.constant 0 : index
    %2 = vector.load %arg3[%c0_3, %c0_4] : memref<1x32xf32, #tpu.memory_space<vmem>>, vector<1x32xf32>
    %c0_5 = arith.constant 0 : index
    %c0_6 = arith.constant 0 : index
    %3 = vector.load %arg4[%c0_5, %c0_6] : memref<1x32xf32, #tpu.memory_space<vmem>>, vector<1x32xf32>
    %c0_7 = arith.constant 0 : index
    %c0_8 = arith.constant 0 : index
    %4 = vector.load %arg5[%c0_7, %c0_8] : memref<1x25xf32, #tpu.memory_space<vmem>>, vector<1x25xf32>
    %c0_9 = arith.constant 0 : index
    %c0_10 = arith.constant 0 : index
    %5 = vector.load %arg6[%c0_9, %c0_10] : memref<1x25xf32, #tpu.memory_space<vmem>>, vector<1x25xf32>
    %c0_11 = arith.constant 0 : index
    %c0_12 = arith.constant 0 : index
    %6 = vector.load %arg7[%c0_11, %c0_12] : memref<32x32xbf16, #tpu.memory_space<vmem>>, vector<32x32xbf16>
    %c0_13 = arith.constant 0 : index
    %c0_14 = arith.constant 0 : index
    %7 = vector.load %arg8[%c0_13, %c0_14] : memref<1x32xf32, #tpu.memory_space<vmem>>, vector<1x32xf32>
    %c0_15 = arith.constant 0 : index
    %c0_16 = arith.constant 0 : index
    %8 = vector.load %arg9[%c0_15, %c0_16] : memref<25x32xbf16, #tpu.memory_space<vmem>>, vector<25x32xbf16>
    %c0_17 = arith.constant 0 : index
    %c0_18 = arith.constant 0 : index
    %9 = vector.load %arg10[%c0_17, %c0_18] : memref<1x32xf32, #tpu.memory_space<vmem>>, vector<1x32xf32>
    %c0_19 = arith.constant 0 : index
    %c0_20 = arith.constant 0 : index
    %10 = vector.load %arg11[%c0_19, %c0_20] : memref<25x32xbf16, #tpu.memory_space<vmem>>, vector<25x32xbf16>
    %c0_21 = arith.constant 0 : index
    %c0_22 = arith.constant 0 : index
    %11 = vector.load %arg12[%c0_21, %c0_22] : memref<1x32xf32, #tpu.memory_space<vmem>>, vector<1x32xf32>
    %c0_23 = arith.constant 0 : index
    %c0_24 = arith.constant 0 : index
    %12 = vector.load %arg13[%c0_23, %c0_24] : memref<32x32xbf16, #tpu.memory_space<vmem>>, vector<32x32xbf16>
    %c0_25 = arith.constant 0 : index
    %c0_26 = arith.constant 0 : index
    %13 = vector.load %arg14[%c0_25, %c0_26] : memref<1x32xf32, #tpu.memory_space<vmem>>, vector<1x32xf32>
    %c0_27 = arith.constant 0 : index
    %c0_28 = arith.constant 0 : index
    %14 = vector.load %arg15[%c0_27, %c0_28] : memref<1x32xf32, #tpu.memory_space<vmem>>, vector<1x32xf32>
    %c0_29 = arith.constant 0 : index
    %c0_30 = arith.constant 0 : index
    %15 = vector.load %arg16[%c0_29, %c0_30] : memref<1x32xf32, #tpu.memory_space<vmem>>, vector<1x32xf32>
    %c0_31 = arith.constant 0 : index
    %c0_32 = arith.constant 0 : index
    %16 = vector.load %arg17[%c0_31, %c0_32] : memref<32x64xbf16, #tpu.memory_space<vmem>>, vector<32x64xbf16>
    %c0_33 = arith.constant 0 : index
    %c0_34 = arith.constant 0 : index
    %17 = vector.load %arg18[%c0_33, %c0_34] : memref<1x64xf32, #tpu.memory_space<vmem>>, vector<1x64xf32>
    %c0_35 = arith.constant 0 : index
    %c0_36 = arith.constant 0 : index
    %18 = vector.load %arg19[%c0_35, %c0_36] : memref<64x32xbf16, #tpu.memory_space<vmem>>, vector<64x32xbf16>
    %c0_37 = arith.constant 0 : index
    %c0_38 = arith.constant 0 : index
    %19 = vector.load %arg20[%c0_37, %c0_38] : memref<1x32xf32, #tpu.memory_space<vmem>>, vector<1x32xf32>
    %cst = arith.constant dense<0.000000e+00> : vector<16xf32>
    %20 = vector.multi_reduction <add>, %0, %cst [1] : vector<16x32xf32> to vector<16xf32>
    %21 = vector.shape_cast %20 : vector<16xf32> to vector<16x1xf32>
    %cst_39 = arith.constant 3.200000e+01 : f32
    %22 = vector.broadcast %cst_39 : f32 to vector<16x1xf32>
    %23 = arith.divf %21, %22 : vector<16x1xf32>
    %24 = vector.broadcast %23 : vector<16x1xf32> to vector<16x32xf32>
    %25 = arith.subf %0, %24 : vector<16x32xf32>
    %26 = arith.mulf %25, %25 : vector<16x32xf32>
    %cst_40 = arith.constant dense<0.000000e+00> : vector<16xf32>
    %27 = vector.multi_reduction <add>, %26, %cst_40 [1] : vector<16x32xf32> to vector<16xf32>
    %28 = vector.shape_cast %27 : vector<16xf32> to vector<16x1xf32>
    %cst_41 = arith.constant 3.200000e+01 : f32
    %29 = vector.broadcast %cst_41 : f32 to vector<16x1xf32>
    %30 = arith.divf %28, %29 : vector<16x1xf32>
    %cst_42 = arith.constant 9.99999974E-6 : f32
    %31 = vector.broadcast %cst_42 : f32 to vector<16x1xf32>
    %32 = arith.addf %30, %31 : vector<16x1xf32>
    %33 = math.rsqrt %32 : vector<16x1xf32>
    %34 = vector.broadcast %33 : vector<16x1xf32> to vector<16x32xf32>
    %35 = arith.mulf %25, %34 : vector<16x32xf32>
    %36 = vector.broadcast %2 : vector<1x32xf32> to vector<16x32xf32>
    %37 = arith.mulf %35, %36 : vector<16x32xf32>
    %38 = vector.broadcast %3 : vector<1x32xf32> to vector<16x32xf32>
    %39 = arith.addf %37, %38 : vector<16x32xf32>
    %cst_43 = arith.constant dense<0.000000e+00> : vector<16xf32>
    %40 = vector.multi_reduction <add>, %1, %cst_43 [1] : vector<16x25xf32> to vector<16xf32>
    %41 = vector.shape_cast %40 : vector<16xf32> to vector<16x1xf32>
    %cst_44 = arith.constant 2.500000e+01 : f32
    %42 = vector.broadcast %cst_44 : f32 to vector<16x1xf32>
    %43 = arith.divf %41, %42 : vector<16x1xf32>
    %44 = vector.broadcast %43 : vector<16x1xf32> to vector<16x25xf32>
    %45 = arith.subf %1, %44 : vector<16x25xf32>
    %46 = arith.mulf %45, %45 : vector<16x25xf32>
    %cst_45 = arith.constant dense<0.000000e+00> : vector<16xf32>
    %47 = vector.multi_reduction <add>, %46, %cst_45 [1] : vector<16x25xf32> to vector<16xf32>
    %48 = vector.shape_cast %47 : vector<16xf32> to vector<16x1xf32>
    %cst_46 = arith.constant 2.500000e+01 : f32
    %49 = vector.broadcast %cst_46 : f32 to vector<16x1xf32>
    %50 = arith.divf %48, %49 : vector<16x1xf32>
    %cst_47 = arith.constant 9.99999974E-6 : f32
    %51 = vector.broadcast %cst_47 : f32 to vector<16x1xf32>
    %52 = arith.addf %50, %51 : vector<16x1xf32>
    %53 = math.rsqrt %52 : vector<16x1xf32>
    %54 = vector.broadcast %53 : vector<16x1xf32> to vector<16x25xf32>
    %55 = arith.mulf %45, %54 : vector<16x25xf32>
    %56 = vector.broadcast %4 : vector<1x25xf32> to vector<16x25xf32>
    %57 = arith.mulf %55, %56 : vector<16x25xf32>
    %58 = vector.broadcast %5 : vector<1x25xf32> to vector<16x25xf32>
    %59 = arith.addf %57, %58 : vector<16x25xf32>
    %60 = arith.truncf %39 : vector<16x32xf32> to vector<16x32xbf16>
    %cst_48 = arith.constant dense<0.000000e+00> : vector<16x32xf32>
    %61 = tpu.matmul %60, %6, %cst_48 {dimension_numbers = #tpu.dot_dimension_numbers<[1], [0], [0], [1], [0, 0, 1, 1], [], []>} : vector<16x32xbf16>, vector<32x32xbf16>, vector<16x32xf32> -> vector<16x32xf32>
    %62 = vector.broadcast %7 : vector<1x32xf32> to vector<16x32xf32>
    %63 = arith.addf %61, %62 : vector<16x32xf32>
    %64 = arith.truncf %59 : vector<16x25xf32> to vector<16x25xbf16>
    %cst_49 = arith.constant dense<0.000000e+00> : vector<16x32xf32>
    %65 = tpu.matmul %64, %8, %cst_49 {dimension_numbers = #tpu.dot_dimension_numbers<[1], [0], [0], [1], [0, 0, 1, 1], [], []>} : vector<16x25xbf16>, vector<25x32xbf16>, vector<16x32xf32> -> vector<16x32xf32>
    %66 = vector.broadcast %9 : vector<1x32xf32> to vector<16x32xf32>
    %67 = arith.addf %65, %66 : vector<16x32xf32>
    %68 = arith.truncf %59 : vector<16x25xf32> to vector<16x25xbf16>
    %cst_50 = arith.constant dense<0.000000e+00> : vector<16x32xf32>
    %69 = tpu.matmul %68, %10, %cst_50 {dimension_numbers = #tpu.dot_dimension_numbers<[1], [0], [0], [1], [0, 0, 1, 1], [], []>} : vector<16x25xbf16>, vector<25x32xbf16>, vector<16x32xf32> -> vector<16x32xf32>
    %70 = vector.broadcast %11 : vector<1x32xf32> to vector<16x32xf32>
    %71 = arith.addf %69, %70 : vector<16x32xf32>
    %72 = vector.extract_strided_slice %63 {offsets = [0, 0], sizes = [16, 8], strides = [1, 1]} : vector<16x32xf32> to vector<16x8xf32>
    %73 = vector.shape_cast %72 : vector<16x8xf32> to vector<2x8x8xf32>
    %74 = arith.truncf %73 : vector<2x8x8xf32> to vector<2x8x8xbf16>
    %75 = vector.extract_strided_slice %67 {offsets = [0, 0], sizes = [16, 8], strides = [1, 1]} : vector<16x32xf32> to vector<16x8xf32>
    %76 = vector.shape_cast %75 : vector<16x8xf32> to vector<2x8x8xf32>
    %77 = arith.truncf %76 : vector<2x8x8xf32> to vector<2x8x8xbf16>
    %78 = vector.extract_strided_slice %71 {offsets = [0, 0], sizes = [16, 8], strides = [1, 1]} : vector<16x32xf32> to vector<16x8xf32>
    %79 = vector.shape_cast %78 : vector<16x8xf32> to vector<2x8x8xf32>
    %80 = arith.truncf %79 : vector<2x8x8xf32> to vector<2x8x8xbf16>
    "tpu.trace_start"() <{level = 10 : i32, message = "bqd,bkd->bqk"}> : () -> ()
    %cst_51 = arith.constant dense<0.000000e+00> : vector<2x8x8xf32>
    %81 = tpu.matmul %74, %77, %cst_51 {dimension_numbers = #tpu.dot_dimension_numbers<[2], [2], [1], [1], [0, 0, 0, 1, 1, 1], [0], [0]>} : vector<2x8x8xbf16>, vector<2x8x8xbf16>, vector<2x8x8xf32> -> vector<2x8x8xf32>
    "tpu.trace_stop"() : () -> ()
    %cst_52 = arith.constant 0.353553385 : f32
    %82 = vector.broadcast %cst_52 : f32 to vector<2x8x8xf32>
    %83 = arith.mulf %81, %82 : vector<2x8x8xf32>
    %cst_53 = arith.constant dense<0xFF800000> : vector<2x8xf32>
    %84 = vector.multi_reduction <maximumf>, %83, %cst_53 [2] : vector<2x8x8xf32> to vector<2x8xf32>
    %85 = vector.shape_cast %84 : vector<2x8xf32> to vector<2x8x1xf32>
    %86 = vector.broadcast %85 : vector<2x8x1xf32> to vector<2x8x8xf32>
    %87 = arith.subf %83, %86 : vector<2x8x8xf32>
    %88 = math.exp %87 : vector<2x8x8xf32>
    %cst_54 = arith.constant dense<0.000000e+00> : vector<2x8xf32>
    %89 = vector.multi_reduction <add>, %88, %cst_54 [2] : vector<2x8x8xf32> to vector<2x8xf32>
    %90 = vector.shape_cast %89 : vector<2x8xf32> to vector<2x8x1xf32>
    %91 = tpu.reciprocal %90 {approx = true} : vector<2x8x1xf32> -> vector<2x8x1xf32>
    %92 = vector.broadcast %91 : vector<2x8x1xf32> to vector<2x8x8xf32>
    %93 = arith.mulf %88, %92 : vector<2x8x8xf32>
    %94 = arith.truncf %93 : vector<2x8x8xf32> to vector<2x8x8xbf16>
    "tpu.trace_start"() <{level = 10 : i32, message = "bqk,bkd->bqd"}> : () -> ()
    %cst_55 = arith.constant dense<0.000000e+00> : vector<2x8x8xf32>
    %95 = tpu.matmul %94, %80, %cst_55 {dimension_numbers = #tpu.dot_dimension_numbers<[2], [1], [1], [2], [0, 0, 0, 1, 1, 2], [0], [0]>} : vector<2x8x8xbf16>, vector<2x8x8xbf16>, vector<2x8x8xf32> -> vector<2x8x8xf32>
    "tpu.trace_stop"() : () -> ()
    %96 = vector.shape_cast %95 : vector<2x8x8xf32> to vector<16x8xf32>
    %97 = arith.truncf %96 : vector<16x8xf32> to vector<16x8xbf16>
    %98 = vector.extract_strided_slice %12 {offsets = [0, 0], sizes = [8, 32], strides = [1, 1]} : vector<32x32xbf16> to vector<8x32xbf16>
    %cst_56 = arith.constant dense<0.000000e+00> : vector<16x32xf32>
    %99 = tpu.matmul %97, %98, %cst_56 {dimension_numbers = #tpu.dot_dimension_numbers<[1], [0], [0], [1], [0, 0, 1, 1], [], []>} : vector<16x8xbf16>, vector<8x32xbf16>, vector<16x32xf32> -> vector<16x32xf32>
    %100 = vector.extract_strided_slice %63 {offsets = [0, 8], sizes = [16, 8], strides = [1, 1]} : vector<16x32xf32> to vector<16x8xf32>
    %101 = vector.shape_cast %100 : vector<16x8xf32> to vector<2x8x8xf32>
    %102 = arith.truncf %101 : vector<2x8x8xf32> to vector<2x8x8xbf16>
    %103 = vector.extract_strided_slice %67 {offsets = [0, 8], sizes = [16, 8], strides = [1, 1]} : vector<16x32xf32> to vector<16x8xf32>
    %104 = vector.shape_cast %103 : vector<16x8xf32> to vector<2x8x8xf32>
    %105 = arith.truncf %104 : vector<2x8x8xf32> to vector<2x8x8xbf16>
    %106 = vector.extract_strided_slice %71 {offsets = [0, 8], sizes = [16, 8], strides = [1, 1]} : vector<16x32xf32> to vector<16x8xf32>
    %107 = vector.shape_cast %106 : vector<16x8xf32> to vector<2x8x8xf32>
    %108 = arith.truncf %107 : vector<2x8x8xf32> to vector<2x8x8xbf16>
    "tpu.trace_start"() <{level = 10 : i32, message = "bqd,bkd->bqk"}> : () -> ()
    %cst_57 = arith.constant dense<0.000000e+00> : vector<2x8x8xf32>
    %109 = tpu.matmul %102, %105, %cst_57 {dimension_numbers = #tpu.dot_dimension_numbers<[2], [2], [1], [1], [0, 0, 0, 1, 1, 1], [0], [0]>} : vector<2x8x8xbf16>, vector<2x8x8xbf16>, vector<2x8x8xf32> -> vector<2x8x8xf32>
    "tpu.trace_stop"() : () -> ()
    %cst_58 = arith.constant 0.353553385 : f32
    %110 = vector.broadcast %cst_58 : f32 to vector<2x8x8xf32>
    %111 = arith.mulf %109, %110 : vector<2x8x8xf32>
    %cst_59 = arith.constant dense<0xFF800000> : vector<2x8xf32>
    %112 = vector.multi_reduction <maximumf>, %111, %cst_59 [2] : vector<2x8x8xf32> to vector<2x8xf32>
    %113 = vector.shape_cast %112 : vector<2x8xf32> to vector<2x8x1xf32>
    %114 = vector.broadcast %113 : vector<2x8x1xf32> to vector<2x8x8xf32>
    %115 = arith.subf %111, %114 : vector<2x8x8xf32>
    %116 = math.exp %115 : vector<2x8x8xf32>
    %cst_60 = arith.constant dense<0.000000e+00> : vector<2x8xf32>
    %117 = vector.multi_reduction <add>, %116, %cst_60 [2] : vector<2x8x8xf32> to vector<2x8xf32>
    %118 = vector.shape_cast %117 : vector<2x8xf32> to vector<2x8x1xf32>
    %119 = tpu.reciprocal %118 {approx = true} : vector<2x8x1xf32> -> vector<2x8x1xf32>
    %120 = vector.broadcast %119 : vector<2x8x1xf32> to vector<2x8x8xf32>
    %121 = arith.mulf %116, %120 : vector<2x8x8xf32>
    %122 = arith.truncf %121 : vector<2x8x8xf32> to vector<2x8x8xbf16>
    "tpu.trace_start"() <{level = 10 : i32, message = "bqk,bkd->bqd"}> : () -> ()
    %cst_61 = arith.constant dense<0.000000e+00> : vector<2x8x8xf32>
    %123 = tpu.matmul %122, %108, %cst_61 {dimension_numbers = #tpu.dot_dimension_numbers<[2], [1], [1], [2], [0, 0, 0, 1, 1, 2], [0], [0]>} : vector<2x8x8xbf16>, vector<2x8x8xbf16>, vector<2x8x8xf32> -> vector<2x8x8xf32>
    "tpu.trace_stop"() : () -> ()
    %124 = vector.shape_cast %123 : vector<2x8x8xf32> to vector<16x8xf32>
    %125 = arith.truncf %124 : vector<16x8xf32> to vector<16x8xbf16>
    %126 = vector.extract_strided_slice %12 {offsets = [8, 0], sizes = [8, 32], strides = [1, 1]} : vector<32x32xbf16> to vector<8x32xbf16>
    %cst_62 = arith.constant dense<0.000000e+00> : vector<16x32xf32>
    %127 = tpu.matmul %125, %126, %cst_62 {dimension_numbers = #tpu.dot_dimension_numbers<[1], [0], [0], [1], [0, 0, 1, 1], [], []>} : vector<16x8xbf16>, vector<8x32xbf16>, vector<16x32xf32> -> vector<16x32xf32>
    %128 = arith.addf %99, %127 : vector<16x32xf32>
    %129 = vector.extract_strided_slice %63 {offsets = [0, 16], sizes = [16, 8], strides = [1, 1]} : vector<16x32xf32> to vector<16x8xf32>
    %130 = vector.shape_cast %129 : vector<16x8xf32> to vector<2x8x8xf32>
    %131 = arith.truncf %130 : vector<2x8x8xf32> to vector<2x8x8xbf16>
    %132 = vector.extract_strided_slice %67 {offsets = [0, 16], sizes = [16, 8], strides = [1, 1]} : vector<16x32xf32> to vector<16x8xf32>
    %133 = vector.shape_cast %132 : vector<16x8xf32> to vector<2x8x8xf32>
    %134 = arith.truncf %133 : vector<2x8x8xf32> to vector<2x8x8xbf16>
    %135 = vector.extract_strided_slice %71 {offsets = [0, 16], sizes = [16, 8], strides = [1, 1]} : vector<16x32xf32> to vector<16x8xf32>
    %136 = vector.shape_cast %135 : vector<16x8xf32> to vector<2x8x8xf32>
    %137 = arith.truncf %136 : vector<2x8x8xf32> to vector<2x8x8xbf16>
    "tpu.trace_start"() <{level = 10 : i32, message = "bqd,bkd->bqk"}> : () -> ()
    %cst_63 = arith.constant dense<0.000000e+00> : vector<2x8x8xf32>
    %138 = tpu.matmul %131, %134, %cst_63 {dimension_numbers = #tpu.dot_dimension_numbers<[2], [2], [1], [1], [0, 0, 0, 1, 1, 1], [0], [0]>} : vector<2x8x8xbf16>, vector<2x8x8xbf16>, vector<2x8x8xf32> -> vector<2x8x8xf32>
    "tpu.trace_stop"() : () -> ()
    %cst_64 = arith.constant 0.353553385 : f32
    %139 = vector.broadcast %cst_64 : f32 to vector<2x8x8xf32>
    %140 = arith.mulf %138, %139 : vector<2x8x8xf32>
    %cst_65 = arith.constant dense<0xFF800000> : vector<2x8xf32>
    %141 = vector.multi_reduction <maximumf>, %140, %cst_65 [2] : vector<2x8x8xf32> to vector<2x8xf32>
    %142 = vector.shape_cast %141 : vector<2x8xf32> to vector<2x8x1xf32>
    %143 = vector.broadcast %142 : vector<2x8x1xf32> to vector<2x8x8xf32>
    %144 = arith.subf %140, %143 : vector<2x8x8xf32>
    %145 = math.exp %144 : vector<2x8x8xf32>
    %cst_66 = arith.constant dense<0.000000e+00> : vector<2x8xf32>
    %146 = vector.multi_reduction <add>, %145, %cst_66 [2] : vector<2x8x8xf32> to vector<2x8xf32>
    %147 = vector.shape_cast %146 : vector<2x8xf32> to vector<2x8x1xf32>
    %148 = tpu.reciprocal %147 {approx = true} : vector<2x8x1xf32> -> vector<2x8x1xf32>
    %149 = vector.broadcast %148 : vector<2x8x1xf32> to vector<2x8x8xf32>
    %150 = arith.mulf %145, %149 : vector<2x8x8xf32>
    %151 = arith.truncf %150 : vector<2x8x8xf32> to vector<2x8x8xbf16>
    "tpu.trace_start"() <{level = 10 : i32, message = "bqk,bkd->bqd"}> : () -> ()
    %cst_67 = arith.constant dense<0.000000e+00> : vector<2x8x8xf32>
    %152 = tpu.matmul %151, %137, %cst_67 {dimension_numbers = #tpu.dot_dimension_numbers<[2], [1], [1], [2], [0, 0, 0, 1, 1, 2], [0], [0]>} : vector<2x8x8xbf16>, vector<2x8x8xbf16>, vector<2x8x8xf32> -> vector<2x8x8xf32>
    "tpu.trace_stop"() : () -> ()
    %153 = vector.shape_cast %152 : vector<2x8x8xf32> to vector<16x8xf32>
    %154 = arith.truncf %153 : vector<16x8xf32> to vector<16x8xbf16>
    %155 = vector.extract_strided_slice %12 {offsets = [16, 0], sizes = [8, 32], strides = [1, 1]} : vector<32x32xbf16> to vector<8x32xbf16>
    %cst_68 = arith.constant dense<0.000000e+00> : vector<16x32xf32>
    %156 = tpu.matmul %154, %155, %cst_68 {dimension_numbers = #tpu.dot_dimension_numbers<[1], [0], [0], [1], [0, 0, 1, 1], [], []>} : vector<16x8xbf16>, vector<8x32xbf16>, vector<16x32xf32> -> vector<16x32xf32>
    %157 = arith.addf %128, %156 : vector<16x32xf32>
    %158 = vector.extract_strided_slice %63 {offsets = [0, 24], sizes = [16, 8], strides = [1, 1]} : vector<16x32xf32> to vector<16x8xf32>
    %159 = vector.shape_cast %158 : vector<16x8xf32> to vector<2x8x8xf32>
    %160 = arith.truncf %159 : vector<2x8x8xf32> to vector<2x8x8xbf16>
    %161 = vector.extract_strided_slice %67 {offsets = [0, 24], sizes = [16, 8], strides = [1, 1]} : vector<16x32xf32> to vector<16x8xf32>
    %162 = vector.shape_cast %161 : vector<16x8xf32> to vector<2x8x8xf32>
    %163 = arith.truncf %162 : vector<2x8x8xf32> to vector<2x8x8xbf16>
    %164 = vector.extract_strided_slice %71 {offsets = [0, 24], sizes = [16, 8], strides = [1, 1]} : vector<16x32xf32> to vector<16x8xf32>
    %165 = vector.shape_cast %164 : vector<16x8xf32> to vector<2x8x8xf32>
    %166 = arith.truncf %165 : vector<2x8x8xf32> to vector<2x8x8xbf16>
    "tpu.trace_start"() <{level = 10 : i32, message = "bqd,bkd->bqk"}> : () -> ()
    %cst_69 = arith.constant dense<0.000000e+00> : vector<2x8x8xf32>
    %167 = tpu.matmul %160, %163, %cst_69 {dimension_numbers = #tpu.dot_dimension_numbers<[2], [2], [1], [1], [0, 0, 0, 1, 1, 1], [0], [0]>} : vector<2x8x8xbf16>, vector<2x8x8xbf16>, vector<2x8x8xf32> -> vector<2x8x8xf32>
    "tpu.trace_stop"() : () -> ()
    %cst_70 = arith.constant 0.353553385 : f32
    %168 = vector.broadcast %cst_70 : f32 to vector<2x8x8xf32>
    %169 = arith.mulf %167, %168 : vector<2x8x8xf32>
    %cst_71 = arith.constant dense<0xFF800000> : vector<2x8xf32>
    %170 = vector.multi_reduction <maximumf>, %169, %cst_71 [2] : vector<2x8x8xf32> to vector<2x8xf32>
    %171 = vector.shape_cast %170 : vector<2x8xf32> to vector<2x8x1xf32>
    %172 = vector.broadcast %171 : vector<2x8x1xf32> to vector<2x8x8xf32>
    %173 = arith.subf %169, %172 : vector<2x8x8xf32>
    %174 = math.exp %173 : vector<2x8x8xf32>
    %cst_72 = arith.constant dense<0.000000e+00> : vector<2x8xf32>
    %175 = vector.multi_reduction <add>, %174, %cst_72 [2] : vector<2x8x8xf32> to vector<2x8xf32>
    %176 = vector.shape_cast %175 : vector<2x8xf32> to vector<2x8x1xf32>
    %177 = tpu.reciprocal %176 {approx = true} : vector<2x8x1xf32> -> vector<2x8x1xf32>
    %178 = vector.broadcast %177 : vector<2x8x1xf32> to vector<2x8x8xf32>
    %179 = arith.mulf %174, %178 : vector<2x8x8xf32>
    %180 = arith.truncf %179 : vector<2x8x8xf32> to vector<2x8x8xbf16>
    "tpu.trace_start"() <{level = 10 : i32, message = "bqk,bkd->bqd"}> : () -> ()
    %cst_73 = arith.constant dense<0.000000e+00> : vector<2x8x8xf32>
    %181 = tpu.matmul %180, %166, %cst_73 {dimension_numbers = #tpu.dot_dimension_numbers<[2], [1], [1], [2], [0, 0, 0, 1, 1, 2], [0], [0]>} : vector<2x8x8xbf16>, vector<2x8x8xbf16>, vector<2x8x8xf32> -> vector<2x8x8xf32>
    "tpu.trace_stop"() : () -> ()
    %182 = vector.shape_cast %181 : vector<2x8x8xf32> to vector<16x8xf32>
    %183 = arith.truncf %182 : vector<16x8xf32> to vector<16x8xbf16>
    %184 = vector.extract_strided_slice %12 {offsets = [24, 0], sizes = [8, 32], strides = [1, 1]} : vector<32x32xbf16> to vector<8x32xbf16>
    %cst_74 = arith.constant dense<0.000000e+00> : vector<16x32xf32>
    %185 = tpu.matmul %183, %184, %cst_74 {dimension_numbers = #tpu.dot_dimension_numbers<[1], [0], [0], [1], [0, 0, 1, 1], [], []>} : vector<16x8xbf16>, vector<8x32xbf16>, vector<16x32xf32> -> vector<16x32xf32>
    %186 = arith.addf %157, %185 : vector<16x32xf32>
    %187 = vector.broadcast %13 : vector<1x32xf32> to vector<16x32xf32>
    %188 = arith.addf %186, %187 : vector<16x32xf32>
    %189 = arith.addf %0, %188 : vector<16x32xf32>
    %cst_75 = arith.constant dense<0.000000e+00> : vector<16xf32>
    %190 = vector.multi_reduction <add>, %189, %cst_75 [1] : vector<16x32xf32> to vector<16xf32>
    %191 = vector.shape_cast %190 : vector<16xf32> to vector<16x1xf32>
    %cst_76 = arith.constant 3.200000e+01 : f32
    %192 = vector.broadcast %cst_76 : f32 to vector<16x1xf32>
    %193 = arith.divf %191, %192 : vector<16x1xf32>
    %194 = vector.broadcast %193 : vector<16x1xf32> to vector<16x32xf32>
    %195 = arith.subf %189, %194 : vector<16x32xf32>
    %196 = arith.mulf %195, %195 : vector<16x32xf32>
    %cst_77 = arith.constant dense<0.000000e+00> : vector<16xf32>
    %197 = vector.multi_reduction <add>, %196, %cst_77 [1] : vector<16x32xf32> to vector<16xf32>
    %198 = vector.shape_cast %197 : vector<16xf32> to vector<16x1xf32>
    %cst_78 = arith.constant 3.200000e+01 : f32
    %199 = vector.broadcast %cst_78 : f32 to vector<16x1xf32>
    %200 = arith.divf %198, %199 : vector<16x1xf32>
    %cst_79 = arith.constant 9.99999974E-6 : f32
    %201 = vector.broadcast %cst_79 : f32 to vector<16x1xf32>
    %202 = arith.addf %200, %201 : vector<16x1xf32>
    %203 = math.rsqrt %202 : vector<16x1xf32>
    %204 = vector.broadcast %203 : vector<16x1xf32> to vector<16x32xf32>
    %205 = arith.mulf %195, %204 : vector<16x32xf32>
    %206 = vector.broadcast %14 : vector<1x32xf32> to vector<16x32xf32>
    %207 = arith.mulf %205, %206 : vector<16x32xf32>
    %208 = vector.broadcast %15 : vector<1x32xf32> to vector<16x32xf32>
    %209 = arith.addf %207, %208 : vector<16x32xf32>
    %210 = arith.truncf %209 : vector<16x32xf32> to vector<16x32xbf16>
    %cst_80 = arith.constant dense<0.000000e+00> : vector<16x64xf32>
    %211 = tpu.matmul %210, %16, %cst_80 {dimension_numbers = #tpu.dot_dimension_numbers<[1], [0], [0], [1], [0, 0, 1, 1], [], []>} : vector<16x32xbf16>, vector<32x64xbf16>, vector<16x64xf32> -> vector<16x64xf32>
    %212 = vector.broadcast %17 : vector<1x64xf32> to vector<16x64xf32>
    %213 = arith.addf %211, %212 : vector<16x64xf32>
    %cst_81 = arith.constant 0.000000e+00 : f32
    %214 = vector.broadcast %cst_81 : f32 to vector<16x64xf32>
    %215 = arith.maximumf %213, %214 : vector<16x64xf32>
    %216 = arith.truncf %215 : vector<16x64xf32> to vector<16x64xbf16>
    %cst_82 = arith.constant dense<0.000000e+00> : vector<16x32xf32>
    %217 = tpu.matmul %216, %18, %cst_82 {dimension_numbers = #tpu.dot_dimension_numbers<[1], [0], [0], [1], [0, 0, 1, 1], [], []>} : vector<16x64xbf16>, vector<64x32xbf16>, vector<16x32xf32> -> vector<16x32xf32>
    %218 = vector.broadcast %19 : vector<1x32xf32> to vector<16x32xf32>
    %219 = arith.addf %217, %218 : vector<16x32xf32>
    %220 = arith.addf %189, %219 : vector<16x32xf32>
    %c0_83 = arith.constant 0 : index
    %c0_84 = arith.constant 0 : index
    %221 = vector.load %arg21[%c0_83, %c0_84] : memref<1x32xf32, #tpu.memory_space<vmem>>, vector<1x32xf32>
    %c0_85 = arith.constant 0 : index
    %c0_86 = arith.constant 0 : index
    %222 = vector.load %arg22[%c0_85, %c0_86] : memref<1x32xf32, #tpu.memory_space<vmem>>, vector<1x32xf32>
    %c0_87 = arith.constant 0 : index
    %c0_88 = arith.constant 0 : index
    %223 = vector.load %arg23[%c0_87, %c0_88] : memref<32x32xbf16, #tpu.memory_space<vmem>>, vector<32x32xbf16>
    %c0_89 = arith.constant 0 : index
    %c0_90 = arith.constant 0 : index
    %224 = vector.load %arg24[%c0_89, %c0_90] : memref<1x32xf32, #tpu.memory_space<vmem>>, vector<1x32xf32>
    %c0_91 = arith.constant 0 : index
    %c0_92 = arith.constant 0 : index
    %225 = vector.load %arg25[%c0_91, %c0_92] : memref<32x32xbf16, #tpu.memory_space<vmem>>, vector<32x32xbf16>
    %c0_93 = arith.constant 0 : index
    %c0_94 = arith.constant 0 : index
    %226 = vector.load %arg26[%c0_93, %c0_94] : memref<1x32xf32, #tpu.memory_space<vmem>>, vector<1x32xf32>
    %c0_95 = arith.constant 0 : index
    %c0_96 = arith.constant 0 : index
    %227 = vector.load %arg27[%c0_95, %c0_96] : memref<32x32xbf16, #tpu.memory_space<vmem>>, vector<32x32xbf16>
    %c0_97 = arith.constant 0 : index
    %c0_98 = arith.constant 0 : index
    %228 = vector.load %arg28[%c0_97, %c0_98] : memref<1x32xf32, #tpu.memory_space<vmem>>, vector<1x32xf32>
    %c0_99 = arith.constant 0 : index
    %c0_100 = arith.constant 0 : index
    %229 = vector.load %arg29[%c0_99, %c0_100] : memref<32x32xbf16, #tpu.memory_space<vmem>>, vector<32x32xbf16>
    %c0_101 = arith.constant 0 : index
    %c0_102 = arith.constant 0 : index
    %230 = vector.load %arg30[%c0_101, %c0_102] : memref<1x32xf32, #tpu.memory_space<vmem>>, vector<1x32xf32>
    %c0_103 = arith.constant 0 : index
    %c0_104 = arith.constant 0 : index
    %231 = vector.load %arg31[%c0_103, %c0_104] : memref<1x32xf32, #tpu.memory_space<vmem>>, vector<1x32xf32>
    %c0_105 = arith.constant 0 : index
    %c0_106 = arith.constant 0 : index
    %232 = vector.load %arg32[%c0_105, %c0_106] : memref<1x32xf32, #tpu.memory_space<vmem>>, vector<1x32xf32>
    %c0_107 = arith.constant 0 : index
    %c0_108 = arith.constant 0 : index
    %233 = vector.load %arg33[%c0_107, %c0_108] : memref<32x64xbf16, #tpu.memory_space<vmem>>, vector<32x64xbf16>
    %c0_109 = arith.constant 0 : index
    %c0_110 = arith.constant 0 : index
    %234 = vector.load %arg34[%c0_109, %c0_110] : memref<1x64xf32, #tpu.memory_space<vmem>>, vector<1x64xf32>
    %c0_111 = arith.constant 0 : index
    %c0_112 = arith.constant 0 : index
    %235 = vector.load %arg35[%c0_111, %c0_112] : memref<64x32xbf16, #tpu.memory_space<vmem>>, vector<64x32xbf16>
    %c0_113 = arith.constant 0 : index
    %c0_114 = arith.constant 0 : index
    %236 = vector.load %arg36[%c0_113, %c0_114] : memref<1x32xf32, #tpu.memory_space<vmem>>, vector<1x32xf32>
    %cst_115 = arith.constant dense<0.000000e+00> : vector<16xf32>
    %237 = vector.multi_reduction <add>, %220, %cst_115 [1] : vector<16x32xf32> to vector<16xf32>
    %238 = vector.shape_cast %237 : vector<16xf32> to vector<16x1xf32>
    %cst_116 = arith.constant 3.200000e+01 : f32
    %239 = vector.broadcast %cst_116 : f32 to vector<16x1xf32>
    %240 = arith.divf %238, %239 : vector<16x1xf32>
    %241 = vector.broadcast %240 : vector<16x1xf32> to vector<16x32xf32>
    %242 = arith.subf %220, %241 : vector<16x32xf32>
    %243 = arith.mulf %242, %242 : vector<16x32xf32>
    %cst_117 = arith.constant dense<0.000000e+00> : vector<16xf32>
    %244 = vector.multi_reduction <add>, %243, %cst_117 [1] : vector<16x32xf32> to vector<16xf32>
    %245 = vector.shape_cast %244 : vector<16xf32> to vector<16x1xf32>
    %cst_118 = arith.constant 3.200000e+01 : f32
    %246 = vector.broadcast %cst_118 : f32 to vector<16x1xf32>
    %247 = arith.divf %245, %246 : vector<16x1xf32>
    %cst_119 = arith.constant 9.99999974E-6 : f32
    %248 = vector.broadcast %cst_119 : f32 to vector<16x1xf32>
    %249 = arith.addf %247, %248 : vector<16x1xf32>
    %250 = math.rsqrt %249 : vector<16x1xf32>
    %251 = vector.broadcast %250 : vector<16x1xf32> to vector<16x32xf32>
    %252 = arith.mulf %242, %251 : vector<16x32xf32>
    %253 = vector.broadcast %221 : vector<1x32xf32> to vector<16x32xf32>
    %254 = arith.mulf %252, %253 : vector<16x32xf32>
    %255 = vector.broadcast %222 : vector<1x32xf32> to vector<16x32xf32>
    %256 = arith.addf %254, %255 : vector<16x32xf32>
    %257 = arith.truncf %256 : vector<16x32xf32> to vector<16x32xbf16>
    %cst_120 = arith.constant dense<0.000000e+00> : vector<16x32xf32>
    %258 = tpu.matmul %257, %223, %cst_120 {dimension_numbers = #tpu.dot_dimension_numbers<[1], [0], [0], [1], [0, 0, 1, 1], [], []>} : vector<16x32xbf16>, vector<32x32xbf16>, vector<16x32xf32> -> vector<16x32xf32>
    %259 = vector.broadcast %224 : vector<1x32xf32> to vector<16x32xf32>
    %260 = arith.addf %258, %259 : vector<16x32xf32>
    %261 = arith.truncf %256 : vector<16x32xf32> to vector<16x32xbf16>
    %cst_121 = arith.constant dense<0.000000e+00> : vector<16x32xf32>
    %262 = tpu.matmul %261, %225, %cst_121 {dimension_numbers = #tpu.dot_dimension_numbers<[1], [0], [0], [1], [0, 0, 1, 1], [], []>} : vector<16x32xbf16>, vector<32x32xbf16>, vector<16x32xf32> -> vector<16x32xf32>
    %263 = vector.broadcast %226 : vector<1x32xf32> to vector<16x32xf32>
    %264 = arith.addf %262, %263 : vector<16x32xf32>
    %265 = arith.truncf %256 : vector<16x32xf32> to vector<16x32xbf16>
    %cst_122 = arith.constant dense<0.000000e+00> : vector<16x32xf32>
    %266 = tpu.matmul %265, %227, %cst_122 {dimension_numbers = #tpu.dot_dimension_numbers<[1], [0], [0], [1], [0, 0, 1, 1], [], []>} : vector<16x32xbf16>, vector<32x32xbf16>, vector<16x32xf32> -> vector<16x32xf32>
    %267 = vector.broadcast %228 : vector<1x32xf32> to vector<16x32xf32>
    %268 = arith.addf %266, %267 : vector<16x32xf32>
    %269 = vector.extract_strided_slice %260 {offsets = [0, 0], sizes = [16, 8], strides = [1, 1]} : vector<16x32xf32> to vector<16x8xf32>
    %270 = vector.shape_cast %269 : vector<16x8xf32> to vector<2x8x8xf32>
    %271 = arith.truncf %270 : vector<2x8x8xf32> to vector<2x8x8xbf16>
    %272 = vector.extract_strided_slice %264 {offsets = [0, 0], sizes = [16, 8], strides = [1, 1]} : vector<16x32xf32> to vector<16x8xf32>
    %273 = vector.shape_cast %272 : vector<16x8xf32> to vector<2x8x8xf32>
    %274 = arith.truncf %273 : vector<2x8x8xf32> to vector<2x8x8xbf16>
    %275 = vector.extract_strided_slice %268 {offsets = [0, 0], sizes = [16, 8], strides = [1, 1]} : vector<16x32xf32> to vector<16x8xf32>
    %276 = vector.shape_cast %275 : vector<16x8xf32> to vector<2x8x8xf32>
    %277 = arith.truncf %276 : vector<2x8x8xf32> to vector<2x8x8xbf16>
    "tpu.trace_start"() <{level = 10 : i32, message = "bqd,bkd->bqk"}> : () -> ()
    %cst_123 = arith.constant dense<0.000000e+00> : vector<2x8x8xf32>
    %278 = tpu.matmul %271, %274, %cst_123 {dimension_numbers = #tpu.dot_dimension_numbers<[2], [2], [1], [1], [0, 0, 0, 1, 1, 1], [0], [0]>} : vector<2x8x8xbf16>, vector<2x8x8xbf16>, vector<2x8x8xf32> -> vector<2x8x8xf32>
    "tpu.trace_stop"() : () -> ()
    %cst_124 = arith.constant 0.353553385 : f32
    %279 = vector.broadcast %cst_124 : f32 to vector<2x8x8xf32>
    %280 = arith.mulf %278, %279 : vector<2x8x8xf32>
    %cst_125 = arith.constant dense<0xFF800000> : vector<2x8xf32>
    %281 = vector.multi_reduction <maximumf>, %280, %cst_125 [2] : vector<2x8x8xf32> to vector<2x8xf32>
    %282 = vector.shape_cast %281 : vector<2x8xf32> to vector<2x8x1xf32>
    %283 = vector.broadcast %282 : vector<2x8x1xf32> to vector<2x8x8xf32>
    %284 = arith.subf %280, %283 : vector<2x8x8xf32>
    %285 = math.exp %284 : vector<2x8x8xf32>
    %cst_126 = arith.constant dense<0.000000e+00> : vector<2x8xf32>
    %286 = vector.multi_reduction <add>, %285, %cst_126 [2] : vector<2x8x8xf32> to vector<2x8xf32>
    %287 = vector.shape_cast %286 : vector<2x8xf32> to vector<2x8x1xf32>
    %288 = tpu.reciprocal %287 {approx = true} : vector<2x8x1xf32> -> vector<2x8x1xf32>
    %289 = vector.broadcast %288 : vector<2x8x1xf32> to vector<2x8x8xf32>
    %290 = arith.mulf %285, %289 : vector<2x8x8xf32>
    %291 = arith.truncf %290 : vector<2x8x8xf32> to vector<2x8x8xbf16>
    "tpu.trace_start"() <{level = 10 : i32, message = "bqk,bkd->bqd"}> : () -> ()
    %cst_127 = arith.constant dense<0.000000e+00> : vector<2x8x8xf32>
    %292 = tpu.matmul %291, %277, %cst_127 {dimension_numbers = #tpu.dot_dimension_numbers<[2], [1], [1], [2], [0, 0, 0, 1, 1, 2], [0], [0]>} : vector<2x8x8xbf16>, vector<2x8x8xbf16>, vector<2x8x8xf32> -> vector<2x8x8xf32>
    "tpu.trace_stop"() : () -> ()
    %293 = vector.shape_cast %292 : vector<2x8x8xf32> to vector<16x8xf32>
    %294 = arith.truncf %293 : vector<16x8xf32> to vector<16x8xbf16>
    %295 = vector.extract_strided_slice %229 {offsets = [0, 0], sizes = [8, 32], strides = [1, 1]} : vector<32x32xbf16> to vector<8x32xbf16>
    %cst_128 = arith.constant dense<0.000000e+00> : vector<16x32xf32>
    %296 = tpu.matmul %294, %295, %cst_128 {dimension_numbers = #tpu.dot_dimension_numbers<[1], [0], [0], [1], [0, 0, 1, 1], [], []>} : vector<16x8xbf16>, vector<8x32xbf16>, vector<16x32xf32> -> vector<16x32xf32>
    %297 = vector.extract_strided_slice %260 {offsets = [0, 8], sizes = [16, 8], strides = [1, 1]} : vector<16x32xf32> to vector<16x8xf32>
    %298 = vector.shape_cast %297 : vector<16x8xf32> to vector<2x8x8xf32>
    %299 = arith.truncf %298 : vector<2x8x8xf32> to vector<2x8x8xbf16>
    %300 = vector.extract_strided_slice %264 {offsets = [0, 8], sizes = [16, 8], strides = [1, 1]} : vector<16x32xf32> to vector<16x8xf32>
    %301 = vector.shape_cast %300 : vector<16x8xf32> to vector<2x8x8xf32>
    %302 = arith.truncf %301 : vector<2x8x8xf32> to vector<2x8x8xbf16>
    %303 = vector.extract_strided_slice %268 {offsets = [0, 8], sizes = [16, 8], strides = [1, 1]} : vector<16x32xf32> to vector<16x8xf32>
    %304 = vector.shape_cast %303 : vector<16x8xf32> to vector<2x8x8xf32>
    %305 = arith.truncf %304 : vector<2x8x8xf32> to vector<2x8x8xbf16>
    "tpu.trace_start"() <{level = 10 : i32, message = "bqd,bkd->bqk"}> : () -> ()
    %cst_129 = arith.constant dense<0.000000e+00> : vector<2x8x8xf32>
    %306 = tpu.matmul %299, %302, %cst_129 {dimension_numbers = #tpu.dot_dimension_numbers<[2], [2], [1], [1], [0, 0, 0, 1, 1, 1], [0], [0]>} : vector<2x8x8xbf16>, vector<2x8x8xbf16>, vector<2x8x8xf32> -> vector<2x8x8xf32>
    "tpu.trace_stop"() : () -> ()
    %cst_130 = arith.constant 0.353553385 : f32
    %307 = vector.broadcast %cst_130 : f32 to vector<2x8x8xf32>
    %308 = arith.mulf %306, %307 : vector<2x8x8xf32>
    %cst_131 = arith.constant dense<0xFF800000> : vector<2x8xf32>
    %309 = vector.multi_reduction <maximumf>, %308, %cst_131 [2] : vector<2x8x8xf32> to vector<2x8xf32>
    %310 = vector.shape_cast %309 : vector<2x8xf32> to vector<2x8x1xf32>
    %311 = vector.broadcast %310 : vector<2x8x1xf32> to vector<2x8x8xf32>
    %312 = arith.subf %308, %311 : vector<2x8x8xf32>
    %313 = math.exp %312 : vector<2x8x8xf32>
    %cst_132 = arith.constant dense<0.000000e+00> : vector<2x8xf32>
    %314 = vector.multi_reduction <add>, %313, %cst_132 [2] : vector<2x8x8xf32> to vector<2x8xf32>
    %315 = vector.shape_cast %314 : vector<2x8xf32> to vector<2x8x1xf32>
    %316 = tpu.reciprocal %315 {approx = true} : vector<2x8x1xf32> -> vector<2x8x1xf32>
    %317 = vector.broadcast %316 : vector<2x8x1xf32> to vector<2x8x8xf32>
    %318 = arith.mulf %313, %317 : vector<2x8x8xf32>
    %319 = arith.truncf %318 : vector<2x8x8xf32> to vector<2x8x8xbf16>
    "tpu.trace_start"() <{level = 10 : i32, message = "bqk,bkd->bqd"}> : () -> ()
    %cst_133 = arith.constant dense<0.000000e+00> : vector<2x8x8xf32>
    %320 = tpu.matmul %319, %305, %cst_133 {dimension_numbers = #tpu.dot_dimension_numbers<[2], [1], [1], [2], [0, 0, 0, 1, 1, 2], [0], [0]>} : vector<2x8x8xbf16>, vector<2x8x8xbf16>, vector<2x8x8xf32> -> vector<2x8x8xf32>
    "tpu.trace_stop"() : () -> ()
    %321 = vector.shape_cast %320 : vector<2x8x8xf32> to vector<16x8xf32>
    %322 = arith.truncf %321 : vector<16x8xf32> to vector<16x8xbf16>
    %323 = vector.extract_strided_slice %229 {offsets = [8, 0], sizes = [8, 32], strides = [1, 1]} : vector<32x32xbf16> to vector<8x32xbf16>
    %cst_134 = arith.constant dense<0.000000e+00> : vector<16x32xf32>
    %324 = tpu.matmul %322, %323, %cst_134 {dimension_numbers = #tpu.dot_dimension_numbers<[1], [0], [0], [1], [0, 0, 1, 1], [], []>} : vector<16x8xbf16>, vector<8x32xbf16>, vector<16x32xf32> -> vector<16x32xf32>
    %325 = arith.addf %296, %324 : vector<16x32xf32>
    %326 = vector.extract_strided_slice %260 {offsets = [0, 16], sizes = [16, 8], strides = [1, 1]} : vector<16x32xf32> to vector<16x8xf32>
    %327 = vector.shape_cast %326 : vector<16x8xf32> to vector<2x8x8xf32>
    %328 = arith.truncf %327 : vector<2x8x8xf32> to vector<2x8x8xbf16>
    %329 = vector.extract_strided_slice %264 {offsets = [0, 16], sizes = [16, 8], strides = [1, 1]} : vector<16x32xf32> to vector<16x8xf32>
    %330 = vector.shape_cast %329 : vector<16x8xf32> to vector<2x8x8xf32>
    %331 = arith.truncf %330 : vector<2x8x8xf32> to vector<2x8x8xbf16>
    %332 = vector.extract_strided_slice %268 {offsets = [0, 16], sizes = [16, 8], strides = [1, 1]} : vector<16x32xf32> to vector<16x8xf32>
    %333 = vector.shape_cast %332 : vector<16x8xf32> to vector<2x8x8xf32>
    %334 = arith.truncf %333 : vector<2x8x8xf32> to vector<2x8x8xbf16>
    "tpu.trace_start"() <{level = 10 : i32, message = "bqd,bkd->bqk"}> : () -> ()
    %cst_135 = arith.constant dense<0.000000e+00> : vector<2x8x8xf32>
    %335 = tpu.matmul %328, %331, %cst_135 {dimension_numbers = #tpu.dot_dimension_numbers<[2], [2], [1], [1], [0, 0, 0, 1, 1, 1], [0], [0]>} : vector<2x8x8xbf16>, vector<2x8x8xbf16>, vector<2x8x8xf32> -> vector<2x8x8xf32>
    "tpu.trace_stop"() : () -> ()
    %cst_136 = arith.constant 0.353553385 : f32
    %336 = vector.broadcast %cst_136 : f32 to vector<2x8x8xf32>
    %337 = arith.mulf %335, %336 : vector<2x8x8xf32>
    %cst_137 = arith.constant dense<0xFF800000> : vector<2x8xf32>
    %338 = vector.multi_reduction <maximumf>, %337, %cst_137 [2] : vector<2x8x8xf32> to vector<2x8xf32>
    %339 = vector.shape_cast %338 : vector<2x8xf32> to vector<2x8x1xf32>
    %340 = vector.broadcast %339 : vector<2x8x1xf32> to vector<2x8x8xf32>
    %341 = arith.subf %337, %340 : vector<2x8x8xf32>
    %342 = math.exp %341 : vector<2x8x8xf32>
    %cst_138 = arith.constant dense<0.000000e+00> : vector<2x8xf32>
    %343 = vector.multi_reduction <add>, %342, %cst_138 [2] : vector<2x8x8xf32> to vector<2x8xf32>
    %344 = vector.shape_cast %343 : vector<2x8xf32> to vector<2x8x1xf32>
    %345 = tpu.reciprocal %344 {approx = true} : vector<2x8x1xf32> -> vector<2x8x1xf32>
    %346 = vector.broadcast %345 : vector<2x8x1xf32> to vector<2x8x8xf32>
    %347 = arith.mulf %342, %346 : vector<2x8x8xf32>
    %348 = arith.truncf %347 : vector<2x8x8xf32> to vector<2x8x8xbf16>
    "tpu.trace_start"() <{level = 10 : i32, message = "bqk,bkd->bqd"}> : () -> ()
    %cst_139 = arith.constant dense<0.000000e+00> : vector<2x8x8xf32>
    %349 = tpu.matmul %348, %334, %cst_139 {dimension_numbers = #tpu.dot_dimension_numbers<[2], [1], [1], [2], [0, 0, 0, 1, 1, 2], [0], [0]>} : vector<2x8x8xbf16>, vector<2x8x8xbf16>, vector<2x8x8xf32> -> vector<2x8x8xf32>
    "tpu.trace_stop"() : () -> ()
    %350 = vector.shape_cast %349 : vector<2x8x8xf32> to vector<16x8xf32>
    %351 = arith.truncf %350 : vector<16x8xf32> to vector<16x8xbf16>
    %352 = vector.extract_strided_slice %229 {offsets = [16, 0], sizes = [8, 32], strides = [1, 1]} : vector<32x32xbf16> to vector<8x32xbf16>
    %cst_140 = arith.constant dense<0.000000e+00> : vector<16x32xf32>
    %353 = tpu.matmul %351, %352, %cst_140 {dimension_numbers = #tpu.dot_dimension_numbers<[1], [0], [0], [1], [0, 0, 1, 1], [], []>} : vector<16x8xbf16>, vector<8x32xbf16>, vector<16x32xf32> -> vector<16x32xf32>
    %354 = arith.addf %325, %353 : vector<16x32xf32>
    %355 = vector.extract_strided_slice %260 {offsets = [0, 24], sizes = [16, 8], strides = [1, 1]} : vector<16x32xf32> to vector<16x8xf32>
    %356 = vector.shape_cast %355 : vector<16x8xf32> to vector<2x8x8xf32>
    %357 = arith.truncf %356 : vector<2x8x8xf32> to vector<2x8x8xbf16>
    %358 = vector.extract_strided_slice %264 {offsets = [0, 24], sizes = [16, 8], strides = [1, 1]} : vector<16x32xf32> to vector<16x8xf32>
    %359 = vector.shape_cast %358 : vector<16x8xf32> to vector<2x8x8xf32>
    %360 = arith.truncf %359 : vector<2x8x8xf32> to vector<2x8x8xbf16>
    %361 = vector.extract_strided_slice %268 {offsets = [0, 24], sizes = [16, 8], strides = [1, 1]} : vector<16x32xf32> to vector<16x8xf32>
    %362 = vector.shape_cast %361 : vector<16x8xf32> to vector<2x8x8xf32>
    %363 = arith.truncf %362 : vector<2x8x8xf32> to vector<2x8x8xbf16>
    "tpu.trace_start"() <{level = 10 : i32, message = "bqd,bkd->bqk"}> : () -> ()
    %cst_141 = arith.constant dense<0.000000e+00> : vector<2x8x8xf32>
    %364 = tpu.matmul %357, %360, %cst_141 {dimension_numbers = #tpu.dot_dimension_numbers<[2], [2], [1], [1], [0, 0, 0, 1, 1, 1], [0], [0]>} : vector<2x8x8xbf16>, vector<2x8x8xbf16>, vector<2x8x8xf32> -> vector<2x8x8xf32>
    "tpu.trace_stop"() : () -> ()
    %cst_142 = arith.constant 0.353553385 : f32
    %365 = vector.broadcast %cst_142 : f32 to vector<2x8x8xf32>
    %366 = arith.mulf %364, %365 : vector<2x8x8xf32>
    %cst_143 = arith.constant dense<0xFF800000> : vector<2x8xf32>
    %367 = vector.multi_reduction <maximumf>, %366, %cst_143 [2] : vector<2x8x8xf32> to vector<2x8xf32>
    %368 = vector.shape_cast %367 : vector<2x8xf32> to vector<2x8x1xf32>
    %369 = vector.broadcast %368 : vector<2x8x1xf32> to vector<2x8x8xf32>
    %370 = arith.subf %366, %369 : vector<2x8x8xf32>
    %371 = math.exp %370 : vector<2x8x8xf32>
    %cst_144 = arith.constant dense<0.000000e+00> : vector<2x8xf32>
    %372 = vector.multi_reduction <add>, %371, %cst_144 [2] : vector<2x8x8xf32> to vector<2x8xf32>
    %373 = vector.shape_cast %372 : vector<2x8xf32> to vector<2x8x1xf32>
    %374 = tpu.reciprocal %373 {approx = true} : vector<2x8x1xf32> -> vector<2x8x1xf32>
    %375 = vector.broadcast %374 : vector<2x8x1xf32> to vector<2x8x8xf32>
    %376 = arith.mulf %371, %375 : vector<2x8x8xf32>
    %377 = arith.truncf %376 : vector<2x8x8xf32> to vector<2x8x8xbf16>
    "tpu.trace_start"() <{level = 10 : i32, message = "bqk,bkd->bqd"}> : () -> ()
    %cst_145 = arith.constant dense<0.000000e+00> : vector<2x8x8xf32>
    %378 = tpu.matmul %377, %363, %cst_145 {dimension_numbers = #tpu.dot_dimension_numbers<[2], [1], [1], [2], [0, 0, 0, 1, 1, 2], [0], [0]>} : vector<2x8x8xbf16>, vector<2x8x8xbf16>, vector<2x8x8xf32> -> vector<2x8x8xf32>
    "tpu.trace_stop"() : () -> ()
    %379 = vector.shape_cast %378 : vector<2x8x8xf32> to vector<16x8xf32>
    %380 = arith.truncf %379 : vector<16x8xf32> to vector<16x8xbf16>
    %381 = vector.extract_strided_slice %229 {offsets = [24, 0], sizes = [8, 32], strides = [1, 1]} : vector<32x32xbf16> to vector<8x32xbf16>
    %cst_146 = arith.constant dense<0.000000e+00> : vector<16x32xf32>
    %382 = tpu.matmul %380, %381, %cst_146 {dimension_numbers = #tpu.dot_dimension_numbers<[1], [0], [0], [1], [0, 0, 1, 1], [], []>} : vector<16x8xbf16>, vector<8x32xbf16>, vector<16x32xf32> -> vector<16x32xf32>
    %383 = arith.addf %354, %382 : vector<16x32xf32>
    %384 = vector.broadcast %230 : vector<1x32xf32> to vector<16x32xf32>
    %385 = arith.addf %383, %384 : vector<16x32xf32>
    %386 = arith.addf %220, %385 : vector<16x32xf32>
    %cst_147 = arith.constant dense<0.000000e+00> : vector<16xf32>
    %387 = vector.multi_reduction <add>, %386, %cst_147 [1] : vector<16x32xf32> to vector<16xf32>
    %388 = vector.shape_cast %387 : vector<16xf32> to vector<16x1xf32>
    %cst_148 = arith.constant 3.200000e+01 : f32
    %389 = vector.broadcast %cst_148 : f32 to vector<16x1xf32>
    %390 = arith.divf %388, %389 : vector<16x1xf32>
    %391 = vector.broadcast %390 : vector<16x1xf32> to vector<16x32xf32>
    %392 = arith.subf %386, %391 : vector<16x32xf32>
    %393 = arith.mulf %392, %392 : vector<16x32xf32>
    %cst_149 = arith.constant dense<0.000000e+00> : vector<16xf32>
    %394 = vector.multi_reduction <add>, %393, %cst_149 [1] : vector<16x32xf32> to vector<16xf32>
    %395 = vector.shape_cast %394 : vector<16xf32> to vector<16x1xf32>
    %cst_150 = arith.constant 3.200000e+01 : f32
    %396 = vector.broadcast %cst_150 : f32 to vector<16x1xf32>
    %397 = arith.divf %395, %396 : vector<16x1xf32>
    %cst_151 = arith.constant 9.99999974E-6 : f32
    %398 = vector.broadcast %cst_151 : f32 to vector<16x1xf32>
    %399 = arith.addf %397, %398 : vector<16x1xf32>
    %400 = math.rsqrt %399 : vector<16x1xf32>
    %401 = vector.broadcast %400 : vector<16x1xf32> to vector<16x32xf32>
    %402 = arith.mulf %392, %401 : vector<16x32xf32>
    %403 = vector.broadcast %231 : vector<1x32xf32> to vector<16x32xf32>
    %404 = arith.mulf %402, %403 : vector<16x32xf32>
    %405 = vector.broadcast %232 : vector<1x32xf32> to vector<16x32xf32>
    %406 = arith.addf %404, %405 : vector<16x32xf32>
    %407 = arith.truncf %406 : vector<16x32xf32> to vector<16x32xbf16>
    %cst_152 = arith.constant dense<0.000000e+00> : vector<16x64xf32>
    %408 = tpu.matmul %407, %233, %cst_152 {dimension_numbers = #tpu.dot_dimension_numbers<[1], [0], [0], [1], [0, 0, 1, 1], [], []>} : vector<16x32xbf16>, vector<32x64xbf16>, vector<16x64xf32> -> vector<16x64xf32>
    %409 = vector.broadcast %234 : vector<1x64xf32> to vector<16x64xf32>
    %410 = arith.addf %408, %409 : vector<16x64xf32>
    %cst_153 = arith.constant 0.000000e+00 : f32
    %411 = vector.broadcast %cst_153 : f32 to vector<16x64xf32>
    %412 = arith.maximumf %410, %411 : vector<16x64xf32>
    %413 = arith.truncf %412 : vector<16x64xf32> to vector<16x64xbf16>
    %cst_154 = arith.constant dense<0.000000e+00> : vector<16x32xf32>
    %414 = tpu.matmul %413, %235, %cst_154 {dimension_numbers = #tpu.dot_dimension_numbers<[1], [0], [0], [1], [0, 0, 1, 1], [], []>} : vector<16x64xbf16>, vector<64x32xbf16>, vector<16x32xf32> -> vector<16x32xf32>
    %415 = vector.broadcast %236 : vector<1x32xf32> to vector<16x32xf32>
    %416 = arith.addf %414, %415 : vector<16x32xf32>
    %417 = arith.addf %386, %416 : vector<16x32xf32>
    %418 = vector.shape_cast %417 : vector<16x32xf32> to vector<2x8x32xf32>
    %cst_155 = arith.constant dense<0.000000e+00> : vector<2x32xf32>
    %419 = vector.multi_reduction <add>, %418, %cst_155 [1] : vector<2x8x32xf32> to vector<2x32xf32>
    %cst_156 = arith.constant 8.000000e+00 : f32
    %420 = vector.broadcast %cst_156 : f32 to vector<2x32xf32>
    %421 = arith.divf %419, %420 : vector<2x32xf32>
    %c0_157 = arith.constant 0 : index
    %c0_158 = arith.constant 0 : index
    %422 = vector.load %arg37[%c0_157, %c0_158] : memref<2x32xf32, #tpu.memory_space<vmem>>, vector<2x32xf32>
    tpu.vector_store %arg37[%c0_157, %c0_158], %421 {strides = array<i32>} : memref<2x32xf32, #tpu.memory_space<vmem>>, vector<2x32xf32>,
    return
  }
  func.func @transform_0(%arg0: i32) -> (i32, i32) {
    %c0_i32 = arith.constant 0 : i32
    %c0_i32_0 = arith.constant 0 : i32
    %c0_i32_1 = arith.constant 0 : i32
    return %c0_i32, %c0_i32_0 : i32, i32
  }
  func.func @transform_1(%arg0: i32) -> (i32, i32) {
    %c0_i32 = arith.constant 0 : i32
    %c0_i32_0 = arith.constant 0 : i32
    %c0_i32_1 = arith.constant 0 : i32
    return %c0_i32, %c0_i32_0 : i32, i32
  }
  func.func @transform_2(%arg0: i32) -> (i32, i32) {
    %c0_i32 = arith.constant 0 : i32
    %c0_i32_0 = arith.constant 0 : i32
    %c0_i32_1 = arith.constant 0 : i32
    return %c0_i32, %c0_i32_0 : i32, i32
  }
  func.func @transform_3(%arg0: i32) -> (i32, i32) {
    %c0_i32 = arith.constant 0 : i32
    %c0_i32_0 = arith.constant 0 : i32
    %c0_i32_1 = arith.constant 0 : i32
    return %c0_i32, %c0_i32_0 : i32, i32
  }
  func.func @transform_4(%arg0: i32) -> (i32, i32) {
    %c0_i32 = arith.constant 0 : i32
    %c0_i32_0 = arith.constant 0 : i32
    %c0_i32_1 = arith.constant 0 : i32
    return %c0_i32, %c0_i32_0 : i32, i32
  }
  func.func @transform_5(%arg0: i32) -> (i32, i32) {
    %c0_i32 = arith.constant 0 : i32
    %c0_i32_0 = arith.constant 0 : i32
    %c0_i32_1 = arith.constant 0 : i32
    return %c0_i32, %c0_i32_0 : i32, i32
  }
  func.func @transform_6(%arg0: i32) -> (i32, i32) {
    %c0_i32 = arith.constant 0 : i32
    %c0_i32_0 = arith.constant 0 : i32
    %c0_i32_1 = arith.constant 0 : i32
    return %c0_i32, %c0_i32_0 : i32, i32
  }
  func.func @transform_7(%arg0: i32) -> (i32, i32) {
    %c0_i32 = arith.constant 0 : i32
    %c0_i32_0 = arith.constant 0 : i32
    %c0_i32_1 = arith.constant 0 : i32
    return %c0_i32, %c0_i32_0 : i32, i32
  }
  func.func @transform_8(%arg0: i32) -> (i32, i32) {
    %c0_i32 = arith.constant 0 : i32
    %c0_i32_0 = arith.constant 0 : i32
    %c0_i32_1 = arith.constant 0 : i32
    return %c0_i32, %c0_i32_0 : i32, i32
  }
  func.func @transform_9(%arg0: i32) -> (i32, i32) {
    %c0_i32 = arith.constant 0 : i32
    %c0_i32_0 = arith.constant 0 : i32
    %c0_i32_1 = arith.constant 0 : i32
    return %c0_i32, %c0_i32_0 : i32, i32
  }
  func.func @transform_10(%arg0: i32) -> (i32, i32) {
    %c0_i32 = arith.constant 0 : i32
    %c0_i32_0 = arith.constant 0 : i32
    %c0_i32_1 = arith.constant 0 : i32
    return %c0_i32, %c0_i32_0 : i32, i32
  }
  func.func @transform_11(%arg0: i32) -> (i32, i32) {
    %c0_i32 = arith.constant 0 : i32
    %c0_i32_0 = arith.constant 0 : i32
    %c0_i32_1 = arith.constant 0 : i32
    return %c0_i32, %c0_i32_0 : i32, i32
  }
  func.func @transform_12(%arg0: i32) -> (i32, i32) {
    %c0_i32 = arith.constant 0 : i32
    %c0_i32_0 = arith.constant 0 : i32
    %c0_i32_1 = arith.constant 0 : i32
    return %c0_i32, %c0_i32_0 : i32, i32
  }
  func.func @transform_13(%arg0: i32) -> (i32, i32) {
    %c0_i32 = arith.constant 0 : i32
    %c0_i32_0 = arith.constant 0 : i32
    %c0_i32_1 = arith.constant 0 : i32
    return %c0_i32, %c0_i32_0 : i32, i32
  }
  func.func @transform_14(%arg0: i32) -> (i32, i32) {
    %c0_i32 = arith.constant 0 : i32
    %c0_i32_0 = arith.constant 0 : i32
    %c0_i32_1 = arith.constant 0 : i32
    return %c0_i32, %c0_i32_0 : i32, i32
  }
  func.func @transform_15(%arg0: i32) -> (i32, i32) {
    %c0_i32 = arith.constant 0 : i32
    %c0_i32_0 = arith.constant 0 : i32
    %c0_i32_1 = arith.constant 0 : i32
    return %c0_i32, %c0_i32_0 : i32, i32
  }
  func.func @transform_16(%arg0: i32) -> (i32, i32) {
    %c0_i32 = arith.constant 0 : i32
    %c0_i32_0 = arith.constant 0 : i32
    %c0_i32_1 = arith.constant 0 : i32
    return %c0_i32, %c0_i32_0 : i32, i32
  }
  func.func @transform_17(%arg0: i32) -> (i32, i32) {
    %c0_i32 = arith.constant 0 : i32
    %c0_i32_0 = arith.constant 0 : i32
    %c0_i32_1 = arith.constant 0 : i32
    return %c0_i32, %c0_i32_0 : i32, i32
  }
  func.func @transform_18(%arg0: i32) -> (i32, i32) {
    %c0_i32 = arith.constant 0 : i32
    %c0_i32_0 = arith.constant 0 : i32
    %c0_i32_1 = arith.constant 0 : i32
    return %c0_i32, %c0_i32_0 : i32, i32
  }
  func.func @transform_19(%arg0: i32) -> (i32, i32) {
    %c0_i32 = arith.constant 0 : i32
    %c0_i32_0 = arith.constant 0 : i32
    %c0_i32_1 = arith.constant 0 : i32
    return %c0_i32, %c0_i32_0 : i32, i32
  }
  func.func @transform_20(%arg0: i32) -> (i32, i32) {
    %c0_i32 = arith.constant 0 : i32
    %c0_i32_0 = arith.constant 0 : i32
    %c0_i32_1 = arith.constant 0 : i32
    return %c0_i32, %c0_i32_0 : i32, i32
  }
  func.func @transform_21(%arg0: i32) -> (i32, i32) {
    %c0_i32 = arith.constant 0 : i32
    %c0_i32_0 = arith.constant 0 : i32
    %c0_i32_1 = arith.constant 0 : i32
    return %c0_i32, %c0_i32_0 : i32, i32
  }
  func.func @transform_22(%arg0: i32) -> (i32, i32) {
    %c0_i32 = arith.constant 0 : i32
    %c0_i32_0 = arith.constant 0 : i32
    %c0_i32_1 = arith.constant 0 : i32
    return %c0_i32, %c0_i32_0 : i32, i32
  }
  func.func @transform_23(%arg0: i32) -> (i32, i32) {
    %c0_i32 = arith.constant 0 : i32
    %c0_i32_0 = arith.constant 0 : i32
    %c0_i32_1 = arith.constant 0 : i32
    return %c0_i32, %c0_i32_0 : i32, i32
  }
  func.func @transform_24(%arg0: i32) -> (i32, i32) {
    %c0_i32 = arith.constant 0 : i32
    %c0_i32_0 = arith.constant 0 : i32
    %c0_i32_1 = arith.constant 0 : i32
    return %c0_i32, %c0_i32_0 : i32, i32
  }
  func.func @transform_25(%arg0: i32) -> (i32, i32) {
    %c0_i32 = arith.constant 0 : i32
    %c0_i32_0 = arith.constant 0 : i32
    %c0_i32_1 = arith.constant 0 : i32
    return %c0_i32, %c0_i32_0 : i32, i32
  }
  func.func @transform_26(%arg0: i32) -> (i32, i32) {
    %c0_i32 = arith.constant 0 : i32
    %c0_i32_0 = arith.constant 0 : i32
    %c0_i32_1 = arith.constant 0 : i32
    return %c0_i32, %c0_i32_0 : i32, i32
  }
  func.func @transform_27(%arg0: i32) -> (i32, i32) {
    %c0_i32 = arith.constant 0 : i32
    %c0_i32_0 = arith.constant 0 : i32
    %c0_i32_1 = arith.constant 0 : i32
    return %c0_i32, %c0_i32_0 : i32, i32
  }
  func.func @transform_28(%arg0: i32) -> (i32, i32) {
    %c0_i32 = arith.constant 0 : i32
    %c0_i32_0 = arith.constant 0 : i32
    %c0_i32_1 = arith.constant 0 : i32
    return %c0_i32, %c0_i32_0 : i32, i32
  }
  func.func @transform_29(%arg0: i32) -> (i32, i32) {
    %c0_i32 = arith.constant 0 : i32
    %c0_i32_0 = arith.constant 0 : i32
    %c0_i32_1 = arith.constant 0 : i32
    return %c0_i32, %c0_i32_0 : i32, i32
  }
  func.func @transform_30(%arg0: i32) -> (i32, i32) {
    %c0_i32 = arith.constant 0 : i32
    %c0_i32_0 = arith.constant 0 : i32
    %c0_i32_1 = arith.constant 0 : i32
    return %c0_i32, %c0_i32_0 : i32, i32
  }
  func.func @transform_31(%arg0: i32) -> (i32, i32) {
    %c0_i32 = arith.constant 0 : i32
    %c0_i32_0 = arith.constant 0 : i32
    %c0_i32_1 = arith.constant 0 : i32
    return %c0_i32, %c0_i32_0 : i32, i32
  }
  func.func @transform_32(%arg0: i32) -> (i32, i32) {
    %c0_i32 = arith.constant 0 : i32
    %c0_i32_0 = arith.constant 0 : i32
    %c0_i32_1 = arith.constant 0 : i32
    return %c0_i32, %c0_i32_0 : i32, i32
  }
  func.func @transform_33(%arg0: i32) -> (i32, i32) {
    %c0_i32 = arith.constant 0 : i32
    %c0_i32_0 = arith.constant 0 : i32
    %c0_i32_1 = arith.constant 0 : i32
    return %c0_i32, %c0_i32_0 : i32, i32
  }
  func.func @transform_34(%arg0: i32) -> (i32, i32) {
    %c0_i32 = arith.constant 0 : i32
    %c0_i32_0 = arith.constant 0 : i32
    %c0_i32_1 = arith.constant 0 : i32
    return %c0_i32, %c0_i32_0 : i32, i32
  }
  func.func @transform_35(%arg0: i32) -> (i32, i32) {
    %c0_i32 = arith.constant 0 : i32
    %c0_i32_0 = arith.constant 0 : i32
    %c0_i32_1 = arith.constant 0 : i32
    return %c0_i32, %c0_i32_0 : i32, i32
  }
  func.func @transform_36(%arg0: i32) -> (i32, i32) {
    %c0_i32 = arith.constant 0 : i32
    %c0_i32_0 = arith.constant 0 : i32
    %c0_i32_1 = arith.constant 0 : i32
    return %c0_i32, %c0_i32_0 : i32, i32
  }
}

module attributes {stable_mosaic.version = 11 : i64} {
  func.func @_perceiver_layer_kernel(%arg0: i32, %arg1: memref<16x32xf32, #tpu.memory_space<vmem>>, %arg2: memref<16x25xf32, #tpu.memory_space<vmem>>, %arg3: memref<1x32xf32, #tpu.memory_space<vmem>>, %arg4: memref<1x32xf32, #tpu.memory_space<vmem>>, %arg5: memref<1x25xf32, #tpu.memory_space<vmem>>, %arg6: memref<1x25xf32, #tpu.memory_space<vmem>>, %arg7: memref<32x32xbf16, #tpu.memory_space<vmem>>, %arg8: memref<1x32xf32, #tpu.memory_space<vmem>>, %arg9: memref<25x32xbf16, #tpu.memory_space<vmem>>, %arg10: memref<1x32xf32, #tpu.memory_space<vmem>>, %arg11: memref<25x32xbf16, #tpu.memory_space<vmem>>, %arg12: memref<1x32xf32, #tpu.memory_space<vmem>>, %arg13: memref<32x32xbf16, #tpu.memory_space<vmem>>, %arg14: memref<1x32xf32, #tpu.memory_space<vmem>>, %arg15: memref<1x32xf32, #tpu.memory_space<vmem>>, %arg16: memref<1x32xf32, #tpu.memory_space<vmem>>, %arg17: memref<32x64xbf16, #tpu.memory_space<vmem>>, %arg18: memref<1x64xf32, #tpu.memory_space<vmem>>, %arg19: memref<64x32xbf16, #tpu.memory_space<vmem>>, %arg20: memref<1x32xf32, #tpu.memory_space<vmem>>, %arg21: memref<1x32xf32, #tpu.memory_space<vmem>>, %arg22: memref<1x32xf32, #tpu.memory_space<vmem>>, %arg23: memref<32x32xbf16, #tpu.memory_space<vmem>>, %arg24: memref<1x32xf32, #tpu.memory_space<vmem>>, %arg25: memref<32x32xbf16, #tpu.memory_space<vmem>>, %arg26: memref<1x32xf32, #tpu.memory_space<vmem>>, %arg27: memref<32x32xbf16, #tpu.memory_space<vmem>>, %arg28: memref<1x32xf32, #tpu.memory_space<vmem>>, %arg29: memref<32x32xbf16, #tpu.memory_space<vmem>>, %arg30: memref<1x32xf32, #tpu.memory_space<vmem>>, %arg31: memref<1x32xf32, #tpu.memory_space<vmem>>, %arg32: memref<1x32xf32, #tpu.memory_space<vmem>>, %arg33: memref<32x64xbf16, #tpu.memory_space<vmem>>, %arg34: memref<1x64xf32, #tpu.memory_space<vmem>>, %arg35: memref<64x32xbf16, #tpu.memory_space<vmem>>, %arg36: memref<1x32xf32, #tpu.memory_space<vmem>>, %arg37: memref<16x32xf32, #tpu.memory_space<vmem>>) attributes {dimension_semantics = [#tpu.dimension_semantics<arbitrary>], iteration_bounds = array<i64: 1>, scalar_prefetch = 0 : i64, scratch_operands = 0 : i64, tpu.core_type = #tpu.core_type<tc>, window_params = [{pipeline_mode = #tpu.pipeline_mode<synchronous>, transform_indices = @transform_0, window_bounds = array<i64: 16, 32>}, {pipeline_mode = #tpu.pipeline_mode<synchronous>, transform_indices = @transform_1, window_bounds = array<i64: 16, 25>}, {pipeline_mode = #tpu.pipeline_mode<synchronous>, transform_indices = @transform_2, window_bounds = array<i64: 1, 32>}, {pipeline_mode = #tpu.pipeline_mode<synchronous>, transform_indices = @transform_3, window_bounds = array<i64: 1, 32>}, {pipeline_mode = #tpu.pipeline_mode<synchronous>, transform_indices = @transform_4, window_bounds = array<i64: 1, 25>}, {pipeline_mode = #tpu.pipeline_mode<synchronous>, transform_indices = @transform_5, window_bounds = array<i64: 1, 25>}, {pipeline_mode = #tpu.pipeline_mode<synchronous>, transform_indices = @transform_6, window_bounds = array<i64: 32, 32>}, {pipeline_mode = #tpu.pipeline_mode<synchronous>, transform_indices = @transform_7, window_bounds = array<i64: 1, 32>}, {pipeline_mode = #tpu.pipeline_mode<synchronous>, transform_indices = @transform_8, window_bounds = array<i64: 25, 32>}, {pipeline_mode = #tpu.pipeline_mode<synchronous>, transform_indices = @transform_9, window_bounds = array<i64: 1, 32>}, {pipeline_mode = #tpu.pipeline_mode<synchronous>, transform_indices = @transform_10, window_bounds = array<i64: 25, 32>}, {pipeline_mode = #tpu.pipeline_mode<synchronous>, transform_indices = @transform_11, window_bounds = array<i64: 1, 32>}, {pipeline_mode = #tpu.pipeline_mode<synchronous>, transform_indices = @transform_12, window_bounds = array<i64: 32, 32>}, {pipeline_mode = #tpu.pipeline_mode<synchronous>, transform_indices = @transform_13, window_bounds = array<i64: 1, 32>}, {pipeline_mode = #tpu.pipeline_mode<synchronous>, transform_indices = @transform_14, window_bounds = array<i64: 1, 32>}, {pipeline_mode = #tpu.pipeline_mode<synchronous>, transform_indices = @transform_15, window_bounds = array<i64: 1, 32>}, {pipeline_mode = #tpu.pipeline_mode<synchronous>, transform_indices = @transform_16, window_bounds = array<i64: 32, 64>}, {pipeline_mode = #tpu.pipeline_mode<synchronous>, transform_indices = @transform_17, window_bounds = array<i64: 1, 64>}, {pipeline_mode = #tpu.pipeline_mode<synchronous>, transform_indices = @transform_18, window_bounds = array<i64: 64, 32>}, {pipeline_mode = #tpu.pipeline_mode<synchronous>, transform_indices = @transform_19, window_bounds = array<i64: 1, 32>}, {pipeline_mode = #tpu.pipeline_mode<synchronous>, transform_indices = @transform_20, window_bounds = array<i64: 1, 32>}, {pipeline_mode = #tpu.pipeline_mode<synchronous>, transform_indices = @transform_21, window_bounds = array<i64: 1, 32>}, {pipeline_mode = #tpu.pipeline_mode<synchronous>, transform_indices = @transform_22, window_bounds = array<i64: 32, 32>}, {pipeline_mode = #tpu.pipeline_mode<synchronous>, transform_indices = @transform_23, window_bounds = array<i64: 1, 32>}, {pipeline_mode = #tpu.pipeline_mode<synchronous>, transform_indices = @transform_24, window_bounds = array<i64: 32, 32>}, {pipeline_mode = #tpu.pipeline_mode<synchronous>, transform_indices = @transform_25, window_bounds = array<i64: 1, 32>}, {pipeline_mode = #tpu.pipeline_mode<synchronous>, transform_indices = @transform_26, window_bounds = array<i64: 32, 32>}, {pipeline_mode = #tpu.pipeline_mode<synchronous>, transform_indices = @transform_27, window_bounds = array<i64: 1, 32>}, {pipeline_mode = #tpu.pipeline_mode<synchronous>, transform_indices = @transform_28, window_bounds = array<i64: 32, 32>}, {pipeline_mode = #tpu.pipeline_mode<synchronous>, transform_indices = @transform_29, window_bounds = array<i64: 1, 32>}, {pipeline_mode = #tpu.pipeline_mode<synchronous>, transform_indices = @transform_30, window_bounds = array<i64: 1, 32>}, {pipeline_mode = #tpu.pipeline_mode<synchronous>, transform_indices = @transform_31, window_bounds = array<i64: 1, 32>}, {pipeline_mode = #tpu.pipeline_mode<synchronous>, transform_indices = @transform_32, window_bounds = array<i64: 32, 64>}, {pipeline_mode = #tpu.pipeline_mode<synchronous>, transform_indices = @transform_33, window_bounds = array<i64: 1, 64>}, {pipeline_mode = #tpu.pipeline_mode<synchronous>, transform_indices = @transform_34, window_bounds = array<i64: 64, 32>}, {pipeline_mode = #tpu.pipeline_mode<synchronous>, transform_indices = @transform_35, window_bounds = array<i64: 1, 32>}, {pipeline_mode = #tpu.pipeline_mode<synchronous>, transform_indices = @transform_36, window_bounds = array<i64: 16, 32>}]} {
    %c0 = arith.constant 0 : index
    %c0_0 = arith.constant 0 : index
    %0 = vector.load %arg1[%c0, %c0_0] : memref<16x32xf32, #tpu.memory_space<vmem>>, vector<16x32xf32>
    %c0_1 = arith.constant 0 : index
    %c0_2 = arith.constant 0 : index
    %1 = vector.load %arg2[%c0_1, %c0_2] : memref<16x25xf32, #tpu.memory_space<vmem>>, vector<16x25xf32>
    %c0_3 = arith.constant 0 : index
    %c0_4 = arith.constant 0 : index
    %2 = vector.load %arg3[%c0_3, %c0_4] : memref<1x32xf32, #tpu.memory_space<vmem>>, vector<1x32xf32>
    %c0_5 = arith.constant 0 : index
    %c0_6 = arith.constant 0 : index
    %3 = vector.load %arg4[%c0_5, %c0_6] : memref<1x32xf32, #tpu.memory_space<vmem>>, vector<1x32xf32>
    %c0_7 = arith.constant 0 : index
    %c0_8 = arith.constant 0 : index
    %4 = vector.load %arg5[%c0_7, %c0_8] : memref<1x25xf32, #tpu.memory_space<vmem>>, vector<1x25xf32>
    %c0_9 = arith.constant 0 : index
    %c0_10 = arith.constant 0 : index
    %5 = vector.load %arg6[%c0_9, %c0_10] : memref<1x25xf32, #tpu.memory_space<vmem>>, vector<1x25xf32>
    %c0_11 = arith.constant 0 : index
    %c0_12 = arith.constant 0 : index
    %6 = vector.load %arg7[%c0_11, %c0_12] : memref<32x32xbf16, #tpu.memory_space<vmem>>, vector<32x32xbf16>
    %c0_13 = arith.constant 0 : index
    %c0_14 = arith.constant 0 : index
    %7 = vector.load %arg8[%c0_13, %c0_14] : memref<1x32xf32, #tpu.memory_space<vmem>>, vector<1x32xf32>
    %c0_15 = arith.constant 0 : index
    %c0_16 = arith.constant 0 : index
    %8 = vector.load %arg9[%c0_15, %c0_16] : memref<25x32xbf16, #tpu.memory_space<vmem>>, vector<25x32xbf16>
    %c0_17 = arith.constant 0 : index
    %c0_18 = arith.constant 0 : index
    %9 = vector.load %arg10[%c0_17, %c0_18] : memref<1x32xf32, #tpu.memory_space<vmem>>, vector<1x32xf32>
    %c0_19 = arith.constant 0 : index
    %c0_20 = arith.constant 0 : index
    %10 = vector.load %arg11[%c0_19, %c0_20] : memref<25x32xbf16, #tpu.memory_space<vmem>>, vector<25x32xbf16>
    %c0_21 = arith.constant 0 : index
    %c0_22 = arith.constant 0 : index
    %11 = vector.load %arg12[%c0_21, %c0_22] : memref<1x32xf32, #tpu.memory_space<vmem>>, vector<1x32xf32>
    %c0_23 = arith.constant 0 : index
    %c0_24 = arith.constant 0 : index
    %12 = vector.load %arg13[%c0_23, %c0_24] : memref<32x32xbf16, #tpu.memory_space<vmem>>, vector<32x32xbf16>
    %c0_25 = arith.constant 0 : index
    %c0_26 = arith.constant 0 : index
    %13 = vector.load %arg14[%c0_25, %c0_26] : memref<1x32xf32, #tpu.memory_space<vmem>>, vector<1x32xf32>
    %c0_27 = arith.constant 0 : index
    %c0_28 = arith.constant 0 : index
    %14 = vector.load %arg15[%c0_27, %c0_28] : memref<1x32xf32, #tpu.memory_space<vmem>>, vector<1x32xf32>
    %c0_29 = arith.constant 0 : index
    %c0_30 = arith.constant 0 : index
    %15 = vector.load %arg16[%c0_29, %c0_30] : memref<1x32xf32, #tpu.memory_space<vmem>>, vector<1x32xf32>
    %c0_31 = arith.constant 0 : index
    %c0_32 = arith.constant 0 : index
    %16 = vector.load %arg17[%c0_31, %c0_32] : memref<32x64xbf16, #tpu.memory_space<vmem>>, vector<32x64xbf16>
    %c0_33 = arith.constant 0 : index
    %c0_34 = arith.constant 0 : index
    %17 = vector.load %arg18[%c0_33, %c0_34] : memref<1x64xf32, #tpu.memory_space<vmem>>, vector<1x64xf32>
    %c0_35 = arith.constant 0 : index
    %c0_36 = arith.constant 0 : index
    %18 = vector.load %arg19[%c0_35, %c0_36] : memref<64x32xbf16, #tpu.memory_space<vmem>>, vector<64x32xbf16>
    %c0_37 = arith.constant 0 : index
    %c0_38 = arith.constant 0 : index
    %19 = vector.load %arg20[%c0_37, %c0_38] : memref<1x32xf32, #tpu.memory_space<vmem>>, vector<1x32xf32>
    %cst = arith.constant dense<0.000000e+00> : vector<16xf32>
    %20 = vector.multi_reduction <add>, %0, %cst [1] : vector<16x32xf32> to vector<16xf32>
    %21 = vector.shape_cast %20 : vector<16xf32> to vector<16x1xf32>
    %cst_39 = arith.constant 3.200000e+01 : f32
    %22 = vector.broadcast %cst_39 : f32 to vector<16x1xf32>
    %23 = arith.divf %21, %22 : vector<16x1xf32>
    %24 = vector.broadcast %23 : vector<16x1xf32> to vector<16x32xf32>
    %25 = arith.subf %0, %24 : vector<16x32xf32>
    %26 = arith.mulf %25, %25 : vector<16x32xf32>
    %cst_40 = arith.constant dense<0.000000e+00> : vector<16xf32>
    %27 = vector.multi_reduction <add>, %26, %cst_40 [1] : vector<16x32xf32> to vector<16xf32>
    %28 = vector.shape_cast %27 : vector<16xf32> to vector<16x1xf32>
    %cst_41 = arith.constant 3.200000e+01 : f32
    %29 = vector.broadcast %cst_41 : f32 to vector<16x1xf32>
    %30 = arith.divf %28, %29 : vector<16x1xf32>
    %cst_42 = arith.constant 9.99999974E-6 : f32
    %31 = vector.broadcast %cst_42 : f32 to vector<16x1xf32>
    %32 = arith.addf %30, %31 : vector<16x1xf32>
    %33 = math.rsqrt %32 : vector<16x1xf32>
    %34 = vector.broadcast %33 : vector<16x1xf32> to vector<16x32xf32>
    %35 = arith.mulf %25, %34 : vector<16x32xf32>
    %36 = vector.broadcast %2 : vector<1x32xf32> to vector<16x32xf32>
    %37 = arith.mulf %35, %36 : vector<16x32xf32>
    %38 = vector.broadcast %3 : vector<1x32xf32> to vector<16x32xf32>
    %39 = arith.addf %37, %38 : vector<16x32xf32>
    %cst_43 = arith.constant dense<0.000000e+00> : vector<16xf32>
    %40 = vector.multi_reduction <add>, %1, %cst_43 [1] : vector<16x25xf32> to vector<16xf32>
    %41 = vector.shape_cast %40 : vector<16xf32> to vector<16x1xf32>
    %cst_44 = arith.constant 2.500000e+01 : f32
    %42 = vector.broadcast %cst_44 : f32 to vector<16x1xf32>
    %43 = arith.divf %41, %42 : vector<16x1xf32>
    %44 = vector.broadcast %43 : vector<16x1xf32> to vector<16x25xf32>
    %45 = arith.subf %1, %44 : vector<16x25xf32>
    %46 = arith.mulf %45, %45 : vector<16x25xf32>
    %cst_45 = arith.constant dense<0.000000e+00> : vector<16xf32>
    %47 = vector.multi_reduction <add>, %46, %cst_45 [1] : vector<16x25xf32> to vector<16xf32>
    %48 = vector.shape_cast %47 : vector<16xf32> to vector<16x1xf32>
    %cst_46 = arith.constant 2.500000e+01 : f32
    %49 = vector.broadcast %cst_46 : f32 to vector<16x1xf32>
    %50 = arith.divf %48, %49 : vector<16x1xf32>
    %cst_47 = arith.constant 9.99999974E-6 : f32
    %51 = vector.broadcast %cst_47 : f32 to vector<16x1xf32>
    %52 = arith.addf %50, %51 : vector<16x1xf32>
    %53 = math.rsqrt %52 : vector<16x1xf32>
    %54 = vector.broadcast %53 : vector<16x1xf32> to vector<16x25xf32>
    %55 = arith.mulf %45, %54 : vector<16x25xf32>
    %56 = vector.broadcast %4 : vector<1x25xf32> to vector<16x25xf32>
    %57 = arith.mulf %55, %56 : vector<16x25xf32>
    %58 = vector.broadcast %5 : vector<1x25xf32> to vector<16x25xf32>
    %59 = arith.addf %57, %58 : vector<16x25xf32>
    %60 = arith.truncf %39 : vector<16x32xf32> to vector<16x32xbf16>
    %cst_48 = arith.constant dense<0.000000e+00> : vector<16x32xf32>
    %61 = tpu.matmul %60, %6, %cst_48 {dimension_numbers = #tpu.dot_dimension_numbers<[1], [0], [0], [1], [0, 0, 1, 1], [], []>} : vector<16x32xbf16>, vector<32x32xbf16>, vector<16x32xf32> -> vector<16x32xf32>
    %62 = vector.broadcast %7 : vector<1x32xf32> to vector<16x32xf32>
    %63 = arith.addf %61, %62 : vector<16x32xf32>
    %64 = arith.truncf %59 : vector<16x25xf32> to vector<16x25xbf16>
    %cst_49 = arith.constant dense<0.000000e+00> : vector<16x32xf32>
    %65 = tpu.matmul %64, %8, %cst_49 {dimension_numbers = #tpu.dot_dimension_numbers<[1], [0], [0], [1], [0, 0, 1, 1], [], []>} : vector<16x25xbf16>, vector<25x32xbf16>, vector<16x32xf32> -> vector<16x32xf32>
    %66 = vector.broadcast %9 : vector<1x32xf32> to vector<16x32xf32>
    %67 = arith.addf %65, %66 : vector<16x32xf32>
    %68 = arith.truncf %59 : vector<16x25xf32> to vector<16x25xbf16>
    %cst_50 = arith.constant dense<0.000000e+00> : vector<16x32xf32>
    %69 = tpu.matmul %68, %10, %cst_50 {dimension_numbers = #tpu.dot_dimension_numbers<[1], [0], [0], [1], [0, 0, 1, 1], [], []>} : vector<16x25xbf16>, vector<25x32xbf16>, vector<16x32xf32> -> vector<16x32xf32>
    %70 = vector.broadcast %11 : vector<1x32xf32> to vector<16x32xf32>
    %71 = arith.addf %69, %70 : vector<16x32xf32>
    %72 = vector.extract_strided_slice %63 {offsets = [0, 0], sizes = [16, 8], strides = [1, 1]} : vector<16x32xf32> to vector<16x8xf32>
    %73 = vector.shape_cast %72 : vector<16x8xf32> to vector<2x8x8xf32>
    %74 = arith.truncf %73 : vector<2x8x8xf32> to vector<2x8x8xbf16>
    %75 = vector.extract_strided_slice %67 {offsets = [0, 0], sizes = [16, 8], strides = [1, 1]} : vector<16x32xf32> to vector<16x8xf32>
    %76 = vector.shape_cast %75 : vector<16x8xf32> to vector<2x8x8xf32>
    %77 = arith.truncf %76 : vector<2x8x8xf32> to vector<2x8x8xbf16>
    %78 = vector.extract_strided_slice %71 {offsets = [0, 0], sizes = [16, 8], strides = [1, 1]} : vector<16x32xf32> to vector<16x8xf32>
    %79 = vector.shape_cast %78 : vector<16x8xf32> to vector<2x8x8xf32>
    %80 = arith.truncf %79 : vector<2x8x8xf32> to vector<2x8x8xbf16>
    "tpu.trace_start"() <{level = 10 : i32, message = "bqd,bkd->bqk"}> : () -> ()
    %cst_51 = arith.constant dense<0.000000e+00> : vector<2x8x8xf32>
    %81 = tpu.matmul %74, %77, %cst_51 {dimension_numbers = #tpu.dot_dimension_numbers<[2], [2], [1], [1], [0, 0, 0, 1, 1, 1], [0], [0]>} : vector<2x8x8xbf16>, vector<2x8x8xbf16>, vector<2x8x8xf32> -> vector<2x8x8xf32>
    "tpu.trace_stop"() : () -> ()
    %cst_52 = arith.constant 0.353553385 : f32
    %82 = vector.broadcast %cst_52 : f32 to vector<2x8x8xf32>
    %83 = arith.mulf %81, %82 : vector<2x8x8xf32>
    %cst_53 = arith.constant dense<0xFF800000> : vector<2x8xf32>
    %84 = vector.multi_reduction <maximumf>, %83, %cst_53 [2] : vector<2x8x8xf32> to vector<2x8xf32>
    %85 = vector.shape_cast %84 : vector<2x8xf32> to vector<2x8x1xf32>
    %86 = vector.broadcast %85 : vector<2x8x1xf32> to vector<2x8x8xf32>
    %87 = arith.subf %83, %86 : vector<2x8x8xf32>
    %88 = math.exp %87 : vector<2x8x8xf32>
    %cst_54 = arith.constant dense<0.000000e+00> : vector<2x8xf32>
    %89 = vector.multi_reduction <add>, %88, %cst_54 [2] : vector<2x8x8xf32> to vector<2x8xf32>
    %90 = vector.shape_cast %89 : vector<2x8xf32> to vector<2x8x1xf32>
    %91 = tpu.reciprocal %90 {approx = true} : vector<2x8x1xf32> -> vector<2x8x1xf32>
    %92 = vector.broadcast %91 : vector<2x8x1xf32> to vector<2x8x8xf32>
    %93 = arith.mulf %88, %92 : vector<2x8x8xf32>
    %94 = arith.truncf %93 : vector<2x8x8xf32> to vector<2x8x8xbf16>
    "tpu.trace_start"() <{level = 10 : i32, message = "bqk,bkd->bqd"}> : () -> ()
    %cst_55 = arith.constant dense<0.000000e+00> : vector<2x8x8xf32>
    %95 = tpu.matmul %94, %80, %cst_55 {dimension_numbers = #tpu.dot_dimension_numbers<[2], [1], [1], [2], [0, 0, 0, 1, 1, 2], [0], [0]>} : vector<2x8x8xbf16>, vector<2x8x8xbf16>, vector<2x8x8xf32> -> vector<2x8x8xf32>
    "tpu.trace_stop"() : () -> ()
    %96 = vector.shape_cast %95 : vector<2x8x8xf32> to vector<16x8xf32>
    %97 = arith.truncf %96 : vector<16x8xf32> to vector<16x8xbf16>
    %98 = vector.extract_strided_slice %12 {offsets = [0, 0], sizes = [8, 32], strides = [1, 1]} : vector<32x32xbf16> to vector<8x32xbf16>
    %cst_56 = arith.constant dense<0.000000e+00> : vector<16x32xf32>
    %99 = tpu.matmul %97, %98, %cst_56 {dimension_numbers = #tpu.dot_dimension_numbers<[1], [0], [0], [1], [0, 0, 1, 1], [], []>} : vector<16x8xbf16>, vector<8x32xbf16>, vector<16x32xf32> -> vector<16x32xf32>
    %100 = vector.extract_strided_slice %63 {offsets = [0, 8], sizes = [16, 8], strides = [1, 1]} : vector<16x32xf32> to vector<16x8xf32>
    %101 = vector.shape_cast %100 : vector<16x8xf32> to vector<2x8x8xf32>
    %102 = arith.truncf %101 : vector<2x8x8xf32> to vector<2x8x8xbf16>
    %103 = vector.extract_strided_slice %67 {offsets = [0, 8], sizes = [16, 8], strides = [1, 1]} : vector<16x32xf32> to vector<16x8xf32>
    %104 = vector.shape_cast %103 : vector<16x8xf32> to vector<2x8x8xf32>
    %105 = arith.truncf %104 : vector<2x8x8xf32> to vector<2x8x8xbf16>
    %106 = vector.extract_strided_slice %71 {offsets = [0, 8], sizes = [16, 8], strides = [1, 1]} : vector<16x32xf32> to vector<16x8xf32>
    %107 = vector.shape_cast %106 : vector<16x8xf32> to vector<2x8x8xf32>
    %108 = arith.truncf %107 : vector<2x8x8xf32> to vector<2x8x8xbf16>
    "tpu.trace_start"() <{level = 10 : i32, message = "bqd,bkd->bqk"}> : () -> ()
    %cst_57 = arith.constant dense<0.000000e+00> : vector<2x8x8xf32>
    %109 = tpu.matmul %102, %105, %cst_57 {dimension_numbers = #tpu.dot_dimension_numbers<[2], [2], [1], [1], [0, 0, 0, 1, 1, 1], [0], [0]>} : vector<2x8x8xbf16>, vector<2x8x8xbf16>, vector<2x8x8xf32> -> vector<2x8x8xf32>
    "tpu.trace_stop"() : () -> ()
    %cst_58 = arith.constant 0.353553385 : f32
    %110 = vector.broadcast %cst_58 : f32 to vector<2x8x8xf32>
    %111 = arith.mulf %109, %110 : vector<2x8x8xf32>
    %cst_59 = arith.constant dense<0xFF800000> : vector<2x8xf32>
    %112 = vector.multi_reduction <maximumf>, %111, %cst_59 [2] : vector<2x8x8xf32> to vector<2x8xf32>
    %113 = vector.shape_cast %112 : vector<2x8xf32> to vector<2x8x1xf32>
    %114 = vector.broadcast %113 : vector<2x8x1xf32> to vector<2x8x8xf32>
    %115 = arith.subf %111, %114 : vector<2x8x8xf32>
    %116 = math.exp %115 : vector<2x8x8xf32>
    %cst_60 = arith.constant dense<0.000000e+00> : vector<2x8xf32>
    %117 = vector.multi_reduction <add>, %116, %cst_60 [2] : vector<2x8x8xf32> to vector<2x8xf32>
    %118 = vector.shape_cast %117 : vector<2x8xf32> to vector<2x8x1xf32>
    %119 = tpu.reciprocal %118 {approx = true} : vector<2x8x1xf32> -> vector<2x8x1xf32>
    %120 = vector.broadcast %119 : vector<2x8x1xf32> to vector<2x8x8xf32>
    %121 = arith.mulf %116, %120 : vector<2x8x8xf32>
    %122 = arith.truncf %121 : vector<2x8x8xf32> to vector<2x8x8xbf16>
    "tpu.trace_start"() <{level = 10 : i32, message = "bqk,bkd->bqd"}> : () -> ()
    %cst_61 = arith.constant dense<0.000000e+00> : vector<2x8x8xf32>
    %123 = tpu.matmul %122, %108, %cst_61 {dimension_numbers = #tpu.dot_dimension_numbers<[2], [1], [1], [2], [0, 0, 0, 1, 1, 2], [0], [0]>} : vector<2x8x8xbf16>, vector<2x8x8xbf16>, vector<2x8x8xf32> -> vector<2x8x8xf32>
    "tpu.trace_stop"() : () -> ()
    %124 = vector.shape_cast %123 : vector<2x8x8xf32> to vector<16x8xf32>
    %125 = arith.truncf %124 : vector<16x8xf32> to vector<16x8xbf16>
    %126 = vector.extract_strided_slice %12 {offsets = [8, 0], sizes = [8, 32], strides = [1, 1]} : vector<32x32xbf16> to vector<8x32xbf16>
    %cst_62 = arith.constant dense<0.000000e+00> : vector<16x32xf32>
    %127 = tpu.matmul %125, %126, %cst_62 {dimension_numbers = #tpu.dot_dimension_numbers<[1], [0], [0], [1], [0, 0, 1, 1], [], []>} : vector<16x8xbf16>, vector<8x32xbf16>, vector<16x32xf32> -> vector<16x32xf32>
    %128 = arith.addf %99, %127 : vector<16x32xf32>
    %129 = vector.extract_strided_slice %63 {offsets = [0, 16], sizes = [16, 8], strides = [1, 1]} : vector<16x32xf32> to vector<16x8xf32>
    %130 = vector.shape_cast %129 : vector<16x8xf32> to vector<2x8x8xf32>
    %131 = arith.truncf %130 : vector<2x8x8xf32> to vector<2x8x8xbf16>
    %132 = vector.extract_strided_slice %67 {offsets = [0, 16], sizes = [16, 8], strides = [1, 1]} : vector<16x32xf32> to vector<16x8xf32>
    %133 = vector.shape_cast %132 : vector<16x8xf32> to vector<2x8x8xf32>
    %134 = arith.truncf %133 : vector<2x8x8xf32> to vector<2x8x8xbf16>
    %135 = vector.extract_strided_slice %71 {offsets = [0, 16], sizes = [16, 8], strides = [1, 1]} : vector<16x32xf32> to vector<16x8xf32>
    %136 = vector.shape_cast %135 : vector<16x8xf32> to vector<2x8x8xf32>
    %137 = arith.truncf %136 : vector<2x8x8xf32> to vector<2x8x8xbf16>
    "tpu.trace_start"() <{level = 10 : i32, message = "bqd,bkd->bqk"}> : () -> ()
    %cst_63 = arith.constant dense<0.000000e+00> : vector<2x8x8xf32>
    %138 = tpu.matmul %131, %134, %cst_63 {dimension_numbers = #tpu.dot_dimension_numbers<[2], [2], [1], [1], [0, 0, 0, 1, 1, 1], [0], [0]>} : vector<2x8x8xbf16>, vector<2x8x8xbf16>, vector<2x8x8xf32> -> vector<2x8x8xf32>
    "tpu.trace_stop"() : () -> ()
    %cst_64 = arith.constant 0.353553385 : f32
    %139 = vector.broadcast %cst_64 : f32 to vector<2x8x8xf32>
    %140 = arith.mulf %138, %139 : vector<2x8x8xf32>
    %cst_65 = arith.constant dense<0xFF800000> : vector<2x8xf32>
    %141 = vector.multi_reduction <maximumf>, %140, %cst_65 [2] : vector<2x8x8xf32> to vector<2x8xf32>
    %142 = vector.shape_cast %141 : vector<2x8xf32> to vector<2x8x1xf32>
    %143 = vector.broadcast %142 : vector<2x8x1xf32> to vector<2x8x8xf32>
    %144 = arith.subf %140, %143 : vector<2x8x8xf32>
    %145 = math.exp %144 : vector<2x8x8xf32>
    %cst_66 = arith.constant dense<0.000000e+00> : vector<2x8xf32>
    %146 = vector.multi_reduction <add>, %145, %cst_66 [2] : vector<2x8x8xf32> to vector<2x8xf32>
    %147 = vector.shape_cast %146 : vector<2x8xf32> to vector<2x8x1xf32>
    %148 = tpu.reciprocal %147 {approx = true} : vector<2x8x1xf32> -> vector<2x8x1xf32>
    %149 = vector.broadcast %148 : vector<2x8x1xf32> to vector<2x8x8xf32>
    %150 = arith.mulf %145, %149 : vector<2x8x8xf32>
    %151 = arith.truncf %150 : vector<2x8x8xf32> to vector<2x8x8xbf16>
    "tpu.trace_start"() <{level = 10 : i32, message = "bqk,bkd->bqd"}> : () -> ()
    %cst_67 = arith.constant dense<0.000000e+00> : vector<2x8x8xf32>
    %152 = tpu.matmul %151, %137, %cst_67 {dimension_numbers = #tpu.dot_dimension_numbers<[2], [1], [1], [2], [0, 0, 0, 1, 1, 2], [0], [0]>} : vector<2x8x8xbf16>, vector<2x8x8xbf16>, vector<2x8x8xf32> -> vector<2x8x8xf32>
    "tpu.trace_stop"() : () -> ()
    %153 = vector.shape_cast %152 : vector<2x8x8xf32> to vector<16x8xf32>
    %154 = arith.truncf %153 : vector<16x8xf32> to vector<16x8xbf16>
    %155 = vector.extract_strided_slice %12 {offsets = [16, 0], sizes = [8, 32], strides = [1, 1]} : vector<32x32xbf16> to vector<8x32xbf16>
    %cst_68 = arith.constant dense<0.000000e+00> : vector<16x32xf32>
    %156 = tpu.matmul %154, %155, %cst_68 {dimension_numbers = #tpu.dot_dimension_numbers<[1], [0], [0], [1], [0, 0, 1, 1], [], []>} : vector<16x8xbf16>, vector<8x32xbf16>, vector<16x32xf32> -> vector<16x32xf32>
    %157 = arith.addf %128, %156 : vector<16x32xf32>
    %158 = vector.extract_strided_slice %63 {offsets = [0, 24], sizes = [16, 8], strides = [1, 1]} : vector<16x32xf32> to vector<16x8xf32>
    %159 = vector.shape_cast %158 : vector<16x8xf32> to vector<2x8x8xf32>
    %160 = arith.truncf %159 : vector<2x8x8xf32> to vector<2x8x8xbf16>
    %161 = vector.extract_strided_slice %67 {offsets = [0, 24], sizes = [16, 8], strides = [1, 1]} : vector<16x32xf32> to vector<16x8xf32>
    %162 = vector.shape_cast %161 : vector<16x8xf32> to vector<2x8x8xf32>
    %163 = arith.truncf %162 : vector<2x8x8xf32> to vector<2x8x8xbf16>
    %164 = vector.extract_strided_slice %71 {offsets = [0, 24], sizes = [16, 8], strides = [1, 1]} : vector<16x32xf32> to vector<16x8xf32>
    %165 = vector.shape_cast %164 : vector<16x8xf32> to vector<2x8x8xf32>
    %166 = arith.truncf %165 : vector<2x8x8xf32> to vector<2x8x8xbf16>
    "tpu.trace_start"() <{level = 10 : i32, message = "bqd,bkd->bqk"}> : () -> ()
    %cst_69 = arith.constant dense<0.000000e+00> : vector<2x8x8xf32>
    %167 = tpu.matmul %160, %163, %cst_69 {dimension_numbers = #tpu.dot_dimension_numbers<[2], [2], [1], [1], [0, 0, 0, 1, 1, 1], [0], [0]>} : vector<2x8x8xbf16>, vector<2x8x8xbf16>, vector<2x8x8xf32> -> vector<2x8x8xf32>
    "tpu.trace_stop"() : () -> ()
    %cst_70 = arith.constant 0.353553385 : f32
    %168 = vector.broadcast %cst_70 : f32 to vector<2x8x8xf32>
    %169 = arith.mulf %167, %168 : vector<2x8x8xf32>
    %cst_71 = arith.constant dense<0xFF800000> : vector<2x8xf32>
    %170 = vector.multi_reduction <maximumf>, %169, %cst_71 [2] : vector<2x8x8xf32> to vector<2x8xf32>
    %171 = vector.shape_cast %170 : vector<2x8xf32> to vector<2x8x1xf32>
    %172 = vector.broadcast %171 : vector<2x8x1xf32> to vector<2x8x8xf32>
    %173 = arith.subf %169, %172 : vector<2x8x8xf32>
    %174 = math.exp %173 : vector<2x8x8xf32>
    %cst_72 = arith.constant dense<0.000000e+00> : vector<2x8xf32>
    %175 = vector.multi_reduction <add>, %174, %cst_72 [2] : vector<2x8x8xf32> to vector<2x8xf32>
    %176 = vector.shape_cast %175 : vector<2x8xf32> to vector<2x8x1xf32>
    %177 = tpu.reciprocal %176 {approx = true} : vector<2x8x1xf32> -> vector<2x8x1xf32>
    %178 = vector.broadcast %177 : vector<2x8x1xf32> to vector<2x8x8xf32>
    %179 = arith.mulf %174, %178 : vector<2x8x8xf32>
    %180 = arith.truncf %179 : vector<2x8x8xf32> to vector<2x8x8xbf16>
    "tpu.trace_start"() <{level = 10 : i32, message = "bqk,bkd->bqd"}> : () -> ()
    %cst_73 = arith.constant dense<0.000000e+00> : vector<2x8x8xf32>
    %181 = tpu.matmul %180, %166, %cst_73 {dimension_numbers = #tpu.dot_dimension_numbers<[2], [1], [1], [2], [0, 0, 0, 1, 1, 2], [0], [0]>} : vector<2x8x8xbf16>, vector<2x8x8xbf16>, vector<2x8x8xf32> -> vector<2x8x8xf32>
    "tpu.trace_stop"() : () -> ()
    %182 = vector.shape_cast %181 : vector<2x8x8xf32> to vector<16x8xf32>
    %183 = arith.truncf %182 : vector<16x8xf32> to vector<16x8xbf16>
    %184 = vector.extract_strided_slice %12 {offsets = [24, 0], sizes = [8, 32], strides = [1, 1]} : vector<32x32xbf16> to vector<8x32xbf16>
    %cst_74 = arith.constant dense<0.000000e+00> : vector<16x32xf32>
    %185 = tpu.matmul %183, %184, %cst_74 {dimension_numbers = #tpu.dot_dimension_numbers<[1], [0], [0], [1], [0, 0, 1, 1], [], []>} : vector<16x8xbf16>, vector<8x32xbf16>, vector<16x32xf32> -> vector<16x32xf32>
    %186 = arith.addf %157, %185 : vector<16x32xf32>
    %187 = vector.broadcast %13 : vector<1x32xf32> to vector<16x32xf32>
    %188 = arith.addf %186, %187 : vector<16x32xf32>
    %189 = arith.addf %0, %188 : vector<16x32xf32>
    %cst_75 = arith.constant dense<0.000000e+00> : vector<16xf32>
    %190 = vector.multi_reduction <add>, %189, %cst_75 [1] : vector<16x32xf32> to vector<16xf32>
    %191 = vector.shape_cast %190 : vector<16xf32> to vector<16x1xf32>
    %cst_76 = arith.constant 3.200000e+01 : f32
    %192 = vector.broadcast %cst_76 : f32 to vector<16x1xf32>
    %193 = arith.divf %191, %192 : vector<16x1xf32>
    %194 = vector.broadcast %193 : vector<16x1xf32> to vector<16x32xf32>
    %195 = arith.subf %189, %194 : vector<16x32xf32>
    %196 = arith.mulf %195, %195 : vector<16x32xf32>
    %cst_77 = arith.constant dense<0.000000e+00> : vector<16xf32>
    %197 = vector.multi_reduction <add>, %196, %cst_77 [1] : vector<16x32xf32> to vector<16xf32>
    %198 = vector.shape_cast %197 : vector<16xf32> to vector<16x1xf32>
    %cst_78 = arith.constant 3.200000e+01 : f32
    %199 = vector.broadcast %cst_78 : f32 to vector<16x1xf32>
    %200 = arith.divf %198, %199 : vector<16x1xf32>
    %cst_79 = arith.constant 9.99999974E-6 : f32
    %201 = vector.broadcast %cst_79 : f32 to vector<16x1xf32>
    %202 = arith.addf %200, %201 : vector<16x1xf32>
    %203 = math.rsqrt %202 : vector<16x1xf32>
    %204 = vector.broadcast %203 : vector<16x1xf32> to vector<16x32xf32>
    %205 = arith.mulf %195, %204 : vector<16x32xf32>
    %206 = vector.broadcast %14 : vector<1x32xf32> to vector<16x32xf32>
    %207 = arith.mulf %205, %206 : vector<16x32xf32>
    %208 = vector.broadcast %15 : vector<1x32xf32> to vector<16x32xf32>
    %209 = arith.addf %207, %208 : vector<16x32xf32>
    %210 = arith.truncf %209 : vector<16x32xf32> to vector<16x32xbf16>
    %cst_80 = arith.constant dense<0.000000e+00> : vector<16x64xf32>
    %211 = tpu.matmul %210, %16, %cst_80 {dimension_numbers = #tpu.dot_dimension_numbers<[1], [0], [0], [1], [0, 0, 1, 1], [], []>} : vector<16x32xbf16>, vector<32x64xbf16>, vector<16x64xf32> -> vector<16x64xf32>
    %212 = vector.broadcast %17 : vector<1x64xf32> to vector<16x64xf32>
    %213 = arith.addf %211, %212 : vector<16x64xf32>
    %cst_81 = arith.constant 0.000000e+00 : f32
    %214 = vector.broadcast %cst_81 : f32 to vector<16x64xf32>
    %215 = arith.maximumf %213, %214 : vector<16x64xf32>
    %216 = arith.truncf %215 : vector<16x64xf32> to vector<16x64xbf16>
    %cst_82 = arith.constant dense<0.000000e+00> : vector<16x32xf32>
    %217 = tpu.matmul %216, %18, %cst_82 {dimension_numbers = #tpu.dot_dimension_numbers<[1], [0], [0], [1], [0, 0, 1, 1], [], []>} : vector<16x64xbf16>, vector<64x32xbf16>, vector<16x32xf32> -> vector<16x32xf32>
    %218 = vector.broadcast %19 : vector<1x32xf32> to vector<16x32xf32>
    %219 = arith.addf %217, %218 : vector<16x32xf32>
    %220 = arith.addf %189, %219 : vector<16x32xf32>
    %c0_83 = arith.constant 0 : index
    %c0_84 = arith.constant 0 : index
    %221 = vector.load %arg21[%c0_83, %c0_84] : memref<1x32xf32, #tpu.memory_space<vmem>>, vector<1x32xf32>
    %c0_85 = arith.constant 0 : index
    %c0_86 = arith.constant 0 : index
    %222 = vector.load %arg22[%c0_85, %c0_86] : memref<1x32xf32, #tpu.memory_space<vmem>>, vector<1x32xf32>
    %c0_87 = arith.constant 0 : index
    %c0_88 = arith.constant 0 : index
    %223 = vector.load %arg23[%c0_87, %c0_88] : memref<32x32xbf16, #tpu.memory_space<vmem>>, vector<32x32xbf16>
    %c0_89 = arith.constant 0 : index
    %c0_90 = arith.constant 0 : index
    %224 = vector.load %arg24[%c0_89, %c0_90] : memref<1x32xf32, #tpu.memory_space<vmem>>, vector<1x32xf32>
    %c0_91 = arith.constant 0 : index
    %c0_92 = arith.constant 0 : index
    %225 = vector.load %arg25[%c0_91, %c0_92] : memref<32x32xbf16, #tpu.memory_space<vmem>>, vector<32x32xbf16>
    %c0_93 = arith.constant 0 : index
    %c0_94 = arith.constant 0 : index
    %226 = vector.load %arg26[%c0_93, %c0_94] : memref<1x32xf32, #tpu.memory_space<vmem>>, vector<1x32xf32>
    %c0_95 = arith.constant 0 : index
    %c0_96 = arith.constant 0 : index
    %227 = vector.load %arg27[%c0_95, %c0_96] : memref<32x32xbf16, #tpu.memory_space<vmem>>, vector<32x32xbf16>
    %c0_97 = arith.constant 0 : index
    %c0_98 = arith.constant 0 : index
    %228 = vector.load %arg28[%c0_97, %c0_98] : memref<1x32xf32, #tpu.memory_space<vmem>>, vector<1x32xf32>
    %c0_99 = arith.constant 0 : index
    %c0_100 = arith.constant 0 : index
    %229 = vector.load %arg29[%c0_99, %c0_100] : memref<32x32xbf16, #tpu.memory_space<vmem>>, vector<32x32xbf16>
    %c0_101 = arith.constant 0 : index
    %c0_102 = arith.constant 0 : index
    %230 = vector.load %arg30[%c0_101, %c0_102] : memref<1x32xf32, #tpu.memory_space<vmem>>, vector<1x32xf32>
    %c0_103 = arith.constant 0 : index
    %c0_104 = arith.constant 0 : index
    %231 = vector.load %arg31[%c0_103, %c0_104] : memref<1x32xf32, #tpu.memory_space<vmem>>, vector<1x32xf32>
    %c0_105 = arith.constant 0 : index
    %c0_106 = arith.constant 0 : index
    %232 = vector.load %arg32[%c0_105, %c0_106] : memref<1x32xf32, #tpu.memory_space<vmem>>, vector<1x32xf32>
    %c0_107 = arith.constant 0 : index
    %c0_108 = arith.constant 0 : index
    %233 = vector.load %arg33[%c0_107, %c0_108] : memref<32x64xbf16, #tpu.memory_space<vmem>>, vector<32x64xbf16>
    %c0_109 = arith.constant 0 : index
    %c0_110 = arith.constant 0 : index
    %234 = vector.load %arg34[%c0_109, %c0_110] : memref<1x64xf32, #tpu.memory_space<vmem>>, vector<1x64xf32>
    %c0_111 = arith.constant 0 : index
    %c0_112 = arith.constant 0 : index
    %235 = vector.load %arg35[%c0_111, %c0_112] : memref<64x32xbf16, #tpu.memory_space<vmem>>, vector<64x32xbf16>
    %c0_113 = arith.constant 0 : index
    %c0_114 = arith.constant 0 : index
    %236 = vector.load %arg36[%c0_113, %c0_114] : memref<1x32xf32, #tpu.memory_space<vmem>>, vector<1x32xf32>
    %cst_115 = arith.constant dense<0.000000e+00> : vector<16xf32>
    %237 = vector.multi_reduction <add>, %220, %cst_115 [1] : vector<16x32xf32> to vector<16xf32>
    %238 = vector.shape_cast %237 : vector<16xf32> to vector<16x1xf32>
    %cst_116 = arith.constant 3.200000e+01 : f32
    %239 = vector.broadcast %cst_116 : f32 to vector<16x1xf32>
    %240 = arith.divf %238, %239 : vector<16x1xf32>
    %241 = vector.broadcast %240 : vector<16x1xf32> to vector<16x32xf32>
    %242 = arith.subf %220, %241 : vector<16x32xf32>
    %243 = arith.mulf %242, %242 : vector<16x32xf32>
    %cst_117 = arith.constant dense<0.000000e+00> : vector<16xf32>
    %244 = vector.multi_reduction <add>, %243, %cst_117 [1] : vector<16x32xf32> to vector<16xf32>
    %245 = vector.shape_cast %244 : vector<16xf32> to vector<16x1xf32>
    %cst_118 = arith.constant 3.200000e+01 : f32
    %246 = vector.broadcast %cst_118 : f32 to vector<16x1xf32>
    %247 = arith.divf %245, %246 : vector<16x1xf32>
    %cst_119 = arith.constant 9.99999974E-6 : f32
    %248 = vector.broadcast %cst_119 : f32 to vector<16x1xf32>
    %249 = arith.addf %247, %248 : vector<16x1xf32>
    %250 = math.rsqrt %249 : vector<16x1xf32>
    %251 = vector.broadcast %250 : vector<16x1xf32> to vector<16x32xf32>
    %252 = arith.mulf %242, %251 : vector<16x32xf32>
    %253 = vector.broadcast %221 : vector<1x32xf32> to vector<16x32xf32>
    %254 = arith.mulf %252, %253 : vector<16x32xf32>
    %255 = vector.broadcast %222 : vector<1x32xf32> to vector<16x32xf32>
    %256 = arith.addf %254, %255 : vector<16x32xf32>
    %257 = arith.truncf %256 : vector<16x32xf32> to vector<16x32xbf16>
    %cst_120 = arith.constant dense<0.000000e+00> : vector<16x32xf32>
    %258 = tpu.matmul %257, %223, %cst_120 {dimension_numbers = #tpu.dot_dimension_numbers<[1], [0], [0], [1], [0, 0, 1, 1], [], []>} : vector<16x32xbf16>, vector<32x32xbf16>, vector<16x32xf32> -> vector<16x32xf32>
    %259 = vector.broadcast %224 : vector<1x32xf32> to vector<16x32xf32>
    %260 = arith.addf %258, %259 : vector<16x32xf32>
    %261 = arith.truncf %256 : vector<16x32xf32> to vector<16x32xbf16>
    %cst_121 = arith.constant dense<0.000000e+00> : vector<16x32xf32>
    %262 = tpu.matmul %261, %225, %cst_121 {dimension_numbers = #tpu.dot_dimension_numbers<[1], [0], [0], [1], [0, 0, 1, 1], [], []>} : vector<16x32xbf16>, vector<32x32xbf16>, vector<16x32xf32> -> vector<16x32xf32>
    %263 = vector.broadcast %226 : vector<1x32xf32> to vector<16x32xf32>
    %264 = arith.addf %262, %263 : vector<16x32xf32>
    %265 = arith.truncf %256 : vector<16x32xf32> to vector<16x32xbf16>
    %cst_122 = arith.constant dense<0.000000e+00> : vector<16x32xf32>
    %266 = tpu.matmul %265, %227, %cst_122 {dimension_numbers = #tpu.dot_dimension_numbers<[1], [0], [0], [1], [0, 0, 1, 1], [], []>} : vector<16x32xbf16>, vector<32x32xbf16>, vector<16x32xf32> -> vector<16x32xf32>
    %267 = vector.broadcast %228 : vector<1x32xf32> to vector<16x32xf32>
    %268 = arith.addf %266, %267 : vector<16x32xf32>
    %269 = vector.extract_strided_slice %260 {offsets = [0, 0], sizes = [16, 8], strides = [1, 1]} : vector<16x32xf32> to vector<16x8xf32>
    %270 = vector.shape_cast %269 : vector<16x8xf32> to vector<2x8x8xf32>
    %271 = arith.truncf %270 : vector<2x8x8xf32> to vector<2x8x8xbf16>
    %272 = vector.extract_strided_slice %264 {offsets = [0, 0], sizes = [16, 8], strides = [1, 1]} : vector<16x32xf32> to vector<16x8xf32>
    %273 = vector.shape_cast %272 : vector<16x8xf32> to vector<2x8x8xf32>
    %274 = arith.truncf %273 : vector<2x8x8xf32> to vector<2x8x8xbf16>
    %275 = vector.extract_strided_slice %268 {offsets = [0, 0], sizes = [16, 8], strides = [1, 1]} : vector<16x32xf32> to vector<16x8xf32>
    %276 = vector.shape_cast %275 : vector<16x8xf32> to vector<2x8x8xf32>
    %277 = arith.truncf %276 : vector<2x8x8xf32> to vector<2x8x8xbf16>
    "tpu.trace_start"() <{level = 10 : i32, message = "bqd,bkd->bqk"}> : () -> ()
    %cst_123 = arith.constant dense<0.000000e+00> : vector<2x8x8xf32>
    %278 = tpu.matmul %271, %274, %cst_123 {dimension_numbers = #tpu.dot_dimension_numbers<[2], [2], [1], [1], [0, 0, 0, 1, 1, 1], [0], [0]>} : vector<2x8x8xbf16>, vector<2x8x8xbf16>, vector<2x8x8xf32> -> vector<2x8x8xf32>
    "tpu.trace_stop"() : () -> ()
    %cst_124 = arith.constant 0.353553385 : f32
    %279 = vector.broadcast %cst_124 : f32 to vector<2x8x8xf32>
    %280 = arith.mulf %278, %279 : vector<2x8x8xf32>
    %cst_125 = arith.constant dense<0xFF800000> : vector<2x8xf32>
    %281 = vector.multi_reduction <maximumf>, %280, %cst_125 [2] : vector<2x8x8xf32> to vector<2x8xf32>
    %282 = vector.shape_cast %281 : vector<2x8xf32> to vector<2x8x1xf32>
    %283 = vector.broadcast %282 : vector<2x8x1xf32> to vector<2x8x8xf32>
    %284 = arith.subf %280, %283 : vector<2x8x8xf32>
    %285 = math.exp %284 : vector<2x8x8xf32>
    %cst_126 = arith.constant dense<0.000000e+00> : vector<2x8xf32>
    %286 = vector.multi_reduction <add>, %285, %cst_126 [2] : vector<2x8x8xf32> to vector<2x8xf32>
    %287 = vector.shape_cast %286 : vector<2x8xf32> to vector<2x8x1xf32>
    %288 = tpu.reciprocal %287 {approx = true} : vector<2x8x1xf32> -> vector<2x8x1xf32>
    %289 = vector.broadcast %288 : vector<2x8x1xf32> to vector<2x8x8xf32>
    %290 = arith.mulf %285, %289 : vector<2x8x8xf32>
    %291 = arith.truncf %290 : vector<2x8x8xf32> to vector<2x8x8xbf16>
    "tpu.trace_start"() <{level = 10 : i32, message = "bqk,bkd->bqd"}> : () -> ()
    %cst_127 = arith.constant dense<0.000000e+00> : vector<2x8x8xf32>
    %292 = tpu.matmul %291, %277, %cst_127 {dimension_numbers = #tpu.dot_dimension_numbers<[2], [1], [1], [2], [0, 0, 0, 1, 1, 2], [0], [0]>} : vector<2x8x8xbf16>, vector<2x8x8xbf16>, vector<2x8x8xf32> -> vector<2x8x8xf32>
    "tpu.trace_stop"() : () -> ()
    %293 = vector.shape_cast %292 : vector<2x8x8xf32> to vector<16x8xf32>
    %294 = arith.truncf %293 : vector<16x8xf32> to vector<16x8xbf16>
    %295 = vector.extract_strided_slice %229 {offsets = [0, 0], sizes = [8, 32], strides = [1, 1]} : vector<32x32xbf16> to vector<8x32xbf16>
    %cst_128 = arith.constant dense<0.000000e+00> : vector<16x32xf32>
    %296 = tpu.matmul %294, %295, %cst_128 {dimension_numbers = #tpu.dot_dimension_numbers<[1], [0], [0], [1], [0, 0, 1, 1], [], []>} : vector<16x8xbf16>, vector<8x32xbf16>, vector<16x32xf32> -> vector<16x32xf32>
    %297 = vector.extract_strided_slice %260 {offsets = [0, 8], sizes = [16, 8], strides = [1, 1]} : vector<16x32xf32> to vector<16x8xf32>
    %298 = vector.shape_cast %297 : vector<16x8xf32> to vector<2x8x8xf32>
    %299 = arith.truncf %298 : vector<2x8x8xf32> to vector<2x8x8xbf16>
    %300 = vector.extract_strided_slice %264 {offsets = [0, 8], sizes = [16, 8], strides = [1, 1]} : vector<16x32xf32> to vector<16x8xf32>
    %301 = vector.shape_cast %300 : vector<16x8xf32> to vector<2x8x8xf32>
    %302 = arith.truncf %301 : vector<2x8x8xf32> to vector<2x8x8xbf16>
    %303 = vector.extract_strided_slice %268 {offsets = [0, 8], sizes = [16, 8], strides = [1, 1]} : vector<16x32xf32> to vector<16x8xf32>
    %304 = vector.shape_cast %303 : vector<16x8xf32> to vector<2x8x8xf32>
    %305 = arith.truncf %304 : vector<2x8x8xf32> to vector<2x8x8xbf16>
    "tpu.trace_start"() <{level = 10 : i32, message = "bqd,bkd->bqk"}> : () -> ()
    %cst_129 = arith.constant dense<0.000000e+00> : vector<2x8x8xf32>
    %306 = tpu.matmul %299, %302, %cst_129 {dimension_numbers = #tpu.dot_dimension_numbers<[2], [2], [1], [1], [0, 0, 0, 1, 1, 1], [0], [0]>} : vector<2x8x8xbf16>, vector<2x8x8xbf16>, vector<2x8x8xf32> -> vector<2x8x8xf32>
    "tpu.trace_stop"() : () -> ()
    %cst_130 = arith.constant 0.353553385 : f32
    %307 = vector.broadcast %cst_130 : f32 to vector<2x8x8xf32>
    %308 = arith.mulf %306, %307 : vector<2x8x8xf32>
    %cst_131 = arith.constant dense<0xFF800000> : vector<2x8xf32>
    %309 = vector.multi_reduction <maximumf>, %308, %cst_131 [2] : vector<2x8x8xf32> to vector<2x8xf32>
    %310 = vector.shape_cast %309 : vector<2x8xf32> to vector<2x8x1xf32>
    %311 = vector.broadcast %310 : vector<2x8x1xf32> to vector<2x8x8xf32>
    %312 = arith.subf %308, %311 : vector<2x8x8xf32>
    %313 = math.exp %312 : vector<2x8x8xf32>
    %cst_132 = arith.constant dense<0.000000e+00> : vector<2x8xf32>
    %314 = vector.multi_reduction <add>, %313, %cst_132 [2] : vector<2x8x8xf32> to vector<2x8xf32>
    %315 = vector.shape_cast %314 : vector<2x8xf32> to vector<2x8x1xf32>
    %316 = tpu.reciprocal %315 {approx = true} : vector<2x8x1xf32> -> vector<2x8x1xf32>
    %317 = vector.broadcast %316 : vector<2x8x1xf32> to vector<2x8x8xf32>
    %318 = arith.mulf %313, %317 : vector<2x8x8xf32>
    %319 = arith.truncf %318 : vector<2x8x8xf32> to vector<2x8x8xbf16>
    "tpu.trace_start"() <{level = 10 : i32, message = "bqk,bkd->bqd"}> : () -> ()
    %cst_133 = arith.constant dense<0.000000e+00> : vector<2x8x8xf32>
    %320 = tpu.matmul %319, %305, %cst_133 {dimension_numbers = #tpu.dot_dimension_numbers<[2], [1], [1], [2], [0, 0, 0, 1, 1, 2], [0], [0]>} : vector<2x8x8xbf16>, vector<2x8x8xbf16>, vector<2x8x8xf32> -> vector<2x8x8xf32>
    "tpu.trace_stop"() : () -> ()
    %321 = vector.shape_cast %320 : vector<2x8x8xf32> to vector<16x8xf32>
    %322 = arith.truncf %321 : vector<16x8xf32> to vector<16x8xbf16>
    %323 = vector.extract_strided_slice %229 {offsets = [8, 0], sizes = [8, 32], strides = [1, 1]} : vector<32x32xbf16> to vector<8x32xbf16>
    %cst_134 = arith.constant dense<0.000000e+00> : vector<16x32xf32>
    %324 = tpu.matmul %322, %323, %cst_134 {dimension_numbers = #tpu.dot_dimension_numbers<[1], [0], [0], [1], [0, 0, 1, 1], [], []>} : vector<16x8xbf16>, vector<8x32xbf16>, vector<16x32xf32> -> vector<16x32xf32>
    %325 = arith.addf %296, %324 : vector<16x32xf32>
    %326 = vector.extract_strided_slice %260 {offsets = [0, 16], sizes = [16, 8], strides = [1, 1]} : vector<16x32xf32> to vector<16x8xf32>
    %327 = vector.shape_cast %326 : vector<16x8xf32> to vector<2x8x8xf32>
    %328 = arith.truncf %327 : vector<2x8x8xf32> to vector<2x8x8xbf16>
    %329 = vector.extract_strided_slice %264 {offsets = [0, 16], sizes = [16, 8], strides = [1, 1]} : vector<16x32xf32> to vector<16x8xf32>
    %330 = vector.shape_cast %329 : vector<16x8xf32> to vector<2x8x8xf32>
    %331 = arith.truncf %330 : vector<2x8x8xf32> to vector<2x8x8xbf16>
    %332 = vector.extract_strided_slice %268 {offsets = [0, 16], sizes = [16, 8], strides = [1, 1]} : vector<16x32xf32> to vector<16x8xf32>
    %333 = vector.shape_cast %332 : vector<16x8xf32> to vector<2x8x8xf32>
    %334 = arith.truncf %333 : vector<2x8x8xf32> to vector<2x8x8xbf16>
    "tpu.trace_start"() <{level = 10 : i32, message = "bqd,bkd->bqk"}> : () -> ()
    %cst_135 = arith.constant dense<0.000000e+00> : vector<2x8x8xf32>
    %335 = tpu.matmul %328, %331, %cst_135 {dimension_numbers = #tpu.dot_dimension_numbers<[2], [2], [1], [1], [0, 0, 0, 1, 1, 1], [0], [0]>} : vector<2x8x8xbf16>, vector<2x8x8xbf16>, vector<2x8x8xf32> -> vector<2x8x8xf32>
    "tpu.trace_stop"() : () -> ()
    %cst_136 = arith.constant 0.353553385 : f32
    %336 = vector.broadcast %cst_136 : f32 to vector<2x8x8xf32>
    %337 = arith.mulf %335, %336 : vector<2x8x8xf32>
    %cst_137 = arith.constant dense<0xFF800000> : vector<2x8xf32>
    %338 = vector.multi_reduction <maximumf>, %337, %cst_137 [2] : vector<2x8x8xf32> to vector<2x8xf32>
    %339 = vector.shape_cast %338 : vector<2x8xf32> to vector<2x8x1xf32>
    %340 = vector.broadcast %339 : vector<2x8x1xf32> to vector<2x8x8xf32>
    %341 = arith.subf %337, %340 : vector<2x8x8xf32>
    %342 = math.exp %341 : vector<2x8x8xf32>
    %cst_138 = arith.constant dense<0.000000e+00> : vector<2x8xf32>
    %343 = vector.multi_reduction <add>, %342, %cst_138 [2] : vector<2x8x8xf32> to vector<2x8xf32>
    %344 = vector.shape_cast %343 : vector<2x8xf32> to vector<2x8x1xf32>
    %345 = tpu.reciprocal %344 {approx = true} : vector<2x8x1xf32> -> vector<2x8x1xf32>
    %346 = vector.broadcast %345 : vector<2x8x1xf32> to vector<2x8x8xf32>
    %347 = arith.mulf %342, %346 : vector<2x8x8xf32>
    %348 = arith.truncf %347 : vector<2x8x8xf32> to vector<2x8x8xbf16>
    "tpu.trace_start"() <{level = 10 : i32, message = "bqk,bkd->bqd"}> : () -> ()
    %cst_139 = arith.constant dense<0.000000e+00> : vector<2x8x8xf32>
    %349 = tpu.matmul %348, %334, %cst_139 {dimension_numbers = #tpu.dot_dimension_numbers<[2], [1], [1], [2], [0, 0, 0, 1, 1, 2], [0], [0]>} : vector<2x8x8xbf16>, vector<2x8x8xbf16>, vector<2x8x8xf32> -> vector<2x8x8xf32>
    "tpu.trace_stop"() : () -> ()
    %350 = vector.shape_cast %349 : vector<2x8x8xf32> to vector<16x8xf32>
    %351 = arith.truncf %350 : vector<16x8xf32> to vector<16x8xbf16>
    %352 = vector.extract_strided_slice %229 {offsets = [16, 0], sizes = [8, 32], strides = [1, 1]} : vector<32x32xbf16> to vector<8x32xbf16>
    %cst_140 = arith.constant dense<0.000000e+00> : vector<16x32xf32>
    %353 = tpu.matmul %351, %352, %cst_140 {dimension_numbers = #tpu.dot_dimension_numbers<[1], [0], [0], [1], [0, 0, 1, 1], [], []>} : vector<16x8xbf16>, vector<8x32xbf16>, vector<16x32xf32> -> vector<16x32xf32>
    %354 = arith.addf %325, %353 : vector<16x32xf32>
    %355 = vector.extract_strided_slice %260 {offsets = [0, 24], sizes = [16, 8], strides = [1, 1]} : vector<16x32xf32> to vector<16x8xf32>
    %356 = vector.shape_cast %355 : vector<16x8xf32> to vector<2x8x8xf32>
    %357 = arith.truncf %356 : vector<2x8x8xf32> to vector<2x8x8xbf16>
    %358 = vector.extract_strided_slice %264 {offsets = [0, 24], sizes = [16, 8], strides = [1, 1]} : vector<16x32xf32> to vector<16x8xf32>
    %359 = vector.shape_cast %358 : vector<16x8xf32> to vector<2x8x8xf32>
    %360 = arith.truncf %359 : vector<2x8x8xf32> to vector<2x8x8xbf16>
    %361 = vector.extract_strided_slice %268 {offsets = [0, 24], sizes = [16, 8], strides = [1, 1]} : vector<16x32xf32> to vector<16x8xf32>
    %362 = vector.shape_cast %361 : vector<16x8xf32> to vector<2x8x8xf32>
    %363 = arith.truncf %362 : vector<2x8x8xf32> to vector<2x8x8xbf16>
    "tpu.trace_start"() <{level = 10 : i32, message = "bqd,bkd->bqk"}> : () -> ()
    %cst_141 = arith.constant dense<0.000000e+00> : vector<2x8x8xf32>
    %364 = tpu.matmul %357, %360, %cst_141 {dimension_numbers = #tpu.dot_dimension_numbers<[2], [2], [1], [1], [0, 0, 0, 1, 1, 1], [0], [0]>} : vector<2x8x8xbf16>, vector<2x8x8xbf16>, vector<2x8x8xf32> -> vector<2x8x8xf32>
    "tpu.trace_stop"() : () -> ()
    %cst_142 = arith.constant 0.353553385 : f32
    %365 = vector.broadcast %cst_142 : f32 to vector<2x8x8xf32>
    %366 = arith.mulf %364, %365 : vector<2x8x8xf32>
    %cst_143 = arith.constant dense<0xFF800000> : vector<2x8xf32>
    %367 = vector.multi_reduction <maximumf>, %366, %cst_143 [2] : vector<2x8x8xf32> to vector<2x8xf32>
    %368 = vector.shape_cast %367 : vector<2x8xf32> to vector<2x8x1xf32>
    %369 = vector.broadcast %368 : vector<2x8x1xf32> to vector<2x8x8xf32>
    %370 = arith.subf %366, %369 : vector<2x8x8xf32>
    %371 = math.exp %370 : vector<2x8x8xf32>
    %cst_144 = arith.constant dense<0.000000e+00> : vector<2x8xf32>
    %372 = vector.multi_reduction <add>, %371, %cst_144 [2] : vector<2x8x8xf32> to vector<2x8xf32>
    %373 = vector.shape_cast %372 : vector<2x8xf32> to vector<2x8x1xf32>
    %374 = tpu.reciprocal %373 {approx = true} : vector<2x8x1xf32> -> vector<2x8x1xf32>
    %375 = vector.broadcast %374 : vector<2x8x1xf32> to vector<2x8x8xf32>
    %376 = arith.mulf %371, %375 : vector<2x8x8xf32>
    %377 = arith.truncf %376 : vector<2x8x8xf32> to vector<2x8x8xbf16>
    "tpu.trace_start"() <{level = 10 : i32, message = "bqk,bkd->bqd"}> : () -> ()
    %cst_145 = arith.constant dense<0.000000e+00> : vector<2x8x8xf32>
    %378 = tpu.matmul %377, %363, %cst_145 {dimension_numbers = #tpu.dot_dimension_numbers<[2], [1], [1], [2], [0, 0, 0, 1, 1, 2], [0], [0]>} : vector<2x8x8xbf16>, vector<2x8x8xbf16>, vector<2x8x8xf32> -> vector<2x8x8xf32>
    "tpu.trace_stop"() : () -> ()
    %379 = vector.shape_cast %378 : vector<2x8x8xf32> to vector<16x8xf32>
    %380 = arith.truncf %379 : vector<16x8xf32> to vector<16x8xbf16>
    %381 = vector.extract_strided_slice %229 {offsets = [24, 0], sizes = [8, 32], strides = [1, 1]} : vector<32x32xbf16> to vector<8x32xbf16>
    %cst_146 = arith.constant dense<0.000000e+00> : vector<16x32xf32>
    %382 = tpu.matmul %380, %381, %cst_146 {dimension_numbers = #tpu.dot_dimension_numbers<[1], [0], [0], [1], [0, 0, 1, 1], [], []>} : vector<16x8xbf16>, vector<8x32xbf16>, vector<16x32xf32> -> vector<16x32xf32>
    %383 = arith.addf %354, %382 : vector<16x32xf32>
    %384 = vector.broadcast %230 : vector<1x32xf32> to vector<16x32xf32>
    %385 = arith.addf %383, %384 : vector<16x32xf32>
    %386 = arith.addf %220, %385 : vector<16x32xf32>
    %cst_147 = arith.constant dense<0.000000e+00> : vector<16xf32>
    %387 = vector.multi_reduction <add>, %386, %cst_147 [1] : vector<16x32xf32> to vector<16xf32>
    %388 = vector.shape_cast %387 : vector<16xf32> to vector<16x1xf32>
    %cst_148 = arith.constant 3.200000e+01 : f32
    %389 = vector.broadcast %cst_148 : f32 to vector<16x1xf32>
    %390 = arith.divf %388, %389 : vector<16x1xf32>
    %391 = vector.broadcast %390 : vector<16x1xf32> to vector<16x32xf32>
    %392 = arith.subf %386, %391 : vector<16x32xf32>
    %393 = arith.mulf %392, %392 : vector<16x32xf32>
    %cst_149 = arith.constant dense<0.000000e+00> : vector<16xf32>
    %394 = vector.multi_reduction <add>, %393, %cst_149 [1] : vector<16x32xf32> to vector<16xf32>
    %395 = vector.shape_cast %394 : vector<16xf32> to vector<16x1xf32>
    %cst_150 = arith.constant 3.200000e+01 : f32
    %396 = vector.broadcast %cst_150 : f32 to vector<16x1xf32>
    %397 = arith.divf %395, %396 : vector<16x1xf32>
    %cst_151 = arith.constant 9.99999974E-6 : f32
    %398 = vector.broadcast %cst_151 : f32 to vector<16x1xf32>
    %399 = arith.addf %397, %398 : vector<16x1xf32>
    %400 = math.rsqrt %399 : vector<16x1xf32>
    %401 = vector.broadcast %400 : vector<16x1xf32> to vector<16x32xf32>
    %402 = arith.mulf %392, %401 : vector<16x32xf32>
    %403 = vector.broadcast %231 : vector<1x32xf32> to vector<16x32xf32>
    %404 = arith.mulf %402, %403 : vector<16x32xf32>
    %405 = vector.broadcast %232 : vector<1x32xf32> to vector<16x32xf32>
    %406 = arith.addf %404, %405 : vector<16x32xf32>
    %407 = arith.truncf %406 : vector<16x32xf32> to vector<16x32xbf16>
    %cst_152 = arith.constant dense<0.000000e+00> : vector<16x64xf32>
    %408 = tpu.matmul %407, %233, %cst_152 {dimension_numbers = #tpu.dot_dimension_numbers<[1], [0], [0], [1], [0, 0, 1, 1], [], []>} : vector<16x32xbf16>, vector<32x64xbf16>, vector<16x64xf32> -> vector<16x64xf32>
    %409 = vector.broadcast %234 : vector<1x64xf32> to vector<16x64xf32>
    %410 = arith.addf %408, %409 : vector<16x64xf32>
    %cst_153 = arith.constant 0.000000e+00 : f32
    %411 = vector.broadcast %cst_153 : f32 to vector<16x64xf32>
    %412 = arith.maximumf %410, %411 : vector<16x64xf32>
    %413 = arith.truncf %412 : vector<16x64xf32> to vector<16x64xbf16>
    %cst_154 = arith.constant dense<0.000000e+00> : vector<16x32xf32>
    %414 = tpu.matmul %413, %235, %cst_154 {dimension_numbers = #tpu.dot_dimension_numbers<[1], [0], [0], [1], [0, 0, 1, 1], [], []>} : vector<16x64xbf16>, vector<64x32xbf16>, vector<16x32xf32> -> vector<16x32xf32>
    %415 = vector.broadcast %236 : vector<1x32xf32> to vector<16x32xf32>
    %416 = arith.addf %414, %415 : vector<16x32xf32>
    %417 = arith.addf %386, %416 : vector<16x32xf32>
    %c0_155 = arith.constant 0 : index
    %c0_156 = arith.constant 0 : index
    %418 = vector.load %arg37[%c0_155, %c0_156] : memref<16x32xf32, #tpu.memory_space<vmem>>, vector<16x32xf32>
    tpu.vector_store %arg37[%c0_155, %c0_156], %417 {strides = array<i32>} : memref<16x32xf32, #tpu.memory_space<vmem>>, vector<16x32xf32>,
    return
  }
  func.func @transform_0(%arg0: i32) -> (i32, i32) {
    %c0_i32 = arith.constant 0 : i32
    %c0_i32_0 = arith.constant 0 : i32
    %c0_i32_1 = arith.constant 0 : i32
    return %c0_i32, %c0_i32_0 : i32, i32
  }
  func.func @transform_1(%arg0: i32) -> (i32, i32) {
    %c0_i32 = arith.constant 0 : i32
    %c0_i32_0 = arith.constant 0 : i32
    %c0_i32_1 = arith.constant 0 : i32
    return %c0_i32, %c0_i32_0 : i32, i32
  }
  func.func @transform_2(%arg0: i32) -> (i32, i32) {
    %c0_i32 = arith.constant 0 : i32
    %c0_i32_0 = arith.constant 0 : i32
    %c0_i32_1 = arith.constant 0 : i32
    return %c0_i32, %c0_i32_0 : i32, i32
  }
  func.func @transform_3(%arg0: i32) -> (i32, i32) {
    %c0_i32 = arith.constant 0 : i32
    %c0_i32_0 = arith.constant 0 : i32
    %c0_i32_1 = arith.constant 0 : i32
    return %c0_i32, %c0_i32_0 : i32, i32
  }
  func.func @transform_4(%arg0: i32) -> (i32, i32) {
    %c0_i32 = arith.constant 0 : i32
    %c0_i32_0 = arith.constant 0 : i32
    %c0_i32_1 = arith.constant 0 : i32
    return %c0_i32, %c0_i32_0 : i32, i32
  }
  func.func @transform_5(%arg0: i32) -> (i32, i32) {
    %c0_i32 = arith.constant 0 : i32
    %c0_i32_0 = arith.constant 0 : i32
    %c0_i32_1 = arith.constant 0 : i32
    return %c0_i32, %c0_i32_0 : i32, i32
  }
  func.func @transform_6(%arg0: i32) -> (i32, i32) {
    %c0_i32 = arith.constant 0 : i32
    %c0_i32_0 = arith.constant 0 : i32
    %c0_i32_1 = arith.constant 0 : i32
    return %c0_i32, %c0_i32_0 : i32, i32
  }
  func.func @transform_7(%arg0: i32) -> (i32, i32) {
    %c0_i32 = arith.constant 0 : i32
    %c0_i32_0 = arith.constant 0 : i32
    %c0_i32_1 = arith.constant 0 : i32
    return %c0_i32, %c0_i32_0 : i32, i32
  }
  func.func @transform_8(%arg0: i32) -> (i32, i32) {
    %c0_i32 = arith.constant 0 : i32
    %c0_i32_0 = arith.constant 0 : i32
    %c0_i32_1 = arith.constant 0 : i32
    return %c0_i32, %c0_i32_0 : i32, i32
  }
  func.func @transform_9(%arg0: i32) -> (i32, i32) {
    %c0_i32 = arith.constant 0 : i32
    %c0_i32_0 = arith.constant 0 : i32
    %c0_i32_1 = arith.constant 0 : i32
    return %c0_i32, %c0_i32_0 : i32, i32
  }
  func.func @transform_10(%arg0: i32) -> (i32, i32) {
    %c0_i32 = arith.constant 0 : i32
    %c0_i32_0 = arith.constant 0 : i32
    %c0_i32_1 = arith.constant 0 : i32
    return %c0_i32, %c0_i32_0 : i32, i32
  }
  func.func @transform_11(%arg0: i32) -> (i32, i32) {
    %c0_i32 = arith.constant 0 : i32
    %c0_i32_0 = arith.constant 0 : i32
    %c0_i32_1 = arith.constant 0 : i32
    return %c0_i32, %c0_i32_0 : i32, i32
  }
  func.func @transform_12(%arg0: i32) -> (i32, i32) {
    %c0_i32 = arith.constant 0 : i32
    %c0_i32_0 = arith.constant 0 : i32
    %c0_i32_1 = arith.constant 0 : i32
    return %c0_i32, %c0_i32_0 : i32, i32
  }
  func.func @transform_13(%arg0: i32) -> (i32, i32) {
    %c0_i32 = arith.constant 0 : i32
    %c0_i32_0 = arith.constant 0 : i32
    %c0_i32_1 = arith.constant 0 : i32
    return %c0_i32, %c0_i32_0 : i32, i32
  }
  func.func @transform_14(%arg0: i32) -> (i32, i32) {
    %c0_i32 = arith.constant 0 : i32
    %c0_i32_0 = arith.constant 0 : i32
    %c0_i32_1 = arith.constant 0 : i32
    return %c0_i32, %c0_i32_0 : i32, i32
  }
  func.func @transform_15(%arg0: i32) -> (i32, i32) {
    %c0_i32 = arith.constant 0 : i32
    %c0_i32_0 = arith.constant 0 : i32
    %c0_i32_1 = arith.constant 0 : i32
    return %c0_i32, %c0_i32_0 : i32, i32
  }
  func.func @transform_16(%arg0: i32) -> (i32, i32) {
    %c0_i32 = arith.constant 0 : i32
    %c0_i32_0 = arith.constant 0 : i32
    %c0_i32_1 = arith.constant 0 : i32
    return %c0_i32, %c0_i32_0 : i32, i32
  }
  func.func @transform_17(%arg0: i32) -> (i32, i32) {
    %c0_i32 = arith.constant 0 : i32
    %c0_i32_0 = arith.constant 0 : i32
    %c0_i32_1 = arith.constant 0 : i32
    return %c0_i32, %c0_i32_0 : i32, i32
  }
  func.func @transform_18(%arg0: i32) -> (i32, i32) {
    %c0_i32 = arith.constant 0 : i32
    %c0_i32_0 = arith.constant 0 : i32
    %c0_i32_1 = arith.constant 0 : i32
    return %c0_i32, %c0_i32_0 : i32, i32
  }
  func.func @transform_19(%arg0: i32) -> (i32, i32) {
    %c0_i32 = arith.constant 0 : i32
    %c0_i32_0 = arith.constant 0 : i32
    %c0_i32_1 = arith.constant 0 : i32
    return %c0_i32, %c0_i32_0 : i32, i32
  }
  func.func @transform_20(%arg0: i32) -> (i32, i32) {
    %c0_i32 = arith.constant 0 : i32
    %c0_i32_0 = arith.constant 0 : i32
    %c0_i32_1 = arith.constant 0 : i32
    return %c0_i32, %c0_i32_0 : i32, i32
  }
  func.func @transform_21(%arg0: i32) -> (i32, i32) {
    %c0_i32 = arith.constant 0 : i32
    %c0_i32_0 = arith.constant 0 : i32
    %c0_i32_1 = arith.constant 0 : i32
    return %c0_i32, %c0_i32_0 : i32, i32
  }
  func.func @transform_22(%arg0: i32) -> (i32, i32) {
    %c0_i32 = arith.constant 0 : i32
    %c0_i32_0 = arith.constant 0 : i32
    %c0_i32_1 = arith.constant 0 : i32
    return %c0_i32, %c0_i32_0 : i32, i32
  }
  func.func @transform_23(%arg0: i32) -> (i32, i32) {
    %c0_i32 = arith.constant 0 : i32
    %c0_i32_0 = arith.constant 0 : i32
    %c0_i32_1 = arith.constant 0 : i32
    return %c0_i32, %c0_i32_0 : i32, i32
  }
  func.func @transform_24(%arg0: i32) -> (i32, i32) {
    %c0_i32 = arith.constant 0 : i32
    %c0_i32_0 = arith.constant 0 : i32
    %c0_i32_1 = arith.constant 0 : i32
    return %c0_i32, %c0_i32_0 : i32, i32
  }
  func.func @transform_25(%arg0: i32) -> (i32, i32) {
    %c0_i32 = arith.constant 0 : i32
    %c0_i32_0 = arith.constant 0 : i32
    %c0_i32_1 = arith.constant 0 : i32
    return %c0_i32, %c0_i32_0 : i32, i32
  }
  func.func @transform_26(%arg0: i32) -> (i32, i32) {
    %c0_i32 = arith.constant 0 : i32
    %c0_i32_0 = arith.constant 0 : i32
    %c0_i32_1 = arith.constant 0 : i32
    return %c0_i32, %c0_i32_0 : i32, i32
  }
  func.func @transform_27(%arg0: i32) -> (i32, i32) {
    %c0_i32 = arith.constant 0 : i32
    %c0_i32_0 = arith.constant 0 : i32
    %c0_i32_1 = arith.constant 0 : i32
    return %c0_i32, %c0_i32_0 : i32, i32
  }
  func.func @transform_28(%arg0: i32) -> (i32, i32) {
    %c0_i32 = arith.constant 0 : i32
    %c0_i32_0 = arith.constant 0 : i32
    %c0_i32_1 = arith.constant 0 : i32
    return %c0_i32, %c0_i32_0 : i32, i32
  }
  func.func @transform_29(%arg0: i32) -> (i32, i32) {
    %c0_i32 = arith.constant 0 : i32
    %c0_i32_0 = arith.constant 0 : i32
    %c0_i32_1 = arith.constant 0 : i32
    return %c0_i32, %c0_i32_0 : i32, i32
  }
  func.func @transform_30(%arg0: i32) -> (i32, i32) {
    %c0_i32 = arith.constant 0 : i32
    %c0_i32_0 = arith.constant 0 : i32
    %c0_i32_1 = arith.constant 0 : i32
    return %c0_i32, %c0_i32_0 : i32, i32
  }
  func.func @transform_31(%arg0: i32) -> (i32, i32) {
    %c0_i32 = arith.constant 0 : i32
    %c0_i32_0 = arith.constant 0 : i32
    %c0_i32_1 = arith.constant 0 : i32
    return %c0_i32, %c0_i32_0 : i32, i32
  }
  func.func @transform_32(%arg0: i32) -> (i32, i32) {
    %c0_i32 = arith.constant 0 : i32
    %c0_i32_0 = arith.constant 0 : i32
    %c0_i32_1 = arith.constant 0 : i32
    return %c0_i32, %c0_i32_0 : i32, i32
  }
  func.func @transform_33(%arg0: i32) -> (i32, i32) {
    %c0_i32 = arith.constant 0 : i32
    %c0_i32_0 = arith.constant 0 : i32
    %c0_i32_1 = arith.constant 0 : i32
    return %c0_i32, %c0_i32_0 : i32, i32
  }
  func.func @transform_34(%arg0: i32) -> (i32, i32) {
    %c0_i32 = arith.constant 0 : i32
    %c0_i32_0 = arith.constant 0 : i32
    %c0_i32_1 = arith.constant 0 : i32
    return %c0_i32, %c0_i32_0 : i32, i32
  }
  func.func @transform_35(%arg0: i32) -> (i32, i32) {
    %c0_i32 = arith.constant 0 : i32
    %c0_i32_0 = arith.constant 0 : i32
    %c0_i32_1 = arith.constant 0 : i32
    return %c0_i32, %c0_i32_0 : i32, i32
  }
  func.func @transform_36(%arg0: i32) -> (i32, i32) {
    %c0_i32 = arith.constant 0 : i32
    %c0_i32_0 = arith.constant 0 : i32
    %c0_i32_1 = arith.constant 0 : i32
    return %c0_i32, %c0_i32_0 : i32, i32
  }
}

</mosaic_0001>

<bundles_post_ra>
// kernel: perceiver_forward.2
= control target key start
LH: loop header
LB: loop body
LE: loop exit
PB: predicated region body
PF: predicated region fallthrough
CT: control target
= control target key end

     0   :  { %s4065_s6 = smov 1   ;;  %s4066_s10 = smov 2   ;;  %s4844_s0 = inlined_call_operand.smem [shape: u32[37], index: -1, kind: input, shape index: {}] }
   0x1   :  { %s4116_s5 = sld [smem:[%s4844_s0]]   ;;  %s4067_s14 = smov 3  }
   0x2   :  { %s4121_s9 = sld [smem:[%s4844_s0 + %s4065_s6]]   ;;  %s4068_s18 = smov 4  }
   0x3   :  { %s4126_s13 = sld [smem:[%s4844_s0 + %s4066_s10]]   ;;  %s4069_s22 = smov 5  }
   0x4   :  { %s4131_s17 = sld [smem:[%s4844_s0 + %s4067_s14]]   ;;  %s4070_s26 = smov 6  }
   0x5   :  { %s4136_s21 = sld [smem:[%s4844_s0 + %s4068_s18]]   ;;  %s4071_s30 = smov 7  }
   0x6   :  { %s4141_s25 = sld [smem:[%s4844_s0 + %s4069_s22]]   ;;  %s4072_s4 = smov 8  }
   0x7   :  { %s4146_s29 = sld [smem:[%s4844_s0 + %s4070_s26]]   ;;  %s4073_s10 = smov 9  }
   0x8   :  { %s4151_s3 = sld [smem:[%s4844_s0 + %s4071_s30]]   ;;  %s4074_s15 = smov 10  }
   0x9   :  { %s4156_s8 = sld [smem:[%s4844_s0 + %s4072_s4]]   ;;  %s4075_s20 = smov 11  }
   0xa   :  { %s4161_s14 = sld [smem:[%s4844_s0 + %s4073_s10]]   ;;  %s4076_s26 = smov 12  }
   0xb   :  { %s4166_s19 = sld [smem:[%s4844_s0 + %s4074_s15]]   ;;  %s4077_s1 = smov 13  }
   0xc   :  { %s4171_s24 = sld [smem:[%s4844_s0 + %s4075_s20]]   ;;  %s4078_s7 = smov 14  }
   0xd   :  { %s4176_s30 = sld [smem:[%s4844_s0 + %s4076_s26]]   ;;  %s4079_s15 = smov 15  }
   0xe   :  { %s4181_s6 = sld [smem:[%s4844_s0 + %s4077_s1]]   ;;  %s4080_s22 = smov 16  }
   0xf   :  { %s4186_s12 = sld [smem:[%s4844_s0 + %s4078_s7]]   ;;  %s4081_s28 = smov 17  }
  0x10   :  { %s4191_s20 = sld [smem:[%s4844_s0 + %s4079_s15]]   ;;  %s4082_s7 = smov 18  }
  0x11   :  { %s4196_s27 = sld [smem:[%s4844_s0 + %s4080_s22]]   ;;  %s4083_s15 = smov 19  }
  0x12   :  { %s4201_s4 = sld [smem:[%s4844_s0 + %s4081_s28]]   ;;  %s4084_s22 = smov 20  }
  0x13   :  { %s4085_s28 = smov 21   ;;  %s4100_s23 = smov 36  }
  0x15   :  { %4852 = sst [smem:[#allocation5_spill]] %s4186_s12 }
  0x16   :  { %4853 = sst [smem:[#allocation6_spill]] %s4191_s20 }
  0x17   :  { %4854 = sst [smem:[#allocation7_spill]] %s4196_s27 }
  0x18   :  { %4855 = sst [smem:[#allocation8_spill]] %s4201_s4 }
  0x19   :  { %s4206_s12 = sld [smem:[%s4844_s0 + %s4082_s7]]   ;;  %s4086_s7 = smov 22  }
  0x1a   :  { %s4211_s20 = sld [smem:[%s4844_s0 + %s4083_s15]]   ;;  %s4087_s15 = smov 23  }
  0x1b   :  { %s4216_s27 = sld [smem:[%s4844_s0 + %s4084_s22]]   ;;  %s4088_s22 = smov 24  }
  0x1c   :  { %s4221_s4 = sld [smem:[%s4844_s0 + %s4085_s28]]   ;;  %s4089_s28 = smov 25  }
  0x1f   :  { %4856 = sst [smem:[#allocation9_spill]] %s4206_s12 }
  0x20   :  { %4857 = sst [smem:[#allocation10_spill]] %s4211_s20 }
  0x21   :  { %4858 = sst [smem:[#allocation11_spill]] %s4216_s27 }
  0x22   :  { %4859 = sst [smem:[#allocation12_spill]] %s4221_s4 }
  0x23   :  { %s4226_s12 = sld [smem:[%s4844_s0 + %s4086_s7]]   ;;  %s4090_s7 = smov 26  }
  0x24   :  { %s4231_s20 = sld [smem:[%s4844_s0 + %s4087_s15]]   ;;  %s4091_s15 = smov 27  }
  0x25   :  { %s4236_s27 = sld [smem:[%s4844_s0 + %s4088_s22]]   ;;  %s4092_s22 = smov 28  }
  0x26   :  { %s4241_s4 = sld [smem:[%s4844_s0 + %s4089_s28]]   ;;  %s4093_s28 = smov 29  }
  0x29   :  { %4860 = sst [smem:[#allocation13_spill]] %s4226_s12 }
  0x2a   :  { %4861 = sst [smem:[#allocation14_spill]] %s4231_s20 }
  0x2b   :  { %4862 = sst [smem:[#allocation15_spill]] %s4236_s27 }
  0x2c   :  { %4863 = sst [smem:[#allocation16_spill]] %s4241_s4 }
  0x2d   :  { %s4246_s12 = sld [smem:[%s4844_s0 + %s4090_s7]]   ;;  %s4094_s7 = smov 30  }
  0x2e   :  { %s4251_s20 = sld [smem:[%s4844_s0 + %s4091_s15]]   ;;  %s4095_s15 = smov 31  }
  0x2f   :  { %s4256_s27 = sld [smem:[%s4844_s0 + %s4092_s22]]   ;;  %s4096_s22 = smov 32  }
  0x30   :  { %s4261_s4 = sld [smem:[%s4844_s0 + %s4093_s28]]   ;;  %s4097_s28 = smov 33  }
  0x33   :  { %4864 = sst [smem:[#allocation17_spill]] %s4246_s12 }
  0x34   :  { %4865 = sst [smem:[#allocation18_spill]] %s4251_s20 }
  0x35   :  { %4866 = sst [smem:[#allocation19_spill]] %s4256_s27 }
  0x36   :  { %4867 = sst [smem:[#allocation20_spill]] %s4261_s4 }
  0x37   :  { %s4266_s12 = sld [smem:[%s4844_s0 + %s4094_s7]]   ;;  %s4098_s7 = smov 34  }
  0x38   :  { %s4271_s20 = sld [smem:[%s4844_s0 + %s4095_s15]]   ;;  %s4099_s15 = smov 35  }
  0x39   :  { %s4276_s27 = sld [smem:[%s4844_s0 + %s4096_s22]]  }
  0x3a   :  { %s4281_s4 = sld [smem:[%s4844_s0 + %s4097_s28]]  }
  0x3d   :  { %4868 = sst [smem:[#allocation21_spill]] %s4266_s12 }
  0x3e   :  { %4869 = sst [smem:[#allocation22_spill]] %s4271_s20 }
  0x3f   :  { %4870 = sst [smem:[#allocation23_spill]] %s4276_s27 }
  0x40   :  { %s4286_s12 = sld [smem:[%s4844_s0 + %s4098_s7]]  }
  0x41   :  { %s3348_s20 = sld [smem:[%s4844_s0 + %s4099_s15]]  }
  0x42   :  { %s4294_s27 = sld [smem:[%s4844_s0 + %s4100_s23]]  }
  0x43   :  { %78 = vsyncpa [#allocation3], 0  ;;  %s4101_s28 = smov [#allocation2]  }
  0x44   :  { %s155_s1 = sshll.u32 %s4101_s28, 4  ;;  %s156_s1 = int_to_ptr.vmem [resolvable:$true] %s155_s1 }
  0x47   :  { %s4041_s2 = scalar_lea.hbm %s3348_s20, 16 }
  0x48   :  { %p4042_p0 = scmp.ne.s32.totalorder %s3348_s20, %s4041_s2  ;;  %p4045_p1 = scmp.lt.u32.totalorder %s4041_s2, %s3348_s20 }
  0x4a   :  { %p4047_p2 = pnand %p4045_p1, %p4042_p0 }
  0x4c   :  { %4050 = shalt.err (!%p4047_p2)
}
  0x4d   :  { %s4051_s7 = scalar_lea.vmem %s156_s1, 16  ;;  %s4055_s10 = scalar_lea.vmem %s156_s1, 32 }
  0x4e   :  { %p4052_p3 = scmp.ne.s32.totalorder %s156_s1, %s4051_s7  ;;  %p4056_p4 = scmp.lt.s32.totalorder %s156_s1, %s156_s1 }
  0x4f   :  { %p4057_p5 = scmp.lt.s32.totalorder %s4055_s10, %s4051_s7 }
  0x51   :  { %p4058_p6 = por %p4057_p5, %p4056_p4 }
  0x53   :  { %p4059_p7 = pnand %p4058_p6, %p4052_p3 }
  0x55   :  { %4062 = shalt.err (!%p4059_p7)
}
  0x56   :  { %158 = dma.hbm_to_vmem [thread:$0]  %s3348_s20, 16, %s156_s1, [#allocation3]  }
  0x57   :  { %4063 = dma.done.wait [#allocation3], 16  }
  0x58   :  { %4064 = vsyncadd [#allocation3], 4294967280  ;;  %vm207_vm0 = vcmask 261120   ;;  %vm251_vm1 = vcmask 203776   ;;  %v163_v0 = vld [vmem:[%s4116_s5] sm:$0xff]  ;;  %v164_v2 = vld [vmem:[%s4116_s5 + $0x8] sm:$0xff] }
  0x59   :  { %v165_v1 = vld [vmem:[%s4121_s9] sm:$0xff]  ;;  %v208_v3 = vsel %vm207_vm0, %v163_v0, 0.0  ;;  %v166_v5 = vld [vmem:[%s4121_s9 + $0x8] sm:$0xff]  ;;  %v211_v6 = vsel %vm207_vm0, %v164_v2, 0.0  ;;  %v4102_v29 = vmov 0.0   ;;  %vm4103_vm2 = vmmov 0  }
  0x5a   :  { %v252_v4 = vsel %vm251_vm1, %v165_v1, 0.0  ;;  %209 = vadd.xlane.f32.xlu0 %v208_v3  ;;  %v255_v7 = vsel %vm251_vm1, %v166_v5, 0.0  ;;  %v3931_v28 = vld [vmem:[%s4146_s29] sm:$0xff]   ;;  %3560 = vmatprep.subr.bf16.mxu1 %v4102_v29  ;;  %v3932_v30 = vld [vmem:[%s4146_s29 + $0x8] sm:$0xff]   ;;  %vm379_vm3 = vcmask 1043456   ;;  %vm380_vm4 = vcmask 1044480  }
  0x5b   :  { %253 = vadd.xlane.f32.xlu1 %v252_v4  ;;  %3576 = vmatprep.subr.bf16.mxu0 %v4102_v29  ;;  %v3933_v31 = vld [vmem:[%s4166_s19] sm:$0xff]   ;;  %v4104_v32 = vmov 65535   ;;  %v3936_v34 = vld [vmem:[%s4166_s19 + $0x8] sm:$0x1f]   ;;  %vm494_vm5 = vcmask 64512   ;;  %s4105_s0 = smov 120  }
  0x5c   :  { %3561 = vmatpush3.bf16.msra.mxu1 %v3931_v28  ;;  %3564 = vmatprep.mubr.msk.bf16.mxu1 %vm4103_vm2, %v4102_v29  ;;  %v381_v33 = vsel %vm379_vm3, 4294967295, %v4104_v32  ;;  %v3350_v51 = vld [vmem:[%s4126_s13] ss:$0 sm:$0xff]  ;;  %s4106_s9 = smov 112   ;;  %s4107_s13 = smov 104   ;;  %vm1721_vm6 = vcmask 523264  }
  0x5d   :  { %3562 = vmatprep.subr.bf16.mxu1 %v4102_v29  ;;  %3580 = vmatprep.mubr.msk.bf16.mxu0 %vm4103_vm2, %v4102_v29  ;;  %v382_v35 = vsel %vm380_vm4, %v381_v33, 0  ;;  %v3351_v57 = vld [vmem:[%s4131_s17] ss:$0 sm:$0xff]  ;;  %s4871_s17 = sld [smem:[#allocation7_spill]]  ;;  %s4875_s29 = sld [smem:[#allocation8_spill]] }
  0x5e   :  { %212 = vadd.xlane.f32.xlu0 %v211_v6  ;;  %3577 = vmatpush3.bf16.msra.mxu0 %v3933_v31  ;;  %v445_v36 = vand.u32 %v3936_v34, %v382_v35  ;;  %v3352_v58 = vld [vmem:[%s4136_s21] ss:$0 sm:$0xff]  ;;  %s4872_s21 = sld [smem:[#allocation9_spill]]  ;;  %s4879_s19 = sld [smem:[#allocation11_spill]] }
  0x5f   :  { %256 = vadd.xlane.f32.xlu1 %v255_v7  ;;  %3578 = vmatprep.subr.bf16.mxu0 %v4102_v29  ;;  %v3353_v3 = vld [vmem:[%s4141_s25] ss:$0 sm:$0xff]  ;;  %s4874_s25 = sld [smem:[#allocation6_spill]]  ;;  %s4883_s20 = sld [smem:[#allocation18_spill]] }
  0x60   :  { %3563 = vmatpush3.bf16.msra.mxu1 %v3932_v30  ;;  %s4884_s11 = sld [smem:[#allocation14_spill]]  ;;  %s4885_s15 = sld [smem:[#allocation19_spill]] }
  0x61   :  { %3568 = vmatprep.subr.bf16.mxu1 %v4102_v29  ;;  %s4886_s16 = sld [smem:[#allocation20_spill]]  ;;  %s4887_s18 = sld [smem:[#allocation23_spill]] }
  0x62   :  { %3579 = vmatpush3.bf16.msra.mxu0 %v445_v36  ;;  %s4888_s23 = sld [smem:[#allocation21_spill]]  ;;  %s4889_s22 = sld [smem:[#allocation22_spill]] }
  0x63   :  { %3590 = vmatprep.subr.bf16.mxu0 %v4102_v29 }
  0xe7   :  { %v210_v8 = vpop.xlane.xlu0 %209 }
  0xe8   :  { %v254_v9 = vpop.xlane.xlu1 %253  ;;  %v215_v10 = vmul.f32 0.03125, %v210_v8 }
  0xe9   :  { %v259_v11 = vmul.f32 0.04, %v254_v9 }
  0xea   :  { %v217_v12 = vsub.f32 %v163_v0, %v215_v10 }
  0xeb   :  { %v4304_v13 = vsub.f32 %v165_v1, %v259_v11  ;;  %v213_v14 = vpop.xlane.xlu0 %212  ;;  %v3934_v1 = vld [vmem:[%s4156_s8] sm:$0xff]  }
  0xec   :  { %v257_v15 = vpop.xlane.xlu1 %256  ;;  %v216_v16 = vmul.f32 0.03125, %v213_v14  ;;  %v219_v18 = vmul.f32 %v217_v12, %v217_v12 }
  0xed   :  { %v260_v17 = vmul.f32 0.04, %v257_v15  ;;  %v263_v19 = vmul.f32 %v4304_v13, %v4304_v13 }
  0xee   :  { %v218_v20 = vsub.f32 %v164_v2, %v216_v16  ;;  %v221_v22 = vsel %vm207_vm0, %v219_v18, 0.0  ;;  %v3935_v2 = vld [vmem:[%s4156_s8 + $0x8] sm:$0x1f]   ;;  %s4877_s8 = sld [smem:[#allocation13_spill]] }
  0xef   :  { %v4308_v21 = vsub.f32 %v166_v5, %v260_v17  ;;  %222 = vadd.xlane.f32.xlu0 %v221_v22  ;;  %v265_v23 = vsel %vm251_vm1, %v263_v19, 0.0  ;;  %v384_v8 = vand.u32 %v3935_v2, %v382_v35  ;;  %v3358_v17 = vld [vmem:[%s4161_s14] ss:$0 sm:$0xff]  ;;  %s4878_s14 = sld [smem:[#allocation17_spill]] }
  0xf0   :  { %v220_v24 = vmul.f32 %v218_v20, %v218_v20  ;;  %v3362_v22 = vld [vmem:[%s4171_s24] ss:$0 sm:$0xff]  ;;  %s4880_s24 = sld [smem:[#allocation12_spill]] }
  0xf1   :  { %v264_v25 = vmul.f32 %v4308_v21, %v4308_v21 }
  0xf2   :  { %v224_v26 = vsel %vm207_vm0, %v220_v24, 0.0 }
  0xf3   :  { %266 = vadd.xlane.f32.xlu0 %v265_v23  ;;  %225 = vadd.xlane.f32.xlu1 %v224_v26  ;;  %v268_v27 = vsel %vm251_vm1, %v264_v25, 0.0 }
  0xf7   :  { %269 = vadd.xlane.f32.xlu1 %v268_v27  ;;  %v3354_v27 = vld [vmem:[%s4151_s3] ss:$0 sm:$0xff]  ;;  %s4876_s3 = sld [smem:[#allocation10_spill]] }
 0x17c   :  { %v223_v37 = vpop.xlane.xlu0 %222 }
 0x17d   :  { %v227_v38 = vmul.f32 0.03125, %v223_v37 }
 0x17f   :  { %v229_v39 = vadd.f32 1e-05, %v227_v38 }
 0x180   :  { %v226_v40 = vpop.xlane.xlu1 %225  ;;  %v267_v41 = vpop.xlane.xlu0 %266 }
 0x181   :  { %3955 = vrsqrt.f32 %v229_v39  ;;  %v228_v42 = vmul.f32 0.03125, %v226_v40  ;;  %v271_v43 = vmul.f32 0.04, %v267_v41 }
 0x183   :  { %v230_v44 = vadd.f32 1e-05, %v228_v42  ;;  %v273_v45 = vadd.f32 1e-05, %v271_v43 }
 0x184   :  { %v270_v46 = vpop.xlane.xlu1 %269 }
 0x185   :  { %3957 = vrsqrt.f32 %v230_v44  ;;  %v272_v47 = vmul.f32 0.04, %v270_v46 }
 0x186   :  { %3959 = vrsqrt.f32 %v273_v45 }
 0x187   :  { %v274_v48 = vadd.f32 1e-05, %v272_v47 }
 0x189   :  { %3961 = vrsqrt.f32 %v274_v48 }
 0x18b   :  { %v3956_v49 = vpop.eup %3955 }
 0x18c   :  { %v233_v50 = vmul.f32 %v3956_v49, %v217_v12 }
 0x18e   :  { %v241_v55 = vmul.f32 %v3350_v51, %v233_v50 }
 0x18f   :  { %v3958_v52 = vpop.eup %3957 }
 0x190   :  { %v3960_v53 = vpop.eup %3959  ;;  %v234_v54 = vmul.f32 %v3958_v52, %v218_v20  ;;  %v249_v62 = vadd.f32 %v3351_v57, %v241_v55 }
 0x191   :  { %v277_v56 = vmul.f32 %v3960_v53, %v4304_v13 }
 0x192   :  { %v242_v59 = vmul.f32 %v3350_v51, %v234_v54 }
 0x193   :  { %v3962_v60 = vpop.eup %3961  ;;  %v285_v0 = vmul.f32 %v3352_v58, %v277_v56 }
 0x194   :  { %v278_v61 = vmul.f32 %v3962_v60, %v4308_v21  ;;  %v250_v63 = vadd.f32 %v3351_v57, %v242_v59 }
 0x195   :  { %v293_v6 = vadd.f32 %v3353_v3, %v285_v0 }
 0x196   :  { %v295_v4 = vpack.c.bf16 %v250_v63, %v249_v62  ;;  %v286_v5 = vmul.f32 %v3352_v58, %v278_v61 }
 0x198   :  { %3565 = vmatmul.mubr.msk.bf16.vlgmr.msra.gmra.mrb[0].mxu1 %vm207_vm0, %v295_v4  ;;  %v294_v7 = vadd.f32 %v3353_v3, %v286_v5 }
 0x199   :  { %3569 = vmatpush3.bf16.msra.mxu1 %v3934_v1  ;;  %3572 = vmatprep.mubr.msk.bf16.mxu1 %vm4103_vm2, %v4102_v29 }
 0x19a   :  { %3570 = vmatprep.subr.bf16.mxu1 %v4102_v29  ;;  %v358_v9 = vpack.c.bf16 %v294_v7, %v293_v6 }
 0x19c   :  { %3581 = vmatmul.mubr.msk.bf16.vlgmr.msra.gmra.mrb[0].mxu0 %vm251_vm1, %v358_v9 }
 0x19d   :  { %3571 = vmatpush3.bf16.msra.mxu1 %v384_v8  ;;  %3592 = vmatprep.mubr.msk.bf16.mxu0 %vm4103_vm2, %v4102_v29 }
 0x19e   :  { %3584 = vmatprep.subr.bf16.mxu1 %v4102_v29 }
 0x1a0   :  { %3573 = vmatmul.mubr.msk.bf16.vlgmr.msra.gmra.mrb[4].mxu1 %vm251_vm1, %v358_v9 }
 0x1a1   :  { %3586 = vmatprep.mubr.msk.bf16.mxu1 %vm4103_vm2, %v4102_v29 }
 0x26b   :  { %v351_v10 = vpop.f32.mrb[0].mxu1 }
 0x26c   :  { %v3566_v11 = vpop.f32.mrb[1].mxu1  ;;  %v352_v32 = vadd.f32 %v3354_v27, %v351_v10 }
 0x26d   :  { %v354_v12 = vpop.f32.mrb[2].mxu1 }
 0x26e   :  { %v3567_v13 = vpop.f32.mrb[3].mxu1  ;;  %v355_v35 = vadd.f32 %v3354_v27, %v354_v12  ;;  %v4365_v37 = vpack.c.bf16 %v352_v32, %v352_v32 }
 0x26f   :  { %v481_v14 = vpop.f32.mrb[0].mxu0 }
 0x270   :  { %v3582_v15 = vpop.f32.mrb[1].mxu0  ;;  %v482_v28 = vadd.f32 %v3362_v22, %v481_v14  ;;  %v4369_v39 = vpack.c.bf16 %v355_v35, %v355_v35 }
 0x271   :  { %v484_v16 = vpop.f32.mrb[2].mxu0 }
 0x272   :  { %v3583_v18 = vpop.f32.mrb[3].mxu0  ;;  %v485_v33 = vadd.f32 %v3362_v22, %v484_v16  ;;  %v4362_v36 = vpack.c.bf16 %v482_v28, %v482_v28 }
 0x273   :  { %v420_v19 = vpop.f32.mrb[4].mxu1 }
 0x274   :  { %v421_v20 = vadd.f32 %v3358_v17, %v420_v19  ;;  %v3574_v21 = vpop.f32.mrb[5].mxu1  ;;  %v4367_v38 = vpack.c.bf16 %v485_v33, %v485_v33  ;;  %v617_v40 = vsel %vm379_vm3, %v4362_v36, 0 }
 0x275   :  { %v423_v23 = vpop.f32.mrb[6].mxu1 }
 0x276   :  { %v4352_v24 = vpack.c.bf16 %v421_v20, %v421_v20  ;;  %v424_v25 = vadd.f32 %v3358_v17, %v423_v23  ;;  %v3575_v26 = vpop.f32.mrb[7].mxu1  ;;  %v663_v41 = vsel %vm379_vm3, %v4367_v38, 0 }
 0x278   :  { %v4355_v30 = vpack.c.bf16 %v424_v25, %v424_v25  ;;  %v499_v31 = vsel %vm494_vm5, %v4352_v24, 0 }
 0x279   :  { %3585 = vmatpush3.bf16.xpose.msra.mxu1 %v499_v31 }
 0x27a   :  { %v545_v34 = vsel %vm494_vm5, %v4355_v30, 0  ;;  %3596 = vmatprep.subr.bf16.mxu1 %v4102_v29 }
 0x27b   :  { %3591 = vmatpush3.bf16.xpose.msra.mxu0 %v545_v34 }
 0x27c   :  { %3602 = vmatprep.subr.bf16.mxu0 %v4102_v29 }
 0x280   :  { %3587 = vmatmul.mubr.msk.bf16.vlgmr.msra.gmra.mrb[8].mxu1 %vm494_vm5, %v4365_v37 }
 0x281   :  { %3597 = vmatpush3.bf16.msra.mxu1 %v617_v40  ;;  %3598 = vmatprep.mubr.msk.bf16.mxu1 %vm4103_vm2, %v4102_v29 }
 0x282   :  { %3593 = vmatmul.mubr.msk.bf16.vlgmr.msra.gmra.mrb[4].mxu0 %vm494_vm5, %v4369_v39  ;;  %3608 = vmatprep.subr.bf16.mxu1 %v4102_v29 }
 0x283   :  { %3603 = vmatpush3.bf16.msra.mxu0 %v663_v41  ;;  %3604 = vmatprep.mubr.msk.bf16.mxu0 %vm4103_vm2, %v4102_v29 }
 0x284   :  { %3614 = vmatprep.subr.bf16.mxu0 %v4102_v29 }
 0x353   :  { %v535_v42 = vpop.f32.mrb[8].mxu1 }
 0x354   :  { %v587_v43 = vmul.f32 0.35355338, %v535_v42  ;;  %v3588_v44 = vpop.f32.mrb[9].mxu1 }
 0x355   :  { %v538_v45 = vpop.f32.mrb[10].mxu1  ;;  %v581_v46 = vpop.f32.mrb[4].mxu0 }
 0x356   :  { %v588_v47 = vmul.f32 0.35355338, %v581_v46  ;;  %v3589_v48 = vpop.f32.mrb[11].mxu1  ;;  %v3594_v49 = vpop.f32.mrb[5].mxu0  ;;  %v589_v50 = vsel %vm494_vm5, %v587_v43, -inf }
 0x357   :  { %v584_v51 = vpop.f32.mrb[6].mxu0  ;;  %590 = vmax.xlane.f32.xlu0 %v589_v50 }
 0x358   :  { %v3595_v52 = vpop.f32.mrb[7].mxu0  ;;  %v592_v53 = vsel %vm494_vm5, %v588_v47, -inf }
 0x359   :  { %593 = vmax.xlane.f32.xlu1 %v592_v53 }
 0x36a   :  { %762 = vrot.lane.b32.xlu1 %v4355_v30, %s4105_s0 }
 0x3e4   :  { %v591_v54 = vpop.xlane.xlu0 %590 }
 0x3e5   :  { %v595_v55 = vsub.f32 %v587_v43, %v591_v54 }
 0x3e6   :  { %v594_v56 = vpop.xlane.xlu1 %593 }
 0x3e7   :  { %v597_v57 = vmul.f32 1.442695, %v595_v55  ;;  %v596_v58 = vsub.f32 %v588_v47, %v594_v56 }
 0x3e9   :  { %3963 = vpow2.f32 %v597_v57  ;;  %v599_v59 = vmul.f32 1.442695, %v596_v58 }
 0x3ea   :  { %v763_v0 = vpop.permute.xlu1 %762 }
 0x3eb   :  { %3965 = vpow2.f32 %v599_v59  ;;  %v768_v11 = vsel %vm494_vm5, %v763_v0, 0  ;;  %v187_v59 = vld [vmem:[%s4176_s30 + $0x4] sm:$0xf]  ;;  %v186_v0 = vld [vmem:[%s4176_s30] sm:$0xf] }
 0x3f3   :  { %v3964_v60 = vpop.eup %3963 }
 0x3f4   :  { %v601_v61 = vsel %vm494_vm5, %v3964_v60, 0.0 }
 0x3f5   :  { %v3966_v62 = vpop.eup %3965  ;;  %602 = vadd.xlane.f32.xlu0 %v601_v61 }
 0x3f6   :  { %v604_v63 = vsel %vm494_vm5, %v3966_v62, 0.0 }
 0x3f7   :  { %605 = vadd.xlane.f32.xlu1 %v604_v63 }
 0x408   :  { %707 = vrot.lane.b32.xlu1 %v4365_v37, %s4105_s0 }
 0x40b   :  { %710 = vrot.lane.b32.xlu0 %v4352_v24, %s4105_s0 }
 0x40c   :  { %759 = vrot.lane.b32.xlu1 %v4369_v39, %s4105_s0 }
 0x482   :  { %v603_v1 = vpop.xlane.xlu0 %602 }
 0x483   :  { %3967 = vrcp.f32 %v603_v1 }
 0x484   :  { %v606_v2 = vpop.xlane.xlu1 %605 }
 0x485   :  { %3969 = vrcp.f32 %v606_v2 }
 0x486   :  { %v711_v6 = vpop.permute.xlu0 %710 }
 0x487   :  { %v716_v9 = vsel %vm494_vm5, %v711_v6, 0 }
 0x488   :  { %v708_v12 = vpop.permute.xlu1 %707 }
 0x48c   :  { %v760_v13 = vpop.permute.xlu1 %759 }
 0x48d   :  { %v3968_v3 = vpop.eup %3967 }
 0x48e   :  { %v609_v4 = vmul.f32 %v3968_v3, %v3964_v60  ;;  %v986_v3 = vsel %vm379_vm3, %v186_v0, 0 }
 0x48f   :  { %v3970_v5 = vpop.eup %3969 }
 0x490   :  { %v610_v7 = vmul.f32 %v3970_v5, %v3966_v62  ;;  %v611_v8 = vpack.c.bf16 %v609_v4, %v609_v4  ;;  %v939_v62 = vsel %vm379_vm3, %v187_v59, 0 }
 0x492   :  { %3599 = vmatmul.mubr.msk.bf16.vlgmr.msra.gmra.mrb[12].mxu1 %vm494_vm5, %v611_v8  ;;  %v612_v10 = vpack.c.bf16 %v610_v7, %v610_v7 }
 0x493   :  { %3609 = vmatpush3.bf16.xpose.msra.mxu1 %v716_v9  ;;  %3610 = vmatprep.mubr.msk.bf16.mxu1 %vm4103_vm2, %v4102_v29 }
 0x494   :  { %3605 = vmatmul.mubr.msk.bf16.vlgmr.msra.gmra.mrb[8].mxu0 %vm494_vm5, %v612_v10  ;;  %3620 = vmatprep.subr.bf16.mxu1 %v4102_v29 }
 0x495   :  { %3615 = vmatpush3.bf16.xpose.msra.mxu0 %v768_v11  ;;  %3616 = vmatprep.mubr.msk.bf16.mxu0 %vm4103_vm2, %v4102_v29 }
 0x496   :  { %3626 = vmatprep.subr.bf16.mxu0 %v4102_v29 }
 0x49a   :  { %3611 = vmatmul.mubr.msk.bf16.vlgmr.msra.gmra.mrb[16].mxu1 %vm494_vm5, %v708_v12 }
 0x49b   :  { %3622 = vmatprep.mubr.msk.bf16.mxu1 %vm4103_vm2, %v4102_v29 }
 0x49c   :  { %3617 = vmatmul.mubr.msk.bf16.vlgmr.msra.gmra.mrb[12].mxu0 %vm494_vm5, %v760_v13 }
 0x49d   :  { %3628 = vmatprep.mubr.msk.bf16.mxu0 %vm4103_vm2, %v4102_v29 }
 0x565   :  { %v4413_v14 = vpop.f32.mrb[12].mxu1 }
 0x566   :  { %v3600_v15 = vpop.f32.mrb[13].mxu1 }
 0x567   :  { %v656_v16 = vpop.f32.mrb[14].mxu1  ;;  %v4415_v17 = vpop.f32.mrb[8].mxu0 }
 0x568   :  { %v705_v18 = vpack.c.bf16 %v4415_v17, %v4413_v14  ;;  %v3601_v19 = vpop.f32.mrb[15].mxu1  ;;  %v3606_v20 = vpop.f32.mrb[9].mxu0 }
 0x569   :  { %v702_v21 = vpop.f32.mrb[10].mxu0 }
 0x56a   :  { %v3607_v22 = vpop.f32.mrb[11].mxu0 }
 0x56d   :  { %v752_v23 = vpop.f32.mrb[16].mxu1 }
 0x56e   :  { %v810_v25 = vmul.f32 0.35355338, %v752_v23  ;;  %v3612_v26 = vpop.f32.mrb[17].mxu1 }
 0x56f   :  { %v755_v27 = vpop.f32.mrb[18].mxu1  ;;  %v804_v28 = vpop.f32.mrb[12].mxu0 }
 0x570   :  { %v811_v31 = vmul.f32 0.35355338, %v804_v28  ;;  %v3613_v32 = vpop.f32.mrb[19].mxu1  ;;  %v3618_v33 = vpop.f32.mrb[13].mxu0  ;;  %v812_v34 = vsel %vm494_vm5, %v810_v25, -inf }
 0x571   :  { %v807_v35 = vpop.f32.mrb[14].mxu0  ;;  %813 = vmax.xlane.f32.xlu0 %v812_v34 }
 0x572   :  { %v3619_v40 = vpop.f32.mrb[15].mxu0  ;;  %v815_v41 = vsel %vm494_vm5, %v811_v31, -inf }
 0x573   :  { %816 = vmax.xlane.f32.xlu1 %v815_v41 }
 0x584   :  { %886 = vrot.lane.b32.xlu1 %v4367_v38, %s4105_s0 }
 0x588   :  { %1031 = vrot.lane.b32.xlu1 %v4352_v24, %s4106_s9 }
 0x58c   :  { %1081 = vrot.lane.b32.xlu1 %v4355_v30, %s4106_s9 }
 0x590   :  { %1079 = vrot.lane.b32.xlu1 %v4369_v39, %s4106_s9 }
 0x5fe   :  { %v814_v42 = vpop.xlane.xlu0 %813 }
 0x5ff   :  { %v818_v43 = vsub.f32 %v810_v25, %v814_v42 }
 0x600   :  { %v817_v44 = vpop.xlane.xlu1 %816 }
 0x601   :  { %v820_v45 = vmul.f32 1.442695, %v818_v43  ;;  %v819_v46 = vsub.f32 %v811_v31, %v817_v44 }
 0x603   :  { %3971 = vpow2.f32 %v820_v45  ;;  %v822_v47 = vmul.f32 1.442695, %v819_v46 }
 0x604   :  { %v887_v48 = vpop.permute.xlu1 %886 }
 0x605   :  { %3973 = vpow2.f32 %v822_v47  ;;  %v892_v49 = vsel %vm379_vm3, %v887_v48, 0 }
 0x606   :  { %3627 = vmatpush3.bf16.msra.mxu0 %v892_v49 }
 0x607   :  { %3638 = vmatprep.subr.bf16.mxu0 %v4102_v29 }
 0x608   :  { %v1032_v4 = vpop.permute.xlu1 %1031 }
 0x609   :  { %v1037_v16 = vsel %vm494_vm5, %v1032_v4, 0 }
 0x60c   :  { %v1082_v5 = vpop.permute.xlu1 %1081 }
 0x60d   :  { %v3972_v50 = vpop.eup %3971  ;;  %v1087_v6 = vsel %vm494_vm5, %v1082_v5, 0 }
 0x60e   :  { %v824_v51 = vsel %vm494_vm5, %v3972_v50, 0.0 }
 0x60f   :  { %v3974_v52 = vpop.eup %3973  ;;  %825 = vadd.xlane.f32.xlu0 %v824_v51 }
 0x610   :  { %v827_v53 = vsel %vm494_vm5, %v3974_v52, 0.0  ;;  %v1080_v7 = vpop.permute.xlu1 %1079 }
 0x613   :  { %828 = vadd.xlane.f32.xlu0 %v827_v53 }
 0x629   :  { %837 = vrot.lane.b32.xlu0 %v4362_v36, %s4105_s0 }
 0x62d   :  { %1029 = vrot.lane.b32.xlu0 %v4365_v37, %s4106_s9 }
 0x69c   :  { %v826_v54 = vpop.xlane.xlu0 %825 }
 0x69d   :  { %3975 = vrcp.f32 %v826_v54 }
 0x6a0   :  { %v829_v55 = vpop.xlane.xlu0 %828 }
 0x6a1   :  { %3977 = vrcp.f32 %v829_v55 }
 0x6a4   :  { %v838_v56 = vpop.permute.xlu0 %837 }
 0x6a5   :  { %v843_v57 = vsel %vm379_vm3, %v838_v56, 0 }
 0x6a6   :  { %3621 = vmatpush3.bf16.msra.mxu1 %v843_v57 }
 0x6a7   :  { %v3976_v58 = vpop.eup %3975  ;;  %3632 = vmatprep.subr.bf16.mxu1 %v4102_v29 }
 0x6a8   :  { %v832_v60 = vmul.f32 %v3976_v58, %v3972_v50  ;;  %v1030_v20 = vpop.permute.xlu0 %1029 }
 0x6aa   :  { %v834_v61 = vpack.c.bf16 %v832_v60, %v832_v60 }
 0x6ab   :  { %v3978_v63 = vpop.eup %3977 }
 0x6ac   :  { %v833_v1 = vmul.f32 %v3978_v63, %v3974_v52  ;;  %3623 = vmatmul.mubr.msk.bf16.vlgmr.msra.gmra.mrb[20].mxu1 %vm494_vm5, %v834_v61 }
 0x6ad   :  { %3633 = vmatpush3.bf16.msra.mxu1 %v939_v62  ;;  %3634 = vmatprep.mubr.msk.bf16.mxu1 %vm4103_vm2, %v4102_v29 }
 0x6ae   :  { %v835_v2 = vpack.c.bf16 %v833_v1, %v833_v1  ;;  %3644 = vmatprep.subr.bf16.mxu1 %v4102_v29 }
 0x6b0   :  { %3629 = vmatmul.mubr.msk.bf16.vlgmr.msra.gmra.mrb[16].mxu0 %vm494_vm5, %v835_v2 }
 0x6b1   :  { %3639 = vmatpush3.bf16.msra.mxu0 %v986_v3  ;;  %3640 = vmatprep.mubr.msk.bf16.mxu0 %vm4103_vm2, %v4102_v29 }
 0x6b2   :  { %3650 = vmatprep.subr.bf16.mxu0 %v4102_v29 }
 0x6b8   :  { %3641 = vmatmul.mubr.msk.bf16.vlgmr.msra.gmra.mrb[20].mxu0 %vm494_vm5, %v705_v18 }
 0x6b9   :  { %3652 = vmatprep.mubr.msk.bf16.mxu0 %vm4103_vm2, %v4102_v29 }
 0x6ba   :  { %3651 = vmatpush3.bf16.xpose.msra.mxu0 %v1087_v6 }
 0x6bb   :  { %3662 = vmatprep.subr.bf16.mxu0 %v4102_v29 }
 0x6c1   :  { %3653 = vmatmul.mubr.msk.bf16.vlgmr.msra.gmra.mrb[24].mxu0 %vm494_vm5, %v1080_v7 }
 0x6c2   :  { %3664 = vmatprep.mubr.msk.bf16.mxu0 %vm4103_vm2, %v4102_v29 }
 0x77f   :  { %v879_v8 = vpop.f32.mrb[20].mxu1 }
 0x780   :  { %v3624_v9 = vpop.f32.mrb[21].mxu1 }
 0x781   :  { %v882_v10 = vpop.f32.mrb[22].mxu1  ;;  %v188_v9 = vld [vmem:[%s4176_s30 + $0x8] sm:$0xf] }
 0x782   :  { %v3625_v11 = vpop.f32.mrb[23].mxu1  ;;  %v1256_v10 = vsel %vm379_vm3, %v188_v9, 0 }
 0x783   :  { %v928_v12 = vpop.f32.mrb[16].mxu0 }
 0x784   :  { %v934_v13 = vpack.c.bf16 %v928_v12, %v879_v8  ;;  %v3630_v14 = vpop.f32.mrb[17].mxu0 }
 0x785   :  { %v931_v15 = vpop.f32.mrb[18].mxu0 }
 0x786   :  { %v3631_v17 = vpop.f32.mrb[19].mxu0  ;;  %3635 = vmatmul.mubr.msk.bf16.vlgmr.msra.gmra.mrb[24].mxu1 %vm494_vm5, %v934_v13 }
 0x787   :  { %3645 = vmatpush3.bf16.xpose.msra.mxu1 %v1037_v16  ;;  %3646 = vmatprep.mubr.msk.bf16.mxu1 %vm4103_vm2, %v4102_v29 }
 0x788   :  { %3656 = vmatprep.subr.bf16.mxu1 %v4102_v29 }
 0x78b   :  { %v1022_v18 = vpop.f32.mrb[20].mxu0 }
 0x78c   :  { %v3642_v19 = vpop.f32.mrb[21].mxu0 }
 0x78d   :  { %v1025_v21 = vpop.f32.mrb[22].mxu0 }
 0x78e   :  { %v3643_v22 = vpop.f32.mrb[23].mxu0  ;;  %3647 = vmatmul.mubr.msk.bf16.vlgmr.msra.gmra.mrb[28].mxu1 %vm494_vm5, %v1030_v20 }
 0x78f   :  { %3658 = vmatprep.mubr.msk.bf16.mxu1 %vm4103_vm2, %v4102_v29 }
 0x794   :  { %v1123_v23 = vpop.f32.mrb[24].mxu0 }
 0x795   :  { %v1130_v25 = vmul.f32 0.35355338, %v1123_v23  ;;  %v3654_v26 = vpop.f32.mrb[25].mxu0 }
 0x796   :  { %v1126_v27 = vpop.f32.mrb[26].mxu0 }
 0x797   :  { %v3655_v28 = vpop.f32.mrb[27].mxu0  ;;  %v1134_v31 = vsel %vm494_vm5, %v1130_v25, -inf }
 0x798   :  { %1135 = vmax.xlane.f32.xlu1 %v1134_v31 }
 0x7a9   :  { %1203 = vrot.lane.b32.xlu1 %v4367_v38, %s4106_s9 }
 0x7ad   :  { %1303 = vrot.lane.b32.xlu1 %v4352_v24, %s4107_s13 }
 0x7b1   :  { %1353 = vrot.lane.b32.xlu1 %v4355_v30, %s4107_s13 }
 0x7b5   :  { %1351 = vrot.lane.b32.xlu1 %v4369_v39, %s4107_s13 }
 0x825   :  { %v1136_v32 = vpop.xlane.xlu1 %1135 }
 0x826   :  { %v1138_v35 = vsub.f32 %v1130_v25, %v1136_v32 }
 0x828   :  { %v1141_v40 = vmul.f32 1.442695, %v1138_v35 }
 0x829   :  { %v1204_v33 = vpop.permute.xlu1 %1203 }
 0x82a   :  { %v1209_v34 = vsel %vm379_vm3, %v1204_v33, 0  ;;  %3979 = vpow2.f32 %v1141_v40 }
 0x82b   :  { %3663 = vmatpush3.bf16.msra.mxu0 %v1209_v34 }
 0x82c   :  { %3674 = vmatprep.subr.bf16.mxu0 %v4102_v29 }
 0x82d   :  { %v1304_v60 = vpop.permute.xlu1 %1303 }
 0x82e   :  { %v1309_v62 = vsel %vm494_vm5, %v1304_v60, 0 }
 0x831   :  { %v1354_v17 = vpop.permute.xlu1 %1353 }
 0x832   :  { %v1359_v22 = vsel %vm494_vm5, %v1354_v17, 0 }
 0x834   :  { %v3980_v50 = vpop.eup %3979 }
 0x835   :  { %v1146_v51 = vsel %vm494_vm5, %v3980_v50, 0.0  ;;  %v1352_v25 = vpop.permute.xlu1 %1351 }
 0x859   :  { %v975_v41 = vpop.f32.mrb[24].mxu1 }
 0x85a   :  { %v4481_v42 = vadd.f32 %v1022_v18, %v975_v41  ;;  %v3636_v43 = vpop.f32.mrb[25].mxu1 }
 0x85b   :  { %v978_v24 = vpop.f32.mrb[26].mxu1 }
 0x85c   :  { %v4483_v44 = vadd.f32 %v1025_v21, %v978_v24  ;;  %v3637_v30 = vpop.f32.mrb[27].mxu1 }
 0x861   :  { %v1073_v45 = vpop.f32.mrb[28].mxu1 }
 0x862   :  { %v1129_v39 = vmul.f32 0.35355338, %v1073_v45  ;;  %v3648_v46 = vpop.f32.mrb[29].mxu1 }
 0x863   :  { %v1076_v47 = vpop.f32.mrb[30].mxu1 }
 0x864   :  { %v3649_v48 = vpop.f32.mrb[31].mxu1  ;;  %v1131_v49 = vsel %vm494_vm5, %v1129_v39, -inf }
 0x865   :  { %1132 = vmax.xlane.f32.xlu0 %v1131_v49 }
 0x869   :  { %1147 = vadd.xlane.f32.xlu0 %v1146_v51 }
 0x8f2   :  { %v1133_v52 = vpop.xlane.xlu0 %1132 }
 0x8f3   :  { %v1137_v53 = vsub.f32 %v1129_v39, %v1133_v52 }
 0x8f5   :  { %v1139_v54 = vmul.f32 1.442695, %v1137_v53 }
 0x8f6   :  { %v1148_v55 = vpop.xlane.xlu0 %1147 }
 0x8f7   :  { %3981 = vpow2.f32 %v1139_v54 }
 0x8f8   :  { %3983 = vrcp.f32 %v1148_v55 }
 0x901   :  { %v3982_v56 = vpop.eup %3981 }
 0x902   :  { %v3984_v57 = vpop.eup %3983  ;;  %v1143_v58 = vsel %vm494_vm5, %v3982_v56, 0.0 }
 0x903   :  { %v1152_v59 = vmul.f32 %v3984_v57, %v3980_v50  ;;  %1144 = vadd.xlane.f32.xlu0 %v1143_v58 }
 0x905   :  { %v1154_v61 = vpack.c.bf16 %v1152_v59, %v1152_v59 }
 0x907   :  { %3665 = vmatmul.mubr.msk.bf16.vlgmr.msra.gmra.mrb[28].mxu0 %vm494_vm5, %v1154_v61  ;;  %v189_v61 = vld [vmem:[%s4176_s30 + $0xc] sm:$0xf]  ;;  %s4881_s30 = sld [smem:[#allocation15_spill]] }
 0x908   :  { %3675 = vmatpush3.bf16.xpose.msra.mxu0 %v1309_v62  ;;  %3676 = vmatprep.mubr.msk.bf16.mxu0 %vm4103_vm2, %v4102_v29  ;;  %v1528_v62 = vsel %vm379_vm3, %v189_v61, 0 }
 0x909   :  { %3686 = vmatprep.subr.bf16.mxu0 %v4102_v29 }
 0x919   :  { %1155 = vrot.lane.b32.xlu0 %v4362_v36, %s4106_s9 }
 0x91d   :  { %1301 = vrot.lane.b32.xlu0 %v4365_v37, %s4107_s13 }
 0x990   :  { %v1145_v63 = vpop.xlane.xlu0 %1144 }
 0x991   :  { %3985 = vrcp.f32 %v1145_v63 }
 0x994   :  { %v1156_v0 = vpop.permute.xlu0 %1155 }
 0x995   :  { %v1161_v1 = vsel %vm379_vm3, %v1156_v0, 0 }
 0x996   :  { %3657 = vmatpush3.bf16.msra.mxu1 %v1161_v1 }
 0x997   :  { %3668 = vmatprep.subr.bf16.mxu1 %v4102_v29 }
 0x998   :  { %v1302_v2 = vpop.permute.xlu0 %1301 }
 0x999   :  { %3677 = vmatmul.mubr.msk.bf16.vlgmr.msra.gmra.mrb[32].mxu0 %vm494_vm5, %v1302_v2 }
 0x99a   :  { %3688 = vmatprep.mubr.msk.bf16.mxu0 %vm4103_vm2, %v4102_v29 }
 0x99b   :  { %v3986_v3 = vpop.eup %3985 }
 0x99c   :  { %v1151_v4 = vmul.f32 %v3986_v3, %v3982_v56 }
 0x99e   :  { %v1153_v5 = vpack.c.bf16 %v1151_v4, %v1151_v4 }
 0x9a0   :  { %3659 = vmatmul.mubr.msk.bf16.vlgmr.msra.gmra.mrb[32].mxu1 %vm494_vm5, %v1153_v5 }
 0x9a1   :  { %3670 = vmatprep.mubr.msk.bf16.mxu1 %vm4103_vm2, %v4102_v29  ;;  %3669 = vmatpush3.bf16.msra.mxu1 %v1256_v10 }
 0x9a2   :  { %3680 = vmatprep.subr.bf16.mxu1 %v4102_v29 }
 0x9da   :  { %v1245_v37 = vpop.f32.mrb[28].mxu0 }
 0x9db   :  { %v3666_v6 = vpop.f32.mrb[29].mxu0 }
 0x9dc   :  { %v1248_v7 = vpop.f32.mrb[30].mxu0 }
 0x9dd   :  { %v3667_v8 = vpop.f32.mrb[31].mxu0  ;;  %v3386_v7 = vld [vmem:[%s4181_s6] ss:$0 sm:$0xff]  ;;  %s4882_s6 = sld [smem:[#allocation16_spill]] }
 0xa6c   :  { %v1345_v11 = vpop.f32.mrb[32].mxu0 }
 0xa6d   :  { %v1401_v12 = vmul.f32 0.35355338, %v1345_v11  ;;  %v3678_v13 = vpop.f32.mrb[33].mxu0 }
 0xa6e   :  { %v1348_v14 = vpop.f32.mrb[34].mxu0 }
 0xa6f   :  { %v3679_v15 = vpop.f32.mrb[35].mxu0  ;;  %v1403_v16 = vsel %vm494_vm5, %v1401_v12, -inf }
 0xa70   :  { %1404 = vmax.xlane.f32.xlu0 %v1403_v16  ;;  %v4039_v15 = vld [vmem:[%s4116_s5] sm:$0xff] }
 0xa73   :  { %v1197_v18 = vpop.f32.mrb[32].mxu1 }
 0xa74   :  { %v1251_v19 = vpack.c.bf16 %v1245_v37, %v1197_v18  ;;  %v3660_v20 = vpop.f32.mrb[33].mxu1  ;;  %v4040_v18 = vld [vmem:[%s4116_s5 + $0x8] sm:$0xff]  ;;  %s4873_s5 = sld [smem:[#allocation5_spill]] }
 0xa75   :  { %v1200_v21 = vpop.f32.mrb[34].mxu1 }
 0xa76   :  { %v3661_v23 = vpop.f32.mrb[35].mxu1  ;;  %3671 = vmatmul.mubr.msk.bf16.vlgmr.msra.gmra.mrb[36].mxu1 %vm494_vm5, %v1251_v19 }
 0xa77   :  { %3681 = vmatpush3.bf16.xpose.msra.mxu1 %v1359_v22  ;;  %3682 = vmatprep.mubr.msk.bf16.mxu1 %vm4103_vm2, %v4102_v29 }
 0xa78   :  { %3692 = vmatprep.subr.bf16.mxu1 %v4102_v29 }
 0xa7e   :  { %3683 = vmatmul.mubr.msk.bf16.vlgmr.msra.gmra.mrb[40].mxu1 %vm494_vm5, %v1352_v25 }
 0xa7f   :  { %3694 = vmatprep.mubr.msk.bf16.mxu1 %vm4103_vm2, %v4102_v29 }
 0xafd   :  { %v1405_v26 = vpop.xlane.xlu0 %1404 }
 0xafe   :  { %v1409_v27 = vsub.f32 %v1401_v12, %v1405_v26 }
 0xb00   :  { %v1411_v28 = vmul.f32 1.442695, %v1409_v27 }
 0xb02   :  { %3987 = vpow2.f32 %v1411_v28 }
 0xb0c   :  { %v3988_v31 = vpop.eup %3987 }
 0xb0d   :  { %v1415_v32 = vsel %vm494_vm5, %v3988_v31, 0.0 }
 0xb0e   :  { %1416 = vadd.xlane.f32.xlu0 %v1415_v32 }
 0xb49   :  { %v1292_v33 = vpop.f32.mrb[36].mxu1 }
 0xb4a   :  { %v1299_v34 = vadd.f32 %v1292_v33, %v4481_v42  ;;  %v3672_v35 = vpop.f32.mrb[37].mxu1 }
 0xb4b   :  { %v1295_v40 = vpop.f32.mrb[38].mxu1  ;;  %v3937_v35 = vld [vmem:[%s4871_s17] sm:$0xff]  }
 0xb4c   :  { %v1300_v41 = vadd.f32 %v1295_v40, %v4483_v44  ;;  %v3673_v43 = vpop.f32.mrb[39].mxu1  ;;  %v3938_v40 = vld [vmem:[%s4871_s17 + $0x8] sm:$0xff]  }
 0xb4d   :  { %v3940_v43 = vld [vmem:[%s4872_s21 + $0x8] sm:$0xff]  }
 0xb51   :  { %v1395_v24 = vpop.f32.mrb[40].mxu1 }
 0xb52   :  { %v1402_v30 = vmul.f32 0.35355338, %v1395_v24  ;;  %v3684_v45 = vpop.f32.mrb[41].mxu1 }
 0xb53   :  { %v1398_v39 = vpop.f32.mrb[42].mxu1 }
 0xb54   :  { %v3685_v46 = vpop.f32.mrb[43].mxu1  ;;  %v1406_v47 = vsel %vm494_vm5, %v1402_v30, -inf }
 0xb55   :  { %1407 = vmax.xlane.f32.xlu1 %v1406_v47 }
 0xb66   :  { %1475 = vrot.lane.b32.xlu1 %v4367_v38, %s4107_s13 }
 0xb9b   :  { %v1417_v53 = vpop.xlane.xlu0 %1416 }
 0xbe2   :  { %v1408_v48 = vpop.xlane.xlu1 %1407 }
 0xbe3   :  { %v1410_v49 = vsub.f32 %v1402_v30, %v1408_v48 }
 0xbe5   :  { %v1413_v50 = vmul.f32 1.442695, %v1410_v49  ;;  %v3387_v49 = vld [vmem:[%s4873_s5] ss:$0 sm:$0xff] }
 0xbe6   :  { %v1476_v42 = vpop.permute.xlu1 %1475 }
 0xbe7   :  { %3989 = vpow2.f32 %v1413_v50  ;;  %v1481_v51 = vsel %vm379_vm3, %v1476_v42, 0 }
 0xbe8   :  { %3693 = vmatpush3.bf16.msra.mxu1 %v1481_v51  ;;  %3991 = vrcp.f32 %v1417_v53 }
 0xbe9   :  { %3704 = vmatprep.subr.bf16.mxu1 %v4102_v29 }
 0xbf1   :  { %v3990_v44 = vpop.eup %3989 }
 0xbf2   :  { %v1418_v52 = vsel %vm494_vm5, %v3990_v44, 0.0  ;;  %v3992_v38 = vpop.eup %3991 }
 0xbf3   :  { %1419 = vadd.xlane.f32.xlu0 %v1418_v52  ;;  %v1423_v55 = vmul.f32 %v3992_v38, %v3988_v31  ;;  %v3388_v52 = vld [vmem:[%s4874_s25] ss:$0 sm:$0xff] }
 0xbf5   :  { %v1425_v58 = vpack.c.bf16 %v1423_v55, %v1423_v55 }
 0xc09   :  { %1427 = vrot.lane.b32.xlu0 %v4362_v36, %s4107_s13 }
 0xc80   :  { %v1420_v54 = vpop.xlane.xlu0 %1419 }
 0xc81   :  { %3993 = vrcp.f32 %v1420_v54 }
 0xc84   :  { %v1428_v56 = vpop.permute.xlu0 %1427 }
 0xc85   :  { %v1433_v57 = vsel %vm379_vm3, %v1428_v56, 0  ;;  %v3941_v56 = vld [vmem:[%s4872_s21 + $0x10] sm:$0xff]  }
 0xc86   :  { %3687 = vmatpush3.bf16.msra.mxu0 %v1433_v57  ;;  %v3942_v57 = vld [vmem:[%s4872_s21 + $0x18] sm:$0xff]  }
 0xc87   :  { %3698 = vmatprep.subr.bf16.mxu0 %v4102_v29 }
 0xc89   :  { %3689 = vmatmul.mubr.msk.bf16.vlgmr.msra.gmra.mrb[36].mxu0 %vm494_vm5, %v1425_v58  ;;  %v3389_v58 = vld [vmem:[%s4875_s29] ss:$0 sm:$0xff] }
 0xc8a   :  { %3700 = vmatprep.mubr.msk.bf16.mxu0 %vm4103_vm2, %v4102_v29  ;;  %3699 = vmatpush3.bf16.msra.mxu0 %v1528_v62 }
 0xc8b   :  { %v3994_v36 = vpop.eup %3993  ;;  %3712 = vmatprep.subr.bf16.mxu0 %v4102_v29 }
 0xc8c   :  { %v1424_v59 = vmul.f32 %v3994_v36, %v3990_v44 }
 0xc8e   :  { %v1426_v60 = vpack.c.bf16 %v1424_v59, %v1424_v59 }
 0xc90   :  { %3695 = vmatmul.mubr.msk.bf16.vlgmr.msra.gmra.mrb[44].mxu1 %vm494_vm5, %v1426_v60 }
 0xc91   :  { %3708 = vmatprep.mubr.msk.bf16.mxu1 %vm4103_vm2, %v4102_v29  ;;  %3705 = vmatpush3.bf16.msra.mxu1 %v3937_v35 }
 0xc92   :  { %3706 = vmatprep.subr.bf16.mxu1 %v4102_v29 }
 0xc95   :  { %3707 = vmatpush3.bf16.msra.mxu1 %v3938_v40 }
 0xc96   :  { %3724 = vmatprep.subr.bf16.mxu1 %v4102_v29 }
 0xd5c   :  { %v1469_v63 = vpop.f32.mrb[36].mxu0 }
 0xd5d   :  { %v3690_v0 = vpop.f32.mrb[37].mxu0 }
 0xd5e   :  { %v1472_v1 = vpop.f32.mrb[38].mxu0 }
 0xd5f   :  { %v3691_v2 = vpop.f32.mrb[39].mxu0 }
 0xd63   :  { %v1517_v3 = vpop.f32.mrb[44].mxu1 }
 0xd64   :  { %v1523_v4 = vpack.c.bf16 %v1517_v3, %v1469_v63  ;;  %v3696_v5 = vpop.f32.mrb[45].mxu1  ;;  %v3393_v3 = vld [vmem:[%s4876_s3] ss:$0 sm:$0xff] }
 0xd65   :  { %v1520_v37 = vpop.f32.mrb[46].mxu1 }
 0xd66   :  { %v3697_v6 = vpop.f32.mrb[47].mxu1  ;;  %3701 = vmatmul.mubr.msk.bf16.vlgmr.msra.gmra.mrb[40].mxu0 %vm494_vm5, %v1523_v4 }
 0xd67   :  { %3720 = vmatprep.mubr.msk.bf16.mxu0 %vm4103_vm2, %v4102_v29 }
 0xe39   :  { %v1564_v8 = vpop.f32.mrb[40].mxu0 }
 0xe3a   :  { %v1571_v9 = vadd.f32 %v1564_v8, %v1299_v34  ;;  %v3702_v10 = vpop.f32.mrb[41].mxu0 }
 0xe3b   :  { %v1567_v11 = vpop.f32.mrb[42].mxu0 }
 0xe3c   :  { %v1579_v12 = vadd.f32 %v3386_v7, %v1571_v9  ;;  %v1572_v13 = vadd.f32 %v1567_v11, %v1300_v41  ;;  %v3703_v14 = vpop.f32.mrb[43].mxu0  ;;  %v3939_v41 = vld [vmem:[%s4872_s21] sm:$0xff]  }
 0xe3d   :  { %3713 = vmatpush3.bf16.msra.mxu0 %v3939_v41  ;;  %v3399_v41 = vld [vmem:[%s4879_s19] ss:$0 sm:$0xff] }
 0xe3e   :  { %v4544_v16 = vadd.f32 %v4039_v15, %v1579_v12  ;;  %v1580_v17 = vadd.f32 %v3386_v7, %v1572_v13  ;;  %3714 = vmatprep.subr.bf16.mxu0 %v4102_v29 }
 0xe40   :  { %v4547_v19 = vadd.f32 %v4040_v18, %v1580_v17  ;;  %v1583_v20 = vsel %vm207_vm0, %v4544_v16, 0.0 }
 0xe41   :  { %1584 = vadd.xlane.f32.xlu1 %v1583_v20  ;;  %3715 = vmatpush3.bf16.msra.mxu0 %v3940_v43 }
 0xe42   :  { %v1586_v21 = vsel %vm207_vm0, %v4547_v19, 0.0  ;;  %3716 = vmatprep.subr.bf16.mxu0 %v4102_v29 }
 0xe43   :  { %1587 = vadd.xlane.f32.xlu0 %v1586_v21 }
 0xe45   :  { %3717 = vmatpush3.bf16.msra.mxu0 %v3941_v56 }
 0xe46   :  { %3718 = vmatprep.subr.bf16.mxu0 %v4102_v29 }
 0xe49   :  { %3719 = vmatpush3.bf16.msra.mxu0 %v3942_v57  ;;  %v3405_v57 = vld [vmem:[%s4882_s6] ss:$0 sm:$0xff] }
 0xe4a   :  { %3740 = vmatprep.subr.bf16.mxu0 %v4102_v29 }
 0xece   :  { %v1585_v22 = vpop.xlane.xlu1 %1584 }
 0xecf   :  { %v1589_v23 = vmul.f32 0.03125, %v1585_v22 }
 0xed0   :  { %v1588_v25 = vpop.xlane.xlu0 %1587 }
 0xed1   :  { %v1591_v26 = vsub.f32 %v4544_v16, %v1589_v23  ;;  %v1590_v27 = vmul.f32 0.03125, %v1588_v25  ;;  %v3943_v23 = vld [vmem:[%s4877_s8] sm:$0xff]  }
 0xed2   :  { %v3944_v25 = vld [vmem:[%s4878_s14] sm:$0xff]  }
 0xed3   :  { %v1592_v28 = vsub.f32 %v4547_v19, %v1590_v27  ;;  %v1593_v31 = vmul.f32 %v1591_v26, %v1591_v26  ;;  %v3946_v27 = vld [vmem:[%s4878_s14 + $0x8] sm:$0xff]  }
 0xed5   :  { %v1595_v32 = vsel %vm207_vm0, %v1593_v31, 0.0  ;;  %v1594_v33 = vmul.f32 %v1592_v28, %v1592_v28 }
 0xed6   :  { %1596 = vadd.xlane.f32.xlu0 %v1595_v32 }
 0xed7   :  { %v1598_v34 = vsel %vm207_vm0, %v1594_v33, 0.0 }
 0xed8   :  { %1599 = vadd.xlane.f32.xlu1 %v1598_v34 }
 0xf63   :  { %v1597_v24 = vpop.xlane.xlu0 %1596 }
 0xf64   :  { %v1601_v30 = vmul.f32 0.03125, %v1597_v24 }
 0xf65   :  { %v1600_v45 = vpop.xlane.xlu1 %1599 }
 0xf66   :  { %v1603_v39 = vadd.f32 1e-05, %v1601_v30  ;;  %v1602_v46 = vmul.f32 0.03125, %v1600_v45 }
 0xf68   :  { %3995 = vrsqrt.f32 %v1603_v39  ;;  %v1604_v47 = vadd.f32 1e-05, %v1602_v46  ;;  %v3400_v39 = vld [vmem:[%s4880_s24] ss:$0 sm:$0xff] }
 0xf6a   :  { %3997 = vrsqrt.f32 %v1604_v47 }
 0xf72   :  { %v3996_v48 = vpop.eup %3995 }
 0xf73   :  { %v1607_v50 = vmul.f32 %v3996_v48, %v1591_v26  ;;  %v3945_v26 = vld [vmem:[%s4877_s8 + $0x8] sm:$0xff]  }
 0xf74   :  { %v3998_v42 = vpop.eup %3997 }
 0xf75   :  { %v1615_v51 = vmul.f32 %v3387_v49, %v1607_v50  ;;  %v1608_v44 = vmul.f32 %v3998_v42, %v1592_v28  ;;  %v3948_v42 = vld [vmem:[%s4881_s30 + $0x8] sm:$0xff]  }
 0xf77   :  { %v1616_v53 = vmul.f32 %v3387_v49, %v1608_v44  ;;  %v1623_v38 = vadd.f32 %v3388_v52, %v1615_v51  ;;  %v3947_v49 = vld [vmem:[%s4881_s30] sm:$0xff]  }
 0xf79   :  { %v1624_v54 = vadd.f32 %v3388_v52, %v1616_v53 }
 0xf7b   :  { %v1625_v55 = vpack.c.bf16 %v1624_v54, %v1623_v38 }
 0xf7d   :  { %3709 = vmatmul.mubr.msk.bf16.vlgmr.msra.gmra.mrb[48].mxu1 %vm207_vm0, %v1625_v55 }
 0xf7e   :  { %3728 = vmatprep.mubr.msk.bf16.mxu1 %vm4103_vm2, %v4102_v29  ;;  %3725 = vmatpush3.bf16.msra.mxu1 %v3943_v23 }
 0xf7f   :  { %3726 = vmatprep.subr.bf16.mxu1 %v4102_v29 }
 0xf82   :  { %3727 = vmatpush3.bf16.msra.mxu1 %v3945_v26 }
 0xf83   :  { %3732 = vmatprep.subr.bf16.mxu1 %v4102_v29 }
0x1050   :  { %v1681_v36 = vpop.f32.mrb[48].mxu1 }
0x1051   :  { %v1682_v59 = vadd.f32 %v3389_v58, %v1681_v36  ;;  %v3710_v60 = vpop.f32.mrb[49].mxu1 }
0x1052   :  { %v1684_v61 = vpop.f32.mrb[50].mxu1  ;;  %v3409_v60 = vld [vmem:[%s4883_s20] ss:$0 sm:$0xff] }
0x1053   :  { %v1685_v62 = vadd.f32 %v3389_v58, %v1684_v61  ;;  %v3711_v63 = vpop.f32.mrb[51].mxu1  ;;  %v1688_v0 = vmax.f32 %v1682_v59, 0.0 }
0x1055   :  { %v1689_v1 = vmax.f32 %v1685_v62, 0.0 }
0x1057   :  { %v1690_v2 = vpack.c.bf16 %v1689_v1, %v1688_v0  ;;  %v3401_v1 = vld [vmem:[%s4884_s11] ss:$0 sm:$0xff] }
0x1059   :  { %3721 = vmatmul.mubr.msk.bf16.vlgmr.msra.gmra.mrb[44].mxu0 %vm1721_vm6, %v1690_v2 }
0x105a   :  { %3744 = vmatprep.mubr.msk.bf16.mxu0 %vm4103_vm2, %v4102_v29  ;;  %3741 = vmatpush3.bf16.msra.mxu0 %v3944_v25 }
0x105b   :  { %3742 = vmatprep.subr.bf16.mxu0 %v4102_v29 }
0x105e   :  { %3743 = vmatpush3.bf16.msra.mxu0 %v3946_v27 }
0x105f   :  { %3754 = vmatprep.subr.bf16.mxu0 %v4102_v29 }
0x112c   :  { %v1759_v4 = vpop.f32.mrb[44].mxu0 }
0x112d   :  { %v1760_v5 = vadd.f32 %v3393_v3, %v1759_v4  ;;  %v3722_v37 = vpop.f32.mrb[45].mxu0 }
0x112e   :  { %v1762_v6 = vpop.f32.mrb[46].mxu0 }
0x112f   :  { %v4580_v7 = vadd.f32 %v1760_v5, %v4544_v16  ;;  %v1763_v8 = vadd.f32 %v3393_v3, %v1762_v6  ;;  %v3723_v9 = vpop.f32.mrb[47].mxu0 }
0x1131   :  { %v4583_v10 = vadd.f32 %v1763_v8, %v4547_v19  ;;  %v1806_v11 = vsel %vm207_vm0, %v4580_v7, 0.0 }
0x1132   :  { %1807 = vadd.xlane.f32.xlu0 %v1806_v11 }
0x1133   :  { %v1809_v12 = vsel %vm207_vm0, %v4583_v10, 0.0 }
0x1134   :  { %1810 = vadd.xlane.f32.xlu1 %v1809_v12 }
0x11bf   :  { %v1808_v13 = vpop.xlane.xlu0 %1807 }
0x11c0   :  { %v1812_v14 = vmul.f32 0.03125, %v1808_v13 }
0x11c1   :  { %v1811_v15 = vpop.xlane.xlu1 %1810 }
0x11c2   :  { %v1814_v16 = vsub.f32 %v4580_v7, %v1812_v14  ;;  %v1813_v17 = vmul.f32 0.03125, %v1811_v15 }
0x11c4   :  { %v1815_v18 = vsub.f32 %v4583_v10, %v1813_v17  ;;  %v1816_v19 = vmul.f32 %v1814_v16, %v1814_v16 }
0x11c6   :  { %v1818_v20 = vsel %vm207_vm0, %v1816_v19, 0.0  ;;  %v1817_v21 = vmul.f32 %v1815_v18, %v1815_v18 }
0x11c7   :  { %1819 = vadd.xlane.f32.xlu0 %v1818_v20 }
0x11c8   :  { %v1821_v22 = vsel %vm207_vm0, %v1817_v21, 0.0 }
0x11c9   :  { %1822 = vadd.xlane.f32.xlu1 %v1821_v22 }
0x1254   :  { %v1820_v28 = vpop.xlane.xlu0 %1819 }
0x1255   :  { %v1824_v31 = vmul.f32 0.03125, %v1820_v28 }
0x1256   :  { %v1823_v32 = vpop.xlane.xlu1 %1822 }
0x1257   :  { %v1826_v33 = vadd.f32 1e-05, %v1824_v31  ;;  %v1825_v34 = vmul.f32 0.03125, %v1823_v32 }
0x1259   :  { %3999 = vrsqrt.f32 %v1826_v33  ;;  %v1827_v35 = vadd.f32 1e-05, %v1825_v34 }
0x125b   :  { %4001 = vrsqrt.f32 %v1827_v35 }
0x1263   :  { %v4000_v40 = vpop.eup %3999 }
0x1264   :  { %v1830_v43 = vmul.f32 %v4000_v40, %v1814_v16 }
0x1265   :  { %v4002_v24 = vpop.eup %4001 }
0x1266   :  { %v1838_v30 = vmul.f32 %v3399_v41, %v1830_v43  ;;  %v1831_v45 = vmul.f32 %v4002_v24, %v1815_v18 }
0x1268   :  { %v1839_v46 = vmul.f32 %v3399_v41, %v1831_v45  ;;  %v1846_v47 = vadd.f32 %v3400_v39, %v1838_v30 }
0x126a   :  { %v1847_v48 = vadd.f32 %v3400_v39, %v1839_v46 }
0x126c   :  { %v1848_v50 = vpack.c.bf16 %v1847_v48, %v1846_v47 }
0x126e   :  { %3729 = vmatmul.mubr.msk.bf16.vlgmr.msra.gmra.mrb[52].mxu1 %vm207_vm0, %v1848_v50  ;;  %3745 = vmatmul.mubr.msk.bf16.vlgmr.msra.gmra.mrb[48].mxu0 %vm207_vm0, %v1848_v50 }
0x126f   :  { %3733 = vmatpush3.bf16.msra.mxu1 %v3947_v49  ;;  %3736 = vmatprep.mubr.msk.bf16.mxu1 %vm4103_vm2, %v4102_v29 }
0x1270   :  { %3734 = vmatprep.subr.bf16.mxu1 %v4102_v29  ;;  %3756 = vmatprep.mubr.msk.bf16.mxu0 %vm4103_vm2, %v4102_v29 }
0x1273   :  { %3735 = vmatpush3.bf16.msra.mxu1 %v3948_v42 }
0x1274   :  { %3748 = vmatprep.subr.bf16.mxu1 %v4102_v29 }
0x1276   :  { %3737 = vmatmul.mubr.msk.bf16.vlgmr.msra.gmra.mrb[56].mxu1 %vm207_vm0, %v1848_v50 }
0x1277   :  { %3750 = vmatprep.mubr.msk.bf16.mxu1 %vm4103_vm2, %v4102_v29 }
0x1341   :  { %v1904_v51 = vpop.f32.mrb[52].mxu1  ;;  %v2022_v44 = vpop.f32.mrb[48].mxu0 }
0x1342   :  { %v3730_v52 = vpop.f32.mrb[53].mxu1  ;;  %v3746_v53 = vpop.f32.mrb[49].mxu0  ;;  %v2023_v2 = vadd.f32 %v3409_v60, %v2022_v44  ;;  %v1905_v5 = vadd.f32 %v3401_v1, %v1904_v51 }
0x1343   :  { %v1907_v38 = vpop.f32.mrb[54].mxu1  ;;  %v2025_v54 = vpop.f32.mrb[50].mxu0 }
0x1344   :  { %v3731_v55 = vpop.f32.mrb[55].mxu1  ;;  %v3747_v56 = vpop.f32.mrb[51].mxu0  ;;  %v2026_v37 = vadd.f32 %v3409_v60, %v2025_v54  ;;  %v4628_v8 = vpack.c.bf16 %v2023_v2, %v2023_v2  ;;  %v1908_v9 = vadd.f32 %v3401_v1, %v1907_v38  ;;  %v4631_v11 = vpack.c.bf16 %v1905_v5, %v1905_v5 }
0x1346   :  { %v4633_v12 = vpack.c.bf16 %v2026_v37, %v2026_v37  ;;  %v4635_v13 = vpack.c.bf16 %v1908_v9, %v1908_v9  ;;  %v2157_v14 = vsel %vm379_vm3, %v4628_v8, 0 }
0x1348   :  { %v2203_v15 = vsel %vm379_vm3, %v4633_v12, 0 }
0x1349   :  { %v1963_v58 = vpop.f32.mrb[56].mxu1 }
0x134a   :  { %v1964_v36 = vadd.f32 %v3405_v57, %v1963_v58  ;;  %v3738_v59 = vpop.f32.mrb[57].mxu1 }
0x134b   :  { %v1966_v61 = vpop.f32.mrb[58].mxu1 }
0x134c   :  { %v4618_v62 = vpack.c.bf16 %v1964_v36, %v1964_v36  ;;  %v1967_v63 = vadd.f32 %v3405_v57, %v1966_v61  ;;  %v3739_v0 = vpop.f32.mrb[59].mxu1 }
0x134e   :  { %v4621_v3 = vpack.c.bf16 %v1967_v63, %v1967_v63  ;;  %v2039_v4 = vsel %vm494_vm5, %v4618_v62, 0 }
0x134f   :  { %3749 = vmatpush3.bf16.xpose.msra.mxu1 %v2039_v4 }
0x1350   :  { %v2085_v6 = vsel %vm494_vm5, %v4621_v3, 0  ;;  %3760 = vmatprep.subr.bf16.mxu1 %v4102_v29 }
0x1351   :  { %3755 = vmatpush3.bf16.xpose.msra.mxu0 %v2085_v6 }
0x1352   :  { %3766 = vmatprep.subr.bf16.mxu0 %v4102_v29 }
0x1356   :  { %3751 = vmatmul.mubr.msk.bf16.vlgmr.msra.gmra.mrb[60].mxu1 %vm494_vm5, %v4631_v11 }
0x1357   :  { %3761 = vmatpush3.bf16.msra.mxu1 %v2157_v14  ;;  %3762 = vmatprep.mubr.msk.bf16.mxu1 %vm4103_vm2, %v4102_v29 }
0x1358   :  { %3757 = vmatmul.mubr.msk.bf16.vlgmr.msra.gmra.mrb[52].mxu0 %vm494_vm5, %v4635_v13  ;;  %3772 = vmatprep.subr.bf16.mxu1 %v4102_v29 }
0x1359   :  { %3767 = vmatpush3.bf16.msra.mxu0 %v2203_v15  ;;  %3768 = vmatprep.mubr.msk.bf16.mxu0 %vm4103_vm2, %v4102_v29 }
0x135a   :  { %3778 = vmatprep.subr.bf16.mxu0 %v4102_v29 }
0x1429   :  { %v2075_v16 = vpop.f32.mrb[60].mxu1 }
0x142a   :  { %v2127_v17 = vmul.f32 0.35355338, %v2075_v16  ;;  %v3752_v18 = vpop.f32.mrb[61].mxu1 }
0x142b   :  { %v2078_v19 = vpop.f32.mrb[62].mxu1  ;;  %v2121_v20 = vpop.f32.mrb[52].mxu0 }
0x142c   :  { %v2128_v21 = vmul.f32 0.35355338, %v2121_v20  ;;  %v3753_v22 = vpop.f32.mrb[63].mxu1  ;;  %v3758_v23 = vpop.f32.mrb[53].mxu0  ;;  %v2129_v25 = vsel %vm494_vm5, %v2127_v17, -inf }
0x142d   :  { %v2124_v26 = vpop.f32.mrb[54].mxu0  ;;  %2130 = vmax.xlane.f32.xlu0 %v2129_v25 }
0x142e   :  { %v3759_v27 = vpop.f32.mrb[55].mxu0  ;;  %v2132_v28 = vsel %vm494_vm5, %v2128_v21, -inf }
0x142f   :  { %2133 = vmax.xlane.f32.xlu1 %v2132_v28 }
0x1440   :  { %2302 = vrot.lane.b32.xlu1 %v4621_v3, %s4105_s0 }
0x14ba   :  { %v2131_v31 = vpop.xlane.xlu0 %2130 }
0x14bb   :  { %v2135_v32 = vsub.f32 %v2127_v17, %v2131_v31 }
0x14bc   :  { %v2134_v33 = vpop.xlane.xlu1 %2133 }
0x14bd   :  { %v2137_v34 = vmul.f32 1.442695, %v2135_v32  ;;  %v2136_v35 = vsub.f32 %v2128_v21, %v2134_v33 }
0x14bf   :  { %4003 = vpow2.f32 %v2137_v34  ;;  %v2139_v40 = vmul.f32 1.442695, %v2136_v35 }
0x14c0   :  { %v2303_v45 = vpop.permute.xlu1 %2302 }
0x14c1   :  { %4005 = vpow2.f32 %v2139_v40  ;;  %v2308_v53 = vsel %vm494_vm5, %v2303_v45, 0 }
0x14c9   :  { %v4004_v41 = vpop.eup %4003 }
0x14ca   :  { %v2141_v43 = vsel %vm494_vm5, %v4004_v41, 0.0 }
0x14cb   :  { %v4006_v24 = vpop.eup %4005  ;;  %2142 = vadd.xlane.f32.xlu0 %v2141_v43  ;;  %v1786_v43 = vld [vmem:[%s4885_s15 + $0x4] sm:$0xf] }
0x14cc   :  { %v2144_v30 = vsel %vm494_vm5, %v4006_v24, 0.0  ;;  %v2479_v45 = vsel %vm379_vm3, %v1786_v43, 0 }
0x14cd   :  { %2145 = vadd.xlane.f32.xlu1 %v2144_v30 }
0x14de   :  { %2247 = vrot.lane.b32.xlu1 %v4631_v11, %s4105_s0 }
0x14e1   :  { %2250 = vrot.lane.b32.xlu0 %v4618_v62, %s4105_s0 }
0x14e2   :  { %2299 = vrot.lane.b32.xlu1 %v4635_v13, %s4105_s0 }
0x1558   :  { %v2143_v39 = vpop.xlane.xlu0 %2142 }
0x1559   :  { %4007 = vrcp.f32 %v2143_v39 }
0x155a   :  { %v2146_v46 = vpop.xlane.xlu1 %2145 }
0x155b   :  { %4009 = vrcp.f32 %v2146_v46  ;;  %v1785_v46 = vld [vmem:[%s4885_s15] sm:$0xf] }
0x155c   :  { %v2251_v50 = vpop.permute.xlu0 %2250 }
0x155d   :  { %v2256_v44 = vsel %vm494_vm5, %v2251_v50, 0 }
0x155e   :  { %v2248_v38 = vpop.permute.xlu1 %2247 }
0x1562   :  { %v2300_v54 = vpop.permute.xlu1 %2299 }
0x1563   :  { %v4008_v47 = vpop.eup %4007 }
0x1564   :  { %v2149_v48 = vmul.f32 %v4008_v47, %v4004_v41 }
0x1565   :  { %v4010_v49 = vpop.eup %4009 }
0x1566   :  { %v2150_v42 = vmul.f32 %v4010_v49, %v4006_v24  ;;  %v2151_v51 = vpack.c.bf16 %v2149_v48, %v2149_v48  ;;  %v2526_v49 = vsel %vm379_vm3, %v1785_v46, 0 }
0x1568   :  { %3763 = vmatmul.mubr.msk.bf16.vlgmr.msra.gmra.mrb[64].mxu1 %vm494_vm5, %v2151_v51  ;;  %v2152_v52 = vpack.c.bf16 %v2150_v42, %v2150_v42 }
0x1569   :  { %3773 = vmatpush3.bf16.xpose.msra.mxu1 %v2256_v44  ;;  %3774 = vmatprep.mubr.msk.bf16.mxu1 %vm4103_vm2, %v4102_v29 }
0x156a   :  { %3769 = vmatmul.mubr.msk.bf16.vlgmr.msra.gmra.mrb[56].mxu0 %vm494_vm5, %v2152_v52  ;;  %3784 = vmatprep.subr.bf16.mxu1 %v4102_v29 }
0x156b   :  { %3779 = vmatpush3.bf16.xpose.msra.mxu0 %v2308_v53  ;;  %3780 = vmatprep.mubr.msk.bf16.mxu0 %vm4103_vm2, %v4102_v29 }
0x156c   :  { %3790 = vmatprep.subr.bf16.mxu0 %v4102_v29 }
0x1570   :  { %3775 = vmatmul.mubr.msk.bf16.vlgmr.msra.gmra.mrb[68].mxu1 %vm494_vm5, %v2248_v38 }
0x1571   :  { %3786 = vmatprep.mubr.msk.bf16.mxu1 %vm4103_vm2, %v4102_v29 }
0x1572   :  { %3781 = vmatmul.mubr.msk.bf16.vlgmr.msra.gmra.mrb[60].mxu0 %vm494_vm5, %v2300_v54 }
0x1573   :  { %3792 = vmatprep.mubr.msk.bf16.mxu0 %vm4103_vm2, %v4102_v29 }
0x163b   :  { %v4679_v55 = vpop.f32.mrb[64].mxu1 }
0x163c   :  { %v3764_v56 = vpop.f32.mrb[65].mxu1 }
0x163d   :  { %v2196_v57 = vpop.f32.mrb[66].mxu1  ;;  %v4681_v58 = vpop.f32.mrb[56].mxu0 }
0x163e   :  { %v2245_v36 = vpack.c.bf16 %v4681_v58, %v4679_v55  ;;  %v3765_v59 = vpop.f32.mrb[67].mxu1  ;;  %v3770_v60 = vpop.f32.mrb[57].mxu0 }
0x163f   :  { %v2242_v61 = vpop.f32.mrb[58].mxu0 }
0x1640   :  { %v3771_v63 = vpop.f32.mrb[59].mxu0 }
0x1643   :  { %v2292_v0 = vpop.f32.mrb[68].mxu1 }
0x1644   :  { %v2350_v1 = vmul.f32 0.35355338, %v2292_v0  ;;  %v3776_v2 = vpop.f32.mrb[69].mxu1 }
0x1645   :  { %v2295_v4 = vpop.f32.mrb[70].mxu1  ;;  %v2344_v5 = vpop.f32.mrb[60].mxu0 }
0x1646   :  { %v2351_v37 = vmul.f32 0.35355338, %v2344_v5  ;;  %v3777_v6 = vpop.f32.mrb[71].mxu1  ;;  %v3782_v9 = vpop.f32.mrb[61].mxu0  ;;  %v2352_v14 = vsel %vm494_vm5, %v2350_v1, -inf }
0x1647   :  { %v2347_v15 = vpop.f32.mrb[62].mxu0  ;;  %2353 = vmax.xlane.f32.xlu0 %v2352_v14 }
0x1648   :  { %v3783_v16 = vpop.f32.mrb[63].mxu0  ;;  %v2355_v17 = vsel %vm494_vm5, %v2351_v37, -inf }
0x1649   :  { %2356 = vmax.xlane.f32.xlu1 %v2355_v17 }
0x165a   :  { %2426 = vrot.lane.b32.xlu1 %v4633_v12, %s4105_s0 }
0x165e   :  { %2571 = vrot.lane.b32.xlu1 %v4618_v62, %s4106_s9 }
0x1662   :  { %2621 = vrot.lane.b32.xlu1 %v4621_v3, %s4106_s9 }
0x1666   :  { %2619 = vrot.lane.b32.xlu1 %v4635_v13, %s4106_s9 }
0x16d4   :  { %v2354_v18 = vpop.xlane.xlu0 %2353 }
0x16d5   :  { %v2358_v19 = vsub.f32 %v2350_v1, %v2354_v18 }
0x16d6   :  { %v2357_v20 = vpop.xlane.xlu1 %2356 }
0x16d7   :  { %v2360_v21 = vmul.f32 1.442695, %v2358_v19  ;;  %v2359_v22 = vsub.f32 %v2351_v37, %v2357_v20 }
0x16d9   :  { %4011 = vpow2.f32 %v2360_v21  ;;  %v2362_v23 = vmul.f32 1.442695, %v2359_v22 }
0x16da   :  { %v2427_v25 = vpop.permute.xlu1 %2426 }
0x16db   :  { %4013 = vpow2.f32 %v2362_v23  ;;  %v2432_v26 = vsel %vm379_vm3, %v2427_v25, 0 }
0x16dc   :  { %3791 = vmatpush3.bf16.msra.mxu0 %v2432_v26 }
0x16dd   :  { %3802 = vmatprep.subr.bf16.mxu0 %v4102_v29 }
0x16de   :  { %v2572_v50 = vpop.permute.xlu1 %2571 }
0x16e2   :  { %v2622_v42 = vpop.permute.xlu1 %2621 }
0x16e3   :  { %v4012_v27 = vpop.eup %4011  ;;  %v2627_v51 = vsel %vm494_vm5, %v2622_v42, 0 }
0x16e4   :  { %v2364_v28 = vsel %vm494_vm5, %v4012_v27, 0.0 }
0x16e5   :  { %v4014_v31 = vpop.eup %4013  ;;  %2365 = vadd.xlane.f32.xlu0 %v2364_v28 }
0x16e6   :  { %v2367_v32 = vsel %vm494_vm5, %v4014_v31, 0.0  ;;  %v2620_v44 = vpop.permute.xlu1 %2619 }
0x16e9   :  { %2368 = vadd.xlane.f32.xlu0 %v2367_v32 }
0x16ff   :  { %2377 = vrot.lane.b32.xlu0 %v4628_v8, %s4105_s0 }
0x1703   :  { %2569 = vrot.lane.b32.xlu0 %v4631_v11, %s4106_s9 }
0x1772   :  { %v2366_v33 = vpop.xlane.xlu0 %2365 }
0x1773   :  { %4015 = vrcp.f32 %v2366_v33 }
0x1776   :  { %v2369_v34 = vpop.xlane.xlu0 %2368 }
0x1777   :  { %4017 = vrcp.f32 %v2369_v34 }
0x177a   :  { %v2378_v35 = vpop.permute.xlu0 %2377 }
0x177b   :  { %v2383_v40 = vsel %vm379_vm3, %v2378_v35, 0 }
0x177c   :  { %3785 = vmatpush3.bf16.msra.mxu1 %v2383_v40 }
0x177d   :  { %v4016_v41 = vpop.eup %4015  ;;  %3796 = vmatprep.subr.bf16.mxu1 %v4102_v29 }
0x177e   :  { %v2372_v24 = vmul.f32 %v4016_v41, %v4012_v27  ;;  %v2570_v63 = vpop.permute.xlu0 %2569 }
0x1780   :  { %v2374_v30 = vpack.c.bf16 %v2372_v24, %v2372_v24 }
0x1781   :  { %v4018_v39 = vpop.eup %4017 }
0x1782   :  { %v2373_v47 = vmul.f32 %v4018_v39, %v4014_v31  ;;  %3787 = vmatmul.mubr.msk.bf16.vlgmr.msra.gmra.mrb[72].mxu1 %vm494_vm5, %v2374_v30 }
0x1783   :  { %3797 = vmatpush3.bf16.msra.mxu1 %v2479_v45  ;;  %3798 = vmatprep.mubr.msk.bf16.mxu1 %vm4103_vm2, %v4102_v29 }
0x1784   :  { %v2375_v48 = vpack.c.bf16 %v2373_v47, %v2373_v47  ;;  %3808 = vmatprep.subr.bf16.mxu1 %v4102_v29 }
0x1786   :  { %3793 = vmatmul.mubr.msk.bf16.vlgmr.msra.gmra.mrb[64].mxu0 %vm494_vm5, %v2375_v48 }
0x1787   :  { %3803 = vmatpush3.bf16.msra.mxu0 %v2526_v49  ;;  %3804 = vmatprep.mubr.msk.bf16.mxu0 %vm4103_vm2, %v4102_v29 }
0x1788   :  { %3814 = vmatprep.subr.bf16.mxu0 %v4102_v29 }
0x178e   :  { %3805 = vmatmul.mubr.msk.bf16.vlgmr.msra.gmra.mrb[68].mxu0 %vm494_vm5, %v2245_v36  ;;  %v2577_v36 = vsel %vm494_vm5, %v2572_v50, 0 }
0x178f   :  { %3816 = vmatprep.mubr.msk.bf16.mxu0 %vm4103_vm2, %v4102_v29 }
0x1790   :  { %3815 = vmatpush3.bf16.xpose.msra.mxu0 %v2627_v51 }
0x1791   :  { %3826 = vmatprep.subr.bf16.mxu0 %v4102_v29 }
0x1797   :  { %3817 = vmatmul.mubr.msk.bf16.vlgmr.msra.gmra.mrb[72].mxu0 %vm494_vm5, %v2620_v44 }
0x1798   :  { %3828 = vmatprep.mubr.msk.bf16.mxu0 %vm4103_vm2, %v4102_v29 }
0x1855   :  { %v2419_v52 = vpop.f32.mrb[72].mxu1 }
0x1856   :  { %v3788_v53 = vpop.f32.mrb[73].mxu1 }
0x1857   :  { %v2422_v38 = vpop.f32.mrb[74].mxu1 }
0x1858   :  { %v3789_v54 = vpop.f32.mrb[75].mxu1 }
0x1859   :  { %v2468_v55 = vpop.f32.mrb[64].mxu0  ;;  %v1787_v54 = vld [vmem:[%s4885_s15 + $0x8] sm:$0xf] }
0x185a   :  { %v2474_v56 = vpack.c.bf16 %v2468_v55, %v2419_v52  ;;  %v3794_v57 = vpop.f32.mrb[65].mxu0  ;;  %v2796_v55 = vsel %vm379_vm3, %v1787_v54, 0  ;;  %v3433_v54 = vld [vmem:[%s4886_s16] ss:$0 sm:$0xff] }
0x185b   :  { %v2471_v58 = vpop.f32.mrb[66].mxu0 }
0x185c   :  { %v3795_v59 = vpop.f32.mrb[67].mxu0  ;;  %3799 = vmatmul.mubr.msk.bf16.vlgmr.msra.gmra.mrb[76].mxu1 %vm494_vm5, %v2474_v56 }
0x185d   :  { %3809 = vmatpush3.bf16.xpose.msra.mxu1 %v2577_v36  ;;  %3810 = vmatprep.mubr.msk.bf16.mxu1 %vm4103_vm2, %v4102_v29 }
0x185e   :  { %3820 = vmatprep.subr.bf16.mxu1 %v4102_v29 }
0x1861   :  { %v2562_v60 = vpop.f32.mrb[68].mxu0 }
0x1862   :  { %v3806_v61 = vpop.f32.mrb[69].mxu0 }
0x1863   :  { %v2565_v0 = vpop.f32.mrb[70].mxu0 }
0x1864   :  { %v3807_v1 = vpop.f32.mrb[71].mxu0  ;;  %3811 = vmatmul.mubr.msk.bf16.vlgmr.msra.gmra.mrb[80].mxu1 %vm494_vm5, %v2570_v63 }
0x1865   :  { %3822 = vmatprep.mubr.msk.bf16.mxu1 %vm4103_vm2, %v4102_v29 }
0x186a   :  { %v2663_v2 = vpop.f32.mrb[72].mxu0 }
0x186b   :  { %v2670_v4 = vmul.f32 0.35355338, %v2663_v2  ;;  %v3818_v5 = vpop.f32.mrb[73].mxu0 }
0x186c   :  { %v2666_v37 = vpop.f32.mrb[74].mxu0 }
0x186d   :  { %v3819_v6 = vpop.f32.mrb[75].mxu0  ;;  %v2674_v9 = vsel %vm494_vm5, %v2670_v4, -inf }
0x186e   :  { %2675 = vmax.xlane.f32.xlu1 %v2674_v9 }
0x187f   :  { %2743 = vrot.lane.b32.xlu1 %v4633_v12, %s4106_s9 }
0x1883   :  { %2843 = vrot.lane.b32.xlu1 %v4618_v62, %s4107_s13 }
0x1887   :  { %2893 = vrot.lane.b32.xlu1 %v4621_v3, %s4107_s13 }
0x188b   :  { %2891 = vrot.lane.b32.xlu1 %v4635_v13, %s4107_s13 }
0x18fb   :  { %v2676_v14 = vpop.xlane.xlu1 %2675 }
0x18fc   :  { %v2678_v17 = vsub.f32 %v2670_v4, %v2676_v14 }
0x18fe   :  { %v2681_v18 = vmul.f32 1.442695, %v2678_v17 }
0x18ff   :  { %v2744_v15 = vpop.permute.xlu1 %2743 }
0x1900   :  { %v2749_v16 = vsel %vm379_vm3, %v2744_v15, 0  ;;  %4019 = vpow2.f32 %v2681_v18 }
0x1901   :  { %3827 = vmatpush3.bf16.msra.mxu0 %v2749_v16 }
0x1902   :  { %3838 = vmatprep.subr.bf16.mxu0 %v4102_v29 }
0x1903   :  { %v2844_v45 = vpop.permute.xlu1 %2843 }
0x1904   :  { %v2849_v46 = vsel %vm494_vm5, %v2844_v45, 0 }
0x1907   :  { %v2894_v61 = vpop.permute.xlu1 %2893 }
0x1908   :  { %v2899_v4 = vsel %vm494_vm5, %v2894_v61, 0 }
0x190a   :  { %v4020_v31 = vpop.eup %4019 }
0x190b   :  { %v2686_v32 = vsel %vm494_vm5, %v4020_v31, 0.0  ;;  %v2892_v37 = vpop.permute.xlu1 %2891 }
0x192f   :  { %v2515_v19 = vpop.f32.mrb[76].mxu1 }
0x1930   :  { %v4747_v20 = vadd.f32 %v2562_v60, %v2515_v19  ;;  %v3800_v21 = vpop.f32.mrb[77].mxu1 }
0x1931   :  { %v2518_v62 = vpop.f32.mrb[78].mxu1 }
0x1932   :  { %v4749_v22 = vadd.f32 %v2565_v0, %v2518_v62  ;;  %v3801_v3 = vpop.f32.mrb[79].mxu1 }
0x1937   :  { %v2613_v23 = vpop.f32.mrb[80].mxu1 }
0x1938   :  { %v2669_v13 = vmul.f32 0.35355338, %v2613_v23  ;;  %v3812_v25 = vpop.f32.mrb[81].mxu1 }
0x1939   :  { %v2616_v26 = vpop.f32.mrb[82].mxu1 }
0x193a   :  { %v3813_v27 = vpop.f32.mrb[83].mxu1  ;;  %v2671_v28 = vsel %vm494_vm5, %v2669_v13, -inf }
0x193b   :  { %2672 = vmax.xlane.f32.xlu0 %v2671_v28 }
0x193f   :  { %2687 = vadd.xlane.f32.xlu0 %v2686_v32 }
0x19c8   :  { %v2673_v33 = vpop.xlane.xlu0 %2672 }
0x19c9   :  { %v2677_v34 = vsub.f32 %v2669_v13, %v2673_v33 }
0x19cb   :  { %v2679_v35 = vmul.f32 1.442695, %v2677_v34 }
0x19cc   :  { %v2688_v40 = vpop.xlane.xlu0 %2687 }
0x19cd   :  { %4021 = vpow2.f32 %v2679_v35 }
0x19ce   :  { %4023 = vrcp.f32 %v2688_v40 }
0x19d7   :  { %v4022_v41 = vpop.eup %4021 }
0x19d8   :  { %v4024_v43 = vpop.eup %4023  ;;  %v2683_v24 = vsel %vm494_vm5, %v4022_v41, 0.0 }
0x19d9   :  { %v2692_v30 = vmul.f32 %v4024_v43, %v4020_v31  ;;  %2684 = vadd.xlane.f32.xlu0 %v2683_v24 }
0x19db   :  { %v2694_v39 = vpack.c.bf16 %v2692_v30, %v2692_v30 }
0x19dd   :  { %3829 = vmatmul.mubr.msk.bf16.vlgmr.msra.gmra.mrb[76].mxu0 %vm494_vm5, %v2694_v39 }
0x19de   :  { %3839 = vmatpush3.bf16.xpose.msra.mxu0 %v2849_v46  ;;  %3840 = vmatprep.mubr.msk.bf16.mxu0 %vm4103_vm2, %v4102_v29 }
0x19df   :  { %3850 = vmatprep.subr.bf16.mxu0 %v4102_v29 }
0x19ef   :  { %2695 = vrot.lane.b32.xlu0 %v4628_v8, %s4106_s9 }
0x19f3   :  { %2841 = vrot.lane.b32.xlu0 %v4631_v11, %s4107_s13 }
0x1a66   :  { %v2685_v47 = vpop.xlane.xlu0 %2684 }
0x1a67   :  { %4025 = vrcp.f32 %v2685_v47  ;;  %v1788_v47 = vld [vmem:[%s4885_s15 + $0xc] sm:$0xf] }
0x1a6a   :  { %v2696_v48 = vpop.permute.xlu0 %2695 }
0x1a6b   :  { %v2701_v49 = vsel %vm379_vm3, %v2696_v48, 0  ;;  %v3068_v48 = vsel %vm379_vm3, %v1788_v47, 0 }
0x1a6c   :  { %3821 = vmatpush3.bf16.msra.mxu1 %v2701_v49 }
0x1a6d   :  { %3832 = vmatprep.subr.bf16.mxu1 %v4102_v29 }
0x1a6e   :  { %v2842_v50 = vpop.permute.xlu0 %2841 }
0x1a6f   :  { %3841 = vmatmul.mubr.msk.bf16.vlgmr.msra.gmra.mrb[80].mxu0 %vm494_vm5, %v2842_v50 }
0x1a70   :  { %3852 = vmatprep.mubr.msk.bf16.mxu0 %vm4103_vm2, %v4102_v29 }
0x1a71   :  { %v4026_v42 = vpop.eup %4025 }
0x1a72   :  { %v2691_v51 = vmul.f32 %v4026_v42, %v4022_v41 }
0x1a74   :  { %v2693_v44 = vpack.c.bf16 %v2691_v51, %v2691_v51 }
0x1a76   :  { %3823 = vmatmul.mubr.msk.bf16.vlgmr.msra.gmra.mrb[84].mxu1 %vm494_vm5, %v2693_v44 }
0x1a77   :  { %3834 = vmatprep.mubr.msk.bf16.mxu1 %vm4103_vm2, %v4102_v29  ;;  %3833 = vmatpush3.bf16.msra.mxu1 %v2796_v55 }
0x1a78   :  { %3844 = vmatprep.subr.bf16.mxu1 %v4102_v29 }
0x1ab0   :  { %v2785_v11 = vpop.f32.mrb[76].mxu0 }
0x1ab1   :  { %v3830_v52 = vpop.f32.mrb[77].mxu0 }
0x1ab2   :  { %v2788_v53 = vpop.f32.mrb[78].mxu0 }
0x1ab3   :  { %v3831_v38 = vpop.f32.mrb[79].mxu0 }
0x1b42   :  { %v2885_v56 = vpop.f32.mrb[80].mxu0 }
0x1b43   :  { %v2941_v57 = vmul.f32 0.35355338, %v2885_v56  ;;  %v3842_v58 = vpop.f32.mrb[81].mxu0 }
0x1b44   :  { %v2888_v36 = vpop.f32.mrb[82].mxu0 }
0x1b45   :  { %v3843_v59 = vpop.f32.mrb[83].mxu0  ;;  %v2943_v60 = vsel %vm494_vm5, %v2941_v57, -inf }
0x1b46   :  { %2944 = vmax.xlane.f32.xlu0 %v2943_v60 }
0x1b49   :  { %v2737_v63 = vpop.f32.mrb[84].mxu1 }
0x1b4a   :  { %v2791_v0 = vpack.c.bf16 %v2785_v11, %v2737_v63  ;;  %v3824_v1 = vpop.f32.mrb[85].mxu1 }
0x1b4b   :  { %v2740_v2 = vpop.f32.mrb[86].mxu1 }
0x1b4c   :  { %v3825_v5 = vpop.f32.mrb[87].mxu1  ;;  %3835 = vmatmul.mubr.msk.bf16.vlgmr.msra.gmra.mrb[88].mxu1 %vm494_vm5, %v2791_v0 }
0x1b4d   :  { %3845 = vmatpush3.bf16.xpose.msra.mxu1 %v2899_v4  ;;  %3846 = vmatprep.mubr.msk.bf16.mxu1 %vm4103_vm2, %v4102_v29 }
0x1b4e   :  { %3856 = vmatprep.subr.bf16.mxu1 %v4102_v29 }
0x1b54   :  { %3847 = vmatmul.mubr.msk.bf16.vlgmr.msra.gmra.mrb[92].mxu1 %vm494_vm5, %v2892_v37 }
0x1b55   :  { %3858 = vmatprep.mubr.msk.bf16.mxu1 %vm4103_vm2, %v4102_v29 }
0x1bd3   :  { %v2945_v6 = vpop.xlane.xlu0 %2944 }
0x1bd4   :  { %v2949_v9 = vsub.f32 %v2941_v57, %v2945_v6 }
0x1bd6   :  { %v2951_v14 = vmul.f32 1.442695, %v2949_v9 }
0x1bd8   :  { %4027 = vpow2.f32 %v2951_v14 }
0x1be2   :  { %v4028_v15 = vpop.eup %4027 }
0x1be3   :  { %v2955_v16 = vsel %vm494_vm5, %v4028_v15, 0.0 }
0x1be4   :  { %2956 = vadd.xlane.f32.xlu0 %v2955_v16 }
0x1c1f   :  { %v2832_v17 = vpop.f32.mrb[88].mxu1 }
0x1c20   :  { %v2839_v18 = vadd.f32 %v2832_v17, %v4747_v20  ;;  %v3836_v19 = vpop.f32.mrb[89].mxu1  ;;  %v3949_v17 = vld [vmem:[%s4887_s18] sm:$0xff]  }
0x1c21   :  { %v2835_v21 = vpop.f32.mrb[90].mxu1  ;;  %v3951_v19 = vld [vmem:[%s4286_s12] sm:$0xff]  }
0x1c22   :  { %v2840_v62 = vadd.f32 %v2835_v21, %v4749_v22  ;;  %v3837_v3 = vpop.f32.mrb[91].mxu1  ;;  %v3952_v21 = vld [vmem:[%s4286_s12 + $0x8] sm:$0xff]  }
0x1c27   :  { %v2935_v23 = vpop.f32.mrb[92].mxu1 }
0x1c28   :  { %v2942_v13 = vmul.f32 0.35355338, %v2935_v23  ;;  %v3848_v25 = vpop.f32.mrb[93].mxu1 }
0x1c29   :  { %v2938_v26 = vpop.f32.mrb[94].mxu1 }
0x1c2a   :  { %v3849_v27 = vpop.f32.mrb[95].mxu1  ;;  %v2946_v28 = vsel %vm494_vm5, %v2942_v13, -inf }
0x1c2b   :  { %2947 = vmax.xlane.f32.xlu1 %v2946_v28  ;;  %v3434_v28 = vld [vmem:[%s4888_s23] ss:$0 sm:$0xff] }
0x1c3c   :  { %3015 = vrot.lane.b32.xlu1 %v4633_v12, %s4107_s13 }
0x1c71   :  { %v2957_v40 = vpop.xlane.xlu0 %2956 }
0x1cb8   :  { %v2948_v31 = vpop.xlane.xlu1 %2947 }
0x1cb9   :  { %v2950_v32 = vsub.f32 %v2942_v13, %v2948_v31 }
0x1cbb   :  { %v2953_v33 = vmul.f32 1.442695, %v2950_v32 }
0x1cbc   :  { %v3016_v20 = vpop.permute.xlu1 %3015 }
0x1cbd   :  { %4029 = vpow2.f32 %v2953_v33  ;;  %v3021_v34 = vsel %vm379_vm3, %v3016_v20, 0 }
0x1cbe   :  { %3857 = vmatpush3.bf16.msra.mxu1 %v3021_v34  ;;  %4031 = vrcp.f32 %v2957_v40  ;;  %v3435_v34 = vld [vmem:[%s4889_s22] ss:$0 sm:$0xff] }
0x1cbf   :  { %3868 = vmatprep.subr.bf16.mxu1 %v4102_v29 }
0x1cc7   :  { %v4030_v22 = vpop.eup %4029 }
0x1cc8   :  { %v2958_v35 = vsel %vm494_vm5, %v4030_v22, 0.0  ;;  %v4032_v12 = vpop.eup %4031 }
0x1cc9   :  { %2959 = vadd.xlane.f32.xlu0 %v2958_v35  ;;  %v2963_v43 = vmul.f32 %v4032_v12, %v4028_v15 }
0x1ccb   :  { %v2965_v45 = vpack.c.bf16 %v2963_v43, %v2963_v43  ;;  %v3954_v43 = vld [vmem:[%s4286_s12 + $0x18] sm:$0xff]  }
0x1cdf   :  { %2967 = vrot.lane.b32.xlu0 %v4628_v8, %s4107_s13 }
0x1d56   :  { %v2960_v41 = vpop.xlane.xlu0 %2959 }
0x1d57   :  { %4033 = vrcp.f32 %v2960_v41  ;;  %v3953_v41 = vld [vmem:[%s4286_s12 + $0x10] sm:$0xff]  }
0x1d5a   :  { %v2968_v24 = vpop.permute.xlu0 %2967 }
0x1d5b   :  { %v2973_v30 = vsel %vm379_vm3, %v2968_v24, 0  ;;  %v3436_v24 = vld [vmem:[%s4281_s4] ss:$0 sm:$0xff] }
0x1d5c   :  { %3851 = vmatpush3.bf16.msra.mxu0 %v2973_v30 }
0x1d5d   :  { %3862 = vmatprep.subr.bf16.mxu0 %v4102_v29 }
0x1d5f   :  { %3853 = vmatmul.mubr.msk.bf16.vlgmr.msra.gmra.mrb[84].mxu0 %vm494_vm5, %v2965_v45 }
0x1d60   :  { %3864 = vmatprep.mubr.msk.bf16.mxu0 %vm4103_vm2, %v4102_v29  ;;  %3863 = vmatpush3.bf16.msra.mxu0 %v3068_v48 }
0x1d61   :  { %v4034_v8 = vpop.eup %4033  ;;  %3876 = vmatprep.subr.bf16.mxu0 %v4102_v29 }
0x1d62   :  { %v2964_v39 = vmul.f32 %v4034_v8, %v4030_v22 }
0x1d64   :  { %v2966_v46 = vpack.c.bf16 %v2964_v39, %v2964_v39 }
0x1d66   :  { %3859 = vmatmul.mubr.msk.bf16.vlgmr.msra.gmra.mrb[96].mxu1 %vm494_vm5, %v2966_v46 }
0x1d67   :  { %3872 = vmatprep.mubr.msk.bf16.mxu1 %vm4103_vm2, %v4102_v29  ;;  %3869 = vmatpush3.bf16.msra.mxu1 %v3949_v17 }
0x1d68   :  { %3870 = vmatprep.subr.bf16.mxu1 %v4102_v29 }
0x1e32   :  { %v3009_v49 = vpop.f32.mrb[84].mxu0 }
0x1e33   :  { %v3854_v50 = vpop.f32.mrb[85].mxu0 }
0x1e34   :  { %v3012_v42 = vpop.f32.mrb[86].mxu0 }
0x1e35   :  { %v3855_v51 = vpop.f32.mrb[87].mxu0  ;;  %v3440_v42 = vld [vmem:[#allocation2] ss:$0 sm:$0xff] }
0x1e39   :  { %v3057_v44 = vpop.f32.mrb[96].mxu1 }
0x1e3a   :  { %v3063_v11 = vpack.c.bf16 %v3057_v44, %v3009_v49  ;;  %v3860_v52 = vpop.f32.mrb[97].mxu1 }
0x1e3b   :  { %v3060_v53 = vpop.f32.mrb[98].mxu1 }
0x1e3c   :  { %v3861_v38 = vpop.f32.mrb[99].mxu1  ;;  %3865 = vmatmul.mubr.msk.bf16.vlgmr.msra.gmra.mrb[88].mxu0 %vm494_vm5, %v3063_v11 }
0x1e3d   :  { %3884 = vmatprep.mubr.msk.bf16.mxu0 %vm4103_vm2, %v4102_v29  ;;  %3877 = vmatpush3.bf16.msra.mxu0 %v3951_v19 }
0x1e3e   :  { %3878 = vmatprep.subr.bf16.mxu0 %v4102_v29 }
0x1e41   :  { %3879 = vmatpush3.bf16.msra.mxu0 %v3952_v21 }
0x1e42   :  { %3880 = vmatprep.subr.bf16.mxu0 %v4102_v29 }
0x1e45   :  { %3881 = vmatpush3.bf16.msra.mxu0 %v3953_v41 }
0x1e46   :  { %3882 = vmatprep.subr.bf16.mxu0 %v4102_v29 }
0x1e49   :  { %3883 = vmatpush3.bf16.msra.mxu0 %v3954_v43 }
0x1f0f   :  { %v3104_v55 = vpop.f32.mrb[88].mxu0 }
0x1f10   :  { %v3111_v56 = vadd.f32 %v3104_v55, %v2839_v18  ;;  %v3866_v57 = vpop.f32.mrb[89].mxu0  ;;  %v3950_v18 = vld [vmem:[%s4887_s18 + $0x8] sm:$0xff]  }
0x1f11   :  { %v3107_v58 = vpop.f32.mrb[90].mxu0  ;;  %3871 = vmatpush3.bf16.msra.mxu1 %v3950_v18 }
0x1f12   :  { %v3119_v36 = vadd.f32 %v3433_v54, %v3111_v56  ;;  %v3112_v59 = vadd.f32 %v3107_v58, %v2840_v62  ;;  %v3867_v60 = vpop.f32.mrb[91].mxu0 }
0x1f14   :  { %v4810_v61 = vadd.f32 %v3119_v36, %v4580_v7  ;;  %v3120_v63 = vadd.f32 %v3433_v54, %v3112_v59 }
0x1f16   :  { %v4813_v0 = vadd.f32 %v3120_v63, %v4583_v10  ;;  %v3123_v1 = vsel %vm207_vm0, %v4810_v61, 0.0 }
0x1f17   :  { %3124 = vadd.xlane.f32.xlu1 %v3123_v1 }
0x1f18   :  { %v3126_v2 = vsel %vm207_vm0, %v4813_v0, 0.0 }
0x1f19   :  { %3127 = vadd.xlane.f32.xlu0 %v3126_v2 }
0x1fa4   :  { %v3125_v4 = vpop.xlane.xlu1 %3124 }
0x1fa5   :  { %v3129_v5 = vmul.f32 0.03125, %v3125_v4 }
0x1fa6   :  { %v3128_v37 = vpop.xlane.xlu0 %3127 }
0x1fa7   :  { %v3131_v7 = vsub.f32 %v4810_v61, %v3129_v5  ;;  %v3130_v6 = vmul.f32 0.03125, %v3128_v37 }
0x1fa9   :  { %v3132_v10 = vsub.f32 %v4813_v0, %v3130_v6  ;;  %v3133_v9 = vmul.f32 %v3131_v7, %v3131_v7 }
0x1fab   :  { %v3135_v14 = vsel %vm207_vm0, %v3133_v9, 0.0  ;;  %v3134_v15 = vmul.f32 %v3132_v10, %v3132_v10 }
0x1fac   :  { %3136 = vadd.xlane.f32.xlu0 %v3135_v14 }
0x1fad   :  { %v3138_v16 = vsel %vm207_vm0, %v3134_v15, 0.0 }
0x1fae   :  { %3139 = vadd.xlane.f32.xlu1 %v3138_v16 }
0x2039   :  { %v3137_v62 = vpop.xlane.xlu0 %3136 }
0x203a   :  { %v3141_v3 = vmul.f32 0.03125, %v3137_v62 }
0x203b   :  { %v3140_v23 = vpop.xlane.xlu1 %3139 }
0x203c   :  { %v3143_v13 = vadd.f32 1e-05, %v3141_v3  ;;  %v3142_v25 = vmul.f32 0.03125, %v3140_v23 }
0x203e   :  { %4035 = vrsqrt.f32 %v3143_v13  ;;  %v3144_v26 = vadd.f32 1e-05, %v3142_v25 }
0x2040   :  { %4037 = vrsqrt.f32 %v3144_v26 }
0x2048   :  { %v4036_v27 = vpop.eup %4035 }
0x2049   :  { %v3147_v31 = vmul.f32 %v4036_v27, %v3131_v7 }
0x204a   :  { %v4038_v32 = vpop.eup %4037 }
0x204b   :  { %v3155_v33 = vmul.f32 %v3434_v28, %v3147_v31  ;;  %v3148_v20 = vmul.f32 %v4038_v32, %v3132_v10 }
0x204d   :  { %v3156_v22 = vmul.f32 %v3434_v28, %v3148_v20  ;;  %v3163_v35 = vadd.f32 %v3435_v34, %v3155_v33 }
0x204f   :  { %v3164_v40 = vadd.f32 %v3435_v34, %v3156_v22 }
0x2051   :  { %v3165_v12 = vpack.c.bf16 %v3164_v40, %v3163_v35 }
0x2053   :  { %3873 = vmatmul.mubr.msk.bf16.vlgmr.msra.gmra.mrb[100].mxu1 %vm207_vm0, %v3165_v12 }
0x2126   :  { %v3221_v30 = vpop.f32.mrb[100].mxu1 }
0x2127   :  { %v3222_v45 = vadd.f32 %v3436_v24, %v3221_v30  ;;  %v3874_v8 = vpop.f32.mrb[101].mxu1 }
0x2128   :  { %v3224_v39 = vpop.f32.mrb[102].mxu1 }
0x2129   :  { %v3225_v46 = vadd.f32 %v3436_v24, %v3224_v39  ;;  %v3875_v47 = vpop.f32.mrb[103].mxu1  ;;  %v3228_v48 = vmax.f32 %v3222_v45, 0.0 }
0x212b   :  { %v3229_v49 = vmax.f32 %v3225_v46, 0.0 }
0x212d   :  { %v3230_v50 = vpack.c.bf16 %v3229_v49, %v3228_v48 }
0x212f   :  { %3885 = vmatmul.mubr.msk.bf16.vlgmr.msra.gmra.mrb[92].mxu0 %vm1721_vm6, %v3230_v50 }
0x2202   :  { %v3298_v51 = vpop.f32.mrb[92].mxu0 }
0x2203   :  { %v3299_v44 = vadd.f32 %v3440_v42, %v3298_v51  ;;  %v3886_v29 = vpop.f32.mrb[93].mxu0 }
0x2204   :  { %v3301_v11 = vpop.f32.mrb[94].mxu0 }
0x2205   :  { %v3305_v52 = vadd.f32 %v3299_v44, %v4810_v61  ;;  %v3302_v53 = vadd.f32 %v3440_v42, %v3301_v11  ;;  %v3887_v38 = vpop.f32.mrb[95].mxu0 }
0x2207   :  { %3307 = vst.msk [vmem:[%s4294_s27] sm:$0xff] %vm207_vm0, %v3305_v52  ;;  %v3306_v54 = vadd.f32 %v3302_v53, %v4813_v0 }
0x2209   :  { %3308 = vst.msk [vmem:[%s4294_s27 + $0x8] sm:$0xff] %vm207_vm0, %v3306_v54 }
0x220a   :  { %3313 = vsyncpa [#allocation3], 1 }

// kernel: perceiver_forward.3
= control target key start
LH: loop header
LB: loop body
LE: loop exit
PB: predicated region body
PF: predicated region fallthrough
CT: control target
= control target key end

     0   :  { %s4881_s6 = smov 1   ;;  %s4882_s10 = smov 2   ;;  %s5753_s0 = inlined_call_operand.smem [shape: u32[37], index: -1, kind: input, shape index: {}] }
   0x1   :  { %s4954_s5 = sld [smem:[%s5753_s0]]   ;;  %s4883_s14 = smov 3  }
   0x2   :  { %s4959_s9 = sld [smem:[%s5753_s0 + %s4881_s6]]   ;;  %s4884_s18 = smov 4  }
   0x3   :  { %s4964_s13 = sld [smem:[%s5753_s0 + %s4882_s10]]   ;;  %s4885_s22 = smov 5  }
   0x4   :  { %s4969_s17 = sld [smem:[%s5753_s0 + %s4883_s14]]   ;;  %s4886_s26 = smov 6  }
   0x5   :  { %s4974_s21 = sld [smem:[%s5753_s0 + %s4884_s18]]   ;;  %s4887_s30 = smov 7  }
   0x6   :  { %s4979_s25 = sld [smem:[%s5753_s0 + %s4885_s22]]   ;;  %s4888_s4 = smov 8  }
   0x7   :  { %5773 = sst [smem:[#allocation51_spill]] %s4954_s5  ;;  %s4889_s10 = smov 9  }
   0x8   :  { %5774 = sst [smem:[#allocation52_spill]] %s4959_s9  ;;  %s4890_s15 = smov 10  }
   0x9   :  { %s4984_s29 = sld [smem:[%s5753_s0 + %s4886_s26]]   ;;  %s4891_s20 = smov 11  }
   0xa   :  { %s4989_s3 = sld [smem:[%s5753_s0 + %s4887_s30]]   ;;  %s4892_s26 = smov 12  }
   0xb   :  { %s4994_s8 = sld [smem:[%s5753_s0 + %s4888_s4]]   ;;  %s4893_s1 = smov 13  }
   0xc   :  { %s4999_s14 = sld [smem:[%s5753_s0 + %s4889_s10]]   ;;  %s4894_s7 = smov 14  }
   0xd   :  { %s5004_s19 = sld [smem:[%s5753_s0 + %s4890_s15]]   ;;  %s4895_s15 = smov 15  }
   0xe   :  { %s5009_s24 = sld [smem:[%s5753_s0 + %s4891_s20]]   ;;  %s4896_s22 = smov 16  }
   0xf   :  { %5775 = sst [smem:[#allocation53_spill]] %s4984_s29  ;;  %s4897_s28 = smov 17  }
  0x10   :  { %s5014_s30 = sld [smem:[%s5753_s0 + %s4892_s26]]  }
  0x11   :  { %5776 = sst [smem:[#allocation54_spill]] %s4994_s8 }
  0x12   :  { %s5019_s6 = sld [smem:[%s5753_s0 + %s4893_s1]]  }
  0x13   :  { %5777 = sst [smem:[#allocation55_spill]] %s5004_s19 }
  0x14   :  { %s5024_s12 = sld [smem:[%s5753_s0 + %s4894_s7]]   ;;  %s4898_s7 = smov 18  }
  0x15   :  { %s5029_s20 = sld [smem:[%s5753_s0 + %s4895_s15]]   ;;  %s4899_s15 = smov 19  }
  0x16   :  { %5778 = sst [smem:[#allocation56_spill]] %s5014_s30 }
  0x17   :  { %s5034_s27 = sld [smem:[%s5753_s0 + %s4896_s22]]   ;;  %s4900_s22 = smov 20  }
  0x18   :  { %s5039_s4 = sld [smem:[%s5753_s0 + %s4897_s28]]   ;;  %s4901_s28 = smov 21  }
  0x19   :  { %s5044_s30 = sld [smem:[%s5753_s0 + %s4898_s7]]   ;;  %s4902_s7 = smov 22  }
  0x1a   :  { %5779 = sst [smem:[#allocation57_spill]] %s5024_s12 }
  0x1b   :  { %s5049_s8 = sld [smem:[%s5753_s0 + %s4899_s15]]   ;;  %s4903_s15 = smov 23  }
  0x1c   :  { %s5059_s19 = sld [smem:[%s5753_s0 + %s4901_s28]]   ;;  %s4905_s28 = smov 25  }
  0x1d   :  { %5780 = sst [smem:[#allocation58_spill]] %s5034_s27 }
  0x1e   :  { %5781 = sst [smem:[#allocation59_spill]] %s5039_s4 }
  0x1f   :  { %5782 = sst [smem:[#allocation60_spill]] %s5044_s30 }
  0x20   :  { %s5054_s27 = sld [smem:[%s5753_s0 + %s4900_s22]]   ;;  %s4904_s22 = smov 24  }
  0x21   :  { %s5064_s30 = sld [smem:[%s5753_s0 + %s4902_s7]]   ;;  %s4906_s7 = smov 26  }
  0x22   :  { %s5069_s29 = sld [smem:[%s5753_s0 + %s4903_s15]]   ;;  %s4907_s15 = smov 27  }
  0x23   :  { %s5074_s9 = sld [smem:[%s5753_s0 + %s4904_s22]]   ;;  %s4908_s22 = smov 28  }
  0x24   :  { %s5079_s5 = sld [smem:[%s5753_s0 + %s4905_s28]]   ;;  %s4909_s28 = smov 29  }
  0x26   :  { %5783 = sst [smem:[#allocation61_spill]] %s5054_s27 }
  0x27   :  { %5784 = sst [smem:[#allocation62_spill]] %s5064_s30 }
  0x28   :  { %5785 = sst [smem:[#allocation63_spill]] %s5069_s29 }
  0x29   :  { %5786 = sst [smem:[#allocation64_spill]] %s5074_s9 }
  0x2a   :  { %s5084_s30 = sld [smem:[%s5753_s0 + %s4906_s7]]   ;;  %s4910_s7 = smov 30  }
  0x2b   :  { %s5089_s29 = sld [smem:[%s5753_s0 + %s4907_s15]]   ;;  %s4911_s15 = smov 31  }
  0x2c   :  { %s5094_s9 = sld [smem:[%s5753_s0 + %s4908_s22]]   ;;  %s4912_s22 = smov 32  }
  0x2d   :  { %s5099_s27 = sld [smem:[%s5753_s0 + %s4909_s28]]   ;;  %s4913_s28 = smov 33  }
  0x2e   :  { %s5119_s4 = sld [smem:[%s5753_s0 + %s4913_s28]]  }
  0x30   :  { %5787 = sst [smem:[#allocation65_spill]] %s5084_s30 }
  0x31   :  { %5788 = sst [smem:[#allocation66_spill]] %s5089_s29 }
  0x32   :  { %5789 = sst [smem:[#allocation67_spill]] %s5094_s9 }
  0x33   :  { %s5104_s30 = sld [smem:[%s5753_s0 + %s4910_s7]]   ;;  %s4914_s7 = smov 34  }
  0x34   :  { %s5109_s29 = sld [smem:[%s5753_s0 + %s4911_s15]]   ;;  %s4915_s15 = smov 35  }
  0x35   :  { %s5114_s9 = sld [smem:[%s5753_s0 + %s4912_s22]]   ;;  %s4916_s22 = smov 36  }
  0x36   :  { %s5129_s12 = sld [smem:[%s5753_s0 + %s4915_s15]]  }
  0x39   :  { %5790 = sst [smem:[#allocation68_spill]] %s5104_s30 }
  0x3a   :  { %s5124_s30 = sld [smem:[%s5753_s0 + %s4914_s7]]  }
  0x3b   :  { %5791 = sst [smem:[#allocation69_spill]] %s5114_s9 }
  0x3c   :  { %s5134_s9 = sld [smem:[%s5753_s0 + %s4916_s22]]  }
  0x3d   :  { %78 = vsyncpa [#allocation3], 0 }
  0x3e   :  { %79 = vsyncpa [#allocation6], 0 }
  0x3f   :  { %80 = vsyncpa [#allocation9], 0 }
  0x40   :  { %81 = vsyncpa [#allocation12], 0 }
  0x41   :  { %82 = vsyncpa [#allocation15], 0 }
  0x42   :  { %83 = vsyncpa [#allocation18], 0 }
  0x43   :  { %84 = vsyncpa [#allocation21], 0 }
  0x44   :  { %85 = vsyncpa [#allocation24], 0 }
  0x45   :  { %86 = vsyncpa [#allocation27], 0 }
  0x46   :  { %87 = vsyncpa [#allocation30], 0 }
  0x47   :  { %88 = vsyncpa [#allocation33], 0 }
  0x48   :  { %89 = vsyncpa [#allocation36], 0 }
  0x49   :  { %90 = vsyncpa [#allocation4], 0  ;;  %s4917_s28 = smov [#allocation5]   ;;  %s4918_s0 = smov [#allocation8]  }
  0x4a   :  { %s111_s1 = sshll.u32 %s4917_s28, 4  ;;  %s131_s2 = sshll.u32 %s4918_s0, 4  ;;  %s112_s1 = int_to_ptr.vmem [resolvable:$true] %s111_s1  ;;  %s132_s2 = int_to_ptr.vmem [resolvable:$true] %s131_s2 }
  0x4b   :  { %s4349_s7 = scalar_lea.hbm %s4969_s17, 16 }
  0x4c   :  { %p4350_p0 = scmp.ne.s32.totalorder %s4969_s17, %s4349_s7  ;;  %p4353_p1 = scmp.lt.u32.totalorder %s4349_s7, %s4969_s17 }
  0x4e   :  { %p4355_p2 = pnand %p4353_p1, %p4350_p0 }
  0x50   :  { %4358 = shalt.err (!%p4355_p2)
}
  0x51   :  { %s4359_s10 = scalar_lea.vmem %s112_s1, 16  ;;  %s4363_s11 = scalar_lea.vmem %s112_s1, 32 }
  0x52   :  { %p4360_p3 = scmp.ne.s32.totalorder %s112_s1, %s4359_s10  ;;  %p4364_p4 = scmp.lt.s32.totalorder %s112_s1, %s112_s1 }
  0x53   :  { %p4365_p5 = scmp.lt.s32.totalorder %s4363_s11, %s4359_s10 }
  0x55   :  { %p4366_p6 = por %p4365_p5, %p4364_p4 }
  0x57   :  { %p4367_p7 = pnand %p4366_p6, %p4360_p3 }
  0x59   :  { %4370 = shalt.err (!%p4367_p7)
}
  0x5a   :  { %114 = dma.hbm_to_vmem [thread:$0]  %s4969_s17, 16, %s112_s1, [#allocation6]  }
  0x5b   :  { %s4371_s15 = scalar_lea.hbm %s4979_s25, 16 }
  0x5c   :  { %p4372_p8 = scmp.ne.s32.totalorder %s4979_s25, %s4371_s15  ;;  %p4375_p9 = scmp.lt.u32.totalorder %s4371_s15, %s4979_s25 }
  0x5e   :  { %p4377_p10 = pnand %p4375_p9, %p4372_p8 }
  0x60   :  { %4380 = shalt.err (!%p4377_p10)
}
  0x61   :  { %s4381_s16 = scalar_lea.vmem %s132_s2, 16  ;;  %s4385_s18 = scalar_lea.vmem %s132_s2, 32 }
  0x62   :  { %p4382_p11 = scmp.ne.s32.totalorder %s132_s2, %s4381_s16  ;;  %p4386_p12 = scmp.lt.s32.totalorder %s132_s2, %s132_s2 }
  0x63   :  { %p4387_p13 = scmp.lt.s32.totalorder %s4385_s18, %s4381_s16 }
  0x65   :  { %p4388_p0 = por %p4387_p13, %p4386_p12 }
  0x67   :  { %p4389_p1 = pnand %p4388_p0, %p4382_p11 }
  0x69   :  { %4392 = shalt.err (!%p4389_p1)
}
  0x6a   :  { %134 = dma.hbm_to_vmem [thread:$0]  %s4979_s25, 16, %s132_s2, [#allocation9]  }
  0x6b   :  { %s4919_s22 = smov [#allocation11]   ;;  %s4920_s23 = smov [#allocation14]  }
  0x6c   :  { %s155_s17 = sshll.u32 %s4919_s22, 4  ;;  %s179_s26 = sshll.u32 %s4920_s23, 4  ;;  %s156_s17 = int_to_ptr.vmem [resolvable:$true] %s155_s17  ;;  %s180_s26 = int_to_ptr.vmem [resolvable:$true] %s179_s26 }
  0x6d   :  { %s4393_s28 = scalar_lea.hbm %s4999_s14, 16 }
  0x6e   :  { %p4394_p2 = scmp.ne.s32.totalorder %s4999_s14, %s4393_s28  ;;  %p4397_p3 = scmp.lt.u32.totalorder %s4393_s28, %s4999_s14 }
  0x70   :  { %p4399_p4 = pnand %p4397_p3, %p4394_p2 }
  0x72   :  { %4402 = shalt.err (!%p4399_p4)
}
  0x73   :  { %s4403_s1 = scalar_lea.vmem %s156_s17, 16  ;;  %s4407_s0 = scalar_lea.vmem %s156_s17, 32 }
  0x74   :  { %p4404_p5 = scmp.ne.s32.totalorder %s156_s17, %s4403_s1  ;;  %p4408_p6 = scmp.lt.s32.totalorder %s156_s17, %s156_s17 }
  0x75   :  { %p4409_p7 = scmp.lt.s32.totalorder %s4407_s0, %s4403_s1 }
  0x77   :  { %p4410_p8 = por %p4409_p7, %p4408_p6 }
  0x79   :  { %p4411_p9 = pnand %p4410_p8, %p4404_p5 }
  0x7b   :  { %4414 = shalt.err (!%p4411_p9)
}
  0x7c   :  { %158 = dma.hbm_to_vmem [thread:$0]  %s4999_s14, 16, %s156_s17, [#allocation12]  }
  0x7d   :  { %s4415_s25 = scalar_lea.hbm %s5019_s6, 16 }
  0x7e   :  { %p4416_p10 = scmp.ne.s32.totalorder %s5019_s6, %s4415_s25  ;;  %p4419_p11 = scmp.lt.u32.totalorder %s4415_s25, %s5019_s6 }
  0x80   :  { %p4421_p12 = pnand %p4419_p11, %p4416_p10 }
  0x82   :  { %4424 = shalt.err (!%p4421_p12)
}
  0x83   :  { %s4425_s2 = scalar_lea.vmem %s180_s26, 16  ;;  %s4429_s7 = scalar_lea.vmem %s180_s26, 32 }
  0x84   :  { %p4426_p13 = scmp.ne.s32.totalorder %s180_s26, %s4425_s2  ;;  %p4430_p0 = scmp.lt.s32.totalorder %s180_s26, %s180_s26 }
  0x85   :  { %p4431_p1 = scmp.lt.s32.totalorder %s4429_s7, %s4425_s2 }
  0x87   :  { %p4432_p2 = por %p4431_p1, %p4430_p0 }
  0x89   :  { %p4433_p3 = pnand %p4432_p2, %p4426_p13 }
  0x8b   :  { %4436 = shalt.err (!%p4433_p3)
}
  0x8c   :  { %182 = dma.hbm_to_vmem [thread:$0]  %s5019_s6, 16, %s180_s26, [#allocation15]  }
  0x8d   :  { %s4921_s10 = smov [#allocation17]   ;;  %s4922_s11 = smov [#allocation20]  }
  0x8e   :  { %s199_s14 = sshll.u32 %s4921_s10, 4  ;;  %s223_s15 = sshll.u32 %s4922_s11, 4  ;;  %s200_s14 = int_to_ptr.vmem [resolvable:$true] %s199_s14  ;;  %s224_s15 = int_to_ptr.vmem [resolvable:$true] %s223_s15 }
  0x8f   :  { %s4437_s16 = scalar_lea.hbm %s5029_s20, 16 }
  0x90   :  { %p4438_p4 = scmp.ne.s32.totalorder %s5029_s20, %s4437_s16  ;;  %p4441_p5 = scmp.lt.u32.totalorder %s4437_s16, %s5029_s20 }
  0x92   :  { %p4443_p6 = pnand %p4441_p5, %p4438_p4 }
  0x94   :  { %4446 = shalt.err (!%p4443_p6)
}
  0x95   :  { %s4447_s18 = scalar_lea.vmem %s200_s14, 16  ;;  %s4451_s22 = scalar_lea.vmem %s200_s14, 32 }
  0x96   :  { %p4448_p7 = scmp.ne.s32.totalorder %s200_s14, %s4447_s18  ;;  %p4452_p8 = scmp.lt.s32.totalorder %s200_s14, %s200_s14 }
  0x97   :  { %p4453_p9 = scmp.lt.s32.totalorder %s4451_s22, %s4447_s18 }
  0x99   :  { %p4454_p10 = por %p4453_p9, %p4452_p8 }
  0x9b   :  { %p4455_p11 = pnand %p4454_p10, %p4448_p7 }
  0x9d   :  { %4458 = shalt.err (!%p4455_p11)
}
  0x9e   :  { %202 = dma.hbm_to_vmem [thread:$0]  %s5029_s20, 16, %s200_s14, [#allocation18]  }
  0x9f   :  { %s4459_s6 = scalar_lea.hbm %s5049_s8, 16 }
  0xa0   :  { %p4460_p12 = scmp.ne.s32.totalorder %s5049_s8, %s4459_s6  ;;  %p4463_p13 = scmp.lt.u32.totalorder %s4459_s6, %s5049_s8 }
  0xa2   :  { %p4465_p0 = pnand %p4463_p13, %p4460_p12 }
  0xa4   :  { %4468 = shalt.err (!%p4465_p0)
}
  0xa5   :  { %s4469_s17 = scalar_lea.vmem %s224_s15, 16  ;;  %s4473_s23 = scalar_lea.vmem %s224_s15, 32 }
  0xa6   :  { %p4470_p1 = scmp.ne.s32.totalorder %s224_s15, %s4469_s17  ;;  %p4474_p2 = scmp.lt.s32.totalorder %s224_s15, %s224_s15 }
  0xa7   :  { %p4475_p3 = scmp.lt.s32.totalorder %s4473_s23, %s4469_s17 }
  0xa9   :  { %p4476_p4 = por %p4475_p3, %p4474_p2 }
  0xab   :  { %p4477_p5 = pnand %p4476_p4, %p4470_p1 }
  0xad   :  { %4480 = shalt.err (!%p4477_p5)
}
  0xae   :  { %226 = dma.hbm_to_vmem [thread:$0]  %s5049_s8, 16, %s224_s15, [#allocation21]  }
  0xaf   :  { %s4923_s26 = smov [#allocation23]   ;;  %s4924_s28 = smov [#allocation26]  }
  0xb0   :  { %s243_s20 = sshll.u32 %s4923_s26, 4  ;;  %s267_s1 = sshll.u32 %s4924_s28, 4  ;;  %s244_s20 = int_to_ptr.vmem [resolvable:$true] %s243_s20  ;;  %s268_s1 = int_to_ptr.vmem [resolvable:$true] %s267_s1 }
  0xb1   :  { %s4481_s0 = scalar_lea.hbm %s5059_s19, 16 }
  0xb2   :  { %p4482_p6 = scmp.ne.s32.totalorder %s5059_s19, %s4481_s0  ;;  %p4485_p7 = scmp.lt.u32.totalorder %s4481_s0, %s5059_s19 }
  0xb4   :  { %p4487_p8 = pnand %p4485_p7, %p4482_p6 }
  0xb6   :  { %4490 = shalt.err (!%p4487_p8)
}
  0xb7   :  { %s4491_s25 = scalar_lea.vmem %s244_s20, 16  ;;  %s4495_s2 = scalar_lea.vmem %s244_s20, 32 }
  0xb8   :  { %p4492_p9 = scmp.ne.s32.totalorder %s244_s20, %s4491_s25  ;;  %p4496_p10 = scmp.lt.s32.totalorder %s244_s20, %s244_s20 }
  0xb9   :  { %p4497_p11 = scmp.lt.s32.totalorder %s4495_s2, %s4491_s25 }
  0xbb   :  { %p4498_p12 = por %p4497_p11, %p4496_p10 }
  0xbd   :  { %p4499_p13 = pnand %p4498_p12, %p4492_p9 }
  0xbf   :  { %4502 = shalt.err (!%p4499_p13)
}
  0xc0   :  { %246 = dma.hbm_to_vmem [thread:$0]  %s5059_s19, 16, %s244_s20, [#allocation24]  }
  0xc1   :  { %s4503_s8 = scalar_lea.hbm %s5079_s5, 16 }
  0xc2   :  { %p4504_p0 = scmp.ne.s32.totalorder %s5079_s5, %s4503_s8  ;;  %p4507_p1 = scmp.lt.u32.totalorder %s4503_s8, %s5079_s5 }
  0xc4   :  { %p4509_p2 = pnand %p4507_p1, %p4504_p0 }
  0xc6   :  { %4512 = shalt.err (!%p4509_p2)
}
  0xc7   :  { %s4513_s7 = scalar_lea.vmem %s268_s1, 16  ;;  %s4517_s10 = scalar_lea.vmem %s268_s1, 32 }
  0xc8   :  { %p4514_p3 = scmp.ne.s32.totalorder %s268_s1, %s4513_s7  ;;  %p4518_p4 = scmp.lt.s32.totalorder %s268_s1, %s268_s1 }
  0xc9   :  { %p4519_p5 = scmp.lt.s32.totalorder %s4517_s10, %s4513_s7 }
  0xcb   :  { %p4520_p6 = por %p4519_p5, %p4518_p4 }
  0xcd   :  { %p4521_p7 = pnand %p4520_p6, %p4514_p3 }
  0xcf   :  { %4524 = shalt.err (!%p4521_p7)
}
  0xd0   :  { %270 = dma.hbm_to_vmem [thread:$0]  %s5079_s5, 16, %s268_s1, [#allocation27]  }
  0xd1   :  { %s4925_s14 = smov [#allocation29]   ;;  %s4926_s11 = smov [#allocation32]  }
  0xd2   :  { %s291_s19 = sshll.u32 %s4925_s14, 4  ;;  %s311_s15 = sshll.u32 %s4926_s11, 4  ;;  %s292_s19 = int_to_ptr.vmem [resolvable:$true] %s291_s19  ;;  %s312_s15 = int_to_ptr.vmem [resolvable:$true] %s311_s15 }
  0xd3   :  { %s4525_s16 = scalar_lea.hbm %s5099_s27, 16 }
  0xd4   :  { %p4526_p8 = scmp.ne.s32.totalorder %s5099_s27, %s4525_s16  ;;  %p4529_p9 = scmp.lt.u32.totalorder %s4525_s16, %s5099_s27 }
  0xd6   :  { %p4531_p10 = pnand %p4529_p9, %p4526_p8 }
  0xd8   :  { %4534 = shalt.err (!%p4531_p10)
}
  0xd9   :  { %s4535_s18 = scalar_lea.vmem %s292_s19, 16  ;;  %s4539_s22 = scalar_lea.vmem %s292_s19, 32 }
  0xda   :  { %p4536_p11 = scmp.ne.s32.totalorder %s292_s19, %s4535_s18  ;;  %p4540_p12 = scmp.lt.s32.totalorder %s292_s19, %s292_s19 }
  0xdb   :  { %p4541_p13 = scmp.lt.s32.totalorder %s4539_s22, %s4535_s18 }
  0xdd   :  { %p4542_p0 = por %p4541_p13, %p4540_p12 }
  0xdf   :  { %p4543_p1 = pnand %p4542_p0, %p4536_p11 }
  0xe1   :  { %4546 = shalt.err (!%p4543_p1)
}
  0xe2   :  { %294 = dma.hbm_to_vmem [thread:$0]  %s5099_s27, 16, %s292_s19, [#allocation30]  }
  0xe3   :  { %s4547_s5 = scalar_lea.hbm %s5109_s29, 16 }
  0xe4   :  { %p4548_p2 = scmp.ne.s32.totalorder %s5109_s29, %s4547_s5  ;;  %p4551_p3 = scmp.lt.u32.totalorder %s4547_s5, %s5109_s29 }
  0xe6   :  { %p4553_p4 = pnand %p4551_p3, %p4548_p2 }
  0xe8   :  { %4556 = shalt.err (!%p4553_p4)
}
  0xe9   :  { %s4557_s6 = scalar_lea.vmem %s312_s15, 16  ;;  %s4561_s17 = scalar_lea.vmem %s312_s15, 32 }
  0xea   :  { %p4558_p5 = scmp.ne.s32.totalorder %s312_s15, %s4557_s6  ;;  %p4562_p6 = scmp.lt.s32.totalorder %s312_s15, %s312_s15 }
  0xeb   :  { %p4563_p7 = scmp.lt.s32.totalorder %s4561_s17, %s4557_s6 }
  0xed   :  { %p4564_p8 = por %p4563_p7, %p4562_p6 }
  0xef   :  { %p4565_p9 = pnand %p4564_p8, %p4558_p5 }
  0xf1   :  { %4568 = shalt.err (!%p4565_p9)
}
  0xf2   :  { %314 = dma.hbm_to_vmem [thread:$0]  %s5109_s29, 16, %s312_s15, [#allocation33]  }
  0xf3   :  { %s4927_s23 = smov [#allocation2]   ;;  %s4928_s26 = smov [#allocation7]  }
  0xf4   :  { %s101_s27 = sshll.u32 %s4927_s23, 4  ;;  %s121_s20 = sshll.u32 %s4928_s26, 4  ;;  %s102_s27 = int_to_ptr.vmem [resolvable:$true] %s101_s27  ;;  %s122_s20 = int_to_ptr.vmem [resolvable:$true] %s121_s20 }
  0xf5   :  { %s4569_s28 = scalar_lea.hbm %s4964_s13, 16 }
  0xf6   :  { %p4570_p10 = scmp.ne.s32.totalorder %s4964_s13, %s4569_s28  ;;  %p4573_p11 = scmp.lt.u32.totalorder %s4569_s28, %s4964_s13 }
  0xf8   :  { %p4575_p12 = pnand %p4573_p11, %p4570_p10 }
  0xfa   :  { %4578 = shalt.err (!%p4575_p12)
}
  0xfb   :  { %s4579_s1 = scalar_lea.vmem %s102_s27, 16  ;;  %s4583_s0 = scalar_lea.vmem %s102_s27, 32 }
  0xfc   :  { %p4580_p13 = scmp.ne.s32.totalorder %s102_s27, %s4579_s1  ;;  %p4584_p0 = scmp.lt.s32.totalorder %s102_s27, %s102_s27 }
  0xfd   :  { %p4585_p1 = scmp.lt.s32.totalorder %s4583_s0, %s4579_s1 }
  0xff   :  { %p4586_p2 = por %p4585_p1, %p4584_p0 }
 0x101   :  { %p4587_p3 = pnand %p4586_p2, %p4580_p13 }
 0x103   :  { %4590 = shalt.err (!%p4587_p3)
}
 0x104   :  { %104 = dma.hbm_to_vmem [thread:$0]  %s4964_s13, 16, %s102_s27, [#allocation3]  }
 0x105   :  { %s4591_s29 = scalar_lea.hbm %s4974_s21, 16 }
 0x106   :  { %p4592_p4 = scmp.ne.s32.totalorder %s4974_s21, %s4591_s29  ;;  %p4595_p5 = scmp.lt.u32.totalorder %s4591_s29, %s4974_s21 }
 0x108   :  { %p4597_p6 = pnand %p4595_p5, %p4592_p4 }
 0x10a   :  { %4600 = shalt.err (!%p4597_p6)
}
 0x10b   :  { %s4601_s25 = scalar_lea.vmem %s122_s20, 16  ;;  %s4605_s2 = scalar_lea.vmem %s122_s20, 32 }
 0x10c   :  { %p4602_p7 = scmp.ne.s32.totalorder %s122_s20, %s4601_s25  ;;  %p4606_p8 = scmp.lt.s32.totalorder %s122_s20, %s122_s20 }
 0x10d   :  { %p4607_p9 = scmp.lt.s32.totalorder %s4605_s2, %s4601_s25 }
 0x10f   :  { %p4608_p10 = por %p4607_p9, %p4606_p8 }
 0x111   :  { %p4609_p11 = pnand %p4608_p10, %p4602_p7 }
 0x113   :  { %4612 = shalt.err (!%p4609_p11)
}
 0x114   :  { %124 = dma.hbm_to_vmem [thread:$0]  %s4974_s21, 16, %s122_s20, [#allocation6]  }
 0x115   :  { %s4929_s8 = smov [#allocation10]   ;;  %s4930_s7 = smov [#allocation13]  }
 0x116   :  { %s143_s13 = sshll.u32 %s4929_s8, 4  ;;  %s167_s10 = sshll.u32 %s4930_s7, 4  ;;  %s144_s13 = int_to_ptr.vmem [resolvable:$true] %s143_s13  ;;  %s168_s10 = int_to_ptr.vmem [resolvable:$true] %s167_s10 }
 0x117   :  { %s4613_s14 = scalar_lea.hbm %s4989_s3, 16 }
 0x118   :  { %p4614_p12 = scmp.ne.s32.totalorder %s4989_s3, %s4613_s14  ;;  %p4617_p13 = scmp.lt.u32.totalorder %s4613_s14, %s4989_s3 }
 0x11a   :  { %p4619_p0 = pnand %p4617_p13, %p4614_p12 }
 0x11c   :  { %4622 = shalt.err (!%p4619_p0)
}
 0x11d   :  { %s4623_s19 = scalar_lea.vmem %s144_s13, 16  ;;  %s4627_s11 = scalar_lea.vmem %s144_s13, 32 }
 0x11e   :  { %p4624_p1 = scmp.ne.s32.totalorder %s144_s13, %s4623_s19  ;;  %p4628_p2 = scmp.lt.s32.totalorder %s144_s13, %s144_s13 }
 0x11f   :  { %p4629_p3 = scmp.lt.s32.totalorder %s4627_s11, %s4623_s19 }
 0x121   :  { %p4630_p4 = por %p4629_p3, %p4628_p2 }
 0x123   :  { %p4631_p5 = pnand %p4630_p4, %p4624_p1 }
 0x125   :  { %4634 = shalt.err (!%p4631_p5)
}
 0x126   :  { %146 = dma.hbm_to_vmem [thread:$0]  %s4989_s3, 16, %s144_s13, [#allocation9]  }
 0x127   :  { %s4635_s21 = scalar_lea.hbm %s5009_s24, 16 }
 0x128   :  { %p4636_p6 = scmp.ne.s32.totalorder %s5009_s24, %s4635_s21  ;;  %p4639_p7 = scmp.lt.u32.totalorder %s4635_s21, %s5009_s24 }
 0x12a   :  { %p4641_p8 = pnand %p4639_p7, %p4636_p6 }
 0x12c   :  { %4644 = shalt.err (!%p4641_p8)
}
 0x12d   :  { %s4645_s15 = scalar_lea.vmem %s168_s10, 16  ;;  %s4649_s16 = scalar_lea.vmem %s168_s10, 32 }
 0x12e   :  { %p4646_p9 = scmp.ne.s32.totalorder %s168_s10, %s4645_s15  ;;  %p4650_p10 = scmp.lt.s32.totalorder %s168_s10, %s168_s10 }
 0x12f   :  { %p4651_p11 = scmp.lt.s32.totalorder %s4649_s16, %s4645_s15 }
 0x131   :  { %p4652_p12 = por %p4651_p11, %p4650_p10 }
 0x133   :  { %p4653_p13 = pnand %p4652_p12, %p4646_p9 }
 0x135   :  { %4656 = shalt.err (!%p4653_p13)
}
 0x136   :  { %s5792_s18 = sld [smem:[#allocation57_spill]]  ;;  %s4931_s22 = smov [#allocation16]  }
 0x137   :  { %170 = dma.hbm_to_vmem [thread:$0]  %s5009_s24, 16, %s168_s10, [#allocation12]  }
 0x138   :  { %s189_s3 = sshll.u32 %s4931_s22, 4  ;;  %s4932_s5 = smov [#allocation19]   ;;  %s190_s3 = int_to_ptr.vmem [resolvable:$true] %s189_s3 }
 0x139   :  { %s211_s6 = sshll.u32 %s4932_s5, 4  ;;  %s212_s6 = int_to_ptr.vmem [resolvable:$true] %s211_s6 }
 0x13c   :  { %s4657_s17 = scalar_lea.hbm %s5792_s18, 16 }
 0x13d   :  { %p4658_p0 = scmp.ne.s32.totalorder %s5792_s18, %s4657_s17  ;;  %p4661_p1 = scmp.lt.u32.totalorder %s4657_s17, %s5792_s18 }
 0x13f   :  { %p4663_p2 = pnand %p4661_p1, %p4658_p0 }
 0x141   :  { %4666 = shalt.err (!%p4663_p2)
}
 0x142   :  { %s4667_s23 = scalar_lea.vmem %s190_s3, 16  ;;  %s4671_s27 = scalar_lea.vmem %s190_s3, 32 }
 0x143   :  { %p4668_p3 = scmp.ne.s32.totalorder %s190_s3, %s4667_s23  ;;  %p4672_p4 = scmp.lt.s32.totalorder %s190_s3, %s190_s3 }
 0x144   :  { %p4673_p5 = scmp.lt.s32.totalorder %s4671_s27, %s4667_s23 }
 0x146   :  { %p4674_p6 = por %p4673_p5, %p4672_p4 }
 0x148   :  { %p4675_p7 = pnand %p4674_p6, %p4668_p3 }
 0x14a   :  { %4678 = shalt.err (!%p4675_p7)
}
 0x14b   :  { %s5793_s24 = sld [smem:[#allocation59_spill]] }
 0x14c   :  { %192 = dma.hbm_to_vmem [thread:$0]  %s5792_s18, 16, %s190_s3, [#allocation15]  }
 0x151   :  { %s4679_s26 = scalar_lea.hbm %s5793_s24, 16 }
 0x152   :  { %p4680_p8 = scmp.ne.s32.totalorder %s5793_s24, %s4679_s26  ;;  %p4683_p9 = scmp.lt.u32.totalorder %s4679_s26, %s5793_s24 }
 0x154   :  { %p4685_p10 = pnand %p4683_p9, %p4680_p8 }
 0x156   :  { %4688 = shalt.err (!%p4685_p10)
}
 0x157   :  { %s4689_s20 = scalar_lea.vmem %s212_s6, 16  ;;  %s4693_s28 = scalar_lea.vmem %s212_s6, 32 }
 0x158   :  { %p4690_p11 = scmp.ne.s32.totalorder %s212_s6, %s4689_s20  ;;  %p4694_p12 = scmp.lt.s32.totalorder %s212_s6, %s212_s6 }
 0x159   :  { %p4695_p13 = scmp.lt.s32.totalorder %s4693_s28, %s4689_s20 }
 0x15b   :  { %p4696_p0 = por %p4695_p13, %p4694_p12 }
 0x15d   :  { %p4697_p1 = pnand %p4696_p0, %p4690_p11 }
 0x15f   :  { %4700 = shalt.err (!%p4697_p1)
}
 0x160   :  { %s5794_s1 = sld [smem:[#allocation61_spill]]  ;;  %s4933_s0 = smov [#allocation22]  }
 0x161   :  { %214 = dma.hbm_to_vmem [thread:$0]  %s5793_s24, 16, %s212_s6, [#allocation18]  }
 0x162   :  { %s233_s29 = sshll.u32 %s4933_s0, 4  ;;  %s4934_s25 = smov [#allocation25]   ;;  %s234_s29 = int_to_ptr.vmem [resolvable:$true] %s233_s29 }
 0x163   :  { %s255_s2 = sshll.u32 %s4934_s25, 4  ;;  %s256_s2 = int_to_ptr.vmem [resolvable:$true] %s255_s2 }
 0x166   :  { %s4701_s8 = scalar_lea.hbm %s5794_s1, 16 }
 0x167   :  { %p4702_p2 = scmp.ne.s32.totalorder %s5794_s1, %s4701_s8  ;;  %p4705_p3 = scmp.lt.u32.totalorder %s4701_s8, %s5794_s1 }
 0x169   :  { %p4707_p4 = pnand %p4705_p3, %p4702_p2 }
 0x16b   :  { %4710 = shalt.err (!%p4707_p4)
}
 0x16c   :  { %s4711_s13 = scalar_lea.vmem %s234_s29, 16  ;;  %s4715_s7 = scalar_lea.vmem %s234_s29, 32 }
 0x16d   :  { %p4712_p5 = scmp.ne.s32.totalorder %s234_s29, %s4711_s13  ;;  %p4716_p6 = scmp.lt.s32.totalorder %s234_s29, %s234_s29 }
 0x16e   :  { %p4717_p7 = scmp.lt.s32.totalorder %s4715_s7, %s4711_s13 }
 0x170   :  { %p4718_p8 = por %p4717_p7, %p4716_p6 }
 0x172   :  { %p4719_p9 = pnand %p4718_p8, %p4712_p5 }
 0x174   :  { %4722 = shalt.err (!%p4719_p9)
}
 0x175   :  { %s5795_s10 = sld [smem:[#allocation63_spill]] }
 0x176   :  { %236 = dma.hbm_to_vmem [thread:$0]  %s5794_s1, 16, %s234_s29, [#allocation21]  }
 0x17b   :  { %s4723_s14 = scalar_lea.hbm %s5795_s10, 16 }
 0x17c   :  { %p4724_p10 = scmp.ne.s32.totalorder %s5795_s10, %s4723_s14  ;;  %p4727_p11 = scmp.lt.u32.totalorder %s4723_s14, %s5795_s10 }
 0x17e   :  { %p4729_p12 = pnand %p4727_p11, %p4724_p10 }
 0x180   :  { %4732 = shalt.err (!%p4729_p12)
}
 0x181   :  { %s4733_s19 = scalar_lea.vmem %s256_s2, 16  ;;  %s4737_s11 = scalar_lea.vmem %s256_s2, 32 }
 0x182   :  { %p4734_p13 = scmp.ne.s32.totalorder %s256_s2, %s4733_s19  ;;  %p4738_p0 = scmp.lt.s32.totalorder %s256_s2, %s256_s2 }
 0x183   :  { %p4739_p1 = scmp.lt.s32.totalorder %s4737_s11, %s4733_s19 }
 0x185   :  { %p4740_p2 = por %p4739_p1, %p4738_p0 }
 0x187   :  { %p4741_p3 = pnand %p4740_p2, %p4734_p13 }
 0x189   :  { %4744 = shalt.err (!%p4741_p3)
}
 0x18a   :  { %s5796_s21 = sld [smem:[#allocation66_spill]]  ;;  %s4935_s15 = smov [#allocation28]  }
 0x18b   :  { %258 = dma.hbm_to_vmem [thread:$0]  %s5795_s10, 16, %s256_s2, [#allocation24]  }
 0x18c   :  { %s279_s16 = sshll.u32 %s4935_s15, 4  ;;  %s4936_s18 = smov [#allocation31]   ;;  %s280_s16 = int_to_ptr.vmem [resolvable:$true] %s279_s16 }
 0x18d   :  { %s301_s22 = sshll.u32 %s4936_s18, 4  ;;  %s302_s22 = int_to_ptr.vmem [resolvable:$true] %s301_s22 }
 0x190   :  { %s4745_s3 = scalar_lea.hbm %s5796_s21, 16 }
 0x191   :  { %p4746_p4 = scmp.ne.s32.totalorder %s5796_s21, %s4745_s3  ;;  %p4749_p5 = scmp.lt.u32.totalorder %s4745_s3, %s5796_s21 }
 0x193   :  { %p4751_p6 = pnand %p4749_p5, %p4746_p4 }
 0x195   :  { %4754 = shalt.err (!%p4751_p6)
}
 0x196   :  { %s4755_s5 = scalar_lea.vmem %s280_s16, 16  ;;  %s4759_s6 = scalar_lea.vmem %s280_s16, 32 }
 0x197   :  { %p4756_p7 = scmp.ne.s32.totalorder %s280_s16, %s4755_s5  ;;  %p4760_p8 = scmp.lt.s32.totalorder %s280_s16, %s280_s16 }
 0x198   :  { %p4761_p9 = scmp.lt.s32.totalorder %s4759_s6, %s4755_s5 }
 0x19a   :  { %p4762_p10 = por %p4761_p9, %p4760_p8 }
 0x19c   :  { %p4763_p11 = pnand %p4762_p10, %p4756_p7 }
 0x19e   :  { %4766 = shalt.err (!%p4763_p11)
}
 0x19f   :  { %s5797_s17 = sld [smem:[#allocation68_spill]] }
 0x1a0   :  { %282 = dma.hbm_to_vmem [thread:$0]  %s5796_s21, 16, %s280_s16, [#allocation27]  }
 0x1a5   :  { %s4767_s23 = scalar_lea.hbm %s5797_s17, 16 }
 0x1a6   :  { %p4768_p12 = scmp.ne.s32.totalorder %s5797_s17, %s4767_s23  ;;  %p4771_p13 = scmp.lt.u32.totalorder %s4767_s23, %s5797_s17 }
 0x1a8   :  { %p4773_p0 = pnand %p4771_p13, %p4768_p12 }
 0x1aa   :  { %4776 = shalt.err (!%p4773_p0)
}
 0x1ab   :  { %s4777_s27 = scalar_lea.vmem %s302_s22, 16  ;;  %s4781_s24 = scalar_lea.vmem %s302_s22, 32 }
 0x1ac   :  { %p4778_p1 = scmp.ne.s32.totalorder %s302_s22, %s4777_s27  ;;  %p4782_p2 = scmp.lt.s32.totalorder %s302_s22, %s302_s22 }
 0x1ad   :  { %p4783_p3 = scmp.lt.s32.totalorder %s4781_s24, %s4777_s27 }
 0x1af   :  { %p4784_p4 = por %p4783_p3, %p4782_p2 }
 0x1b1   :  { %p4785_p5 = pnand %p4784_p4, %p4778_p1 }
 0x1b3   :  { %4788 = shalt.err (!%p4785_p5)
}
 0x1b4   :  { %304 = dma.hbm_to_vmem [thread:$0]  %s5797_s17, 16, %s302_s22, [#allocation30]  }
 0x1b5   :  { %s4937_s26 = smov [#allocation34]   ;;  %s4938_s28 = smov [#allocation35]  }
 0x1b6   :  { %s323_s20 = sshll.u32 %s4937_s26, 4  ;;  %s335_s1 = sshll.u32 %s4938_s28, 4  ;;  %s324_s20 = int_to_ptr.vmem [resolvable:$true] %s323_s20  ;;  %s336_s1 = int_to_ptr.vmem [resolvable:$true] %s335_s1 }
 0x1b7   :  { %s4789_s0 = scalar_lea.hbm %s5119_s4, 16 }
 0x1b8   :  { %p4790_p6 = scmp.ne.s32.totalorder %s5119_s4, %s4789_s0  ;;  %p4793_p7 = scmp.lt.u32.totalorder %s4789_s0, %s5119_s4 }
 0x1ba   :  { %p4795_p8 = pnand %p4793_p7, %p4790_p6 }
 0x1bc   :  { %4798 = shalt.err (!%p4795_p8)
}
 0x1bd   :  { %s4799_s29 = scalar_lea.vmem %s324_s20, 16  ;;  %s4803_s25 = scalar_lea.vmem %s324_s20, 32 }
 0x1be   :  { %p4800_p9 = scmp.ne.s32.totalorder %s324_s20, %s4799_s29  ;;  %p4804_p10 = scmp.lt.s32.totalorder %s324_s20, %s324_s20 }
 0x1bf   :  { %p4805_p11 = scmp.lt.s32.totalorder %s4803_s25, %s4799_s29 }
 0x1c1   :  { %p4806_p12 = por %p4805_p11, %p4804_p10 }
 0x1c3   :  { %p4807_p13 = pnand %p4806_p12, %p4800_p9 }
 0x1c5   :  { %4810 = shalt.err (!%p4807_p13)
}
 0x1c6   :  { %326 = dma.hbm_to_vmem [thread:$0]  %s5119_s4, 16, %s324_s20, [#allocation33]  }
 0x1c7   :  { %s4811_s2 = scalar_lea.hbm %s5129_s12, 16 }
 0x1c8   :  { %p4812_p0 = scmp.ne.s32.totalorder %s5129_s12, %s4811_s2  ;;  %p4815_p1 = scmp.lt.u32.totalorder %s4811_s2, %s5129_s12 }
 0x1ca   :  { %p4817_p2 = pnand %p4815_p1, %p4812_p0 }
 0x1cc   :  { %4820 = shalt.err (!%p4817_p2)
}
 0x1cd   :  { %s4821_s8 = scalar_lea.vmem %s336_s1, 16  ;;  %s4825_s13 = scalar_lea.vmem %s336_s1, 32 }
 0x1ce   :  { %p4822_p3 = scmp.ne.s32.totalorder %s336_s1, %s4821_s8  ;;  %p4826_p4 = scmp.lt.s32.totalorder %s336_s1, %s336_s1 }
 0x1cf   :  { %p4827_p5 = scmp.lt.s32.totalorder %s4825_s13, %s4821_s8 }
 0x1d1   :  { %p4828_p6 = por %p4827_p5, %p4826_p4 }
 0x1d3   :  { %p4829_p7 = pnand %p4828_p6, %p4822_p3 }
 0x1d5   :  { %4832 = shalt.err (!%p4829_p7)
}
 0x1d6   :  { %338 = dma.hbm_to_vmem [thread:$0]  %s5129_s12, 16, %s336_s1, [#allocation36]  }
 0x1d7   :  { %4855 = dma.done.wait [#allocation3], 16  }
 0x1d8   :  { %4856 = vsyncadd [#allocation3], 4294967280 }
 0x1d9   :  { %4857 = dma.done.wait [#allocation6], 32  }
 0x1da   :  { %4858 = vsyncadd [#allocation6], 4294967264 }
 0x1db   :  { %4859 = dma.done.wait [#allocation9], 32  }
 0x1dc   :  { %4860 = vsyncadd [#allocation9], 4294967264 }
 0x1dd   :  { %4861 = dma.done.wait [#allocation12], 32  }
 0x1de   :  { %4862 = vsyncadd [#allocation12], 4294967264 }
 0x1df   :  { %4863 = dma.done.wait [#allocation15], 32  }
 0x1e0   :  { %4864 = vsyncadd [#allocation15], 4294967264 }
 0x1e1   :  { %4865 = dma.done.wait [#allocation18], 32  }
 0x1e2   :  { %4866 = vsyncadd [#allocation18], 4294967264 }
 0x1e3   :  { %4867 = dma.done.wait [#allocation21], 32  }
 0x1e4   :  { %4868 = vsyncadd [#allocation21], 4294967264 }
 0x1e5   :  { %4869 = dma.done.wait [#allocation24], 32  }
 0x1e6   :  { %4870 = vsyncadd [#allocation24], 4294967264 }
 0x1e7   :  { %4871 = dma.done.wait [#allocation27], 32  }
 0x1e8   :  { %4872 = vsyncadd [#allocation27], 4294967264 }
 0x1e9   :  { %4873 = dma.done.wait [#allocation30], 32  }
 0x1ea   :  { %4874 = vsyncadd [#allocation30], 4294967264 }
 0x1eb   :  { %4875 = dma.done.wait [#allocation33], 32  }
 0x1ec   :  { %4876 = vsyncadd [#allocation33], 4294967264 }
 0x1ed   :  { %4877 = dma.done.wait [#allocation36], 16  }
 0x1ee   :  { %4878 = vsyncadd [#allocation36], 4294967280  ;;  %s5798_s12 = sld [smem:[#allocation51_spill]]  ;;  %s5799_s4 = sld [smem:[#allocation52_spill]]  ;;  %vm450_vm0 = vcmask 261120   ;;  %vm494_vm1 = vcmask 203776  }
 0x1ef   :  { %s5800_s7 = sld [smem:[#allocation53_spill]]  ;;  %s5801_s10 = sld [smem:[#allocation55_spill]]  ;;  %v4939_v29 = vmov 0.0   ;;  %vm4940_vm2 = vmmov 0   ;;  %vm622_vm3 = vcmask 1043456   ;;  %vm623_vm4 = vcmask 1044480  }
 0x1f0   :  { %3846 = vmatprep.subr.bf16.mxu1 %v4939_v29  ;;  %3862 = vmatprep.subr.bf16.mxu0 %v4939_v29  ;;  %v4941_v32 = vmov 65535   ;;  %s5802_s14 = sld [smem:[#allocation54_spill]]  ;;  %v3636_v51 = vld [vmem:[#allocation2] ss:$0 sm:$0xff]  ;;  %v3637_v57 = vld [vmem:[#allocation5] ss:$0 sm:$0xff] }
 0x1f1   :  { %3850 = vmatprep.mubr.msk.bf16.mxu1 %vm4940_vm2, %v4939_v29  ;;  %3866 = vmatprep.mubr.msk.bf16.mxu0 %vm4940_vm2, %v4939_v29  ;;  %v624_v33 = vsel %vm622_vm3, 4294967295, %v4941_v32  ;;  %v3638_v58 = vld [vmem:[#allocation7] ss:$0 sm:$0xff]  ;;  %vm737_vm5 = vcmask 64512   ;;  %s4942_s19 = smov 120   ;;  %s4943_s11 = smov 112  }
 0x1f2   :  { %v625_v35 = vsel %vm623_vm4, %v624_v33, 0  ;;  %s5803_s21 = sld [smem:[#allocation56_spill]]  ;;  %s4944_s15 = smov 104   ;;  %vm1964_vm6 = vcmask 523264   ;;  %vm3569_vm7 = vcmask 1041409   ;;  %vm3572_vm8 = vcmask 254976  }
 0x1f3   :  { %s5804_s16 = sld [smem:[#allocation58_spill]]  ;;  %s5805_s18 = sld [smem:[#allocation60_spill]] }
 0x1f4   :  { %v406_v0 = vld [vmem:[%s5798_s12] sm:$0xff]  ;;  %v407_v2 = vld [vmem:[%s5798_s12 + $0x8] sm:$0xff]  ;;  %s5806_s22 = sld [smem:[#allocation62_spill]]  ;;  %s5807_s3 = sld [smem:[#allocation65_spill]] }
 0x1f5   :  { %v408_v1 = vld [vmem:[%s5799_s4] sm:$0xff]  ;;  %v451_v3 = vsel %vm450_vm0, %v406_v0, 0.0  ;;  %v409_v5 = vld [vmem:[%s5799_s4 + $0x8] sm:$0xff]  ;;  %v454_v6 = vsel %vm450_vm0, %v407_v2, 0.0  ;;  %s5808_s5 = sld [smem:[#allocation64_spill]]  ;;  %s5809_s6 = sld [smem:[#allocation67_spill]] }
 0x1f6   :  { %v495_v4 = vsel %vm494_vm1, %v408_v1, 0.0  ;;  %452 = vadd.xlane.f32.xlu0 %v451_v3  ;;  %v498_v7 = vsel %vm494_vm1, %v409_v5, 0.0  ;;  %v4239_v28 = vld [vmem:[%s5800_s7] sm:$0xff]   ;;  %v4240_v30 = vld [vmem:[%s5800_s7 + $0x8] sm:$0xff]   ;;  %s5810_s17 = sld [smem:[#allocation69_spill]] }
 0x1f7   :  { %496 = vadd.xlane.f32.xlu1 %v495_v4  ;;  %3847 = vmatpush3.bf16.msra.mxu1 %v4239_v28  ;;  %v4241_v31 = vld [vmem:[%s5801_s10] sm:$0xff]   ;;  %v4244_v34 = vld [vmem:[%s5801_s10 + $0x8] sm:$0x1f]  }
 0x1f8   :  { %3848 = vmatprep.subr.bf16.mxu1 %v4939_v29  ;;  %3863 = vmatpush3.bf16.msra.mxu0 %v4241_v31  ;;  %v688_v36 = vand.u32 %v4244_v34, %v625_v35  ;;  %v3639_v3 = vld [vmem:[#allocation8] ss:$0 sm:$0xff] }
 0x1f9   :  { %3864 = vmatprep.subr.bf16.mxu0 %v4939_v29 }
 0x1fa   :  { %455 = vadd.xlane.f32.xlu0 %v454_v6 }
 0x1fb   :  { %499 = vadd.xlane.f32.xlu1 %v498_v7  ;;  %3849 = vmatpush3.bf16.msra.mxu1 %v4240_v30 }
 0x1fc   :  { %3854 = vmatprep.subr.bf16.mxu1 %v4939_v29  ;;  %3865 = vmatpush3.bf16.msra.mxu0 %v688_v36 }
 0x1fd   :  { %3876 = vmatprep.subr.bf16.mxu0 %v4939_v29 }
 0x283   :  { %v453_v8 = vpop.xlane.xlu0 %452 }
 0x284   :  { %v497_v9 = vpop.xlane.xlu1 %496  ;;  %v458_v10 = vmul.f32 0.03125, %v453_v8 }
 0x285   :  { %v502_v11 = vmul.f32 0.04, %v497_v9 }
 0x286   :  { %v460_v12 = vsub.f32 %v406_v0, %v458_v10 }
 0x287   :  { %v5232_v13 = vsub.f32 %v408_v1, %v502_v11  ;;  %v456_v14 = vpop.xlane.xlu0 %455  ;;  %v4242_v1 = vld [vmem:[%s5802_s14] sm:$0xff]  }
 0x288   :  { %v500_v15 = vpop.xlane.xlu1 %499  ;;  %v459_v16 = vmul.f32 0.03125, %v456_v14  ;;  %v462_v18 = vmul.f32 %v460_v12, %v460_v12 }
 0x289   :  { %v503_v17 = vmul.f32 0.04, %v500_v15  ;;  %v506_v19 = vmul.f32 %v5232_v13, %v5232_v13 }
 0x28a   :  { %v461_v20 = vsub.f32 %v407_v2, %v459_v16  ;;  %v464_v22 = vsel %vm450_vm0, %v462_v18, 0.0  ;;  %v4243_v2 = vld [vmem:[%s5802_s14 + $0x8] sm:$0x1f]  }
 0x28b   :  { %v5236_v21 = vsub.f32 %v409_v5, %v503_v17  ;;  %465 = vadd.xlane.f32.xlu0 %v464_v22  ;;  %v508_v23 = vsel %vm494_vm1, %v506_v19, 0.0  ;;  %v627_v8 = vand.u32 %v4243_v2, %v625_v35  ;;  %v3644_v17 = vld [vmem:[#allocation11] ss:$0 sm:$0xff]  ;;  %v3648_v22 = vld [vmem:[#allocation13] ss:$0 sm:$0xff] }
 0x28c   :  { %v463_v24 = vmul.f32 %v461_v20, %v461_v20 }
 0x28d   :  { %v507_v25 = vmul.f32 %v5236_v21, %v5236_v21 }
 0x28e   :  { %v467_v26 = vsel %vm450_vm0, %v463_v24, 0.0 }
 0x28f   :  { %509 = vadd.xlane.f32.xlu0 %v508_v23  ;;  %468 = vadd.xlane.f32.xlu1 %v467_v26  ;;  %v511_v27 = vsel %vm494_vm1, %v507_v25, 0.0 }
 0x293   :  { %512 = vadd.xlane.f32.xlu1 %v511_v27  ;;  %v3640_v27 = vld [vmem:[#allocation10] ss:$0 sm:$0xff] }
 0x318   :  { %v466_v37 = vpop.xlane.xlu0 %465 }
 0x319   :  { %v470_v38 = vmul.f32 0.03125, %v466_v37 }
 0x31b   :  { %v472_v39 = vadd.f32 1e-05, %v470_v38 }
 0x31c   :  { %v469_v40 = vpop.xlane.xlu1 %468  ;;  %v510_v41 = vpop.xlane.xlu0 %509 }
 0x31d   :  { %4263 = vrsqrt.f32 %v472_v39  ;;  %v471_v42 = vmul.f32 0.03125, %v469_v40  ;;  %v514_v43 = vmul.f32 0.04, %v510_v41 }
 0x31f   :  { %v473_v44 = vadd.f32 1e-05, %v471_v42  ;;  %v516_v45 = vadd.f32 1e-05, %v514_v43 }
 0x320   :  { %v513_v46 = vpop.xlane.xlu1 %512 }
 0x321   :  { %4265 = vrsqrt.f32 %v473_v44  ;;  %v515_v47 = vmul.f32 0.04, %v513_v46 }
 0x322   :  { %4267 = vrsqrt.f32 %v516_v45 }
 0x323   :  { %v517_v48 = vadd.f32 1e-05, %v515_v47 }
 0x325   :  { %4269 = vrsqrt.f32 %v517_v48 }
 0x327   :  { %v4264_v49 = vpop.eup %4263 }
 0x328   :  { %v476_v50 = vmul.f32 %v4264_v49, %v460_v12 }
 0x32a   :  { %v484_v55 = vmul.f32 %v3636_v51, %v476_v50 }
 0x32b   :  { %v4266_v52 = vpop.eup %4265 }
 0x32c   :  { %v4268_v53 = vpop.eup %4267  ;;  %v477_v54 = vmul.f32 %v4266_v52, %v461_v20  ;;  %v492_v62 = vadd.f32 %v3637_v57, %v484_v55 }
 0x32d   :  { %v520_v56 = vmul.f32 %v4268_v53, %v5232_v13 }
 0x32e   :  { %v485_v59 = vmul.f32 %v3636_v51, %v477_v54 }
 0x32f   :  { %v4270_v60 = vpop.eup %4269  ;;  %v528_v0 = vmul.f32 %v3638_v58, %v520_v56 }
 0x330   :  { %v521_v61 = vmul.f32 %v4270_v60, %v5236_v21  ;;  %v493_v63 = vadd.f32 %v3637_v57, %v485_v59 }
 0x331   :  { %v536_v6 = vadd.f32 %v3639_v3, %v528_v0 }
 0x332   :  { %v538_v4 = vpack.c.bf16 %v493_v63, %v492_v62  ;;  %v529_v5 = vmul.f32 %v3638_v58, %v521_v61 }
 0x334   :  { %3851 = vmatmul.mubr.msk.bf16.vlgmr.msra.gmra.mrb[0].mxu1 %vm450_vm0, %v538_v4  ;;  %v537_v7 = vadd.f32 %v3639_v3, %v529_v5 }
 0x335   :  { %3855 = vmatpush3.bf16.msra.mxu1 %v4242_v1  ;;  %3858 = vmatprep.mubr.msk.bf16.mxu1 %vm4940_vm2, %v4939_v29 }
 0x336   :  { %3856 = vmatprep.subr.bf16.mxu1 %v4939_v29  ;;  %v601_v9 = vpack.c.bf16 %v537_v7, %v536_v6 }
 0x338   :  { %3867 = vmatmul.mubr.msk.bf16.vlgmr.msra.gmra.mrb[0].mxu0 %vm494_vm1, %v601_v9 }
 0x339   :  { %3857 = vmatpush3.bf16.msra.mxu1 %v627_v8  ;;  %3878 = vmatprep.mubr.msk.bf16.mxu0 %vm4940_vm2, %v4939_v29 }
 0x33a   :  { %3870 = vmatprep.subr.bf16.mxu1 %v4939_v29 }
 0x33c   :  { %3859 = vmatmul.mubr.msk.bf16.vlgmr.msra.gmra.mrb[4].mxu1 %vm494_vm1, %v601_v9 }
 0x33d   :  { %3872 = vmatprep.mubr.msk.bf16.mxu1 %vm4940_vm2, %v4939_v29 }
 0x407   :  { %v594_v10 = vpop.f32.mrb[0].mxu1 }
 0x408   :  { %v3852_v11 = vpop.f32.mrb[1].mxu1  ;;  %v595_v32 = vadd.f32 %v3640_v27, %v594_v10 }
 0x409   :  { %v597_v12 = vpop.f32.mrb[2].mxu1 }
 0x40a   :  { %v3853_v13 = vpop.f32.mrb[3].mxu1  ;;  %v598_v35 = vadd.f32 %v3640_v27, %v597_v12  ;;  %v5286_v37 = vpack.c.bf16 %v595_v32, %v595_v32 }
 0x40b   :  { %v724_v14 = vpop.f32.mrb[0].mxu0 }
 0x40c   :  { %v3868_v15 = vpop.f32.mrb[1].mxu0  ;;  %v725_v28 = vadd.f32 %v3648_v22, %v724_v14  ;;  %v5290_v39 = vpack.c.bf16 %v598_v35, %v598_v35 }
 0x40d   :  { %v727_v16 = vpop.f32.mrb[2].mxu0 }
 0x40e   :  { %v3869_v18 = vpop.f32.mrb[3].mxu0  ;;  %v728_v33 = vadd.f32 %v3648_v22, %v727_v16  ;;  %v5283_v36 = vpack.c.bf16 %v725_v28, %v725_v28 }
 0x40f   :  { %v663_v19 = vpop.f32.mrb[4].mxu1 }
 0x410   :  { %v664_v20 = vadd.f32 %v3644_v17, %v663_v19  ;;  %v3860_v21 = vpop.f32.mrb[5].mxu1  ;;  %v5288_v38 = vpack.c.bf16 %v728_v33, %v728_v33  ;;  %v860_v40 = vsel %vm622_vm3, %v5283_v36, 0 }
 0x411   :  { %v666_v23 = vpop.f32.mrb[6].mxu1 }
 0x412   :  { %v5274_v24 = vpack.c.bf16 %v664_v20, %v664_v20  ;;  %v667_v25 = vadd.f32 %v3644_v17, %v666_v23  ;;  %v3861_v26 = vpop.f32.mrb[7].mxu1  ;;  %v906_v41 = vsel %vm622_vm3, %v5288_v38, 0 }
 0x414   :  { %v5276_v30 = vpack.c.bf16 %v667_v25, %v667_v25  ;;  %v742_v31 = vsel %vm737_vm5, %v5274_v24, 0 }
 0x415   :  { %3871 = vmatpush3.bf16.xpose.msra.mxu1 %v742_v31 }
 0x416   :  { %v788_v34 = vsel %vm737_vm5, %v5276_v30, 0  ;;  %3882 = vmatprep.subr.bf16.mxu1 %v4939_v29 }
 0x417   :  { %3877 = vmatpush3.bf16.xpose.msra.mxu0 %v788_v34 }
 0x418   :  { %3888 = vmatprep.subr.bf16.mxu0 %v4939_v29 }
 0x41c   :  { %3873 = vmatmul.mubr.msk.bf16.vlgmr.msra.gmra.mrb[8].mxu1 %vm737_vm5, %v5286_v37 }
 0x41d   :  { %3883 = vmatpush3.bf16.msra.mxu1 %v860_v40  ;;  %3884 = vmatprep.mubr.msk.bf16.mxu1 %vm4940_vm2, %v4939_v29 }
 0x41e   :  { %3879 = vmatmul.mubr.msk.bf16.vlgmr.msra.gmra.mrb[4].mxu0 %vm737_vm5, %v5290_v39  ;;  %3894 = vmatprep.subr.bf16.mxu1 %v4939_v29 }
 0x41f   :  { %3889 = vmatpush3.bf16.msra.mxu0 %v906_v41  ;;  %3890 = vmatprep.mubr.msk.bf16.mxu0 %vm4940_vm2, %v4939_v29 }
 0x420   :  { %3900 = vmatprep.subr.bf16.mxu0 %v4939_v29 }
 0x4ef   :  { %v778_v42 = vpop.f32.mrb[8].mxu1 }
 0x4f0   :  { %v830_v43 = vmul.f32 0.35355338, %v778_v42  ;;  %v3874_v44 = vpop.f32.mrb[9].mxu1 }
 0x4f1   :  { %v781_v45 = vpop.f32.mrb[10].mxu1  ;;  %v824_v46 = vpop.f32.mrb[4].mxu0 }
 0x4f2   :  { %v831_v47 = vmul.f32 0.35355338, %v824_v46  ;;  %v3875_v48 = vpop.f32.mrb[11].mxu1  ;;  %v3880_v49 = vpop.f32.mrb[5].mxu0  ;;  %v832_v50 = vsel %vm737_vm5, %v830_v43, -inf }
 0x4f3   :  { %v827_v51 = vpop.f32.mrb[6].mxu0  ;;  %833 = vmax.xlane.f32.xlu0 %v832_v50 }
 0x4f4   :  { %v3881_v52 = vpop.f32.mrb[7].mxu0  ;;  %v835_v53 = vsel %vm737_vm5, %v831_v47, -inf }
 0x4f5   :  { %836 = vmax.xlane.f32.xlu1 %v835_v53 }
 0x506   :  { %1005 = vrot.lane.b32.xlu1 %v5276_v30, %s4942_s19 }
 0x580   :  { %v834_v54 = vpop.xlane.xlu0 %833 }
 0x581   :  { %v838_v55 = vsub.f32 %v830_v43, %v834_v54 }
 0x582   :  { %v837_v56 = vpop.xlane.xlu1 %836 }
 0x583   :  { %v840_v57 = vmul.f32 1.442695, %v838_v55  ;;  %v839_v58 = vsub.f32 %v831_v47, %v837_v56 }
 0x585   :  { %4271 = vpow2.f32 %v840_v57  ;;  %v842_v59 = vmul.f32 1.442695, %v839_v58 }
 0x586   :  { %v1006_v0 = vpop.permute.xlu1 %1005 }
 0x587   :  { %4273 = vpow2.f32 %v842_v59  ;;  %v1011_v11 = vsel %vm737_vm5, %v1006_v0, 0  ;;  %v430_v59 = vld [vmem:[%s5803_s21 + $0x4] sm:$0xf]  ;;  %v429_v0 = vld [vmem:[%s5803_s21] sm:$0xf] }
 0x58f   :  { %v4272_v60 = vpop.eup %4271 }
 0x590   :  { %v844_v61 = vsel %vm737_vm5, %v4272_v60, 0.0 }
 0x591   :  { %v4274_v62 = vpop.eup %4273  ;;  %845 = vadd.xlane.f32.xlu0 %v844_v61 }
 0x592   :  { %v847_v63 = vsel %vm737_vm5, %v4274_v62, 0.0 }
 0x593   :  { %848 = vadd.xlane.f32.xlu1 %v847_v63 }
 0x5a4   :  { %950 = vrot.lane.b32.xlu1 %v5286_v37, %s4942_s19 }
 0x5a7   :  { %953 = vrot.lane.b32.xlu0 %v5274_v24, %s4942_s19 }
 0x5a8   :  { %1002 = vrot.lane.b32.xlu1 %v5290_v39, %s4942_s19 }
 0x61e   :  { %v846_v1 = vpop.xlane.xlu0 %845 }
 0x61f   :  { %4275 = vrcp.f32 %v846_v1 }
 0x620   :  { %v849_v2 = vpop.xlane.xlu1 %848 }
 0x621   :  { %4277 = vrcp.f32 %v849_v2 }
 0x622   :  { %v954_v6 = vpop.permute.xlu0 %953 }
 0x623   :  { %v959_v9 = vsel %vm737_vm5, %v954_v6, 0 }
 0x624   :  { %v951_v12 = vpop.permute.xlu1 %950 }
 0x628   :  { %v1003_v13 = vpop.permute.xlu1 %1002 }
 0x629   :  { %v4276_v3 = vpop.eup %4275 }
 0x62a   :  { %v852_v4 = vmul.f32 %v4276_v3, %v4272_v60  ;;  %v1229_v3 = vsel %vm622_vm3, %v429_v0, 0 }
 0x62b   :  { %v4278_v5 = vpop.eup %4277 }
 0x62c   :  { %v853_v7 = vmul.f32 %v4278_v5, %v4274_v62  ;;  %v854_v8 = vpack.c.bf16 %v852_v4, %v852_v4  ;;  %v1182_v62 = vsel %vm622_vm3, %v430_v59, 0 }
 0x62e   :  { %3885 = vmatmul.mubr.msk.bf16.vlgmr.msra.gmra.mrb[12].mxu1 %vm737_vm5, %v854_v8  ;;  %v855_v10 = vpack.c.bf16 %v853_v7, %v853_v7 }
 0x62f   :  { %3895 = vmatpush3.bf16.xpose.msra.mxu1 %v959_v9  ;;  %3896 = vmatprep.mubr.msk.bf16.mxu1 %vm4940_vm2, %v4939_v29 }
 0x630   :  { %3891 = vmatmul.mubr.msk.bf16.vlgmr.msra.gmra.mrb[8].mxu0 %vm737_vm5, %v855_v10  ;;  %3906 = vmatprep.subr.bf16.mxu1 %v4939_v29 }
 0x631   :  { %3901 = vmatpush3.bf16.xpose.msra.mxu0 %v1011_v11  ;;  %3902 = vmatprep.mubr.msk.bf16.mxu0 %vm4940_vm2, %v4939_v29 }
 0x632   :  { %3912 = vmatprep.subr.bf16.mxu0 %v4939_v29 }
 0x636   :  { %3897 = vmatmul.mubr.msk.bf16.vlgmr.msra.gmra.mrb[16].mxu1 %vm737_vm5, %v951_v12 }
 0x637   :  { %3908 = vmatprep.mubr.msk.bf16.mxu1 %vm4940_vm2, %v4939_v29 }
 0x638   :  { %3903 = vmatmul.mubr.msk.bf16.vlgmr.msra.gmra.mrb[12].mxu0 %vm737_vm5, %v1003_v13 }
 0x639   :  { %3914 = vmatprep.mubr.msk.bf16.mxu0 %vm4940_vm2, %v4939_v29 }
 0x701   :  { %v5334_v14 = vpop.f32.mrb[12].mxu1 }
 0x702   :  { %v3886_v15 = vpop.f32.mrb[13].mxu1 }
 0x703   :  { %v899_v16 = vpop.f32.mrb[14].mxu1  ;;  %v5336_v17 = vpop.f32.mrb[8].mxu0 }
 0x704   :  { %v948_v18 = vpack.c.bf16 %v5336_v17, %v5334_v14  ;;  %v3887_v19 = vpop.f32.mrb[15].mxu1  ;;  %v3892_v20 = vpop.f32.mrb[9].mxu0 }
 0x705   :  { %v945_v21 = vpop.f32.mrb[10].mxu0 }
 0x706   :  { %v3893_v22 = vpop.f32.mrb[11].mxu0 }
 0x709   :  { %v995_v23 = vpop.f32.mrb[16].mxu1 }
 0x70a   :  { %v1053_v25 = vmul.f32 0.35355338, %v995_v23  ;;  %v3898_v26 = vpop.f32.mrb[17].mxu1 }
 0x70b   :  { %v998_v27 = vpop.f32.mrb[18].mxu1  ;;  %v1047_v28 = vpop.f32.mrb[12].mxu0 }
 0x70c   :  { %v1054_v31 = vmul.f32 0.35355338, %v1047_v28  ;;  %v3899_v32 = vpop.f32.mrb[19].mxu1  ;;  %v3904_v33 = vpop.f32.mrb[13].mxu0  ;;  %v1055_v34 = vsel %vm737_vm5, %v1053_v25, -inf }
 0x70d   :  { %v1050_v35 = vpop.f32.mrb[14].mxu0  ;;  %1056 = vmax.xlane.f32.xlu0 %v1055_v34 }
 0x70e   :  { %v3905_v40 = vpop.f32.mrb[15].mxu0  ;;  %v1058_v41 = vsel %vm737_vm5, %v1054_v31, -inf }
 0x70f   :  { %1059 = vmax.xlane.f32.xlu1 %v1058_v41 }
 0x720   :  { %1129 = vrot.lane.b32.xlu1 %v5288_v38, %s4942_s19 }
 0x724   :  { %1274 = vrot.lane.b32.xlu1 %v5274_v24, %s4943_s11 }
 0x728   :  { %1324 = vrot.lane.b32.xlu1 %v5276_v30, %s4943_s11 }
 0x72c   :  { %1322 = vrot.lane.b32.xlu1 %v5290_v39, %s4943_s11 }
 0x79a   :  { %v1057_v42 = vpop.xlane.xlu0 %1056 }
 0x79b   :  { %v1061_v43 = vsub.f32 %v1053_v25, %v1057_v42 }
 0x79c   :  { %v1060_v44 = vpop.xlane.xlu1 %1059 }
 0x79d   :  { %v1063_v45 = vmul.f32 1.442695, %v1061_v43  ;;  %v1062_v46 = vsub.f32 %v1054_v31, %v1060_v44 }
 0x79f   :  { %4279 = vpow2.f32 %v1063_v45  ;;  %v1065_v47 = vmul.f32 1.442695, %v1062_v46 }
 0x7a0   :  { %v1130_v48 = vpop.permute.xlu1 %1129 }
 0x7a1   :  { %4281 = vpow2.f32 %v1065_v47  ;;  %v1135_v49 = vsel %vm622_vm3, %v1130_v48, 0 }
 0x7a2   :  { %3913 = vmatpush3.bf16.msra.mxu0 %v1135_v49 }
 0x7a3   :  { %3924 = vmatprep.subr.bf16.mxu0 %v4939_v29 }
 0x7a4   :  { %v1275_v4 = vpop.permute.xlu1 %1274 }
 0x7a5   :  { %v1280_v16 = vsel %vm737_vm5, %v1275_v4, 0 }
 0x7a8   :  { %v1325_v5 = vpop.permute.xlu1 %1324 }
 0x7a9   :  { %v4280_v50 = vpop.eup %4279  ;;  %v1330_v6 = vsel %vm737_vm5, %v1325_v5, 0 }
 0x7aa   :  { %v1067_v51 = vsel %vm737_vm5, %v4280_v50, 0.0 }
 0x7ab   :  { %v4282_v52 = vpop.eup %4281  ;;  %1068 = vadd.xlane.f32.xlu0 %v1067_v51 }
 0x7ac   :  { %v1070_v53 = vsel %vm737_vm5, %v4282_v52, 0.0  ;;  %v1323_v7 = vpop.permute.xlu1 %1322 }
 0x7af   :  { %1071 = vadd.xlane.f32.xlu0 %v1070_v53 }
 0x7c5   :  { %1080 = vrot.lane.b32.xlu0 %v5283_v36, %s4942_s19 }
 0x7c9   :  { %1272 = vrot.lane.b32.xlu0 %v5286_v37, %s4943_s11 }
 0x838   :  { %v1069_v54 = vpop.xlane.xlu0 %1068 }
 0x839   :  { %4283 = vrcp.f32 %v1069_v54 }
 0x83c   :  { %v1072_v55 = vpop.xlane.xlu0 %1071 }
 0x83d   :  { %4285 = vrcp.f32 %v1072_v55 }
 0x840   :  { %v1081_v56 = vpop.permute.xlu0 %1080 }
 0x841   :  { %v1086_v57 = vsel %vm622_vm3, %v1081_v56, 0 }
 0x842   :  { %3907 = vmatpush3.bf16.msra.mxu1 %v1086_v57 }
 0x843   :  { %v4284_v58 = vpop.eup %4283  ;;  %3918 = vmatprep.subr.bf16.mxu1 %v4939_v29 }
 0x844   :  { %v1075_v60 = vmul.f32 %v4284_v58, %v4280_v50  ;;  %v1273_v20 = vpop.permute.xlu0 %1272 }
 0x846   :  { %v1077_v61 = vpack.c.bf16 %v1075_v60, %v1075_v60 }
 0x847   :  { %v4286_v63 = vpop.eup %4285 }
 0x848   :  { %v1076_v1 = vmul.f32 %v4286_v63, %v4282_v52  ;;  %3909 = vmatmul.mubr.msk.bf16.vlgmr.msra.gmra.mrb[20].mxu1 %vm737_vm5, %v1077_v61 }
 0x849   :  { %3919 = vmatpush3.bf16.msra.mxu1 %v1182_v62  ;;  %3920 = vmatprep.mubr.msk.bf16.mxu1 %vm4940_vm2, %v4939_v29 }
 0x84a   :  { %v1078_v2 = vpack.c.bf16 %v1076_v1, %v1076_v1  ;;  %3930 = vmatprep.subr.bf16.mxu1 %v4939_v29 }
 0x84c   :  { %3915 = vmatmul.mubr.msk.bf16.vlgmr.msra.gmra.mrb[16].mxu0 %vm737_vm5, %v1078_v2 }
 0x84d   :  { %3925 = vmatpush3.bf16.msra.mxu0 %v1229_v3  ;;  %3926 = vmatprep.mubr.msk.bf16.mxu0 %vm4940_vm2, %v4939_v29 }
 0x84e   :  { %3936 = vmatprep.subr.bf16.mxu0 %v4939_v29 }
 0x854   :  { %3927 = vmatmul.mubr.msk.bf16.vlgmr.msra.gmra.mrb[20].mxu0 %vm737_vm5, %v948_v18 }
 0x855   :  { %3938 = vmatprep.mubr.msk.bf16.mxu0 %vm4940_vm2, %v4939_v29 }
 0x856   :  { %3937 = vmatpush3.bf16.xpose.msra.mxu0 %v1330_v6 }
 0x857   :  { %3948 = vmatprep.subr.bf16.mxu0 %v4939_v29 }
 0x85d   :  { %3939 = vmatmul.mubr.msk.bf16.vlgmr.msra.gmra.mrb[24].mxu0 %vm737_vm5, %v1323_v7 }
 0x85e   :  { %3950 = vmatprep.mubr.msk.bf16.mxu0 %vm4940_vm2, %v4939_v29 }
 0x91b   :  { %v1122_v8 = vpop.f32.mrb[20].mxu1 }
 0x91c   :  { %v3910_v9 = vpop.f32.mrb[21].mxu1 }
 0x91d   :  { %v1125_v10 = vpop.f32.mrb[22].mxu1  ;;  %v431_v9 = vld [vmem:[%s5803_s21 + $0x8] sm:$0xf] }
 0x91e   :  { %v3911_v11 = vpop.f32.mrb[23].mxu1  ;;  %v1499_v10 = vsel %vm622_vm3, %v431_v9, 0 }
 0x91f   :  { %v1171_v12 = vpop.f32.mrb[16].mxu0 }
 0x920   :  { %v1177_v13 = vpack.c.bf16 %v1171_v12, %v1122_v8  ;;  %v3916_v14 = vpop.f32.mrb[17].mxu0 }
 0x921   :  { %v1174_v15 = vpop.f32.mrb[18].mxu0 }
 0x922   :  { %v3917_v17 = vpop.f32.mrb[19].mxu0  ;;  %3921 = vmatmul.mubr.msk.bf16.vlgmr.msra.gmra.mrb[24].mxu1 %vm737_vm5, %v1177_v13 }
 0x923   :  { %3931 = vmatpush3.bf16.xpose.msra.mxu1 %v1280_v16  ;;  %3932 = vmatprep.mubr.msk.bf16.mxu1 %vm4940_vm2, %v4939_v29 }
 0x924   :  { %3942 = vmatprep.subr.bf16.mxu1 %v4939_v29 }
 0x927   :  { %v1265_v18 = vpop.f32.mrb[20].mxu0 }
 0x928   :  { %v3928_v19 = vpop.f32.mrb[21].mxu0 }
 0x929   :  { %v1268_v21 = vpop.f32.mrb[22].mxu0 }
 0x92a   :  { %v3929_v22 = vpop.f32.mrb[23].mxu0  ;;  %3933 = vmatmul.mubr.msk.bf16.vlgmr.msra.gmra.mrb[28].mxu1 %vm737_vm5, %v1273_v20 }
 0x92b   :  { %3944 = vmatprep.mubr.msk.bf16.mxu1 %vm4940_vm2, %v4939_v29 }
 0x930   :  { %v1366_v23 = vpop.f32.mrb[24].mxu0 }
 0x931   :  { %v1373_v25 = vmul.f32 0.35355338, %v1366_v23  ;;  %v3940_v26 = vpop.f32.mrb[25].mxu0 }
 0x932   :  { %v1369_v27 = vpop.f32.mrb[26].mxu0 }
 0x933   :  { %v3941_v28 = vpop.f32.mrb[27].mxu0  ;;  %v1377_v31 = vsel %vm737_vm5, %v1373_v25, -inf }
 0x934   :  { %1378 = vmax.xlane.f32.xlu1 %v1377_v31 }
 0x945   :  { %1446 = vrot.lane.b32.xlu1 %v5288_v38, %s4943_s11 }
 0x949   :  { %1546 = vrot.lane.b32.xlu1 %v5274_v24, %s4944_s15 }
 0x94d   :  { %1596 = vrot.lane.b32.xlu1 %v5276_v30, %s4944_s15 }
 0x951   :  { %1594 = vrot.lane.b32.xlu1 %v5290_v39, %s4944_s15 }
 0x9c1   :  { %v1379_v32 = vpop.xlane.xlu1 %1378 }
 0x9c2   :  { %v1381_v35 = vsub.f32 %v1373_v25, %v1379_v32 }
 0x9c4   :  { %v1384_v40 = vmul.f32 1.442695, %v1381_v35 }
 0x9c5   :  { %v1447_v33 = vpop.permute.xlu1 %1446 }
 0x9c6   :  { %v1452_v34 = vsel %vm622_vm3, %v1447_v33, 0  ;;  %4287 = vpow2.f32 %v1384_v40 }
 0x9c7   :  { %3949 = vmatpush3.bf16.msra.mxu0 %v1452_v34 }
 0x9c8   :  { %3960 = vmatprep.subr.bf16.mxu0 %v4939_v29 }
 0x9c9   :  { %v1547_v60 = vpop.permute.xlu1 %1546 }
 0x9ca   :  { %v1552_v62 = vsel %vm737_vm5, %v1547_v60, 0 }
 0x9cd   :  { %v1597_v17 = vpop.permute.xlu1 %1596 }
 0x9ce   :  { %v1602_v22 = vsel %vm737_vm5, %v1597_v17, 0 }
 0x9d0   :  { %v4288_v50 = vpop.eup %4287 }
 0x9d1   :  { %v1389_v51 = vsel %vm737_vm5, %v4288_v50, 0.0  ;;  %v1595_v25 = vpop.permute.xlu1 %1594 }
 0x9f5   :  { %v1218_v41 = vpop.f32.mrb[24].mxu1 }
 0x9f6   :  { %v5402_v42 = vadd.f32 %v1265_v18, %v1218_v41  ;;  %v3922_v43 = vpop.f32.mrb[25].mxu1 }
 0x9f7   :  { %v1221_v24 = vpop.f32.mrb[26].mxu1 }
 0x9f8   :  { %v5404_v44 = vadd.f32 %v1268_v21, %v1221_v24  ;;  %v3923_v30 = vpop.f32.mrb[27].mxu1 }
 0x9fd   :  { %v1316_v45 = vpop.f32.mrb[28].mxu1 }
 0x9fe   :  { %v1372_v39 = vmul.f32 0.35355338, %v1316_v45  ;;  %v3934_v46 = vpop.f32.mrb[29].mxu1 }
 0x9ff   :  { %v1319_v47 = vpop.f32.mrb[30].mxu1 }
 0xa00   :  { %v3935_v48 = vpop.f32.mrb[31].mxu1  ;;  %v1374_v49 = vsel %vm737_vm5, %v1372_v39, -inf }
 0xa01   :  { %1375 = vmax.xlane.f32.xlu0 %v1374_v49 }
 0xa05   :  { %1390 = vadd.xlane.f32.xlu0 %v1389_v51 }
 0xa8e   :  { %v1376_v52 = vpop.xlane.xlu0 %1375 }
 0xa8f   :  { %v1380_v53 = vsub.f32 %v1372_v39, %v1376_v52 }
 0xa91   :  { %v1382_v54 = vmul.f32 1.442695, %v1380_v53 }
 0xa92   :  { %v1391_v55 = vpop.xlane.xlu0 %1390 }
 0xa93   :  { %4289 = vpow2.f32 %v1382_v54 }
 0xa94   :  { %4291 = vrcp.f32 %v1391_v55 }
 0xa9d   :  { %v4290_v56 = vpop.eup %4289 }
 0xa9e   :  { %v4292_v57 = vpop.eup %4291  ;;  %v1386_v58 = vsel %vm737_vm5, %v4290_v56, 0.0 }
 0xa9f   :  { %v1395_v59 = vmul.f32 %v4292_v57, %v4288_v50  ;;  %1387 = vadd.xlane.f32.xlu0 %v1386_v58 }
 0xaa1   :  { %v1397_v61 = vpack.c.bf16 %v1395_v59, %v1395_v59 }
 0xaa3   :  { %3951 = vmatmul.mubr.msk.bf16.vlgmr.msra.gmra.mrb[28].mxu0 %vm737_vm5, %v1397_v61  ;;  %v432_v61 = vld [vmem:[%s5803_s21 + $0xc] sm:$0xf] }
 0xaa4   :  { %3961 = vmatpush3.bf16.xpose.msra.mxu0 %v1552_v62  ;;  %3962 = vmatprep.mubr.msk.bf16.mxu0 %vm4940_vm2, %v4939_v29  ;;  %v1771_v62 = vsel %vm622_vm3, %v432_v61, 0 }
 0xaa5   :  { %3972 = vmatprep.subr.bf16.mxu0 %v4939_v29 }
 0xab5   :  { %1398 = vrot.lane.b32.xlu0 %v5283_v36, %s4943_s11 }
 0xab9   :  { %1544 = vrot.lane.b32.xlu0 %v5286_v37, %s4944_s15 }
 0xb2c   :  { %v1388_v63 = vpop.xlane.xlu0 %1387 }
 0xb2d   :  { %4293 = vrcp.f32 %v1388_v63 }
 0xb30   :  { %v1399_v0 = vpop.permute.xlu0 %1398 }
 0xb31   :  { %v1404_v1 = vsel %vm622_vm3, %v1399_v0, 0 }
 0xb32   :  { %3943 = vmatpush3.bf16.msra.mxu1 %v1404_v1 }
 0xb33   :  { %3954 = vmatprep.subr.bf16.mxu1 %v4939_v29 }
 0xb34   :  { %v1545_v2 = vpop.permute.xlu0 %1544 }
 0xb35   :  { %3963 = vmatmul.mubr.msk.bf16.vlgmr.msra.gmra.mrb[32].mxu0 %vm737_vm5, %v1545_v2 }
 0xb36   :  { %3974 = vmatprep.mubr.msk.bf16.mxu0 %vm4940_vm2, %v4939_v29 }
 0xb37   :  { %v4294_v3 = vpop.eup %4293 }
 0xb38   :  { %v1394_v4 = vmul.f32 %v4294_v3, %v4290_v56 }
 0xb3a   :  { %v1396_v5 = vpack.c.bf16 %v1394_v4, %v1394_v4 }
 0xb3c   :  { %3945 = vmatmul.mubr.msk.bf16.vlgmr.msra.gmra.mrb[32].mxu1 %vm737_vm5, %v1396_v5 }
 0xb3d   :  { %3956 = vmatprep.mubr.msk.bf16.mxu1 %vm4940_vm2, %v4939_v29  ;;  %3955 = vmatpush3.bf16.msra.mxu1 %v1499_v10 }
 0xb3e   :  { %3966 = vmatprep.subr.bf16.mxu1 %v4939_v29 }
 0xb76   :  { %v1488_v37 = vpop.f32.mrb[28].mxu0 }
 0xb77   :  { %v3952_v6 = vpop.f32.mrb[29].mxu0 }
 0xb78   :  { %v1491_v7 = vpop.f32.mrb[30].mxu0 }
 0xb79   :  { %v3953_v8 = vpop.f32.mrb[31].mxu0  ;;  %v3672_v7 = vld [vmem:[#allocation14] ss:$0 sm:$0xff] }
 0xc08   :  { %v1588_v11 = vpop.f32.mrb[32].mxu0 }
 0xc09   :  { %v1644_v12 = vmul.f32 0.35355338, %v1588_v11  ;;  %v3964_v13 = vpop.f32.mrb[33].mxu0 }
 0xc0a   :  { %v1591_v14 = vpop.f32.mrb[34].mxu0 }
 0xc0b   :  { %v3965_v15 = vpop.f32.mrb[35].mxu0  ;;  %v1646_v16 = vsel %vm737_vm5, %v1644_v12, -inf }
 0xc0c   :  { %1647 = vmax.xlane.f32.xlu0 %v1646_v16  ;;  %v4347_v15 = vld [vmem:[%s5798_s12] sm:$0xff] }
 0xc0f   :  { %v1440_v18 = vpop.f32.mrb[32].mxu1 }
 0xc10   :  { %v1494_v19 = vpack.c.bf16 %v1488_v37, %v1440_v18  ;;  %v3946_v20 = vpop.f32.mrb[33].mxu1  ;;  %v4348_v18 = vld [vmem:[%s5798_s12 + $0x8] sm:$0xff] }
 0xc11   :  { %v1443_v21 = vpop.f32.mrb[34].mxu1 }
 0xc12   :  { %v3947_v23 = vpop.f32.mrb[35].mxu1  ;;  %3957 = vmatmul.mubr.msk.bf16.vlgmr.msra.gmra.mrb[36].mxu1 %vm737_vm5, %v1494_v19 }
 0xc13   :  { %3967 = vmatpush3.bf16.xpose.msra.mxu1 %v1602_v22  ;;  %3968 = vmatprep.mubr.msk.bf16.mxu1 %vm4940_vm2, %v4939_v29 }
 0xc14   :  { %3978 = vmatprep.subr.bf16.mxu1 %v4939_v29 }
 0xc1a   :  { %3969 = vmatmul.mubr.msk.bf16.vlgmr.msra.gmra.mrb[40].mxu1 %vm737_vm5, %v1595_v25 }
 0xc1b   :  { %3980 = vmatprep.mubr.msk.bf16.mxu1 %vm4940_vm2, %v4939_v29 }
 0xc99   :  { %v1648_v26 = vpop.xlane.xlu0 %1647 }
 0xc9a   :  { %v1652_v27 = vsub.f32 %v1644_v12, %v1648_v26 }
 0xc9c   :  { %v1654_v28 = vmul.f32 1.442695, %v1652_v27 }
 0xc9e   :  { %4295 = vpow2.f32 %v1654_v28 }
 0xca8   :  { %v4296_v31 = vpop.eup %4295 }
 0xca9   :  { %v1658_v32 = vsel %vm737_vm5, %v4296_v31, 0.0 }
 0xcaa   :  { %1659 = vadd.xlane.f32.xlu0 %v1658_v32 }
 0xce5   :  { %v1535_v33 = vpop.f32.mrb[36].mxu1 }
 0xce6   :  { %v1542_v34 = vadd.f32 %v1535_v33, %v5402_v42  ;;  %v3958_v35 = vpop.f32.mrb[37].mxu1 }
 0xce7   :  { %v1538_v40 = vpop.f32.mrb[38].mxu1  ;;  %v4245_v35 = vld [vmem:[%s5804_s16] sm:$0xff]  }
 0xce8   :  { %v1543_v41 = vadd.f32 %v1538_v40, %v5404_v44  ;;  %v3959_v43 = vpop.f32.mrb[39].mxu1  ;;  %v4246_v40 = vld [vmem:[%s5804_s16 + $0x8] sm:$0xff]  }
 0xce9   :  { %v4248_v43 = vld [vmem:[%s5805_s18 + $0x8] sm:$0xff]  }
 0xced   :  { %v1638_v24 = vpop.f32.mrb[40].mxu1 }
 0xcee   :  { %v1645_v30 = vmul.f32 0.35355338, %v1638_v24  ;;  %v3970_v45 = vpop.f32.mrb[41].mxu1 }
 0xcef   :  { %v1641_v39 = vpop.f32.mrb[42].mxu1 }
 0xcf0   :  { %v3971_v46 = vpop.f32.mrb[43].mxu1  ;;  %v1649_v47 = vsel %vm737_vm5, %v1645_v30, -inf }
 0xcf1   :  { %1650 = vmax.xlane.f32.xlu1 %v1649_v47 }
 0xd02   :  { %1718 = vrot.lane.b32.xlu1 %v5288_v38, %s4944_s15 }
 0xd37   :  { %v1660_v53 = vpop.xlane.xlu0 %1659 }
 0xd7e   :  { %v1651_v48 = vpop.xlane.xlu1 %1650 }
 0xd7f   :  { %v1653_v49 = vsub.f32 %v1645_v30, %v1651_v48 }
 0xd81   :  { %v1656_v50 = vmul.f32 1.442695, %v1653_v49  ;;  %v3673_v49 = vld [vmem:[#allocation16] ss:$0 sm:$0xff] }
 0xd82   :  { %v1719_v42 = vpop.permute.xlu1 %1718 }
 0xd83   :  { %4297 = vpow2.f32 %v1656_v50  ;;  %v1724_v51 = vsel %vm622_vm3, %v1719_v42, 0 }
 0xd84   :  { %3979 = vmatpush3.bf16.msra.mxu1 %v1724_v51  ;;  %4299 = vrcp.f32 %v1660_v53 }
 0xd85   :  { %3990 = vmatprep.subr.bf16.mxu1 %v4939_v29 }
 0xd8d   :  { %v4298_v44 = vpop.eup %4297 }
 0xd8e   :  { %v1661_v52 = vsel %vm737_vm5, %v4298_v44, 0.0  ;;  %v4300_v38 = vpop.eup %4299 }
 0xd8f   :  { %1662 = vadd.xlane.f32.xlu0 %v1661_v52  ;;  %v1666_v55 = vmul.f32 %v4300_v38, %v4296_v31  ;;  %v3674_v52 = vld [vmem:[#allocation17] ss:$0 sm:$0xff] }
 0xd91   :  { %v1668_v58 = vpack.c.bf16 %v1666_v55, %v1666_v55 }
 0xda5   :  { %1670 = vrot.lane.b32.xlu0 %v5283_v36, %s4944_s15 }
 0xe1c   :  { %v1663_v54 = vpop.xlane.xlu0 %1662 }
 0xe1d   :  { %4301 = vrcp.f32 %v1663_v54 }
 0xe20   :  { %v1671_v56 = vpop.permute.xlu0 %1670 }
 0xe21   :  { %v1676_v57 = vsel %vm622_vm3, %v1671_v56, 0  ;;  %v4249_v56 = vld [vmem:[%s5805_s18 + $0x10] sm:$0xff]  }
 0xe22   :  { %3973 = vmatpush3.bf16.msra.mxu0 %v1676_v57  ;;  %v4250_v57 = vld [vmem:[%s5805_s18 + $0x18] sm:$0xff]  }
 0xe23   :  { %3984 = vmatprep.subr.bf16.mxu0 %v4939_v29 }
 0xe25   :  { %3975 = vmatmul.mubr.msk.bf16.vlgmr.msra.gmra.mrb[36].mxu0 %vm737_vm5, %v1668_v58  ;;  %v3675_v58 = vld [vmem:[#allocation19] ss:$0 sm:$0xff] }
 0xe26   :  { %3986 = vmatprep.mubr.msk.bf16.mxu0 %vm4940_vm2, %v4939_v29  ;;  %3985 = vmatpush3.bf16.msra.mxu0 %v1771_v62 }
 0xe27   :  { %v4302_v36 = vpop.eup %4301  ;;  %3998 = vmatprep.subr.bf16.mxu0 %v4939_v29 }
 0xe28   :  { %v1667_v59 = vmul.f32 %v4302_v36, %v4298_v44 }
 0xe2a   :  { %v1669_v60 = vpack.c.bf16 %v1667_v59, %v1667_v59 }
 0xe2c   :  { %3981 = vmatmul.mubr.msk.bf16.vlgmr.msra.gmra.mrb[44].mxu1 %vm737_vm5, %v1669_v60 }
 0xe2d   :  { %3994 = vmatprep.mubr.msk.bf16.mxu1 %vm4940_vm2, %v4939_v29  ;;  %3991 = vmatpush3.bf16.msra.mxu1 %v4245_v35 }
 0xe2e   :  { %3992 = vmatprep.subr.bf16.mxu1 %v4939_v29 }
 0xe31   :  { %3993 = vmatpush3.bf16.msra.mxu1 %v4246_v40 }
 0xe32   :  { %4010 = vmatprep.subr.bf16.mxu1 %v4939_v29 }
 0xef8   :  { %v1712_v63 = vpop.f32.mrb[36].mxu0 }
 0xef9   :  { %v3976_v0 = vpop.f32.mrb[37].mxu0 }
 0xefa   :  { %v1715_v1 = vpop.f32.mrb[38].mxu0 }
 0xefb   :  { %v3977_v2 = vpop.f32.mrb[39].mxu0 }
 0xeff   :  { %v1760_v3 = vpop.f32.mrb[44].mxu1 }
 0xf00   :  { %v1766_v4 = vpack.c.bf16 %v1760_v3, %v1712_v63  ;;  %v3982_v5 = vpop.f32.mrb[45].mxu1  ;;  %v3679_v3 = vld [vmem:[#allocation20] ss:$0 sm:$0xff] }
 0xf01   :  { %v1763_v37 = vpop.f32.mrb[46].mxu1 }
 0xf02   :  { %v3983_v6 = vpop.f32.mrb[47].mxu1  ;;  %3987 = vmatmul.mubr.msk.bf16.vlgmr.msra.gmra.mrb[40].mxu0 %vm737_vm5, %v1766_v4 }
 0xf03   :  { %4006 = vmatprep.mubr.msk.bf16.mxu0 %vm4940_vm2, %v4939_v29 }
 0xfd5   :  { %v1807_v8 = vpop.f32.mrb[40].mxu0 }
 0xfd6   :  { %v1814_v9 = vadd.f32 %v1807_v8, %v1542_v34  ;;  %v3988_v10 = vpop.f32.mrb[41].mxu0 }
 0xfd7   :  { %v1810_v11 = vpop.f32.mrb[42].mxu0 }
 0xfd8   :  { %v1822_v12 = vadd.f32 %v3672_v7, %v1814_v9  ;;  %v1815_v13 = vadd.f32 %v1810_v11, %v1543_v41  ;;  %v3989_v14 = vpop.f32.mrb[43].mxu0  ;;  %v4247_v41 = vld [vmem:[%s5805_s18] sm:$0xff]  }
 0xfd9   :  { %3999 = vmatpush3.bf16.msra.mxu0 %v4247_v41  ;;  %v3685_v41 = vld [vmem:[#allocation22] ss:$0 sm:$0xff] }
 0xfda   :  { %v5464_v16 = vadd.f32 %v4347_v15, %v1822_v12  ;;  %v1823_v17 = vadd.f32 %v3672_v7, %v1815_v13  ;;  %4000 = vmatprep.subr.bf16.mxu0 %v4939_v29 }
 0xfdc   :  { %v5467_v19 = vadd.f32 %v4348_v18, %v1823_v17  ;;  %v1826_v20 = vsel %vm450_vm0, %v5464_v16, 0.0 }
 0xfdd   :  { %1827 = vadd.xlane.f32.xlu1 %v1826_v20  ;;  %4001 = vmatpush3.bf16.msra.mxu0 %v4248_v43 }
 0xfde   :  { %v1829_v21 = vsel %vm450_vm0, %v5467_v19, 0.0  ;;  %4002 = vmatprep.subr.bf16.mxu0 %v4939_v29 }
 0xfdf   :  { %1830 = vadd.xlane.f32.xlu0 %v1829_v21 }
 0xfe1   :  { %4003 = vmatpush3.bf16.msra.mxu0 %v4249_v56 }
 0xfe2   :  { %4004 = vmatprep.subr.bf16.mxu0 %v4939_v29 }
 0xfe5   :  { %4005 = vmatpush3.bf16.msra.mxu0 %v4250_v57  ;;  %v3691_v57 = vld [vmem:[#allocation26] ss:$0 sm:$0xff] }
 0xfe6   :  { %4026 = vmatprep.subr.bf16.mxu0 %v4939_v29 }
0x106a   :  { %v1828_v22 = vpop.xlane.xlu1 %1827 }
0x106b   :  { %v1832_v23 = vmul.f32 0.03125, %v1828_v22 }
0x106c   :  { %v1831_v25 = vpop.xlane.xlu0 %1830 }
0x106d   :  { %v1834_v26 = vsub.f32 %v5464_v16, %v1832_v23  ;;  %v1833_v27 = vmul.f32 0.03125, %v1831_v25  ;;  %v4251_v23 = vld [vmem:[%s5806_s22] sm:$0xff]  }
0x106e   :  { %v4252_v25 = vld [vmem:[%s5807_s3] sm:$0xff]  }
0x106f   :  { %v1835_v28 = vsub.f32 %v5467_v19, %v1833_v27  ;;  %v1836_v31 = vmul.f32 %v1834_v26, %v1834_v26  ;;  %v4254_v27 = vld [vmem:[%s5807_s3 + $0x8] sm:$0xff]  }
0x1071   :  { %v1838_v32 = vsel %vm450_vm0, %v1836_v31, 0.0  ;;  %v1837_v33 = vmul.f32 %v1835_v28, %v1835_v28 }
0x1072   :  { %1839 = vadd.xlane.f32.xlu0 %v1838_v32 }
0x1073   :  { %v1841_v34 = vsel %vm450_vm0, %v1837_v33, 0.0 }
0x1074   :  { %1842 = vadd.xlane.f32.xlu1 %v1841_v34 }
0x10ff   :  { %v1840_v24 = vpop.xlane.xlu0 %1839 }
0x1100   :  { %v1844_v30 = vmul.f32 0.03125, %v1840_v24 }
0x1101   :  { %v1843_v45 = vpop.xlane.xlu1 %1842 }
0x1102   :  { %v1846_v39 = vadd.f32 1e-05, %v1844_v30  ;;  %v1845_v46 = vmul.f32 0.03125, %v1843_v45 }
0x1104   :  { %4303 = vrsqrt.f32 %v1846_v39  ;;  %v1847_v47 = vadd.f32 1e-05, %v1845_v46  ;;  %v3686_v39 = vld [vmem:[#allocation23] ss:$0 sm:$0xff] }
0x1106   :  { %4305 = vrsqrt.f32 %v1847_v47 }
0x110e   :  { %v4304_v48 = vpop.eup %4303 }
0x110f   :  { %v1850_v50 = vmul.f32 %v4304_v48, %v1834_v26  ;;  %v4253_v26 = vld [vmem:[%s5806_s22 + $0x8] sm:$0xff]  }
0x1110   :  { %v4306_v42 = vpop.eup %4305 }
0x1111   :  { %v1858_v51 = vmul.f32 %v3673_v49, %v1850_v50  ;;  %v1851_v44 = vmul.f32 %v4306_v42, %v1835_v28  ;;  %v4256_v42 = vld [vmem:[%s5808_s5 + $0x8] sm:$0xff]  }
0x1113   :  { %v1859_v53 = vmul.f32 %v3673_v49, %v1851_v44  ;;  %v1866_v38 = vadd.f32 %v3674_v52, %v1858_v51  ;;  %v4255_v49 = vld [vmem:[%s5808_s5] sm:$0xff]  }
0x1115   :  { %v1867_v54 = vadd.f32 %v3674_v52, %v1859_v53 }
0x1117   :  { %v1868_v55 = vpack.c.bf16 %v1867_v54, %v1866_v38 }
0x1119   :  { %3995 = vmatmul.mubr.msk.bf16.vlgmr.msra.gmra.mrb[48].mxu1 %vm450_vm0, %v1868_v55 }
0x111a   :  { %4014 = vmatprep.mubr.msk.bf16.mxu1 %vm4940_vm2, %v4939_v29  ;;  %4011 = vmatpush3.bf16.msra.mxu1 %v4251_v23 }
0x111b   :  { %4012 = vmatprep.subr.bf16.mxu1 %v4939_v29 }
0x111e   :  { %4013 = vmatpush3.bf16.msra.mxu1 %v4253_v26 }
0x111f   :  { %4018 = vmatprep.subr.bf16.mxu1 %v4939_v29 }
0x11ec   :  { %v1924_v36 = vpop.f32.mrb[48].mxu1 }
0x11ed   :  { %v1925_v59 = vadd.f32 %v3675_v58, %v1924_v36  ;;  %v3996_v60 = vpop.f32.mrb[49].mxu1 }
0x11ee   :  { %v1927_v61 = vpop.f32.mrb[50].mxu1  ;;  %v3695_v60 = vld [vmem:[#allocation28] ss:$0 sm:$0xff] }
0x11ef   :  { %v1928_v62 = vadd.f32 %v3675_v58, %v1927_v61  ;;  %v3997_v63 = vpop.f32.mrb[51].mxu1  ;;  %v1931_v0 = vmax.f32 %v1925_v59, 0.0 }
0x11f1   :  { %v1932_v1 = vmax.f32 %v1928_v62, 0.0 }
0x11f3   :  { %v1933_v2 = vpack.c.bf16 %v1932_v1, %v1931_v0  ;;  %v3687_v1 = vld [vmem:[#allocation25] ss:$0 sm:$0xff] }
0x11f5   :  { %4007 = vmatmul.mubr.msk.bf16.vlgmr.msra.gmra.mrb[44].mxu0 %vm1964_vm6, %v1933_v2 }
0x11f6   :  { %4030 = vmatprep.mubr.msk.bf16.mxu0 %vm4940_vm2, %v4939_v29  ;;  %4027 = vmatpush3.bf16.msra.mxu0 %v4252_v25 }
0x11f7   :  { %4028 = vmatprep.subr.bf16.mxu0 %v4939_v29 }
0x11fa   :  { %4029 = vmatpush3.bf16.msra.mxu0 %v4254_v27 }
0x11fb   :  { %4040 = vmatprep.subr.bf16.mxu0 %v4939_v29 }
0x12c8   :  { %v2002_v4 = vpop.f32.mrb[44].mxu0 }
0x12c9   :  { %v2003_v5 = vadd.f32 %v3679_v3, %v2002_v4  ;;  %v4008_v37 = vpop.f32.mrb[45].mxu0 }
0x12ca   :  { %v2005_v6 = vpop.f32.mrb[46].mxu0 }
0x12cb   :  { %v5496_v7 = vadd.f32 %v2003_v5, %v5464_v16  ;;  %v2006_v8 = vadd.f32 %v3679_v3, %v2005_v6  ;;  %v4009_v9 = vpop.f32.mrb[47].mxu0 }
0x12cd   :  { %v5499_v10 = vadd.f32 %v2006_v8, %v5467_v19  ;;  %v2049_v11 = vsel %vm450_vm0, %v5496_v7, 0.0 }
0x12ce   :  { %2050 = vadd.xlane.f32.xlu0 %v2049_v11 }
0x12cf   :  { %v2052_v12 = vsel %vm450_vm0, %v5499_v10, 0.0 }
0x12d0   :  { %2053 = vadd.xlane.f32.xlu1 %v2052_v12 }
0x135b   :  { %v2051_v13 = vpop.xlane.xlu0 %2050 }
0x135c   :  { %v2055_v14 = vmul.f32 0.03125, %v2051_v13 }
0x135d   :  { %v2054_v15 = vpop.xlane.xlu1 %2053 }
0x135e   :  { %v2057_v16 = vsub.f32 %v5496_v7, %v2055_v14  ;;  %v2056_v17 = vmul.f32 0.03125, %v2054_v15 }
0x1360   :  { %v2058_v18 = vsub.f32 %v5499_v10, %v2056_v17  ;;  %v2059_v19 = vmul.f32 %v2057_v16, %v2057_v16 }
0x1362   :  { %v2061_v20 = vsel %vm450_vm0, %v2059_v19, 0.0  ;;  %v2060_v21 = vmul.f32 %v2058_v18, %v2058_v18 }
0x1363   :  { %2062 = vadd.xlane.f32.xlu0 %v2061_v20 }
0x1364   :  { %v2064_v22 = vsel %vm450_vm0, %v2060_v21, 0.0 }
0x1365   :  { %2065 = vadd.xlane.f32.xlu1 %v2064_v22 }
0x13f0   :  { %v2063_v28 = vpop.xlane.xlu0 %2062 }
0x13f1   :  { %v2067_v31 = vmul.f32 0.03125, %v2063_v28 }
0x13f2   :  { %v2066_v32 = vpop.xlane.xlu1 %2065 }
0x13f3   :  { %v2069_v33 = vadd.f32 1e-05, %v2067_v31  ;;  %v2068_v34 = vmul.f32 0.03125, %v2066_v32 }
0x13f5   :  { %4307 = vrsqrt.f32 %v2069_v33  ;;  %v2070_v35 = vadd.f32 1e-05, %v2068_v34 }
0x13f7   :  { %4309 = vrsqrt.f32 %v2070_v35 }
0x13ff   :  { %v4308_v40 = vpop.eup %4307 }
0x1400   :  { %v2073_v43 = vmul.f32 %v4308_v40, %v2057_v16 }
0x1401   :  { %v4310_v24 = vpop.eup %4309 }
0x1402   :  { %v2081_v30 = vmul.f32 %v3685_v41, %v2073_v43  ;;  %v2074_v45 = vmul.f32 %v4310_v24, %v2058_v18 }
0x1404   :  { %v2082_v46 = vmul.f32 %v3685_v41, %v2074_v45  ;;  %v2089_v47 = vadd.f32 %v3686_v39, %v2081_v30 }
0x1406   :  { %v2090_v48 = vadd.f32 %v3686_v39, %v2082_v46 }
0x1408   :  { %v2091_v50 = vpack.c.bf16 %v2090_v48, %v2089_v47 }
0x140a   :  { %4015 = vmatmul.mubr.msk.bf16.vlgmr.msra.gmra.mrb[52].mxu1 %vm450_vm0, %v2091_v50  ;;  %4031 = vmatmul.mubr.msk.bf16.vlgmr.msra.gmra.mrb[48].mxu0 %vm450_vm0, %v2091_v50 }
0x140b   :  { %4019 = vmatpush3.bf16.msra.mxu1 %v4255_v49  ;;  %4022 = vmatprep.mubr.msk.bf16.mxu1 %vm4940_vm2, %v4939_v29 }
0x140c   :  { %4020 = vmatprep.subr.bf16.mxu1 %v4939_v29  ;;  %4042 = vmatprep.mubr.msk.bf16.mxu0 %vm4940_vm2, %v4939_v29 }
0x140f   :  { %4021 = vmatpush3.bf16.msra.mxu1 %v4256_v42 }
0x1410   :  { %4034 = vmatprep.subr.bf16.mxu1 %v4939_v29 }
0x1412   :  { %4023 = vmatmul.mubr.msk.bf16.vlgmr.msra.gmra.mrb[56].mxu1 %vm450_vm0, %v2091_v50 }
0x1413   :  { %4036 = vmatprep.mubr.msk.bf16.mxu1 %vm4940_vm2, %v4939_v29 }
0x14dd   :  { %v2147_v51 = vpop.f32.mrb[52].mxu1  ;;  %v2265_v44 = vpop.f32.mrb[48].mxu0 }
0x14de   :  { %v4016_v52 = vpop.f32.mrb[53].mxu1  ;;  %v4032_v53 = vpop.f32.mrb[49].mxu0  ;;  %v2266_v2 = vadd.f32 %v3695_v60, %v2265_v44  ;;  %v2148_v5 = vadd.f32 %v3687_v1, %v2147_v51 }
0x14df   :  { %v2150_v38 = vpop.f32.mrb[54].mxu1  ;;  %v2268_v54 = vpop.f32.mrb[50].mxu0 }
0x14e0   :  { %v4017_v55 = vpop.f32.mrb[55].mxu1  ;;  %v4033_v56 = vpop.f32.mrb[51].mxu0  ;;  %v2269_v37 = vadd.f32 %v3695_v60, %v2268_v54  ;;  %v5539_v8 = vpack.c.bf16 %v2266_v2, %v2266_v2  ;;  %v2151_v9 = vadd.f32 %v3687_v1, %v2150_v38  ;;  %v5542_v11 = vpack.c.bf16 %v2148_v5, %v2148_v5 }
0x14e2   :  { %v5544_v12 = vpack.c.bf16 %v2269_v37, %v2269_v37  ;;  %v5546_v13 = vpack.c.bf16 %v2151_v9, %v2151_v9  ;;  %v2400_v14 = vsel %vm622_vm3, %v5539_v8, 0 }
0x14e4   :  { %v2446_v15 = vsel %vm622_vm3, %v5544_v12, 0 }
0x14e5   :  { %v2206_v58 = vpop.f32.mrb[56].mxu1 }
0x14e6   :  { %v2207_v36 = vadd.f32 %v3691_v57, %v2206_v58  ;;  %v4024_v59 = vpop.f32.mrb[57].mxu1 }
0x14e7   :  { %v2209_v61 = vpop.f32.mrb[58].mxu1 }
0x14e8   :  { %v5530_v62 = vpack.c.bf16 %v2207_v36, %v2207_v36  ;;  %v2210_v63 = vadd.f32 %v3691_v57, %v2209_v61  ;;  %v4025_v0 = vpop.f32.mrb[59].mxu1 }
0x14ea   :  { %v5532_v3 = vpack.c.bf16 %v2210_v63, %v2210_v63  ;;  %v2282_v4 = vsel %vm737_vm5, %v5530_v62, 0 }
0x14eb   :  { %4035 = vmatpush3.bf16.xpose.msra.mxu1 %v2282_v4 }
0x14ec   :  { %v2328_v6 = vsel %vm737_vm5, %v5532_v3, 0  ;;  %4046 = vmatprep.subr.bf16.mxu1 %v4939_v29 }
0x14ed   :  { %4041 = vmatpush3.bf16.xpose.msra.mxu0 %v2328_v6 }
0x14ee   :  { %4052 = vmatprep.subr.bf16.mxu0 %v4939_v29 }
0x14f2   :  { %4037 = vmatmul.mubr.msk.bf16.vlgmr.msra.gmra.mrb[60].mxu1 %vm737_vm5, %v5542_v11 }
0x14f3   :  { %4047 = vmatpush3.bf16.msra.mxu1 %v2400_v14  ;;  %4048 = vmatprep.mubr.msk.bf16.mxu1 %vm4940_vm2, %v4939_v29 }
0x14f4   :  { %4043 = vmatmul.mubr.msk.bf16.vlgmr.msra.gmra.mrb[52].mxu0 %vm737_vm5, %v5546_v13  ;;  %4058 = vmatprep.subr.bf16.mxu1 %v4939_v29 }
0x14f5   :  { %4053 = vmatpush3.bf16.msra.mxu0 %v2446_v15  ;;  %4054 = vmatprep.mubr.msk.bf16.mxu0 %vm4940_vm2, %v4939_v29 }
0x14f6   :  { %4064 = vmatprep.subr.bf16.mxu0 %v4939_v29 }
0x15c5   :  { %v2318_v16 = vpop.f32.mrb[60].mxu1 }
0x15c6   :  { %v2370_v17 = vmul.f32 0.35355338, %v2318_v16  ;;  %v4038_v18 = vpop.f32.mrb[61].mxu1 }
0x15c7   :  { %v2321_v19 = vpop.f32.mrb[62].mxu1  ;;  %v2364_v20 = vpop.f32.mrb[52].mxu0 }
0x15c8   :  { %v2371_v21 = vmul.f32 0.35355338, %v2364_v20  ;;  %v4039_v22 = vpop.f32.mrb[63].mxu1  ;;  %v4044_v23 = vpop.f32.mrb[53].mxu0  ;;  %v2372_v25 = vsel %vm737_vm5, %v2370_v17, -inf }
0x15c9   :  { %v2367_v26 = vpop.f32.mrb[54].mxu0  ;;  %2373 = vmax.xlane.f32.xlu0 %v2372_v25 }
0x15ca   :  { %v4045_v27 = vpop.f32.mrb[55].mxu0  ;;  %v2375_v28 = vsel %vm737_vm5, %v2371_v21, -inf }
0x15cb   :  { %2376 = vmax.xlane.f32.xlu1 %v2375_v28 }
0x15dc   :  { %2545 = vrot.lane.b32.xlu1 %v5532_v3, %s4942_s19 }
0x1656   :  { %v2374_v31 = vpop.xlane.xlu0 %2373 }
0x1657   :  { %v2378_v32 = vsub.f32 %v2370_v17, %v2374_v31 }
0x1658   :  { %v2377_v33 = vpop.xlane.xlu1 %2376 }
0x1659   :  { %v2380_v34 = vmul.f32 1.442695, %v2378_v32  ;;  %v2379_v35 = vsub.f32 %v2371_v21, %v2377_v33 }
0x165b   :  { %4311 = vpow2.f32 %v2380_v34  ;;  %v2382_v40 = vmul.f32 1.442695, %v2379_v35 }
0x165c   :  { %v2546_v45 = vpop.permute.xlu1 %2545 }
0x165d   :  { %4313 = vpow2.f32 %v2382_v40  ;;  %v2551_v53 = vsel %vm737_vm5, %v2546_v45, 0 }
0x1665   :  { %v4312_v41 = vpop.eup %4311 }
0x1666   :  { %v2384_v43 = vsel %vm737_vm5, %v4312_v41, 0.0 }
0x1667   :  { %v4314_v24 = vpop.eup %4313  ;;  %2385 = vadd.xlane.f32.xlu0 %v2384_v43  ;;  %v2029_v43 = vld [vmem:[%s5809_s6 + $0x4] sm:$0xf] }
0x1668   :  { %v2387_v30 = vsel %vm737_vm5, %v4314_v24, 0.0  ;;  %v2722_v45 = vsel %vm622_vm3, %v2029_v43, 0 }
0x1669   :  { %2388 = vadd.xlane.f32.xlu1 %v2387_v30 }
0x167a   :  { %2490 = vrot.lane.b32.xlu1 %v5542_v11, %s4942_s19 }
0x167d   :  { %2493 = vrot.lane.b32.xlu0 %v5530_v62, %s4942_s19 }
0x167e   :  { %2542 = vrot.lane.b32.xlu1 %v5546_v13, %s4942_s19 }
0x16f4   :  { %v2386_v39 = vpop.xlane.xlu0 %2385 }
0x16f5   :  { %4315 = vrcp.f32 %v2386_v39 }
0x16f6   :  { %v2389_v46 = vpop.xlane.xlu1 %2388 }
0x16f7   :  { %4317 = vrcp.f32 %v2389_v46  ;;  %v2028_v46 = vld [vmem:[%s5809_s6] sm:$0xf] }
0x16f8   :  { %v2494_v50 = vpop.permute.xlu0 %2493 }
0x16f9   :  { %v2499_v44 = vsel %vm737_vm5, %v2494_v50, 0 }
0x16fa   :  { %v2491_v38 = vpop.permute.xlu1 %2490 }
0x16fe   :  { %v2543_v54 = vpop.permute.xlu1 %2542 }
0x16ff   :  { %v4316_v47 = vpop.eup %4315 }
0x1700   :  { %v2392_v48 = vmul.f32 %v4316_v47, %v4312_v41 }
0x1701   :  { %v4318_v49 = vpop.eup %4317 }
0x1702   :  { %v2393_v42 = vmul.f32 %v4318_v49, %v4314_v24  ;;  %v2394_v51 = vpack.c.bf16 %v2392_v48, %v2392_v48  ;;  %v2769_v49 = vsel %vm622_vm3, %v2028_v46, 0 }
0x1704   :  { %4049 = vmatmul.mubr.msk.bf16.vlgmr.msra.gmra.mrb[64].mxu1 %vm737_vm5, %v2394_v51  ;;  %v2395_v52 = vpack.c.bf16 %v2393_v42, %v2393_v42 }
0x1705   :  { %4059 = vmatpush3.bf16.xpose.msra.mxu1 %v2499_v44  ;;  %4060 = vmatprep.mubr.msk.bf16.mxu1 %vm4940_vm2, %v4939_v29 }
0x1706   :  { %4055 = vmatmul.mubr.msk.bf16.vlgmr.msra.gmra.mrb[56].mxu0 %vm737_vm5, %v2395_v52  ;;  %4070 = vmatprep.subr.bf16.mxu1 %v4939_v29 }
0x1707   :  { %4065 = vmatpush3.bf16.xpose.msra.mxu0 %v2551_v53  ;;  %4066 = vmatprep.mubr.msk.bf16.mxu0 %vm4940_vm2, %v4939_v29 }
0x1708   :  { %4076 = vmatprep.subr.bf16.mxu0 %v4939_v29 }
0x170c   :  { %4061 = vmatmul.mubr.msk.bf16.vlgmr.msra.gmra.mrb[68].mxu1 %vm737_vm5, %v2491_v38 }
0x170d   :  { %4072 = vmatprep.mubr.msk.bf16.mxu1 %vm4940_vm2, %v4939_v29 }
0x170e   :  { %4067 = vmatmul.mubr.msk.bf16.vlgmr.msra.gmra.mrb[60].mxu0 %vm737_vm5, %v2543_v54 }
0x170f   :  { %4078 = vmatprep.mubr.msk.bf16.mxu0 %vm4940_vm2, %v4939_v29 }
0x17d7   :  { %v5590_v55 = vpop.f32.mrb[64].mxu1 }
0x17d8   :  { %v4050_v56 = vpop.f32.mrb[65].mxu1 }
0x17d9   :  { %v2439_v57 = vpop.f32.mrb[66].mxu1  ;;  %v5592_v58 = vpop.f32.mrb[56].mxu0 }
0x17da   :  { %v2488_v36 = vpack.c.bf16 %v5592_v58, %v5590_v55  ;;  %v4051_v59 = vpop.f32.mrb[67].mxu1  ;;  %v4056_v60 = vpop.f32.mrb[57].mxu0 }
0x17db   :  { %v2485_v61 = vpop.f32.mrb[58].mxu0 }
0x17dc   :  { %v4057_v63 = vpop.f32.mrb[59].mxu0 }
0x17df   :  { %v2535_v0 = vpop.f32.mrb[68].mxu1 }
0x17e0   :  { %v2593_v1 = vmul.f32 0.35355338, %v2535_v0  ;;  %v4062_v2 = vpop.f32.mrb[69].mxu1 }
0x17e1   :  { %v2538_v4 = vpop.f32.mrb[70].mxu1  ;;  %v2587_v5 = vpop.f32.mrb[60].mxu0 }
0x17e2   :  { %v2594_v37 = vmul.f32 0.35355338, %v2587_v5  ;;  %v4063_v6 = vpop.f32.mrb[71].mxu1  ;;  %v4068_v9 = vpop.f32.mrb[61].mxu0  ;;  %v2595_v14 = vsel %vm737_vm5, %v2593_v1, -inf }
0x17e3   :  { %v2590_v15 = vpop.f32.mrb[62].mxu0  ;;  %2596 = vmax.xlane.f32.xlu0 %v2595_v14 }
0x17e4   :  { %v4069_v16 = vpop.f32.mrb[63].mxu0  ;;  %v2598_v17 = vsel %vm737_vm5, %v2594_v37, -inf }
0x17e5   :  { %2599 = vmax.xlane.f32.xlu1 %v2598_v17 }
0x17f6   :  { %2669 = vrot.lane.b32.xlu1 %v5544_v12, %s4942_s19 }
0x17fa   :  { %2814 = vrot.lane.b32.xlu1 %v5530_v62, %s4943_s11 }
0x17fe   :  { %2864 = vrot.lane.b32.xlu1 %v5532_v3, %s4943_s11 }
0x1802   :  { %2862 = vrot.lane.b32.xlu1 %v5546_v13, %s4943_s11 }
0x1870   :  { %v2597_v18 = vpop.xlane.xlu0 %2596 }
0x1871   :  { %v2601_v19 = vsub.f32 %v2593_v1, %v2597_v18 }
0x1872   :  { %v2600_v20 = vpop.xlane.xlu1 %2599 }
0x1873   :  { %v2603_v21 = vmul.f32 1.442695, %v2601_v19  ;;  %v2602_v22 = vsub.f32 %v2594_v37, %v2600_v20 }
0x1875   :  { %4319 = vpow2.f32 %v2603_v21  ;;  %v2605_v23 = vmul.f32 1.442695, %v2602_v22 }
0x1876   :  { %v2670_v25 = vpop.permute.xlu1 %2669 }
0x1877   :  { %4321 = vpow2.f32 %v2605_v23  ;;  %v2675_v26 = vsel %vm622_vm3, %v2670_v25, 0 }
0x1878   :  { %4077 = vmatpush3.bf16.msra.mxu0 %v2675_v26 }
0x1879   :  { %4088 = vmatprep.subr.bf16.mxu0 %v4939_v29 }
0x187a   :  { %v2815_v50 = vpop.permute.xlu1 %2814 }
0x187e   :  { %v2865_v42 = vpop.permute.xlu1 %2864 }
0x187f   :  { %v4320_v27 = vpop.eup %4319  ;;  %v2870_v51 = vsel %vm737_vm5, %v2865_v42, 0 }
0x1880   :  { %v2607_v28 = vsel %vm737_vm5, %v4320_v27, 0.0 }
0x1881   :  { %v4322_v31 = vpop.eup %4321  ;;  %2608 = vadd.xlane.f32.xlu0 %v2607_v28 }
0x1882   :  { %v2610_v32 = vsel %vm737_vm5, %v4322_v31, 0.0  ;;  %v2863_v44 = vpop.permute.xlu1 %2862 }
0x1885   :  { %2611 = vadd.xlane.f32.xlu0 %v2610_v32 }
0x189b   :  { %2620 = vrot.lane.b32.xlu0 %v5539_v8, %s4942_s19 }
0x189f   :  { %2812 = vrot.lane.b32.xlu0 %v5542_v11, %s4943_s11 }
0x190e   :  { %v2609_v33 = vpop.xlane.xlu0 %2608 }
0x190f   :  { %4323 = vrcp.f32 %v2609_v33 }
0x1912   :  { %v2612_v34 = vpop.xlane.xlu0 %2611 }
0x1913   :  { %4325 = vrcp.f32 %v2612_v34 }
0x1916   :  { %v2621_v35 = vpop.permute.xlu0 %2620 }
0x1917   :  { %v2626_v40 = vsel %vm622_vm3, %v2621_v35, 0 }
0x1918   :  { %4071 = vmatpush3.bf16.msra.mxu1 %v2626_v40 }
0x1919   :  { %v4324_v41 = vpop.eup %4323  ;;  %4082 = vmatprep.subr.bf16.mxu1 %v4939_v29 }
0x191a   :  { %v2615_v24 = vmul.f32 %v4324_v41, %v4320_v27  ;;  %v2813_v63 = vpop.permute.xlu0 %2812 }
0x191c   :  { %v2617_v30 = vpack.c.bf16 %v2615_v24, %v2615_v24 }
0x191d   :  { %v4326_v39 = vpop.eup %4325 }
0x191e   :  { %v2616_v47 = vmul.f32 %v4326_v39, %v4322_v31  ;;  %4073 = vmatmul.mubr.msk.bf16.vlgmr.msra.gmra.mrb[72].mxu1 %vm737_vm5, %v2617_v30 }
0x191f   :  { %4083 = vmatpush3.bf16.msra.mxu1 %v2722_v45  ;;  %4084 = vmatprep.mubr.msk.bf16.mxu1 %vm4940_vm2, %v4939_v29 }
0x1920   :  { %v2618_v48 = vpack.c.bf16 %v2616_v47, %v2616_v47  ;;  %4094 = vmatprep.subr.bf16.mxu1 %v4939_v29 }
0x1922   :  { %4079 = vmatmul.mubr.msk.bf16.vlgmr.msra.gmra.mrb[64].mxu0 %vm737_vm5, %v2618_v48 }
0x1923   :  { %4089 = vmatpush3.bf16.msra.mxu0 %v2769_v49  ;;  %4090 = vmatprep.mubr.msk.bf16.mxu0 %vm4940_vm2, %v4939_v29 }
0x1924   :  { %4100 = vmatprep.subr.bf16.mxu0 %v4939_v29 }
0x192a   :  { %4091 = vmatmul.mubr.msk.bf16.vlgmr.msra.gmra.mrb[68].mxu0 %vm737_vm5, %v2488_v36  ;;  %v2820_v36 = vsel %vm737_vm5, %v2815_v50, 0 }
0x192b   :  { %4102 = vmatprep.mubr.msk.bf16.mxu0 %vm4940_vm2, %v4939_v29 }
0x192c   :  { %4101 = vmatpush3.bf16.xpose.msra.mxu0 %v2870_v51 }
0x192d   :  { %4112 = vmatprep.subr.bf16.mxu0 %v4939_v29 }
0x1933   :  { %4103 = vmatmul.mubr.msk.bf16.vlgmr.msra.gmra.mrb[72].mxu0 %vm737_vm5, %v2863_v44 }
0x1934   :  { %4114 = vmatprep.mubr.msk.bf16.mxu0 %vm4940_vm2, %v4939_v29 }
0x19f1   :  { %v2662_v52 = vpop.f32.mrb[72].mxu1 }
0x19f2   :  { %v4074_v53 = vpop.f32.mrb[73].mxu1 }
0x19f3   :  { %v2665_v38 = vpop.f32.mrb[74].mxu1 }
0x19f4   :  { %v4075_v54 = vpop.f32.mrb[75].mxu1 }
0x19f5   :  { %v2711_v55 = vpop.f32.mrb[64].mxu0  ;;  %v2030_v54 = vld [vmem:[%s5809_s6 + $0x8] sm:$0xf] }
0x19f6   :  { %v2717_v56 = vpack.c.bf16 %v2711_v55, %v2662_v52  ;;  %v4080_v57 = vpop.f32.mrb[65].mxu0  ;;  %v3039_v55 = vsel %vm622_vm3, %v2030_v54, 0  ;;  %v3719_v54 = vld [vmem:[#allocation29] ss:$0 sm:$0xff] }
0x19f7   :  { %v2714_v58 = vpop.f32.mrb[66].mxu0 }
0x19f8   :  { %v4081_v59 = vpop.f32.mrb[67].mxu0  ;;  %4085 = vmatmul.mubr.msk.bf16.vlgmr.msra.gmra.mrb[76].mxu1 %vm737_vm5, %v2717_v56 }
0x19f9   :  { %4095 = vmatpush3.bf16.xpose.msra.mxu1 %v2820_v36  ;;  %4096 = vmatprep.mubr.msk.bf16.mxu1 %vm4940_vm2, %v4939_v29 }
0x19fa   :  { %4106 = vmatprep.subr.bf16.mxu1 %v4939_v29 }
0x19fd   :  { %v2805_v60 = vpop.f32.mrb[68].mxu0 }
0x19fe   :  { %v4092_v61 = vpop.f32.mrb[69].mxu0 }
0x19ff   :  { %v2808_v0 = vpop.f32.mrb[70].mxu0 }
0x1a00   :  { %v4093_v1 = vpop.f32.mrb[71].mxu0  ;;  %4097 = vmatmul.mubr.msk.bf16.vlgmr.msra.gmra.mrb[80].mxu1 %vm737_vm5, %v2813_v63 }
0x1a01   :  { %4108 = vmatprep.mubr.msk.bf16.mxu1 %vm4940_vm2, %v4939_v29 }
0x1a06   :  { %v2906_v2 = vpop.f32.mrb[72].mxu0 }
0x1a07   :  { %v2913_v4 = vmul.f32 0.35355338, %v2906_v2  ;;  %v4104_v5 = vpop.f32.mrb[73].mxu0 }
0x1a08   :  { %v2909_v37 = vpop.f32.mrb[74].mxu0 }
0x1a09   :  { %v4105_v6 = vpop.f32.mrb[75].mxu0  ;;  %v2917_v9 = vsel %vm737_vm5, %v2913_v4, -inf }
0x1a0a   :  { %2918 = vmax.xlane.f32.xlu1 %v2917_v9 }
0x1a1b   :  { %2986 = vrot.lane.b32.xlu1 %v5544_v12, %s4943_s11 }
0x1a1f   :  { %3086 = vrot.lane.b32.xlu1 %v5530_v62, %s4944_s15 }
0x1a23   :  { %3136 = vrot.lane.b32.xlu1 %v5532_v3, %s4944_s15 }
0x1a27   :  { %3134 = vrot.lane.b32.xlu1 %v5546_v13, %s4944_s15 }
0x1a97   :  { %v2919_v14 = vpop.xlane.xlu1 %2918 }
0x1a98   :  { %v2921_v17 = vsub.f32 %v2913_v4, %v2919_v14 }
0x1a9a   :  { %v2924_v18 = vmul.f32 1.442695, %v2921_v17 }
0x1a9b   :  { %v2987_v15 = vpop.permute.xlu1 %2986 }
0x1a9c   :  { %v2992_v16 = vsel %vm622_vm3, %v2987_v15, 0  ;;  %4327 = vpow2.f32 %v2924_v18 }
0x1a9d   :  { %4113 = vmatpush3.bf16.msra.mxu0 %v2992_v16 }
0x1a9e   :  { %4124 = vmatprep.subr.bf16.mxu0 %v4939_v29 }
0x1a9f   :  { %v3087_v45 = vpop.permute.xlu1 %3086 }
0x1aa0   :  { %v3092_v46 = vsel %vm737_vm5, %v3087_v45, 0 }
0x1aa3   :  { %v3137_v61 = vpop.permute.xlu1 %3136 }
0x1aa4   :  { %v3142_v4 = vsel %vm737_vm5, %v3137_v61, 0 }
0x1aa6   :  { %v4328_v31 = vpop.eup %4327 }
0x1aa7   :  { %v2929_v32 = vsel %vm737_vm5, %v4328_v31, 0.0  ;;  %v3135_v37 = vpop.permute.xlu1 %3134 }
0x1acb   :  { %v2758_v19 = vpop.f32.mrb[76].mxu1 }
0x1acc   :  { %v5658_v20 = vadd.f32 %v2805_v60, %v2758_v19  ;;  %v4086_v21 = vpop.f32.mrb[77].mxu1 }
0x1acd   :  { %v2761_v62 = vpop.f32.mrb[78].mxu1 }
0x1ace   :  { %v5660_v22 = vadd.f32 %v2808_v0, %v2761_v62  ;;  %v4087_v3 = vpop.f32.mrb[79].mxu1 }
0x1ad3   :  { %v2856_v23 = vpop.f32.mrb[80].mxu1 }
0x1ad4   :  { %v2912_v13 = vmul.f32 0.35355338, %v2856_v23  ;;  %v4098_v25 = vpop.f32.mrb[81].mxu1 }
0x1ad5   :  { %v2859_v26 = vpop.f32.mrb[82].mxu1 }
0x1ad6   :  { %v4099_v27 = vpop.f32.mrb[83].mxu1  ;;  %v2914_v28 = vsel %vm737_vm5, %v2912_v13, -inf }
0x1ad7   :  { %2915 = vmax.xlane.f32.xlu0 %v2914_v28 }
0x1adb   :  { %2930 = vadd.xlane.f32.xlu0 %v2929_v32 }
0x1b64   :  { %v2916_v33 = vpop.xlane.xlu0 %2915 }
0x1b65   :  { %v2920_v34 = vsub.f32 %v2912_v13, %v2916_v33 }
0x1b67   :  { %v2922_v35 = vmul.f32 1.442695, %v2920_v34 }
0x1b68   :  { %v2931_v40 = vpop.xlane.xlu0 %2930 }
0x1b69   :  { %4329 = vpow2.f32 %v2922_v35 }
0x1b6a   :  { %4331 = vrcp.f32 %v2931_v40 }
0x1b73   :  { %v4330_v41 = vpop.eup %4329 }
0x1b74   :  { %v4332_v43 = vpop.eup %4331  ;;  %v2926_v24 = vsel %vm737_vm5, %v4330_v41, 0.0 }
0x1b75   :  { %v2935_v30 = vmul.f32 %v4332_v43, %v4328_v31  ;;  %2927 = vadd.xlane.f32.xlu0 %v2926_v24 }
0x1b77   :  { %v2937_v39 = vpack.c.bf16 %v2935_v30, %v2935_v30 }
0x1b79   :  { %4115 = vmatmul.mubr.msk.bf16.vlgmr.msra.gmra.mrb[76].mxu0 %vm737_vm5, %v2937_v39 }
0x1b7a   :  { %4125 = vmatpush3.bf16.xpose.msra.mxu0 %v3092_v46  ;;  %4126 = vmatprep.mubr.msk.bf16.mxu0 %vm4940_vm2, %v4939_v29 }
0x1b7b   :  { %4136 = vmatprep.subr.bf16.mxu0 %v4939_v29 }
0x1b8b   :  { %2938 = vrot.lane.b32.xlu0 %v5539_v8, %s4943_s11 }
0x1b8f   :  { %3084 = vrot.lane.b32.xlu0 %v5542_v11, %s4944_s15 }
0x1c02   :  { %v2928_v47 = vpop.xlane.xlu0 %2927 }
0x1c03   :  { %4333 = vrcp.f32 %v2928_v47  ;;  %v2031_v47 = vld [vmem:[%s5809_s6 + $0xc] sm:$0xf] }
0x1c06   :  { %v2939_v48 = vpop.permute.xlu0 %2938 }
0x1c07   :  { %v2944_v49 = vsel %vm622_vm3, %v2939_v48, 0  ;;  %v3311_v48 = vsel %vm622_vm3, %v2031_v47, 0 }
0x1c08   :  { %4107 = vmatpush3.bf16.msra.mxu1 %v2944_v49 }
0x1c09   :  { %4118 = vmatprep.subr.bf16.mxu1 %v4939_v29 }
0x1c0a   :  { %v3085_v50 = vpop.permute.xlu0 %3084 }
0x1c0b   :  { %4127 = vmatmul.mubr.msk.bf16.vlgmr.msra.gmra.mrb[80].mxu0 %vm737_vm5, %v3085_v50 }
0x1c0c   :  { %4138 = vmatprep.mubr.msk.bf16.mxu0 %vm4940_vm2, %v4939_v29 }
0x1c0d   :  { %v4334_v42 = vpop.eup %4333 }
0x1c0e   :  { %v2934_v51 = vmul.f32 %v4334_v42, %v4330_v41 }
0x1c10   :  { %v2936_v44 = vpack.c.bf16 %v2934_v51, %v2934_v51 }
0x1c12   :  { %4109 = vmatmul.mubr.msk.bf16.vlgmr.msra.gmra.mrb[84].mxu1 %vm737_vm5, %v2936_v44 }
0x1c13   :  { %4120 = vmatprep.mubr.msk.bf16.mxu1 %vm4940_vm2, %v4939_v29  ;;  %4119 = vmatpush3.bf16.msra.mxu1 %v3039_v55 }
0x1c14   :  { %4130 = vmatprep.subr.bf16.mxu1 %v4939_v29 }
0x1c4c   :  { %v3028_v11 = vpop.f32.mrb[76].mxu0 }
0x1c4d   :  { %v4116_v52 = vpop.f32.mrb[77].mxu0 }
0x1c4e   :  { %v3031_v53 = vpop.f32.mrb[78].mxu0 }
0x1c4f   :  { %v4117_v38 = vpop.f32.mrb[79].mxu0 }
0x1cde   :  { %v3128_v56 = vpop.f32.mrb[80].mxu0 }
0x1cdf   :  { %v3184_v57 = vmul.f32 0.35355338, %v3128_v56  ;;  %v4128_v58 = vpop.f32.mrb[81].mxu0 }
0x1ce0   :  { %v3131_v36 = vpop.f32.mrb[82].mxu0 }
0x1ce1   :  { %v4129_v59 = vpop.f32.mrb[83].mxu0  ;;  %v3186_v60 = vsel %vm737_vm5, %v3184_v57, -inf }
0x1ce2   :  { %3187 = vmax.xlane.f32.xlu0 %v3186_v60 }
0x1ce5   :  { %v2980_v63 = vpop.f32.mrb[84].mxu1 }
0x1ce6   :  { %v3034_v0 = vpack.c.bf16 %v3028_v11, %v2980_v63  ;;  %v4110_v1 = vpop.f32.mrb[85].mxu1 }
0x1ce7   :  { %v2983_v2 = vpop.f32.mrb[86].mxu1 }
0x1ce8   :  { %v4111_v5 = vpop.f32.mrb[87].mxu1  ;;  %4121 = vmatmul.mubr.msk.bf16.vlgmr.msra.gmra.mrb[88].mxu1 %vm737_vm5, %v3034_v0 }
0x1ce9   :  { %4131 = vmatpush3.bf16.xpose.msra.mxu1 %v3142_v4  ;;  %4132 = vmatprep.mubr.msk.bf16.mxu1 %vm4940_vm2, %v4939_v29 }
0x1cea   :  { %4142 = vmatprep.subr.bf16.mxu1 %v4939_v29 }
0x1cf0   :  { %4133 = vmatmul.mubr.msk.bf16.vlgmr.msra.gmra.mrb[92].mxu1 %vm737_vm5, %v3135_v37 }
0x1cf1   :  { %4144 = vmatprep.mubr.msk.bf16.mxu1 %vm4940_vm2, %v4939_v29 }
0x1d6f   :  { %v3188_v6 = vpop.xlane.xlu0 %3187 }
0x1d70   :  { %v3192_v9 = vsub.f32 %v3184_v57, %v3188_v6 }
0x1d72   :  { %v3194_v14 = vmul.f32 1.442695, %v3192_v9 }
0x1d74   :  { %4335 = vpow2.f32 %v3194_v14 }
0x1d7e   :  { %v4336_v15 = vpop.eup %4335 }
0x1d7f   :  { %v3198_v16 = vsel %vm737_vm5, %v4336_v15, 0.0 }
0x1d80   :  { %3199 = vadd.xlane.f32.xlu0 %v3198_v16 }
0x1dbb   :  { %v3075_v17 = vpop.f32.mrb[88].mxu1 }
0x1dbc   :  { %v3082_v18 = vadd.f32 %v3075_v17, %v5658_v20  ;;  %v4122_v19 = vpop.f32.mrb[89].mxu1  ;;  %v4257_v17 = vld [vmem:[%s5810_s17] sm:$0xff]  }
0x1dbd   :  { %v3078_v21 = vpop.f32.mrb[90].mxu1  ;;  %v4259_v19 = vld [vmem:[%s5124_s30] sm:$0xff]  }
0x1dbe   :  { %v3083_v62 = vadd.f32 %v3078_v21, %v5660_v22  ;;  %v4123_v3 = vpop.f32.mrb[91].mxu1  ;;  %v4260_v21 = vld [vmem:[%s5124_s30 + $0x8] sm:$0xff]  }
0x1dc3   :  { %v3178_v23 = vpop.f32.mrb[92].mxu1 }
0x1dc4   :  { %v3185_v13 = vmul.f32 0.35355338, %v3178_v23  ;;  %v4134_v25 = vpop.f32.mrb[93].mxu1 }
0x1dc5   :  { %v3181_v26 = vpop.f32.mrb[94].mxu1 }
0x1dc6   :  { %v4135_v27 = vpop.f32.mrb[95].mxu1  ;;  %v3189_v28 = vsel %vm737_vm5, %v3185_v13, -inf }
0x1dc7   :  { %3190 = vmax.xlane.f32.xlu1 %v3189_v28  ;;  %v3720_v28 = vld [vmem:[#allocation31] ss:$0 sm:$0xff] }
0x1dd8   :  { %3258 = vrot.lane.b32.xlu1 %v5544_v12, %s4944_s15 }
0x1e0d   :  { %v3200_v40 = vpop.xlane.xlu0 %3199 }
0x1e54   :  { %v3191_v31 = vpop.xlane.xlu1 %3190 }
0x1e55   :  { %v3193_v32 = vsub.f32 %v3185_v13, %v3191_v31 }
0x1e57   :  { %v3196_v33 = vmul.f32 1.442695, %v3193_v32 }
0x1e58   :  { %v3259_v20 = vpop.permute.xlu1 %3258 }
0x1e59   :  { %4337 = vpow2.f32 %v3196_v33  ;;  %v3264_v34 = vsel %vm622_vm3, %v3259_v20, 0 }
0x1e5a   :  { %4143 = vmatpush3.bf16.msra.mxu1 %v3264_v34  ;;  %4339 = vrcp.f32 %v3200_v40  ;;  %v3721_v34 = vld [vmem:[#allocation32] ss:$0 sm:$0xff] }
0x1e5b   :  { %4154 = vmatprep.subr.bf16.mxu1 %v4939_v29 }
0x1e63   :  { %v4338_v22 = vpop.eup %4337 }
0x1e64   :  { %v3201_v35 = vsel %vm737_vm5, %v4338_v22, 0.0  ;;  %v4340_v12 = vpop.eup %4339 }
0x1e65   :  { %3202 = vadd.xlane.f32.xlu0 %v3201_v35  ;;  %v3206_v43 = vmul.f32 %v4340_v12, %v4336_v15 }
0x1e67   :  { %v3208_v45 = vpack.c.bf16 %v3206_v43, %v3206_v43  ;;  %v4262_v43 = vld [vmem:[%s5124_s30 + $0x18] sm:$0xff]  }
0x1e7b   :  { %3210 = vrot.lane.b32.xlu0 %v5539_v8, %s4944_s15 }
0x1ef2   :  { %v3203_v41 = vpop.xlane.xlu0 %3202 }
0x1ef3   :  { %4341 = vrcp.f32 %v3203_v41  ;;  %v4261_v41 = vld [vmem:[%s5124_s30 + $0x10] sm:$0xff]   ;;  %s4945_s30 = smov [#allocation37]  }
0x1ef4   :  { %s3580_s23 = sshll.u32 %s4945_s30, 4  ;;  %s3581_s23 = int_to_ptr.vmem [resolvable:$true] %s3580_s23 }
0x1ef5   :  { %s4833_s27 = scalar_lea.vmem %s3581_s23, 32  ;;  %p4838_p9 = scmp.lt.s32.totalorder %s3581_s23, %s3581_s23 }
0x1ef6   :  { %v3211_v24 = vpop.permute.xlu0 %3210  ;;  %p4834_p8 = scmp.ne.s32.totalorder %s3581_s23, %s4833_s27  ;;  %p4839_p10 = scmp.lt.s32.totalorder %s4833_s27, %s4833_s27 }
0x1ef7   :  { %v3216_v30 = vsel %vm622_vm3, %v3211_v24, 0  ;;  %v3722_v24 = vld [vmem:[#allocation34] ss:$0 sm:$0xff] }
0x1ef8   :  { %4137 = vmatpush3.bf16.msra.mxu0 %v3216_v30  ;;  %p4840_p11 = por %p4839_p10, %p4838_p9 }
0x1ef9   :  { %4148 = vmatprep.subr.bf16.mxu0 %v4939_v29 }
0x1efa   :  { %p4841_p12 = pnand %p4840_p11, %p4834_p8 }
0x1efb   :  { %4139 = vmatmul.mubr.msk.bf16.vlgmr.msra.gmra.mrb[84].mxu0 %vm737_vm5, %v3208_v45 }
0x1efc   :  { %4150 = vmatprep.mubr.msk.bf16.mxu0 %vm4940_vm2, %v4939_v29  ;;  %4149 = vmatpush3.bf16.msra.mxu0 %v3311_v48 }
0x1efd   :  { %v4342_v8 = vpop.eup %4341  ;;  %4162 = vmatprep.subr.bf16.mxu0 %v4939_v29 }
0x1efe   :  { %v3207_v39 = vmul.f32 %v4342_v8, %v4338_v22 }
0x1f00   :  { %v3209_v46 = vpack.c.bf16 %v3207_v39, %v3207_v39 }
0x1f02   :  { %4145 = vmatmul.mubr.msk.bf16.vlgmr.msra.gmra.mrb[96].mxu1 %vm737_vm5, %v3209_v46 }
0x1f03   :  { %4158 = vmatprep.mubr.msk.bf16.mxu1 %vm4940_vm2, %v4939_v29  ;;  %4155 = vmatpush3.bf16.msra.mxu1 %v4257_v17 }
0x1f04   :  { %4156 = vmatprep.subr.bf16.mxu1 %v4939_v29 }
0x1fce   :  { %v3252_v49 = vpop.f32.mrb[84].mxu0 }
0x1fcf   :  { %v4140_v50 = vpop.f32.mrb[85].mxu0 }
0x1fd0   :  { %v3255_v42 = vpop.f32.mrb[86].mxu0 }
0x1fd1   :  { %v4141_v51 = vpop.f32.mrb[87].mxu0  ;;  %v3726_v42 = vld [vmem:[#allocation35] ss:$0 sm:$0xff] }
0x1fd5   :  { %v3300_v44 = vpop.f32.mrb[96].mxu1 }
0x1fd6   :  { %v3306_v11 = vpack.c.bf16 %v3300_v44, %v3252_v49  ;;  %v4146_v52 = vpop.f32.mrb[97].mxu1 }
0x1fd7   :  { %v3303_v53 = vpop.f32.mrb[98].mxu1 }
0x1fd8   :  { %v4147_v38 = vpop.f32.mrb[99].mxu1  ;;  %4151 = vmatmul.mubr.msk.bf16.vlgmr.msra.gmra.mrb[88].mxu0 %vm737_vm5, %v3306_v11 }
0x1fd9   :  { %4170 = vmatprep.mubr.msk.bf16.mxu0 %vm4940_vm2, %v4939_v29  ;;  %4163 = vmatpush3.bf16.msra.mxu0 %v4259_v19 }
0x1fda   :  { %4164 = vmatprep.subr.bf16.mxu0 %v4939_v29 }
0x1fdd   :  { %4165 = vmatpush3.bf16.msra.mxu0 %v4260_v21 }
0x1fde   :  { %4166 = vmatprep.subr.bf16.mxu0 %v4939_v29 }
0x1fe1   :  { %4167 = vmatpush3.bf16.msra.mxu0 %v4261_v41 }
0x1fe2   :  { %4168 = vmatprep.subr.bf16.mxu0 %v4939_v29 }
0x1fe5   :  { %4169 = vmatpush3.bf16.msra.mxu0 %v4262_v43 }
0x20ab   :  { %v3347_v55 = vpop.f32.mrb[88].mxu0 }
0x20ac   :  { %v3354_v56 = vadd.f32 %v3347_v55, %v3082_v18  ;;  %v4152_v57 = vpop.f32.mrb[89].mxu0  ;;  %v4258_v18 = vld [vmem:[%s5810_s17 + $0x8] sm:$0xff]  }
0x20ad   :  { %v3350_v58 = vpop.f32.mrb[90].mxu0  ;;  %4157 = vmatpush3.bf16.msra.mxu1 %v4258_v18 }
0x20ae   :  { %v3362_v36 = vadd.f32 %v3719_v54, %v3354_v56  ;;  %v3355_v59 = vadd.f32 %v3350_v58, %v3083_v62  ;;  %v4153_v60 = vpop.f32.mrb[91].mxu0 }
0x20b0   :  { %v5720_v61 = vadd.f32 %v3362_v36, %v5496_v7  ;;  %v3363_v63 = vadd.f32 %v3719_v54, %v3355_v59 }
0x20b2   :  { %v5723_v0 = vadd.f32 %v3363_v63, %v5499_v10  ;;  %v3366_v1 = vsel %vm450_vm0, %v5720_v61, 0.0 }
0x20b3   :  { %3367 = vadd.xlane.f32.xlu1 %v3366_v1 }
0x20b4   :  { %v3369_v2 = vsel %vm450_vm0, %v5723_v0, 0.0 }
0x20b5   :  { %3370 = vadd.xlane.f32.xlu0 %v3369_v2 }
0x2140   :  { %v3368_v4 = vpop.xlane.xlu1 %3367 }
0x2141   :  { %v3372_v5 = vmul.f32 0.03125, %v3368_v4 }
0x2142   :  { %v3371_v37 = vpop.xlane.xlu0 %3370 }
0x2143   :  { %v3374_v7 = vsub.f32 %v5720_v61, %v3372_v5  ;;  %v3373_v6 = vmul.f32 0.03125, %v3371_v37 }
0x2145   :  { %v3375_v10 = vsub.f32 %v5723_v0, %v3373_v6  ;;  %v3376_v9 = vmul.f32 %v3374_v7, %v3374_v7 }
0x2147   :  { %v3378_v14 = vsel %vm450_vm0, %v3376_v9, 0.0  ;;  %v3377_v15 = vmul.f32 %v3375_v10, %v3375_v10 }
0x2148   :  { %3379 = vadd.xlane.f32.xlu0 %v3378_v14 }
0x2149   :  { %v3381_v16 = vsel %vm450_vm0, %v3377_v15, 0.0 }
0x214a   :  { %3382 = vadd.xlane.f32.xlu1 %v3381_v16 }
0x21d5   :  { %v3380_v62 = vpop.xlane.xlu0 %3379 }
0x21d6   :  { %v3384_v3 = vmul.f32 0.03125, %v3380_v62 }
0x21d7   :  { %v3383_v23 = vpop.xlane.xlu1 %3382 }
0x21d8   :  { %v3386_v13 = vadd.f32 1e-05, %v3384_v3  ;;  %v3385_v25 = vmul.f32 0.03125, %v3383_v23 }
0x21da   :  { %4343 = vrsqrt.f32 %v3386_v13  ;;  %v3387_v26 = vadd.f32 1e-05, %v3385_v25 }
0x21dc   :  { %4345 = vrsqrt.f32 %v3387_v26 }
0x21e4   :  { %v4344_v27 = vpop.eup %4343 }
0x21e5   :  { %v3390_v31 = vmul.f32 %v4344_v27, %v3374_v7 }
0x21e6   :  { %v4346_v32 = vpop.eup %4345 }
0x21e7   :  { %v3398_v33 = vmul.f32 %v3720_v28, %v3390_v31  ;;  %v3391_v20 = vmul.f32 %v4346_v32, %v3375_v10 }
0x21e9   :  { %v3399_v22 = vmul.f32 %v3720_v28, %v3391_v20  ;;  %v3406_v35 = vadd.f32 %v3721_v34, %v3398_v33 }
0x21eb   :  { %v3407_v40 = vadd.f32 %v3721_v34, %v3399_v22 }
0x21ed   :  { %v3408_v12 = vpack.c.bf16 %v3407_v40, %v3406_v35 }
0x21ef   :  { %4159 = vmatmul.mubr.msk.bf16.vlgmr.msra.gmra.mrb[100].mxu1 %vm450_vm0, %v3408_v12 }
0x22c2   :  { %v3464_v30 = vpop.f32.mrb[100].mxu1 }
0x22c3   :  { %v3465_v45 = vadd.f32 %v3722_v24, %v3464_v30  ;;  %v4160_v8 = vpop.f32.mrb[101].mxu1 }
0x22c4   :  { %v3467_v39 = vpop.f32.mrb[102].mxu1 }
0x22c5   :  { %v3468_v46 = vadd.f32 %v3722_v24, %v3467_v39  ;;  %v4161_v47 = vpop.f32.mrb[103].mxu1  ;;  %v3471_v48 = vmax.f32 %v3465_v45, 0.0 }
0x22c7   :  { %v3472_v49 = vmax.f32 %v3468_v46, 0.0 }
0x22c9   :  { %v3473_v50 = vpack.c.bf16 %v3472_v49, %v3471_v48 }
0x22cb   :  { %4171 = vmatmul.mubr.msk.bf16.vlgmr.msra.gmra.mrb[92].mxu0 %vm1964_vm6, %v3473_v50 }
0x239e   :  { %v3541_v51 = vpop.f32.mrb[92].mxu0 }
0x239f   :  { %v3542_v44 = vadd.f32 %v3726_v42, %v3541_v51  ;;  %v4172_v11 = vpop.f32.mrb[93].mxu0 }
0x23a0   :  { %v3544_v52 = vpop.f32.mrb[94].mxu0 }
0x23a1   :  { %v3548_v29 = vadd.f32 %v3542_v44, %v5720_v61  ;;  %v3545_v53 = vadd.f32 %v3726_v42, %v3544_v52  ;;  %v4173_v38 = vpop.f32.mrb[95].mxu0 }
0x23a3   :  { %v3550_v54 = vsel %vm450_vm0, %v3548_v29, 0.0  ;;  %v3549_v55 = vadd.f32 %v3545_v53, %v5723_v0 }
0x23a4   :  { %v3551_v56 = vrot.slane %v3550_v54, 4 }
0x23a5   :  { %v3557_v57 = vsel %vm450_vm0, %v3549_v55, 0.0 }
0x23a6   :  { %v3552_v58 = vadd.f32 %v3551_v56, %v3550_v54  ;;  %v3558_v36 = vrot.slane %v3557_v57, 4 }
0x23a8   :  { %v3553_v59 = vrot.slane %v3552_v58, 2  ;;  %v3559_v60 = vadd.f32 %v3558_v36, %v3557_v57 }
0x23aa   :  { %v3554_v63 = vadd.f32 %v3553_v59, %v3552_v58  ;;  %v3560_v1 = vrot.slane %v3559_v60, 2 }
0x23ac   :  { %v3555_v2 = vrot.slane %v3554_v63, 1  ;;  %v3561_v4 = vadd.f32 %v3560_v1, %v3559_v60 }
0x23ae   :  { %v3562_v5 = vrot.slane %v3561_v4, 1  ;;  %v3556_v37 = vadd.f32 %v3555_v2, %v3554_v63 }
0x23b0   :  { %v3563_v61 = vadd.f32 %v3562_v5, %v3561_v4  ;;  %v3565_v7 = vmul.f32 0.125, %v3556_v37 }
0x23b2   :  { %v3566_v6 = vmul.f32 0.125, %v3563_v61 }
0x23b4   :  { %v3570_v0 = vsel %vm3569_vm7, %v3566_v6, %v3565_v7 }
0x23b5   :  { %3573 = vst.msk [vmem:[#allocation37] sm:$0x3] %vm3572_vm8, %v3570_v0 }
0x23b6   :  { %4844 = shalt.err (!%p4841_p12)
}
0x23b7   :  { %s4845_s24 = scalar_lea.hbm %s5134_s9, 32 }
0x23b8   :  { %p4846_p13 = scmp.ne.s32.totalorder %s5134_s9, %s4845_s24  ;;  %p4849_p0 = scmp.lt.u32.totalorder %s4845_s24, %s5134_s9 }
0x23ba   :  { %p4851_p1 = pnand %p4849_p0, %p4846_p13 }
0x23bc   :  { %4854 = shalt.err (!%p4851_p1)
}
0x23bd   :  { %3583 = dma.vmem_to_hbm [thread:$0]  %s3581_s23, 32, %s5134_s9, [#allocation4]  }
0x23be   :  { %4879 = dma.done.wait [#allocation4], 32  }
0x23bf   :  { %4880 = vsyncadd [#allocation4], 4294967264 }
0x23c0   :  { %3587 = vsyncpa [#allocation3], 1 }
0x23c1   :  { %3588 = vsyncpa [#allocation6], 1 }
0x23c2   :  { %3589 = vsyncpa [#allocation9], 1 }
0x23c3   :  { %3590 = vsyncpa [#allocation12], 1 }
0x23c4   :  { %3591 = vsyncpa [#allocation15], 1 }
0x23c5   :  { %3592 = vsyncpa [#allocation18], 1 }
0x23c6   :  { %3593 = vsyncpa [#allocation21], 1 }
0x23c7   :  { %3594 = vsyncpa [#allocation24], 1 }
0x23c8   :  { %3595 = vsyncpa [#allocation27], 1 }
0x23c9   :  { %3596 = vsyncpa [#allocation30], 1 }
0x23ca   :  { %3597 = vsyncpa [#allocation33], 1 }
0x23cb   :  { %3598 = vsyncpa [#allocation36], 1 }
0x23cc   :  { %3599 = vsyncpa [#allocation4], 1 }

</bundles_post_ra>
